<compile_context>
chip_gen: v7x
topology: tpu7x:2x2x1
jax: 0.10.0
libtpu: 0.0.40
codegen_flags: <defaults>
</compile_context>

<pallas_src>
import functools
import math

import jax
import jax.numpy as jnp
from jax.experimental import pallas as pl
from jax.experimental.pallas import tpu as pltpu


# -----------------------------------------------------------------------------
# In-kernel math helpers (only ops that lower cleanly in Mosaic)
# -----------------------------------------------------------------------------
_SQRT_HALF = 0.7071067811865476


def _erf_approx(x):
    # Abramowitz & Stegun 7.1.26 (max abs error ~1.5e-7).
    a1, a2, a3, a4, a5 = (0.254829592, -0.284496736, 1.421413741,
                          -1.453152027, 1.061405429)
    p = 0.3275911
    sgn = jnp.where(x >= 0, 1.0, -1.0)
    ax = jnp.abs(x)
    t = 1.0 / (1.0 + p * ax)
    poly = ((((a5 * t + a4) * t + a3) * t + a2) * t + a1) * t
    return sgn * (1.0 - poly * jnp.exp(-ax * ax))


def _gelu(x):
    return 0.5 * x * (1.0 + _erf_approx(x * _SQRT_HALF))


def _layer_norm(x, w, b, eps):
    mean = jnp.mean(x, axis=-1, keepdims=True)
    var = jnp.mean((x - mean) ** 2, axis=-1, keepdims=True)
    return ((x - mean) * jax.lax.rsqrt(var + eps)) * w + b


def _roll_rows(x, shift):
    """Circular roll of a 2-D value along axis 0 by a small static shift."""
    if shift == 0:
        return x
    return jnp.concatenate([x[-shift:, :], x[:-shift, :]], axis=0)


def _mha_heads(q, k, v, *, n_heads, causal):
    """Per-head scaled-dot-product attention. q:(L,dm), k,v:(S,dm) f32.

    Returns a list of n_heads (L, E) f32 context tiles."""
    L, dm = q.shape
    S = k.shape[0]
    E = dm // n_heads
    scale = 1.0 / math.sqrt(E)
    qb = q.astype(jnp.bfloat16)
    kb = k.astype(jnp.bfloat16)
    vb = v.astype(jnp.bfloat16)
    if causal:
        row = jax.lax.broadcasted_iota(jnp.int32, (L, S), 0)
        col = jax.lax.broadcasted_iota(jnp.int32, (L, S), 1)
        banned = col > row                              # TriangularCausalMask
    ctxs = []
    for h in range(n_heads):                            # static unrolled loop
        qh = qb[:, h * E:(h + 1) * E]
        kh = kb[:, h * E:(h + 1) * E]
        vh = vb[:, h * E:(h + 1) * E]
        s = jax.lax.dot_general(qh, kh, (((1,), (1,)), ((), ())),
                                preferred_element_type=jnp.float32) * scale
        if causal:
            s = jnp.where(banned, -1e30, s)             # f32 mask fill
        m = jnp.max(s, axis=-1, keepdims=True)
        p = jnp.exp(s - m)
        p = p / jnp.sum(p, axis=-1, keepdims=True)
        ctxs.append(jnp.dot(p.astype(jnp.bfloat16), vh,
                            preferred_element_type=jnp.float32))
    return ctxs


# -----------------------------------------------------------------------------
# Pallas kernels
# -----------------------------------------------------------------------------
def _encoder_layer_kernel(x_ref, wqkv_ref, bqkv_ref, wo_ref, bo_ref,
                          n1w_ref, n1b_ref, w1_ref, b1_ref, w2_ref, b2_ref,
                          n2w_ref, n2b_ref, fnw_ref, fnb_ref, o_ref,
                          *, n_heads, eps, final_norm):
    """Full EncoderLayer (self-attn + FFN + both LayerNorms) for one batch row."""
    x = x_ref[...]                                      # (L, dm) f32
    dm = x.shape[-1]

    # fused Q|K|V projection: one (dm, 3dm) matmul
    qkv = jnp.dot(x.astype(jnp.bfloat16), wqkv_ref[...],
                  preferred_element_type=jnp.float32) + bqkv_ref[...]
    ctxs = _mha_heads(qkv[:, :dm], qkv[:, dm:2 * dm], qkv[:, 2 * dm:],
                      n_heads=n_heads, causal=False)
    ctx = jnp.concatenate(ctxs, axis=-1)                # (L, dm), lane-dense
    attn = jnp.dot(ctx.astype(jnp.bfloat16), wo_ref[...],
                   preferred_element_type=jnp.float32) + bo_ref[...]
    x = _layer_norm(x + attn, n1w_ref[...], n1b_ref[...], eps)

    # FFN (1x1 convs are matmuls) + residual + LN2
    h = jnp.dot(x.astype(jnp.bfloat16), w1_ref[...],
                preferred_element_type=jnp.float32) + b1_ref[...]
    h = _gelu(h)
    y = jnp.dot(h.astype(jnp.bfloat16), w2_ref[...],
                preferred_element_type=jnp.float32) + b2_ref[...]
    y = _layer_norm(x + y, n2w_ref[...], n2b_ref[...], eps)
    if final_norm:                                      # encoder's final LayerNorm
        y = _layer_norm(y, fnw_ref[...], fnb_ref[...], eps)
    o_ref[...] = y


def _decoder_layer_kernel(x_ref, cross_ref,
                          s_wqkv_ref, s_bqkv_ref, s_wo_ref, s_bo_ref, perm_ref,
                          n1w_ref, n1b_ref,
                          c_wq_ref, c_bq_ref, c_wkv_ref, c_bkv_ref,
                          c_wo_ref, c_bo_ref, n2w_ref, n2b_ref,
                          w1_ref, b1_ref, w2_ref, b2_ref, n3w_ref, n3b_ref,
                          o_ref, *, n_heads, eps, mix):
    """Full DecoderLayer (causal self-attn [mix] + cross-attn + FFN + LNs)."""
    x = x_ref[...]                                      # (L, dm)
    cross = cross_ref[...]                              # (S, dm)
    L, dm = x.shape

    # ---- causal self-attention (fused QKV) ----
    qkv = jnp.dot(x.astype(jnp.bfloat16), s_wqkv_ref[...],
                  preferred_element_type=jnp.float32) + s_bqkv_ref[...]
    ctxs = _mha_heads(qkv[:, :dm], qkv[:, dm:2 * dm], qkv[:, 2 * dm:],
                      n_heads=n_heads, causal=True)
    if mix:
        # torch: out.transpose(2,1).contiguous().view(B, L, H*E)
        # stack row (h*L + l) = ctx_h[l]; mixed[l', j*E:(j+1)*E] = stack[l'*H + j]
        stack = jnp.concatenate(ctxs, axis=0).astype(jnp.bfloat16)   # (H*L, E)
        permuted = jnp.dot(perm_ref[...], stack,
                           preferred_element_type=jnp.float32)       # (H*L, E)
        mixed = jnp.concatenate(
            [permuted[j * L:(j + 1) * L, :] for j in range(n_heads)], axis=-1)
    else:
        mixed = jnp.concatenate(ctxs, axis=-1)
    attn = jnp.dot(mixed.astype(jnp.bfloat16), s_wo_ref[...],
                   preferred_element_type=jnp.float32) + s_bo_ref[...]
    x = _layer_norm(x + attn, n1w_ref[...], n1b_ref[...], eps)

    # ---- cross attention (fused K|V projection) ----
    q = jnp.dot(x.astype(jnp.bfloat16), c_wq_ref[...],
                preferred_element_type=jnp.float32) + c_bq_ref[...]
    kv = jnp.dot(cross.astype(jnp.bfloat16), c_wkv_ref[...],
                 preferred_element_type=jnp.float32) + c_bkv_ref[...]
    ctxs = _mha_heads(q, kv[:, :dm], kv[:, dm:], n_heads=n_heads, causal=False)
    ctx = jnp.concatenate(ctxs, axis=-1)
    attn = jnp.dot(ctx.astype(jnp.bfloat16), c_wo_ref[...],
                   preferred_element_type=jnp.float32) + c_bo_ref[...]
    x = _layer_norm(x + attn, n2w_ref[...], n2b_ref[...], eps)

    # ---- FFN + residual + LN3 ----
    h = jnp.dot(x.astype(jnp.bfloat16), w1_ref[...],
                preferred_element_type=jnp.float32) + b1_ref[...]
    h = _gelu(h)
    y = jnp.dot(h.astype(jnp.bfloat16), w2_ref[...],
                preferred_element_type=jnp.float32) + b2_ref[...]
    o_ref[...] = _layer_norm(x + y, n3w_ref[...], n3b_ref[...], eps)


def _embed_kernel(x_ref, add_ref, wcat_ref, b_ref, o_ref):
    """TokenEmbedding (circular Conv1d k=3 as ONE matmul on [x(t-1)|x(t)|x(t+1)])
    + precomputed positional/temporal additive embedding."""
    x = x_ref[...]                                      # (L, Cin)
    xc = jnp.concatenate([_roll_rows(x, 1), x, _roll_rows(x, -1)],
                         axis=-1).astype(jnp.bfloat16)  # (L, 3*Cin)
    y = jnp.dot(xc, wcat_ref[...], preferred_element_type=jnp.float32) + b_ref[...]
    o_ref[...] = y + add_ref[...]


def _distill_conv_kernel(x_ref, wcat_ref, b_ref, gw_ref, gb_ref, pool_ref,
                         o_ref, *, eps):
    """ConvLayer: circular conv(k=3) -> BatchNorm1d (training batch stats)
    -> ELU -> MaxPool1d(kernel=3, stride=2, padding=1)."""
    B, L, dm = x_ref.shape
    wcat = wcat_ref[...]                                # (3*dm, dm) bf16
    bias = b_ref[...]                                   # (1, dm) f32
    pool = pool_ref[...]                                # (l_out, L) f32 constant

    ys = []
    s1 = jnp.zeros((1, dm), jnp.float32)
    s2 = jnp.zeros((1, dm), jnp.float32)
    for b in range(B):                                  # static, tiny B
        xb = x_ref[b]
        xc = jnp.concatenate([_roll_rows(xb, 1), xb, _roll_rows(xb, -1)],
                             axis=-1).astype(jnp.bfloat16)
        yb = jnp.dot(xc, wcat, preferred_element_type=jnp.float32) + bias
        ys.append(yb)
        s1 = s1 + jnp.sum(yb, axis=0, keepdims=True)
        s2 = s2 + jnp.sum(yb * yb, axis=0, keepdims=True)

    n = float(B * L)
    mean = s1 / n
    var = s2 / n - mean * mean                          # biased var (BN training)
    scale = jax.lax.rsqrt(var + eps) * gw_ref[...]
    shift = gb_ref[...] - mean * scale

    ridx = jax.lax.broadcasted_iota(jnp.int32, (L, 1), 0)
    for b in range(B):
        z = ys[b] * scale + shift
        # ELU(alpha=1), exp argument clamped so the dead branch stays finite.
        z = jnp.where(z > 0, z, jnp.exp(jnp.minimum(z, 0.0)) - 1.0)
        prev = jnp.where(ridx == 0, -1e30, _roll_rows(z, 1))
        nxt = jnp.where(ridx == L - 1, -1e30, _roll_rows(z, -1))
        m = jnp.maximum(jnp.maximum(prev, z), nxt)      # window max at each pos
        o_ref[b] = jnp.dot(pool, m, preferred_element_type=jnp.float32)


def _norm_proj_kernel(x_ref, nw_ref, nb_ref, pw_ref, pb_ref, o_ref, *, eps):
    """Decoder final LayerNorm fused with the output projection (lane-padded)."""
    z = _layer_norm(x_ref[...], nw_ref[...], nb_ref[...], eps)
    o_ref[...] = jnp.dot(z.astype(jnp.bfloat16), pw_ref[...],
                         preferred_element_type=jnp.float32) + pb_ref[...]


# -----------------------------------------------------------------------------
# pallas_call wrappers
# -----------------------------------------------------------------------------
def _rep(shape):
    """Whole-array block, same tile for every grid step."""
    return pl.BlockSpec(shape, lambda b: (0,) * len(shape))


def pallas_encoder_layer(x, p, final_norm_wb, *, n_heads, final_norm):
    B, L, dm = x.shape
    dff = p["w1"].shape[1]
    if final_norm:
        fnw, fnb = final_norm_wb
    else:  # dummies, statically unused
        fnw, fnb = p["norm2_w"], p["norm2_b"]
    a = p["attn"]
    row = pl.BlockSpec((None, L, dm), lambda b: (b, 0, 0))
    return pl.pallas_call(
        functools.partial(_encoder_layer_kernel, n_heads=n_heads, eps=1e-5,
                          final_norm=final_norm),
        grid=(B,),
        in_specs=[row,
                  _rep((dm, 3 * dm)), _rep((1, 3 * dm)),
                  _rep((dm, dm)), _rep((1, dm)),
                  _rep((1, dm)), _rep((1, dm)),
                  _rep((dm, dff)), _rep((1, dff)),
                  _rep((dff, dm)), _rep((1, dm)),
                  _rep((1, dm)), _rep((1, dm)),
                  _rep((1, dm)), _rep((1, dm))],
        out_specs=pl.BlockSpec((None, L, dm), lambda b: (b, 0, 0)),
        out_shape=jax.ShapeDtypeStruct((B, L, dm), jnp.float32),
        compiler_params=pltpu.CompilerParams(dimension_semantics=("parallel",)),
    )(x, a["wqkv"], a["bqkv"], a["wo"], a["bo"],
      p["norm1_w"], p["norm1_b"],
      p["w1"], p["b1"], p["w2"], p["b2"],
      p["norm2_w"], p["norm2_b"], fnw, fnb)


def pallas_decoder_layer(x, cross, p, *, n_heads, mix):
    B, L, dm = x.shape
    S = cross.shape[1]
    dff = p["w1"].shape[1]
    sa, ca = p["self_attn"], p["cross_attn"]
    H = n_heads
    # constant mix permutation: permuted[j*L + l'] = stack[l'*H + j]
    r = jnp.arange(H * L)
    src = (r % L) * H + (r // L)
    perm = jax.nn.one_hot(src, H * L, dtype=jnp.float32).astype(jnp.bfloat16)
    return pl.pallas_call(
        functools.partial(_decoder_layer_kernel, n_heads=n_heads, eps=1e-5,
                          mix=mix),
        grid=(B,),
        in_specs=[pl.BlockSpec((None, L, dm), lambda b: (b, 0, 0)),
                  pl.BlockSpec((None, S, dm), lambda b: (b, 0, 0)),
                  _rep((dm, 3 * dm)), _rep((1, 3 * dm)),
                  _rep((dm, dm)), _rep((1, dm)),
                  _rep((H * L, H * L)),
                  _rep((1, dm)), _rep((1, dm)),
                  _rep((dm, dm)), _rep((1, dm)),
                  _rep((dm, 2 * dm)), _rep((1, 2 * dm)),
                  _rep((dm, dm)), _rep((1, dm)),
                  _rep((1, dm)), _rep((1, dm)),
                  _rep((dm, dff)), _rep((1, dff)),
                  _rep((dff, dm)), _rep((1, dm)),
                  _rep((1, dm)), _rep((1, dm))],
        out_specs=pl.BlockSpec((None, L, dm), lambda b: (b, 0, 0)),
        out_shape=jax.ShapeDtypeStruct((B, L, dm), jnp.float32),
        compiler_params=pltpu.CompilerParams(dimension_semantics=("parallel",)),
    )(x, cross,
      sa["wqkv"], sa["bqkv"], sa["wo"], sa["bo"], perm,
      p["norm1_w"], p["norm1_b"],
      ca["wq"], ca["bq"], ca["wkv"], ca["bkv"], ca["wo"], ca["bo"],
      p["norm2_w"], p["norm2_b"],
      p["w1"], p["b1"], p["w2"], p["b2"],
      p["norm3_w"], p["norm3_b"])


def pallas_token_embedding(x, add, p):
    B, L, cin = x.shape
    dm = add.shape[-1]
    return pl.pallas_call(
        _embed_kernel,
        grid=(B,),
        in_specs=[pl.BlockSpec((None, L, cin), lambda b: (b, 0, 0)),
                  pl.BlockSpec((None, L, dm), lambda b: (b, 0, 0)),
                  _rep((3 * cin, dm)), _rep((1, dm))],
        out_specs=pl.BlockSpec((None, L, dm), lambda b: (b, 0, 0)),
        out_shape=jax.ShapeDtypeStruct((B, L, dm), jnp.float32),
        compiler_params=pltpu.CompilerParams(dimension_semantics=("parallel",)),
    )(x.astype(jnp.float32), add.astype(jnp.float32), p["wcat"], p["b"])


def pallas_distill_conv(x, p):
    B, L, dm = x.shape
    l_out = (L + 2 - 3) // 2 + 1
    rows = jnp.arange(l_out, dtype=jnp.int32)[:, None]
    cols = jnp.arange(L, dtype=jnp.int32)[None, :]
    pool_sel = (cols == 2 * rows).astype(jnp.float32)   # trace-time constant
    vmem = pl.BlockSpec(memory_space=pltpu.MemorySpace.VMEM)
    return pl.pallas_call(
        functools.partial(_distill_conv_kernel, eps=1e-5),
        in_specs=[vmem] * 6,
        out_specs=pl.BlockSpec(memory_space=pltpu.MemorySpace.VMEM),
        out_shape=jax.ShapeDtypeStruct((B, l_out, dm), jnp.float32),
    )(x, p["wcat"], p["b"], p["bn_w"], p["bn_b"], pool_sel)


def pallas_norm_projection(x, nw, nb, pw_pad, pb_pad, c_out):
    B, L, dm = x.shape
    cpad = pw_pad.shape[1]
    out = pl.pallas_call(
        functools.partial(_norm_proj_kernel, eps=1e-5),
        grid=(B,),
        in_specs=[pl.BlockSpec((None, L, dm), lambda b: (b, 0, 0)),
                  _rep((1, dm)), _rep((1, dm)),
                  _rep((dm, cpad)), _rep((1, cpad))],
        out_specs=pl.BlockSpec((None, L, cpad), lambda b: (b, 0, 0)),
        out_shape=jax.ShapeDtypeStruct((B, L, cpad), jnp.float32),
        compiler_params=pltpu.CompilerParams(dimension_semantics=("parallel",)),
    )(x, nw, nb, pw_pad, pb_pad)
    return out[:, :, :c_out]


# -----------------------------------------------------------------------------
# Model glue (plain JAX, all under one jit)
# -----------------------------------------------------------------------------
def data_embedding(x, x_mark, emb_p, tables):
    B, L, _ = x.shape
    xm = x_mark.astype(jnp.int32)       # columns: [month, day, weekday, hour]
    add = (tables["pos"][None, :L, :]
           + tables["hour"][xm[:, :, 3]]
           + tables["weekday"][xm[:, :, 2]]
           + tables["day"][xm[:, :, 1]]
           + tables["month"][xm[:, :, 0]])
    return pallas_token_embedding(x, add, emb_p)


def run_encoder(x, ep, n_heads):
    n = len(ep["layers"])
    for i in range(n - 1):              # distil=True path
        x = pallas_encoder_layer(x, ep["layers"][i], None,
                                 n_heads=n_heads, final_norm=False)
        x = pallas_distill_conv(x, ep["convs"][i])
    return pallas_encoder_layer(x, ep["layers"][n - 1],
                                (ep["norm_w"], ep["norm_b"]),
                                n_heads=n_heads, final_norm=True)


def run_encoder_stack(x, enc_params, n_heads):
    outs = []
    for i_len, ep in enumerate(enc_params):
        inp_len = x.shape[1] // (2 ** i_len)
        outs.append(run_encoder(x[:, -inp_len:, :], ep, n_heads))
    return jnp.concatenate(outs, axis=-2)


def informer_stack_forward(params, x_enc, x_mark_enc, x_dec, x_mark_dec, *, cfg):
    tables = params["tables"]
    enc_out = data_embedding(x_enc, x_mark_enc, params["enc_emb"], tables)
    enc_out = run_encoder_stack(enc_out, params["encoders"], cfg["n_heads"])
    dec_out = data_embedding(x_dec, x_mark_dec, params["dec_emb"], tables)
    for lp in params["decoder"]["layers"]:
        dec_out = pallas_decoder_layer(dec_out, enc_out, lp,
                                       n_heads=cfg["n_heads"], mix=cfg["mix"])
    # LayerNorm and the projection are per-position, so slicing the last
    # pred_len rows first is exact and cuts work / output DMA ~3x.
    dec_tail = dec_out[:, -cfg["pred_len"]:, :]
    return pallas_norm_projection(dec_tail,
                                  params["decoder"]["norm_w"],
                                  params["decoder"]["norm_b"],
                                  params["proj_w_pad"], params["proj_b_pad"],
                                  cfg["c_out"])


# -----------------------------------------------------------------------------
# Deterministic parameter initialization (synthetic weights, kernel-ready layout)
# -----------------------------------------------------------------------------
def _sinusoid_table(n, d_model):
    pos = jnp.arange(n, dtype=jnp.float32)[:, None]
    div = jnp.exp(jnp.arange(0, d_model, 2, dtype=jnp.float32)
                  * -(math.log(10000.0) / d_model))
    t = jnp.zeros((n, d_model), jnp.float32)
    t = t.at[:, 0::2].set(jnp.sin(pos * div))
    t = t.at[:, 1::2].set(jnp.cos(pos * div))
    return t


def _dense_bf16(key, fan_in, fan_out, scale=0.02):
    kw, kb = jax.random.split(key)
    w = (scale * jax.random.normal(kw, (fan_in, fan_out), jnp.float32)
         ).astype(jnp.bfloat16)
    b = scale * jax.random.normal(kb, (1, fan_out), jnp.float32)
    return w, b


def _self_attn_params(key, dm):
    kqkv, ko = jax.random.split(key)
    wqkv, bqkv = _dense_bf16(kqkv, dm, 3 * dm)          # fused Q|K|V
    wo, bo = _dense_bf16(ko, dm, dm)
    return dict(wqkv=wqkv, bqkv=bqkv, wo=wo, bo=bo)


def _cross_attn_params(key, dm):
    kq, kkv, ko = jax.random.split(key, 3)
    wq, bq = _dense_bf16(kq, dm, dm)
    wkv, bkv = _dense_bf16(kkv, dm, 2 * dm)             # fused K|V
    wo, bo = _dense_bf16(ko, dm, dm)
    return dict(wq=wq, bq=bq, wkv=wkv, bkv=bkv, wo=wo, bo=bo)


def _conv3_params(key, c_in, dm):
    kw, kb = jax.random.split(key)
    wcat = (0.02 * jax.random.normal(kw, (3 * c_in, dm), jnp.float32)
            ).astype(jnp.bfloat16)                      # [left|center|right] taps stacked
    b = 0.02 * jax.random.normal(kb, (1, dm), jnp.float32)
    return dict(wcat=wcat, b=b)


def _conv_layer_params(key, dm):
    p = _conv3_params(key, dm, dm)
    p.update(bn_w=jnp.ones((1, dm), jnp.float32),
             bn_b=jnp.zeros((1, dm), jnp.float32))
    return p


def _encoder_layer_params(key, dm, dff):
    ka, k1, k2 = jax.random.split(key, 3)
    w1, b1 = _dense_bf16(k1, dm, dff)
    w2, b2 = _dense_bf16(k2, dff, dm)
    ones = jnp.ones((1, dm), jnp.float32)
    zeros = jnp.zeros((1, dm), jnp.float32)
    return dict(attn=_self_attn_params(ka, dm), w1=w1, b1=b1, w2=w2, b2=b2,
                norm1_w=ones, norm1_b=zeros, norm2_w=ones, norm2_b=zeros)


def _decoder_layer_params(key, dm, dff):
    ks, kc, k1, k2 = jax.random.split(key, 4)
    w1, b1 = _dense_bf16(k1, dm, dff)
    w2, b2 = _dense_bf16(k2, dff, dm)
    ones = jnp.ones((1, dm), jnp.float32)
    zeros = jnp.zeros((1, dm), jnp.float32)
    return dict(self_attn=_self_attn_params(ks, dm),
                cross_attn=_cross_attn_params(kc, dm),
                w1=w1, b1=b1, w2=w2, b2=b2,
                norm1_w=ones, norm1_b=zeros, norm2_w=ones, norm2_b=zeros,
                norm3_w=ones, norm3_b=zeros)


def init_params(key, cfg):
    dm, dff = cfg["d_model"], cfg["d_ff"]
    k_emb_e, k_emb_d, k_enc, k_dec, k_proj = jax.random.split(key, 5)

    encoders = []
    for el, ke in zip(cfg["e_layers"], jax.random.split(k_enc, len(cfg["e_layers"]))):
        lk = jax.random.split(ke, 2 * el)
        layers = [_encoder_layer_params(lk[i], dm, dff) for i in range(el)]
        convs = [_conv_layer_params(lk[el + i], dm) for i in range(el - 1)]
        encoders.append(dict(layers=layers, convs=convs,
                             norm_w=jnp.ones((1, dm), jnp.float32),
                             norm_b=jnp.zeros((1, dm), jnp.float32)))

    dec_layers = [_decoder_layer_params(k, dm, dff)
                  for k in jax.random.split(k_dec, cfg["d_layers"])]

    # output projection, lane-padded to 128 so the final stores are unmasked
    c_out = cfg["c_out"]
    cpad = ((c_out + 127) // 128) * 128
    kw, kb = jax.random.split(k_proj)
    pw = 0.02 * jax.random.normal(kw, (dm, c_out), jnp.float32)
    pb = 0.02 * jax.random.normal(kb, (1, c_out), jnp.float32)
    proj_w_pad = jnp.zeros((dm, cpad), jnp.float32).at[:, :c_out].set(pw
                                                                      ).astype(jnp.bfloat16)
    proj_b_pad = jnp.zeros((1, cpad), jnp.float32).at[:, :c_out].set(pb)

    max_len = max(cfg["seq_len"], cfg["label_len"] + cfg["pred_len"])
    tables = dict(pos=_sinusoid_table(max_len, dm),
                  month=_sinusoid_table(13, dm),
                  day=_sinusoid_table(32, dm),
                  weekday=_sinusoid_table(7, dm),
                  hour=_sinusoid_table(24, dm))

    return dict(enc_emb=_conv3_params(k_emb_e, cfg["enc_in"], dm),
                dec_emb=_conv3_params(k_emb_d, cfg["dec_in"], dm),
                encoders=encoders,
                decoder=dict(layers=dec_layers,
                             norm_w=jnp.ones((1, dm), jnp.float32),
                             norm_b=jnp.zeros((1, dm), jnp.float32)),
                proj_w_pad=proj_w_pad, proj_b_pad=proj_b_pad, tables=tables)


# -----------------------------------------------------------------------------
if __name__ == "__main__":
    cfg = dict(enc_in=7, dec_in=7, c_out=7,
               seq_len=32, label_len=16, pred_len=8,
               d_model=64, n_heads=4, e_layers=[2, 1], d_layers=1, d_ff=64,
               dropout=0.0, attn="full", mix=True)

    B = 2
    key = jax.random.PRNGKey(0)
    k1, k2, k3, k4, kp = jax.random.split(key, 5)

    x_enc = jax.random.normal(k1, (B, cfg["seq_len"], cfg["enc_in"]), jnp.float32)
    x_dec = jax.random.normal(
        k2, (B, cfg["label_len"] + cfg["pred_len"], cfg["dec_in"]), jnp.float32)

    def make_marks(k, L):
        km, kd, kw, kh = jax.random.split(k, 4)
        month = jax.random.randint(km, (B, L, 1), 0, 13)
        day = jax.random.randint(kd, (B, L, 1), 0, 32)
        weekday = jax.random.randint(kw, (B, L, 1), 0, 7)
        hour = jax.random.randint(kh, (B, L, 1), 0, 24)
        return jnp.concatenate([month, day, weekday, hour],
                               axis=-1).astype(jnp.float32)

    x_mark_enc = make_marks(k3, cfg["seq_len"])
    x_mark_dec = make_marks(k4, cfg["label_len"] + cfg["pred_len"])

    params = init_params(kp, cfg)

    fwd = jax.jit(functools.partial(informer_stack_forward, cfg=cfg))
    out = fwd(params, x_enc, x_mark_enc, x_dec, x_mark_dec)
    out = jax.block_until_ready(out)

    assert out.shape == (B, cfg["pred_len"], cfg["c_out"]), out.shape
    assert bool(jnp.all(jnp.isfinite(out)))
    print("KERNEL_OK")
</pallas_src>

<mosaic_0001>
module attributes {stable_mosaic.version = 11 : i64} {
  func.func @_embed_kernel(%arg0: i32, %arg1: memref<1x32x7xf32, #tpu.memory_space<vmem>>, %arg2: memref<1x32x64xf32, #tpu.memory_space<vmem>>, %arg3: memref<21x64xbf16, #tpu.memory_space<vmem>>, %arg4: memref<1x64xf32, #tpu.memory_space<vmem>>, %arg5: memref<1x32x64xf32, #tpu.memory_space<vmem>>) attributes {dimension_semantics = [#tpu.dimension_semantics<parallel>], iteration_bounds = array<i64: 2>, scalar_prefetch = 0 : i64, scratch_operands = 0 : i64, tpu.core_type = #tpu.core_type<tc>, window_params = [{transform_indices = @transform_0, window_bounds = array<i64: 1, 32, 7>}, {transform_indices = @transform_1, window_bounds = array<i64: 1, 32, 64>}, {pipeline_mode = #tpu.pipeline_mode<synchronous>, transform_indices = @transform_2, window_bounds = array<i64: 21, 64>}, {pipeline_mode = #tpu.pipeline_mode<synchronous>, transform_indices = @transform_3, window_bounds = array<i64: 1, 64>}, {transform_indices = @transform_4, window_bounds = array<i64: 1, 32, 64>}]} {
    %c0 = arith.constant 0 : index
    %c0_0 = arith.constant 0 : index
    %c0_1 = arith.constant 0 : index
    %0 = vector.load %arg1[%c0, %c0_0, %c0_1] : memref<1x32x7xf32, #tpu.memory_space<vmem>>, vector<1x32x7xf32>
    %1 = vector.shape_cast %0 : vector<1x32x7xf32> to vector<32x7xf32>
    %2 = vector.extract_strided_slice %1 {offsets = [31, 0], sizes = [1, 7], strides = [1, 1]} : vector<32x7xf32> to vector<1x7xf32>
    %3 = vector.extract_strided_slice %1 {offsets = [0, 0], sizes = [31, 7], strides = [1, 1]} : vector<32x7xf32> to vector<31x7xf32>
    %4 = tpu.concatenate %2, %3 in 0 : vector<1x7xf32>, vector<31x7xf32> -> vector<32x7xf32>
    %5 = vector.extract_strided_slice %1 {offsets = [1, 0], sizes = [31, 7], strides = [1, 1]} : vector<32x7xf32> to vector<31x7xf32>
    %6 = vector.extract_strided_slice %1 {offsets = [0, 0], sizes = [1, 7], strides = [1, 1]} : vector<32x7xf32> to vector<1x7xf32>
    %7 = tpu.concatenate %5, %6 in 0 : vector<31x7xf32>, vector<1x7xf32> -> vector<32x7xf32>
    %8 = tpu.concatenate %4, %1, %7 in 1 : vector<32x7xf32>, vector<32x7xf32>, vector<32x7xf32> -> vector<32x21xf32>
    %9 = arith.truncf %8 : vector<32x21xf32> to vector<32x21xbf16>
    %c0_2 = arith.constant 0 : index
    %c0_3 = arith.constant 0 : index
    %10 = vector.load %arg3[%c0_2, %c0_3] : memref<21x64xbf16, #tpu.memory_space<vmem>>, vector<21x64xbf16>
    %cst = arith.constant dense<0.000000e+00> : vector<32x64xf32>
    %11 = tpu.matmul %9, %10, %cst {dimension_numbers = #tpu.dot_dimension_numbers<[1], [0], [0], [1], [0, 0, 1, 1], [], []>} : vector<32x21xbf16>, vector<21x64xbf16>, vector<32x64xf32> -> vector<32x64xf32>
    %c0_4 = arith.constant 0 : index
    %c0_5 = arith.constant 0 : index
    %12 = vector.load %arg4[%c0_4, %c0_5] : memref<1x64xf32, #tpu.memory_space<vmem>>, vector<1x64xf32>
    %13 = vector.broadcast %12 : vector<1x64xf32> to vector<32x64xf32>
    %14 = arith.addf %11, %13 : vector<32x64xf32>
    %c0_6 = arith.constant 0 : index
    %c0_7 = arith.constant 0 : index
    %c0_8 = arith.constant 0 : index
    %15 = vector.load %arg2[%c0_6, %c0_7, %c0_8] : memref<1x32x64xf32, #tpu.memory_space<vmem>>, vector<1x32x64xf32>
    %16 = vector.shape_cast %15 : vector<1x32x64xf32> to vector<32x64xf32>
    %17 = arith.addf %14, %16 : vector<32x64xf32>
    %c0_9 = arith.constant 0 : index
    %c0_10 = arith.constant 0 : index
    %c0_11 = arith.constant 0 : index
    %18 = vector.load %arg5[%c0_9, %c0_10, %c0_11] : memref<1x32x64xf32, #tpu.memory_space<vmem>>, vector<1x32x64xf32>
    %19 = vector.shape_cast %18 : vector<1x32x64xf32> to vector<32x64xf32>
    %20 = vector.shape_cast %17 : vector<32x64xf32> to vector<1x32x64xf32>
    tpu.vector_store %arg5[%c0_9, %c0_10, %c0_11], %20 {strides = array<i32>} : memref<1x32x64xf32, #tpu.memory_space<vmem>>, vector<1x32x64xf32>,
    return
  }
  func.func @transform_0(%arg0: i32) -> (i32, i32, i32) {
    %c0_i32 = arith.constant 0 : i32
    %c0_i32_0 = arith.constant 0 : i32
    %c0_i32_1 = arith.constant 0 : i32
    return %arg0, %c0_i32, %c0_i32_0 : i32, i32, i32
  }
  func.func @transform_1(%arg0: i32) -> (i32, i32, i32) {
    %c0_i32 = arith.constant 0 : i32
    %c0_i32_0 = arith.constant 0 : i32
    %c0_i32_1 = arith.constant 0 : i32
    return %arg0, %c0_i32, %c0_i32_0 : i32, i32, i32
  }
  func.func @transform_2(%arg0: i32) -> (i32, i32) {
    %c0_i32 = arith.constant 0 : i32
    %c0_i32_0 = arith.constant 0 : i32
    %c0_i32_1 = arith.constant 0 : i32
    return %c0_i32, %c0_i32_0 : i32, i32
  }
  func.func @transform_3(%arg0: i32) -> (i32, i32) {
    %c0_i32 = arith.constant 0 : i32
    %c0_i32_0 = arith.constant 0 : i32
    %c0_i32_1 = arith.constant 0 : i32
    return %c0_i32, %c0_i32_0 : i32, i32
  }
  func.func @transform_4(%arg0: i32) -> (i32, i32, i32) {
    %c0_i32 = arith.constant 0 : i32
    %c0_i32_0 = arith.constant 0 : i32
    %c0_i32_1 = arith.constant 0 : i32
    return %arg0, %c0_i32, %c0_i32_0 : i32, i32, i32
  }
}

module attributes {stable_mosaic.version = 11 : i64} {
  func.func @_encoder_layer_kernel(%arg0: i32, %arg1: memref<1x32x64xf32, #tpu.memory_space<vmem>>, %arg2: memref<64x192xbf16, #tpu.memory_space<vmem>>, %arg3: memref<1x192xf32, #tpu.memory_space<vmem>>, %arg4: memref<64x64xbf16, #tpu.memory_space<vmem>>, %arg5: memref<1x64xf32, #tpu.memory_space<vmem>>, %arg6: memref<1x64xf32, #tpu.memory_space<vmem>>, %arg7: memref<1x64xf32, #tpu.memory_space<vmem>>, %arg8: memref<64x64xbf16, #tpu.memory_space<vmem>>, %arg9: memref<1x64xf32, #tpu.memory_space<vmem>>, %arg10: memref<64x64xbf16, #tpu.memory_space<vmem>>, %arg11: memref<1x64xf32, #tpu.memory_space<vmem>>, %arg12: memref<1x64xf32, #tpu.memory_space<vmem>>, %arg13: memref<1x64xf32, #tpu.memory_space<vmem>>, %arg14: memref<1x64xf32, #tpu.memory_space<vmem>>, %arg15: memref<1x64xf32, #tpu.memory_space<vmem>>, %arg16: memref<1x32x64xf32, #tpu.memory_space<vmem>>) attributes {dimension_semantics = [#tpu.dimension_semantics<parallel>], iteration_bounds = array<i64: 2>, scalar_prefetch = 0 : i64, scratch_operands = 0 : i64, tpu.core_type = #tpu.core_type<tc>, window_params = [{transform_indices = @transform_0, window_bounds = array<i64: 1, 32, 64>}, {pipeline_mode = #tpu.pipeline_mode<synchronous>, transform_indices = @transform_1, window_bounds = array<i64: 64, 192>}, {pipeline_mode = #tpu.pipeline_mode<synchronous>, transform_indices = @transform_2, window_bounds = array<i64: 1, 192>}, {pipeline_mode = #tpu.pipeline_mode<synchronous>, transform_indices = @transform_3, window_bounds = array<i64: 64, 64>}, {pipeline_mode = #tpu.pipeline_mode<synchronous>, transform_indices = @transform_4, window_bounds = array<i64: 1, 64>}, {pipeline_mode = #tpu.pipeline_mode<synchronous>, transform_indices = @transform_5, window_bounds = array<i64: 1, 64>}, {pipeline_mode = #tpu.pipeline_mode<synchronous>, transform_indices = @transform_6, window_bounds = array<i64: 1, 64>}, {pipeline_mode = #tpu.pipeline_mode<synchronous>, transform_indices = @transform_7, window_bounds = array<i64: 64, 64>}, {pipeline_mode = #tpu.pipeline_mode<synchronous>, transform_indices = @transform_8, window_bounds = array<i64: 1, 64>}, {pipeline_mode = #tpu.pipeline_mode<synchronous>, transform_indices = @transform_9, window_bounds = array<i64: 64, 64>}, {pipeline_mode = #tpu.pipeline_mode<synchronous>, transform_indices = @transform_10, window_bounds = array<i64: 1, 64>}, {pipeline_mode = #tpu.pipeline_mode<synchronous>, transform_indices = @transform_11, window_bounds = array<i64: 1, 64>}, {pipeline_mode = #tpu.pipeline_mode<synchronous>, transform_indices = @transform_12, window_bounds = array<i64: 1, 64>}, {pipeline_mode = #tpu.pipeline_mode<synchronous>, transform_indices = @transform_13, window_bounds = array<i64: 1, 64>}, {pipeline_mode = #tpu.pipeline_mode<synchronous>, transform_indices = @transform_14, window_bounds = array<i64: 1, 64>}, {transform_indices = @transform_15, window_bounds = array<i64: 1, 32, 64>}]} {
    %c0 = arith.constant 0 : index
    %c0_0 = arith.constant 0 : index
    %c0_1 = arith.constant 0 : index
    %0 = vector.load %arg1[%c0, %c0_0, %c0_1] : memref<1x32x64xf32, #tpu.memory_space<vmem>>, vector<1x32x64xf32>
    %1 = vector.shape_cast %0 : vector<1x32x64xf32> to vector<32x64xf32>
    %2 = arith.truncf %1 : vector<32x64xf32> to vector<32x64xbf16>
    %c0_2 = arith.constant 0 : index
    %c0_3 = arith.constant 0 : index
    %3 = vector.load %arg2[%c0_2, %c0_3] : memref<64x192xbf16, #tpu.memory_space<vmem>>, vector<64x192xbf16>
    %cst = arith.constant dense<0.000000e+00> : vector<32x192xf32>
    %4 = tpu.matmul %2, %3, %cst {dimension_numbers = #tpu.dot_dimension_numbers<[1], [0], [0], [1], [0, 0, 1, 1], [], []>} : vector<32x64xbf16>, vector<64x192xbf16>, vector<32x192xf32> -> vector<32x192xf32>
    %c0_4 = arith.constant 0 : index
    %c0_5 = arith.constant 0 : index
    %5 = vector.load %arg3[%c0_4, %c0_5] : memref<1x192xf32, #tpu.memory_space<vmem>>, vector<1x192xf32>
    %6 = vector.broadcast %5 : vector<1x192xf32> to vector<32x192xf32>
    %7 = arith.addf %4, %6 : vector<32x192xf32>
    %8 = vector.extract_strided_slice %7 {offsets = [0, 0], sizes = [32, 64], strides = [1, 1]} : vector<32x192xf32> to vector<32x64xf32>
    %9 = vector.extract_strided_slice %7 {offsets = [0, 64], sizes = [32, 64], strides = [1, 1]} : vector<32x192xf32> to vector<32x64xf32>
    %10 = vector.extract_strided_slice %7 {offsets = [0, 128], sizes = [32, 64], strides = [1, 1]} : vector<32x192xf32> to vector<32x64xf32>
    %11 = arith.truncf %8 : vector<32x64xf32> to vector<32x64xbf16>
    %12 = arith.truncf %9 : vector<32x64xf32> to vector<32x64xbf16>
    %13 = arith.truncf %10 : vector<32x64xf32> to vector<32x64xbf16>
    %14 = vector.extract_strided_slice %11 {offsets = [0, 0], sizes = [32, 16], strides = [1, 1]} : vector<32x64xbf16> to vector<32x16xbf16>
    %15 = vector.extract_strided_slice %12 {offsets = [0, 0], sizes = [32, 16], strides = [1, 1]} : vector<32x64xbf16> to vector<32x16xbf16>
    %16 = vector.extract_strided_slice %13 {offsets = [0, 0], sizes = [32, 16], strides = [1, 1]} : vector<32x64xbf16> to vector<32x16xbf16>
    %cst_6 = arith.constant dense<0.000000e+00> : vector<32x32xf32>
    %17 = tpu.matmul %14, %15, %cst_6 {dimension_numbers = #tpu.dot_dimension_numbers<[1], [1], [0], [0], [0, 0, 1, 0], [], []>} : vector<32x16xbf16>, vector<32x16xbf16>, vector<32x32xf32> -> vector<32x32xf32>
    %cst_7 = arith.constant 2.500000e-01 : f32
    %18 = vector.broadcast %cst_7 : f32 to vector<32x32xf32>
    %19 = arith.mulf %17, %18 : vector<32x32xf32>
    %cst_8 = arith.constant dense<0xFF800000> : vector<32xf32>
    %20 = vector.multi_reduction <maximumf>, %19, %cst_8 [1] : vector<32x32xf32> to vector<32xf32>
    %21 = vector.shape_cast %20 : vector<32xf32> to vector<32x1xf32>
    %22 = vector.broadcast %21 : vector<32x1xf32> to vector<32x32xf32>
    %23 = arith.subf %19, %22 : vector<32x32xf32>
    %24 = math.exp %23 : vector<32x32xf32>
    %cst_9 = arith.constant dense<0.000000e+00> : vector<32xf32>
    %25 = vector.multi_reduction <add>, %24, %cst_9 [1] : vector<32x32xf32> to vector<32xf32>
    %26 = vector.shape_cast %25 : vector<32xf32> to vector<32x1xf32>
    %27 = vector.broadcast %26 : vector<32x1xf32> to vector<32x32xf32>
    %28 = arith.divf %24, %27 : vector<32x32xf32>
    %29 = arith.truncf %28 : vector<32x32xf32> to vector<32x32xbf16>
    %cst_10 = arith.constant dense<0.000000e+00> : vector<32x16xf32>
    %30 = tpu.matmul %29, %16, %cst_10 {dimension_numbers = #tpu.dot_dimension_numbers<[1], [0], [0], [1], [0, 0, 1, 1], [], []>} : vector<32x32xbf16>, vector<32x16xbf16>, vector<32x16xf32> -> vector<32x16xf32>
    %31 = vector.extract_strided_slice %11 {offsets = [0, 16], sizes = [32, 16], strides = [1, 1]} : vector<32x64xbf16> to vector<32x16xbf16>
    %32 = vector.extract_strided_slice %12 {offsets = [0, 16], sizes = [32, 16], strides = [1, 1]} : vector<32x64xbf16> to vector<32x16xbf16>
    %33 = vector.extract_strided_slice %13 {offsets = [0, 16], sizes = [32, 16], strides = [1, 1]} : vector<32x64xbf16> to vector<32x16xbf16>
    %cst_11 = arith.constant dense<0.000000e+00> : vector<32x32xf32>
    %34 = tpu.matmul %31, %32, %cst_11 {dimension_numbers = #tpu.dot_dimension_numbers<[1], [1], [0], [0], [0, 0, 1, 0], [], []>} : vector<32x16xbf16>, vector<32x16xbf16>, vector<32x32xf32> -> vector<32x32xf32>
    %cst_12 = arith.constant 2.500000e-01 : f32
    %35 = vector.broadcast %cst_12 : f32 to vector<32x32xf32>
    %36 = arith.mulf %34, %35 : vector<32x32xf32>
    %cst_13 = arith.constant dense<0xFF800000> : vector<32xf32>
    %37 = vector.multi_reduction <maximumf>, %36, %cst_13 [1] : vector<32x32xf32> to vector<32xf32>
    %38 = vector.shape_cast %37 : vector<32xf32> to vector<32x1xf32>
    %39 = vector.broadcast %38 : vector<32x1xf32> to vector<32x32xf32>
    %40 = arith.subf %36, %39 : vector<32x32xf32>
    %41 = math.exp %40 : vector<32x32xf32>
    %cst_14 = arith.constant dense<0.000000e+00> : vector<32xf32>
    %42 = vector.multi_reduction <add>, %41, %cst_14 [1] : vector<32x32xf32> to vector<32xf32>
    %43 = vector.shape_cast %42 : vector<32xf32> to vector<32x1xf32>
    %44 = vector.broadcast %43 : vector<32x1xf32> to vector<32x32xf32>
    %45 = arith.divf %41, %44 : vector<32x32xf32>
    %46 = arith.truncf %45 : vector<32x32xf32> to vector<32x32xbf16>
    %cst_15 = arith.constant dense<0.000000e+00> : vector<32x16xf32>
    %47 = tpu.matmul %46, %33, %cst_15 {dimension_numbers = #tpu.dot_dimension_numbers<[1], [0], [0], [1], [0, 0, 1, 1], [], []>} : vector<32x32xbf16>, vector<32x16xbf16>, vector<32x16xf32> -> vector<32x16xf32>
    %48 = vector.extract_strided_slice %11 {offsets = [0, 32], sizes = [32, 16], strides = [1, 1]} : vector<32x64xbf16> to vector<32x16xbf16>
    %49 = vector.extract_strided_slice %12 {offsets = [0, 32], sizes = [32, 16], strides = [1, 1]} : vector<32x64xbf16> to vector<32x16xbf16>
    %50 = vector.extract_strided_slice %13 {offsets = [0, 32], sizes = [32, 16], strides = [1, 1]} : vector<32x64xbf16> to vector<32x16xbf16>
    %cst_16 = arith.constant dense<0.000000e+00> : vector<32x32xf32>
    %51 = tpu.matmul %48, %49, %cst_16 {dimension_numbers = #tpu.dot_dimension_numbers<[1], [1], [0], [0], [0, 0, 1, 0], [], []>} : vector<32x16xbf16>, vector<32x16xbf16>, vector<32x32xf32> -> vector<32x32xf32>
    %cst_17 = arith.constant 2.500000e-01 : f32
    %52 = vector.broadcast %cst_17 : f32 to vector<32x32xf32>
    %53 = arith.mulf %51, %52 : vector<32x32xf32>
    %cst_18 = arith.constant dense<0xFF800000> : vector<32xf32>
    %54 = vector.multi_reduction <maximumf>, %53, %cst_18 [1] : vector<32x32xf32> to vector<32xf32>
    %55 = vector.shape_cast %54 : vector<32xf32> to vector<32x1xf32>
    %56 = vector.broadcast %55 : vector<32x1xf32> to vector<32x32xf32>
    %57 = arith.subf %53, %56 : vector<32x32xf32>
    %58 = math.exp %57 : vector<32x32xf32>
    %cst_19 = arith.constant dense<0.000000e+00> : vector<32xf32>
    %59 = vector.multi_reduction <add>, %58, %cst_19 [1] : vector<32x32xf32> to vector<32xf32>
    %60 = vector.shape_cast %59 : vector<32xf32> to vector<32x1xf32>
    %61 = vector.broadcast %60 : vector<32x1xf32> to vector<32x32xf32>
    %62 = arith.divf %58, %61 : vector<32x32xf32>
    %63 = arith.truncf %62 : vector<32x32xf32> to vector<32x32xbf16>
    %cst_20 = arith.constant dense<0.000000e+00> : vector<32x16xf32>
    %64 = tpu.matmul %63, %50, %cst_20 {dimension_numbers = #tpu.dot_dimension_numbers<[1], [0], [0], [1], [0, 0, 1, 1], [], []>} : vector<32x32xbf16>, vector<32x16xbf16>, vector<32x16xf32> -> vector<32x16xf32>
    %65 = vector.extract_strided_slice %11 {offsets = [0, 48], sizes = [32, 16], strides = [1, 1]} : vector<32x64xbf16> to vector<32x16xbf16>
    %66 = vector.extract_strided_slice %12 {offsets = [0, 48], sizes = [32, 16], strides = [1, 1]} : vector<32x64xbf16> to vector<32x16xbf16>
    %67 = vector.extract_strided_slice %13 {offsets = [0, 48], sizes = [32, 16], strides = [1, 1]} : vector<32x64xbf16> to vector<32x16xbf16>
    %cst_21 = arith.constant dense<0.000000e+00> : vector<32x32xf32>
    %68 = tpu.matmul %65, %66, %cst_21 {dimension_numbers = #tpu.dot_dimension_numbers<[1], [1], [0], [0], [0, 0, 1, 0], [], []>} : vector<32x16xbf16>, vector<32x16xbf16>, vector<32x32xf32> -> vector<32x32xf32>
    %cst_22 = arith.constant 2.500000e-01 : f32
    %69 = vector.broadcast %cst_22 : f32 to vector<32x32xf32>
    %70 = arith.mulf %68, %69 : vector<32x32xf32>
    %cst_23 = arith.constant dense<0xFF800000> : vector<32xf32>
    %71 = vector.multi_reduction <maximumf>, %70, %cst_23 [1] : vector<32x32xf32> to vector<32xf32>
    %72 = vector.shape_cast %71 : vector<32xf32> to vector<32x1xf32>
    %73 = vector.broadcast %72 : vector<32x1xf32> to vector<32x32xf32>
    %74 = arith.subf %70, %73 : vector<32x32xf32>
    %75 = math.exp %74 : vector<32x32xf32>
    %cst_24 = arith.constant dense<0.000000e+00> : vector<32xf32>
    %76 = vector.multi_reduction <add>, %75, %cst_24 [1] : vector<32x32xf32> to vector<32xf32>
    %77 = vector.shape_cast %76 : vector<32xf32> to vector<32x1xf32>
    %78 = vector.broadcast %77 : vector<32x1xf32> to vector<32x32xf32>
    %79 = arith.divf %75, %78 : vector<32x32xf32>
    %80 = arith.truncf %79 : vector<32x32xf32> to vector<32x32xbf16>
    %cst_25 = arith.constant dense<0.000000e+00> : vector<32x16xf32>
    %81 = tpu.matmul %80, %67, %cst_25 {dimension_numbers = #tpu.dot_dimension_numbers<[1], [0], [0], [1], [0, 0, 1, 1], [], []>} : vector<32x32xbf16>, vector<32x16xbf16>, vector<32x16xf32> -> vector<32x16xf32>
    %82 = tpu.concatenate %30, %47, %64, %81 in 1 : vector<32x16xf32>, vector<32x16xf32>, vector<32x16xf32>, vector<32x16xf32> -> vector<32x64xf32>
    %83 = arith.truncf %82 : vector<32x64xf32> to vector<32x64xbf16>
    %c0_26 = arith.constant 0 : index
    %c0_27 = arith.constant 0 : index
    %84 = vector.load %arg4[%c0_26, %c0_27] : memref<64x64xbf16, #tpu.memory_space<vmem>>, vector<64x64xbf16>
    %cst_28 = arith.constant dense<0.000000e+00> : vector<32x64xf32>
    %85 = tpu.matmul %83, %84, %cst_28 {dimension_numbers = #tpu.dot_dimension_numbers<[1], [0], [0], [1], [0, 0, 1, 1], [], []>} : vector<32x64xbf16>, vector<64x64xbf16>, vector<32x64xf32> -> vector<32x64xf32>
    %c0_29 = arith.constant 0 : index
    %c0_30 = arith.constant 0 : index
    %86 = vector.load %arg5[%c0_29, %c0_30] : memref<1x64xf32, #tpu.memory_space<vmem>>, vector<1x64xf32>
    %87 = vector.broadcast %86 : vector<1x64xf32> to vector<32x64xf32>
    %88 = arith.addf %85, %87 : vector<32x64xf32>
    %89 = arith.addf %1, %88 : vector<32x64xf32>
    %c0_31 = arith.constant 0 : index
    %c0_32 = arith.constant 0 : index
    %90 = vector.load %arg6[%c0_31, %c0_32] : memref<1x64xf32, #tpu.memory_space<vmem>>, vector<1x64xf32>
    %c0_33 = arith.constant 0 : index
    %c0_34 = arith.constant 0 : index
    %91 = vector.load %arg7[%c0_33, %c0_34] : memref<1x64xf32, #tpu.memory_space<vmem>>, vector<1x64xf32>
    %cst_35 = arith.constant dense<0.000000e+00> : vector<32xf32>
    %92 = vector.multi_reduction <add>, %89, %cst_35 [1] : vector<32x64xf32> to vector<32xf32>
    %93 = vector.shape_cast %92 : vector<32xf32> to vector<32x1xf32>
    %cst_36 = arith.constant 6.400000e+01 : f32
    %94 = vector.broadcast %cst_36 : f32 to vector<32x1xf32>
    %95 = arith.divf %93, %94 : vector<32x1xf32>
    %96 = vector.broadcast %95 : vector<32x1xf32> to vector<32x64xf32>
    %97 = arith.subf %89, %96 : vector<32x64xf32>
    %98 = arith.mulf %97, %97 : vector<32x64xf32>
    %cst_37 = arith.constant dense<0.000000e+00> : vector<32xf32>
    %99 = vector.multi_reduction <add>, %98, %cst_37 [1] : vector<32x64xf32> to vector<32xf32>
    %100 = vector.shape_cast %99 : vector<32xf32> to vector<32x1xf32>
    %cst_38 = arith.constant 6.400000e+01 : f32
    %101 = vector.broadcast %cst_38 : f32 to vector<32x1xf32>
    %102 = arith.divf %100, %101 : vector<32x1xf32>
    %103 = vector.broadcast %95 : vector<32x1xf32> to vector<32x64xf32>
    %104 = arith.subf %89, %103 : vector<32x64xf32>
    %cst_39 = arith.constant 9.99999974E-6 : f32
    %105 = vector.broadcast %cst_39 : f32 to vector<32x1xf32>
    %106 = arith.addf %102, %105 : vector<32x1xf32>
    %107 = math.rsqrt %106 : vector<32x1xf32>
    %108 = vector.broadcast %107 : vector<32x1xf32> to vector<32x64xf32>
    %109 = arith.mulf %104, %108 : vector<32x64xf32>
    %110 = vector.broadcast %90 : vector<1x64xf32> to vector<32x64xf32>
    %111 = arith.mulf %109, %110 : vector<32x64xf32>
    %112 = vector.broadcast %91 : vector<1x64xf32> to vector<32x64xf32>
    %113 = arith.addf %111, %112 : vector<32x64xf32>
    %114 = arith.truncf %113 : vector<32x64xf32> to vector<32x64xbf16>
    %c0_40 = arith.constant 0 : index
    %c0_41 = arith.constant 0 : index
    %115 = vector.load %arg8[%c0_40, %c0_41] : memref<64x64xbf16, #tpu.memory_space<vmem>>, vector<64x64xbf16>
    %cst_42 = arith.constant dense<0.000000e+00> : vector<32x64xf32>
    %116 = tpu.matmul %114, %115, %cst_42 {dimension_numbers = #tpu.dot_dimension_numbers<[1], [0], [0], [1], [0, 0, 1, 1], [], []>} : vector<32x64xbf16>, vector<64x64xbf16>, vector<32x64xf32> -> vector<32x64xf32>
    %c0_43 = arith.constant 0 : index
    %c0_44 = arith.constant 0 : index
    %117 = vector.load %arg9[%c0_43, %c0_44] : memref<1x64xf32, #tpu.memory_space<vmem>>, vector<1x64xf32>
    %118 = vector.broadcast %117 : vector<1x64xf32> to vector<32x64xf32>
    %119 = arith.addf %116, %118 : vector<32x64xf32>
    %cst_45 = arith.constant 5.000000e-01 : f32
    %120 = vector.broadcast %cst_45 : f32 to vector<32x64xf32>
    %121 = arith.mulf %120, %119 : vector<32x64xf32>
    %cst_46 = arith.constant 0.707106769 : f32
    %122 = vector.broadcast %cst_46 : f32 to vector<32x64xf32>
    %123 = arith.mulf %119, %122 : vector<32x64xf32>
    %cst_47 = arith.constant 0.000000e+00 : f32
    %124 = vector.broadcast %cst_47 : f32 to vector<32x64xf32>
    %125 = arith.cmpf oge, %123, %124 : vector<32x64xf32>
    %cst_48 = arith.constant 1.000000e+00 : f32
    %cst_49 = arith.constant -1.000000e+00 : f32
    %126 = vector.broadcast %cst_48 : f32 to vector<32x64xf32>
    %127 = vector.broadcast %cst_49 : f32 to vector<32x64xf32>
    %128 = arith.select %125, %126, %127 : vector<32x64xi1>, vector<32x64xf32>
    %129 = math.absf %123 : vector<32x64xf32>
    %cst_50 = arith.constant 0.327591091 : f32
    %130 = vector.broadcast %cst_50 : f32 to vector<32x64xf32>
    %131 = arith.mulf %130, %129 : vector<32x64xf32>
    %cst_51 = arith.constant 1.000000e+00 : f32
    %132 = vector.broadcast %cst_51 : f32 to vector<32x64xf32>
    %133 = arith.addf %132, %131 : vector<32x64xf32>
    %cst_52 = arith.constant 1.000000e+00 : f32
    %134 = vector.broadcast %cst_52 : f32 to vector<32x64xf32>
    %135 = arith.divf %134, %133 : vector<32x64xf32>
    %cst_53 = arith.constant 1.06140542 : f32
    %136 = vector.broadcast %cst_53 : f32 to vector<32x64xf32>
    %137 = arith.mulf %136, %135 : vector<32x64xf32>
    %cst_54 = arith.constant -1.45315206 : f32
    %138 = vector.broadcast %cst_54 : f32 to vector<32x64xf32>
    %139 = arith.addf %137, %138 : vector<32x64xf32>
    %140 = arith.mulf %139, %135 : vector<32x64xf32>
    %cst_55 = arith.constant 1.42141378 : f32
    %141 = vector.broadcast %cst_55 : f32 to vector<32x64xf32>
    %142 = arith.addf %140, %141 : vector<32x64xf32>
    %143 = arith.mulf %142, %135 : vector<32x64xf32>
    %cst_56 = arith.constant -0.284496725 : f32
    %144 = vector.broadcast %cst_56 : f32 to vector<32x64xf32>
    %145 = arith.addf %143, %144 : vector<32x64xf32>
    %146 = arith.mulf %145, %135 : vector<32x64xf32>
    %cst_57 = arith.constant 0.254829586 : f32
    %147 = vector.broadcast %cst_57 : f32 to vector<32x64xf32>
    %148 = arith.addf %146, %147 : vector<32x64xf32>
    %149 = arith.mulf %148, %135 : vector<32x64xf32>
    %cst_58 = arith.constant 0.000000e+00 : f32
    %150 = vector.broadcast %cst_58 : f32 to vector<32x64xf32>
    %151 = arith.subf %150, %129 : vector<32x64xf32>
    %152 = arith.mulf %151, %129 : vector<32x64xf32>
    %153 = math.exp %152 : vector<32x64xf32>
    %154 = arith.mulf %149, %153 : vector<32x64xf32>
    %cst_59 = arith.constant 1.000000e+00 : f32
    %155 = vector.broadcast %cst_59 : f32 to vector<32x64xf32>
    %156 = arith.subf %155, %154 : vector<32x64xf32>
    %157 = arith.mulf %128, %156 : vector<32x64xf32>
    %cst_60 = arith.constant 1.000000e+00 : f32
    %158 = vector.broadcast %cst_60 : f32 to vector<32x64xf32>
    %159 = arith.addf %158, %157 : vector<32x64xf32>
    %160 = arith.mulf %121, %159 : vector<32x64xf32>
    %161 = arith.truncf %160 : vector<32x64xf32> to vector<32x64xbf16>
    %c0_61 = arith.constant 0 : index
    %c0_62 = arith.constant 0 : index
    %162 = vector.load %arg10[%c0_61, %c0_62] : memref<64x64xbf16, #tpu.memory_space<vmem>>, vector<64x64xbf16>
    %cst_63 = arith.constant dense<0.000000e+00> : vector<32x64xf32>
    %163 = tpu.matmul %161, %162, %cst_63 {dimension_numbers = #tpu.dot_dimension_numbers<[1], [0], [0], [1], [0, 0, 1, 1], [], []>} : vector<32x64xbf16>, vector<64x64xbf16>, vector<32x64xf32> -> vector<32x64xf32>
    %c0_64 = arith.constant 0 : index
    %c0_65 = arith.constant 0 : index
    %164 = vector.load %arg11[%c0_64, %c0_65] : memref<1x64xf32, #tpu.memory_space<vmem>>, vector<1x64xf32>
    %165 = vector.broadcast %164 : vector<1x64xf32> to vector<32x64xf32>
    %166 = arith.addf %163, %165 : vector<32x64xf32>
    %167 = arith.addf %113, %166 : vector<32x64xf32>
    %c0_66 = arith.constant 0 : index
    %c0_67 = arith.constant 0 : index
    %168 = vector.load %arg12[%c0_66, %c0_67] : memref<1x64xf32, #tpu.memory_space<vmem>>, vector<1x64xf32>
    %c0_68 = arith.constant 0 : index
    %c0_69 = arith.constant 0 : index
    %169 = vector.load %arg13[%c0_68, %c0_69] : memref<1x64xf32, #tpu.memory_space<vmem>>, vector<1x64xf32>
    %cst_70 = arith.constant dense<0.000000e+00> : vector<32xf32>
    %170 = vector.multi_reduction <add>, %167, %cst_70 [1] : vector<32x64xf32> to vector<32xf32>
    %171 = vector.shape_cast %170 : vector<32xf32> to vector<32x1xf32>
    %cst_71 = arith.constant 6.400000e+01 : f32
    %172 = vector.broadcast %cst_71 : f32 to vector<32x1xf32>
    %173 = arith.divf %171, %172 : vector<32x1xf32>
    %174 = vector.broadcast %173 : vector<32x1xf32> to vector<32x64xf32>
    %175 = arith.subf %167, %174 : vector<32x64xf32>
    %176 = arith.mulf %175, %175 : vector<32x64xf32>
    %cst_72 = arith.constant dense<0.000000e+00> : vector<32xf32>
    %177 = vector.multi_reduction <add>, %176, %cst_72 [1] : vector<32x64xf32> to vector<32xf32>
    %178 = vector.shape_cast %177 : vector<32xf32> to vector<32x1xf32>
    %cst_73 = arith.constant 6.400000e+01 : f32
    %179 = vector.broadcast %cst_73 : f32 to vector<32x1xf32>
    %180 = arith.divf %178, %179 : vector<32x1xf32>
    %181 = vector.broadcast %173 : vector<32x1xf32> to vector<32x64xf32>
    %182 = arith.subf %167, %181 : vector<32x64xf32>
    %cst_74 = arith.constant 9.99999974E-6 : f32
    %183 = vector.broadcast %cst_74 : f32 to vector<32x1xf32>
    %184 = arith.addf %180, %183 : vector<32x1xf32>
    %185 = math.rsqrt %184 : vector<32x1xf32>
    %186 = vector.broadcast %185 : vector<32x1xf32> to vector<32x64xf32>
    %187 = arith.mulf %182, %186 : vector<32x64xf32>
    %188 = vector.broadcast %168 : vector<1x64xf32> to vector<32x64xf32>
    %189 = arith.mulf %187, %188 : vector<32x64xf32>
    %190 = vector.broadcast %169 : vector<1x64xf32> to vector<32x64xf32>
    %191 = arith.addf %189, %190 : vector<32x64xf32>
    %c0_75 = arith.constant 0 : index
    %c0_76 = arith.constant 0 : index
    %c0_77 = arith.constant 0 : index
    %192 = vector.load %arg16[%c0_75, %c0_76, %c0_77] : memref<1x32x64xf32, #tpu.memory_space<vmem>>, vector<1x32x64xf32>
    %193 = vector.shape_cast %192 : vector<1x32x64xf32> to vector<32x64xf32>
    %194 = vector.shape_cast %191 : vector<32x64xf32> to vector<1x32x64xf32>
    tpu.vector_store %arg16[%c0_75, %c0_76, %c0_77], %194 {strides = array<i32>} : memref<1x32x64xf32, #tpu.memory_space<vmem>>, vector<1x32x64xf32>,
    return
  }
  func.func @transform_0(%arg0: i32) -> (i32, i32, i32) {
    %c0_i32 = arith.constant 0 : i32
    %c0_i32_0 = arith.constant 0 : i32
    %c0_i32_1 = arith.constant 0 : i32
    return %arg0, %c0_i32, %c0_i32_0 : i32, i32, i32
  }
  func.func @transform_1(%arg0: i32) -> (i32, i32) {
    %c0_i32 = arith.constant 0 : i32
    %c0_i32_0 = arith.constant 0 : i32
    %c0_i32_1 = arith.constant 0 : i32
    return %c0_i32, %c0_i32_0 : i32, i32
  }
  func.func @transform_2(%arg0: i32) -> (i32, i32) {
    %c0_i32 = arith.constant 0 : i32
    %c0_i32_0 = arith.constant 0 : i32
    %c0_i32_1 = arith.constant 0 : i32
    return %c0_i32, %c0_i32_0 : i32, i32
  }
  func.func @transform_3(%arg0: i32) -> (i32, i32) {
    %c0_i32 = arith.constant 0 : i32
    %c0_i32_0 = arith.constant 0 : i32
    %c0_i32_1 = arith.constant 0 : i32
    return %c0_i32, %c0_i32_0 : i32, i32
  }
  func.func @transform_4(%arg0: i32) -> (i32, i32) {
    %c0_i32 = arith.constant 0 : i32
    %c0_i32_0 = arith.constant 0 : i32
    %c0_i32_1 = arith.constant 0 : i32
    return %c0_i32, %c0_i32_0 : i32, i32
  }
  func.func @transform_5(%arg0: i32) -> (i32, i32) {
    %c0_i32 = arith.constant 0 : i32
    %c0_i32_0 = arith.constant 0 : i32
    %c0_i32_1 = arith.constant 0 : i32
    return %c0_i32, %c0_i32_0 : i32, i32
  }
  func.func @transform_6(%arg0: i32) -> (i32, i32) {
    %c0_i32 = arith.constant 0 : i32
    %c0_i32_0 = arith.constant 0 : i32
    %c0_i32_1 = arith.constant 0 : i32
    return %c0_i32, %c0_i32_0 : i32, i32
  }
  func.func @transform_7(%arg0: i32) -> (i32, i32) {
    %c0_i32 = arith.constant 0 : i32
    %c0_i32_0 = arith.constant 0 : i32
    %c0_i32_1 = arith.constant 0 : i32
    return %c0_i32, %c0_i32_0 : i32, i32
  }
  func.func @transform_8(%arg0: i32) -> (i32, i32) {
    %c0_i32 = arith.constant 0 : i32
    %c0_i32_0 = arith.constant 0 : i32
    %c0_i32_1 = arith.constant 0 : i32
    return %c0_i32, %c0_i32_0 : i32, i32
  }
  func.func @transform_9(%arg0: i32) -> (i32, i32) {
    %c0_i32 = arith.constant 0 : i32
    %c0_i32_0 = arith.constant 0 : i32
    %c0_i32_1 = arith.constant 0 : i32
    return %c0_i32, %c0_i32_0 : i32, i32
  }
  func.func @transform_10(%arg0: i32) -> (i32, i32) {
    %c0_i32 = arith.constant 0 : i32
    %c0_i32_0 = arith.constant 0 : i32
    %c0_i32_1 = arith.constant 0 : i32
    return %c0_i32, %c0_i32_0 : i32, i32
  }
  func.func @transform_11(%arg0: i32) -> (i32, i32) {
    %c0_i32 = arith.constant 0 : i32
    %c0_i32_0 = arith.constant 0 : i32
    %c0_i32_1 = arith.constant 0 : i32
    return %c0_i32, %c0_i32_0 : i32, i32
  }
  func.func @transform_12(%arg0: i32) -> (i32, i32) {
    %c0_i32 = arith.constant 0 : i32
    %c0_i32_0 = arith.constant 0 : i32
    %c0_i32_1 = arith.constant 0 : i32
    return %c0_i32, %c0_i32_0 : i32, i32
  }
  func.func @transform_13(%arg0: i32) -> (i32, i32) {
    %c0_i32 = arith.constant 0 : i32
    %c0_i32_0 = arith.constant 0 : i32
    %c0_i32_1 = arith.constant 0 : i32
    return %c0_i32, %c0_i32_0 : i32, i32
  }
  func.func @transform_14(%arg0: i32) -> (i32, i32) {
    %c0_i32 = arith.constant 0 : i32
    %c0_i32_0 = arith.constant 0 : i32
    %c0_i32_1 = arith.constant 0 : i32
    return %c0_i32, %c0_i32_0 : i32, i32
  }
  func.func @transform_15(%arg0: i32) -> (i32, i32, i32) {
    %c0_i32 = arith.constant 0 : i32
    %c0_i32_0 = arith.constant 0 : i32
    %c0_i32_1 = arith.constant 0 : i32
    return %arg0, %c0_i32, %c0_i32_0 : i32, i32, i32
  }
}

module attributes {stable_mosaic.version = 11 : i64} {
  func.func @_distill_conv_kernel(%arg0: memref<2x32x64xf32, #tpu.memory_space<vmem>>, %arg1: memref<192x64xbf16, #tpu.memory_space<vmem>>, %arg2: memref<1x64xf32, #tpu.memory_space<vmem>>, %arg3: memref<1x64xf32, #tpu.memory_space<vmem>>, %arg4: memref<1x64xf32, #tpu.memory_space<vmem>>, %arg5: memref<16x32xf32, #tpu.memory_space<vmem>>, %arg6: memref<2x16x64xf32, #tpu.memory_space<vmem>>) attributes {dimension_semantics = [], scalar_prefetch = 0 : i64, scratch_operands = 0 : i64, tpu.core_type = #tpu.core_type<tc>} {
    %c0 = arith.constant 0 : index
    %c0_0 = arith.constant 0 : index
    %0 = vector.load %arg1[%c0, %c0_0] : memref<192x64xbf16, #tpu.memory_space<vmem>>, vector<192x64xbf16>
    %c0_1 = arith.constant 0 : index
    %c0_2 = arith.constant 0 : index
    %1 = vector.load %arg2[%c0_1, %c0_2] : memref<1x64xf32, #tpu.memory_space<vmem>>, vector<1x64xf32>
    %c0_3 = arith.constant 0 : index
    %c0_4 = arith.constant 0 : index
    %2 = vector.load %arg5[%c0_3, %c0_4] : memref<16x32xf32, #tpu.memory_space<vmem>>, vector<16x32xf32>
    %cst = arith.constant 0.000000e+00 : f32
    %3 = vector.broadcast %cst : f32 to vector<1x64xf32>
    %cst_5 = arith.constant 0.000000e+00 : f32
    %4 = vector.broadcast %cst_5 : f32 to vector<1x64xf32>
    %c0_6 = arith.constant 0 : index
    %c0_7 = arith.constant 0 : index
    %c0_8 = arith.constant 0 : index
    %5 = vector.load %arg0[%c0_6, %c0_7, %c0_8] : memref<2x32x64xf32, #tpu.memory_space<vmem>>, vector<1x32x64xf32>
    %6 = vector.shape_cast %5 : vector<1x32x64xf32> to vector<32x64xf32>
    %7 = vector.extract_strided_slice %6 {offsets = [31, 0], sizes = [1, 64], strides = [1, 1]} : vector<32x64xf32> to vector<1x64xf32>
    %8 = vector.extract_strided_slice %6 {offsets = [0, 0], sizes = [31, 64], strides = [1, 1]} : vector<32x64xf32> to vector<31x64xf32>
    %9 = tpu.concatenate %7, %8 in 0 : vector<1x64xf32>, vector<31x64xf32> -> vector<32x64xf32>
    %10 = vector.extract_strided_slice %6 {offsets = [1, 0], sizes = [31, 64], strides = [1, 1]} : vector<32x64xf32> to vector<31x64xf32>
    %11 = vector.extract_strided_slice %6 {offsets = [0, 0], sizes = [1, 64], strides = [1, 1]} : vector<32x64xf32> to vector<1x64xf32>
    %12 = tpu.concatenate %10, %11 in 0 : vector<31x64xf32>, vector<1x64xf32> -> vector<32x64xf32>
    %13 = tpu.concatenate %9, %6, %12 in 1 : vector<32x64xf32>, vector<32x64xf32>, vector<32x64xf32> -> vector<32x192xf32>
    %14 = arith.truncf %13 : vector<32x192xf32> to vector<32x192xbf16>
    %cst_9 = arith.constant dense<0.000000e+00> : vector<32x64xf32>
    %15 = tpu.matmul %14, %0, %cst_9 {dimension_numbers = #tpu.dot_dimension_numbers<[1], [0], [0], [1], [0, 0, 1, 1], [], []>} : vector<32x192xbf16>, vector<192x64xbf16>, vector<32x64xf32> -> vector<32x64xf32>
    %16 = vector.broadcast %1 : vector<1x64xf32> to vector<32x64xf32>
    %17 = arith.addf %15, %16 : vector<32x64xf32>
    %cst_10 = arith.constant dense<0.000000e+00> : vector<64xf32>
    %18 = vector.multi_reduction <add>, %17, %cst_10 [0] : vector<32x64xf32> to vector<64xf32>
    %19 = vector.shape_cast %18 : vector<64xf32> to vector<1x64xf32>
    %20 = arith.addf %3, %19 : vector<1x64xf32>
    %21 = arith.mulf %17, %17 : vector<32x64xf32>
    %cst_11 = arith.constant dense<0.000000e+00> : vector<64xf32>
    %22 = vector.multi_reduction <add>, %21, %cst_11 [0] : vector<32x64xf32> to vector<64xf32>
    %23 = vector.shape_cast %22 : vector<64xf32> to vector<1x64xf32>
    %24 = arith.addf %4, %23 : vector<1x64xf32>
    %c1 = arith.constant 1 : index
    %c0_12 = arith.constant 0 : index
    %c0_13 = arith.constant 0 : index
    %25 = vector.load %arg0[%c1, %c0_12, %c0_13] : memref<2x32x64xf32, #tpu.memory_space<vmem>>, vector<1x32x64xf32>
    %26 = vector.shape_cast %25 : vector<1x32x64xf32> to vector<32x64xf32>
    %27 = vector.extract_strided_slice %26 {offsets = [31, 0], sizes = [1, 64], strides = [1, 1]} : vector<32x64xf32> to vector<1x64xf32>
    %28 = vector.extract_strided_slice %26 {offsets = [0, 0], sizes = [31, 64], strides = [1, 1]} : vector<32x64xf32> to vector<31x64xf32>
    %29 = tpu.concatenate %27, %28 in 0 : vector<1x64xf32>, vector<31x64xf32> -> vector<32x64xf32>
    %30 = vector.extract_strided_slice %26 {offsets = [1, 0], sizes = [31, 64], strides = [1, 1]} : vector<32x64xf32> to vector<31x64xf32>
    %31 = vector.extract_strided_slice %26 {offsets = [0, 0], sizes = [1, 64], strides = [1, 1]} : vector<32x64xf32> to vector<1x64xf32>
    %32 = tpu.concatenate %30, %31 in 0 : vector<31x64xf32>, vector<1x64xf32> -> vector<32x64xf32>
    %33 = tpu.concatenate %29, %26, %32 in 1 : vector<32x64xf32>, vector<32x64xf32>, vector<32x64xf32> -> vector<32x192xf32>
    %34 = arith.truncf %33 : vector<32x192xf32> to vector<32x192xbf16>
    %cst_14 = arith.constant dense<0.000000e+00> : vector<32x64xf32>
    %35 = tpu.matmul %34, %0, %cst_14 {dimension_numbers = #tpu.dot_dimension_numbers<[1], [0], [0], [1], [0, 0, 1, 1], [], []>} : vector<32x192xbf16>, vector<192x64xbf16>, vector<32x64xf32> -> vector<32x64xf32>
    %36 = vector.broadcast %1 : vector<1x64xf32> to vector<32x64xf32>
    %37 = arith.addf %35, %36 : vector<32x64xf32>
    %cst_15 = arith.constant dense<0.000000e+00> : vector<64xf32>
    %38 = vector.multi_reduction <add>, %37, %cst_15 [0] : vector<32x64xf32> to vector<64xf32>
    %39 = vector.shape_cast %38 : vector<64xf32> to vector<1x64xf32>
    %40 = arith.addf %20, %39 : vector<1x64xf32>
    %41 = arith.mulf %37, %37 : vector<32x64xf32>
    %cst_16 = arith.constant dense<0.000000e+00> : vector<64xf32>
    %42 = vector.multi_reduction <add>, %41, %cst_16 [0] : vector<32x64xf32> to vector<64xf32>
    %43 = vector.shape_cast %42 : vector<64xf32> to vector<1x64xf32>
    %44 = arith.addf %24, %43 : vector<1x64xf32>
    %cst_17 = arith.constant 6.400000e+01 : f32
    %45 = vector.broadcast %cst_17 : f32 to vector<1x64xf32>
    %46 = arith.divf %40, %45 : vector<1x64xf32>
    %cst_18 = arith.constant 6.400000e+01 : f32
    %47 = vector.broadcast %cst_18 : f32 to vector<1x64xf32>
    %48 = arith.divf %44, %47 : vector<1x64xf32>
    %49 = arith.mulf %46, %46 : vector<1x64xf32>
    %50 = arith.subf %48, %49 : vector<1x64xf32>
    %cst_19 = arith.constant 9.99999974E-6 : f32
    %51 = vector.broadcast %cst_19 : f32 to vector<1x64xf32>
    %52 = arith.addf %50, %51 : vector<1x64xf32>
    %53 = math.rsqrt %52 : vector<1x64xf32>
    %c0_20 = arith.constant 0 : index
    %c0_21 = arith.constant 0 : index
    %54 = vector.load %arg3[%c0_20, %c0_21] : memref<1x64xf32, #tpu.memory_space<vmem>>, vector<1x64xf32>
    %55 = arith.mulf %53, %54 : vector<1x64xf32>
    %c0_22 = arith.constant 0 : index
    %c0_23 = arith.constant 0 : index
    %56 = vector.load %arg4[%c0_22, %c0_23] : memref<1x64xf32, #tpu.memory_space<vmem>>, vector<1x64xf32>
    %57 = arith.mulf %46, %55 : vector<1x64xf32>
    %58 = arith.subf %56, %57 : vector<1x64xf32>
    %59 = tpu.iota {dimensions = array<i32: 0>} : vector<32x1xi32>
    %60 = vector.broadcast %55 : vector<1x64xf32> to vector<32x64xf32>
    %61 = arith.mulf %17, %60 : vector<32x64xf32>
    %62 = vector.broadcast %58 : vector<1x64xf32> to vector<32x64xf32>
    %63 = arith.addf %61, %62 : vector<32x64xf32>
    %cst_24 = arith.constant 0.000000e+00 : f32
    %64 = vector.broadcast %cst_24 : f32 to vector<32x64xf32>
    %65 = arith.cmpf ogt, %63, %64 : vector<32x64xf32>
    %cst_25 = arith.constant 0.000000e+00 : f32
    %66 = vector.broadcast %cst_25 : f32 to vector<32x64xf32>
    %67 = arith.minimumf %63, %66 : vector<32x64xf32>
    %68 = math.exp %67 : vector<32x64xf32>
    %cst_26 = arith.constant 1.000000e+00 : f32
    %69 = vector.broadcast %cst_26 : f32 to vector<32x64xf32>
    %70 = arith.subf %68, %69 : vector<32x64xf32>
    %71 = arith.select %65, %63, %70 : vector<32x64xi1>, vector<32x64xf32>
    %c0_i32 = arith.constant 0 : i32
    %72 = vector.broadcast %c0_i32 : i32 to vector<32x1xi32>
    %73 = arith.cmpi eq, %59, %72 : vector<32x1xi32>
    %74 = vector.extract_strided_slice %71 {offsets = [31, 0], sizes = [1, 64], strides = [1, 1]} : vector<32x64xf32> to vector<1x64xf32>
    %75 = vector.extract_strided_slice %71 {offsets = [0, 0], sizes = [31, 64], strides = [1, 1]} : vector<32x64xf32> to vector<31x64xf32>
    %76 = tpu.concatenate %74, %75 in 0 : vector<1x64xf32>, vector<31x64xf32> -> vector<32x64xf32>
    %cst_27 = arith.constant -1.000000e+30 : f32
    %77 = vector.shape_cast %73 : vector<32x1xi1> to vector<32x1xi1>
    %78 = vector.broadcast %77 : vector<32x1xi1> to vector<32x64xi1>
    %79 = vector.broadcast %cst_27 : f32 to vector<32x64xf32>
    %80 = arith.select %78, %79, %76 : vector<32x64xi1>, vector<32x64xf32>
    %c31_i32 = arith.constant 31 : i32
    %81 = vector.broadcast %c31_i32 : i32 to vector<32x1xi32>
    %82 = arith.cmpi eq, %59, %81 : vector<32x1xi32>
    %83 = vector.extract_strided_slice %71 {offsets = [1, 0], sizes = [31, 64], strides = [1, 1]} : vector<32x64xf32> to vector<31x64xf32>
    %84 = vector.extract_strided_slice %71 {offsets = [0, 0], sizes = [1, 64], strides = [1, 1]} : vector<32x64xf32> to vector<1x64xf32>
    %85 = tpu.concatenate %83, %84 in 0 : vector<31x64xf32>, vector<1x64xf32> -> vector<32x64xf32>
    %cst_28 = arith.constant -1.000000e+30 : f32
    %86 = vector.shape_cast %82 : vector<32x1xi1> to vector<32x1xi1>
    %87 = vector.broadcast %86 : vector<32x1xi1> to vector<32x64xi1>
    %88 = vector.broadcast %cst_28 : f32 to vector<32x64xf32>
    %89 = arith.select %87, %88, %85 : vector<32x64xi1>, vector<32x64xf32>
    %90 = arith.maximumf %80, %71 : vector<32x64xf32>
    %91 = arith.maximumf %90, %89 : vector<32x64xf32>
    %cst_29 = arith.constant dense<0.000000e+00> : vector<16x64xf32>
    %92 = tpu.matmul %2, %91, %cst_29 {dimension_numbers = #tpu.dot_dimension_numbers<[1], [0], [0], [1], [0, 0, 1, 1], [], []>} : vector<16x32xf32>, vector<32x64xf32>, vector<16x64xf32> -> vector<16x64xf32>
    %c0_30 = arith.constant 0 : index
    %c0_31 = arith.constant 0 : index
    %c0_32 = arith.constant 0 : index
    %93 = vector.load %arg6[%c0_30, %c0_31, %c0_32] : memref<2x16x64xf32, #tpu.memory_space<vmem>>, vector<1x16x64xf32>
    %94 = vector.shape_cast %93 : vector<1x16x64xf32> to vector<16x64xf32>
    %95 = vector.shape_cast %92 : vector<16x64xf32> to vector<1x16x64xf32>
    tpu.vector_store %arg6[%c0_30, %c0_31, %c0_32], %95 {strides = array<i32>} : memref<2x16x64xf32, #tpu.memory_space<vmem>>, vector<1x16x64xf32>,
    %96 = vector.broadcast %55 : vector<1x64xf32> to vector<32x64xf32>
    %97 = arith.mulf %37, %96 : vector<32x64xf32>
    %98 = vector.broadcast %58 : vector<1x64xf32> to vector<32x64xf32>
    %99 = arith.addf %97, %98 : vector<32x64xf32>
    %cst_33 = arith.constant 0.000000e+00 : f32
    %100 = vector.broadcast %cst_33 : f32 to vector<32x64xf32>
    %101 = arith.cmpf ogt, %99, %100 : vector<32x64xf32>
    %cst_34 = arith.constant 0.000000e+00 : f32
    %102 = vector.broadcast %cst_34 : f32 to vector<32x64xf32>
    %103 = arith.minimumf %99, %102 : vector<32x64xf32>
    %104 = math.exp %103 : vector<32x64xf32>
    %cst_35 = arith.constant 1.000000e+00 : f32
    %105 = vector.broadcast %cst_35 : f32 to vector<32x64xf32>
    %106 = arith.subf %104, %105 : vector<32x64xf32>
    %107 = arith.select %101, %99, %106 : vector<32x64xi1>, vector<32x64xf32>
    %c0_i32_36 = arith.constant 0 : i32
    %108 = vector.broadcast %c0_i32_36 : i32 to vector<32x1xi32>
    %109 = arith.cmpi eq, %59, %108 : vector<32x1xi32>
    %110 = vector.extract_strided_slice %107 {offsets = [31, 0], sizes = [1, 64], strides = [1, 1]} : vector<32x64xf32> to vector<1x64xf32>
    %111 = vector.extract_strided_slice %107 {offsets = [0, 0], sizes = [31, 64], strides = [1, 1]} : vector<32x64xf32> to vector<31x64xf32>
    %112 = tpu.concatenate %110, %111 in 0 : vector<1x64xf32>, vector<31x64xf32> -> vector<32x64xf32>
    %cst_37 = arith.constant -1.000000e+30 : f32
    %113 = vector.shape_cast %109 : vector<32x1xi1> to vector<32x1xi1>
    %114 = vector.broadcast %113 : vector<32x1xi1> to vector<32x64xi1>
    %115 = vector.broadcast %cst_37 : f32 to vector<32x64xf32>
    %116 = arith.select %114, %115, %112 : vector<32x64xi1>, vector<32x64xf32>
    %c31_i32_38 = arith.constant 31 : i32
    %117 = vector.broadcast %c31_i32_38 : i32 to vector<32x1xi32>
    %118 = arith.cmpi eq, %59, %117 : vector<32x1xi32>
    %119 = vector.extract_strided_slice %107 {offsets = [1, 0], sizes = [31, 64], strides = [1, 1]} : vector<32x64xf32> to vector<31x64xf32>
    %120 = vector.extract_strided_slice %107 {offsets = [0, 0], sizes = [1, 64], strides = [1, 1]} : vector<32x64xf32> to vector<1x64xf32>
    %121 = tpu.concatenate %119, %120 in 0 : vector<31x64xf32>, vector<1x64xf32> -> vector<32x64xf32>
    %cst_39 = arith.constant -1.000000e+30 : f32
    %122 = vector.shape_cast %118 : vector<32x1xi1> to vector<32x1xi1>
    %123 = vector.broadcast %122 : vector<32x1xi1> to vector<32x64xi1>
    %124 = vector.broadcast %cst_39 : f32 to vector<32x64xf32>
    %125 = arith.select %123, %124, %121 : vector<32x64xi1>, vector<32x64xf32>
    %126 = arith.maximumf %116, %107 : vector<32x64xf32>
    %127 = arith.maximumf %126, %125 : vector<32x64xf32>
    %cst_40 = arith.constant dense<0.000000e+00> : vector<16x64xf32>
    %128 = tpu.matmul %2, %127, %cst_40 {dimension_numbers = #tpu.dot_dimension_numbers<[1], [0], [0], [1], [0, 0, 1, 1], [], []>} : vector<16x32xf32>, vector<32x64xf32>, vector<16x64xf32> -> vector<16x64xf32>
    %c1_41 = arith.constant 1 : index
    %c0_42 = arith.constant 0 : index
    %c0_43 = arith.constant 0 : index
    %129 = vector.load %arg6[%c1_41, %c0_42, %c0_43] : memref<2x16x64xf32, #tpu.memory_space<vmem>>, vector<1x16x64xf32>
    %130 = vector.shape_cast %129 : vector<1x16x64xf32> to vector<16x64xf32>
    %131 = vector.shape_cast %128 : vector<16x64xf32> to vector<1x16x64xf32>
    tpu.vector_store %arg6[%c1_41, %c0_42, %c0_43], %131 {strides = array<i32>} : memref<2x16x64xf32, #tpu.memory_space<vmem>>, vector<1x16x64xf32>,
    return
  }
}

module attributes {stable_mosaic.version = 11 : i64} {
  func.func @_encoder_layer_kernel(%arg0: i32, %arg1: memref<1x16x64xf32, #tpu.memory_space<vmem>>, %arg2: memref<64x192xbf16, #tpu.memory_space<vmem>>, %arg3: memref<1x192xf32, #tpu.memory_space<vmem>>, %arg4: memref<64x64xbf16, #tpu.memory_space<vmem>>, %arg5: memref<1x64xf32, #tpu.memory_space<vmem>>, %arg6: memref<1x64xf32, #tpu.memory_space<vmem>>, %arg7: memref<1x64xf32, #tpu.memory_space<vmem>>, %arg8: memref<64x64xbf16, #tpu.memory_space<vmem>>, %arg9: memref<1x64xf32, #tpu.memory_space<vmem>>, %arg10: memref<64x64xbf16, #tpu.memory_space<vmem>>, %arg11: memref<1x64xf32, #tpu.memory_space<vmem>>, %arg12: memref<1x64xf32, #tpu.memory_space<vmem>>, %arg13: memref<1x64xf32, #tpu.memory_space<vmem>>, %arg14: memref<1x64xf32, #tpu.memory_space<vmem>>, %arg15: memref<1x64xf32, #tpu.memory_space<vmem>>, %arg16: memref<1x16x64xf32, #tpu.memory_space<vmem>>) attributes {dimension_semantics = [#tpu.dimension_semantics<parallel>], iteration_bounds = array<i64: 2>, scalar_prefetch = 0 : i64, scratch_operands = 0 : i64, tpu.core_type = #tpu.core_type<tc>, window_params = [{transform_indices = @transform_0, window_bounds = array<i64: 1, 16, 64>}, {pipeline_mode = #tpu.pipeline_mode<synchronous>, transform_indices = @transform_1, window_bounds = array<i64: 64, 192>}, {pipeline_mode = #tpu.pipeline_mode<synchronous>, transform_indices = @transform_2, window_bounds = array<i64: 1, 192>}, {pipeline_mode = #tpu.pipeline_mode<synchronous>, transform_indices = @transform_3, window_bounds = array<i64: 64, 64>}, {pipeline_mode = #tpu.pipeline_mode<synchronous>, transform_indices = @transform_4, window_bounds = array<i64: 1, 64>}, {pipeline_mode = #tpu.pipeline_mode<synchronous>, transform_indices = @transform_5, window_bounds = array<i64: 1, 64>}, {pipeline_mode = #tpu.pipeline_mode<synchronous>, transform_indices = @transform_6, window_bounds = array<i64: 1, 64>}, {pipeline_mode = #tpu.pipeline_mode<synchronous>, transform_indices = @transform_7, window_bounds = array<i64: 64, 64>}, {pipeline_mode = #tpu.pipeline_mode<synchronous>, transform_indices = @transform_8, window_bounds = array<i64: 1, 64>}, {pipeline_mode = #tpu.pipeline_mode<synchronous>, transform_indices = @transform_9, window_bounds = array<i64: 64, 64>}, {pipeline_mode = #tpu.pipeline_mode<synchronous>, transform_indices = @transform_10, window_bounds = array<i64: 1, 64>}, {pipeline_mode = #tpu.pipeline_mode<synchronous>, transform_indices = @transform_11, window_bounds = array<i64: 1, 64>}, {pipeline_mode = #tpu.pipeline_mode<synchronous>, transform_indices = @transform_12, window_bounds = array<i64: 1, 64>}, {pipeline_mode = #tpu.pipeline_mode<synchronous>, transform_indices = @transform_13, window_bounds = array<i64: 1, 64>}, {pipeline_mode = #tpu.pipeline_mode<synchronous>, transform_indices = @transform_14, window_bounds = array<i64: 1, 64>}, {transform_indices = @transform_15, window_bounds = array<i64: 1, 16, 64>}]} {
    %c0 = arith.constant 0 : index
    %c0_0 = arith.constant 0 : index
    %c0_1 = arith.constant 0 : index
    %0 = vector.load %arg1[%c0, %c0_0, %c0_1] : memref<1x16x64xf32, #tpu.memory_space<vmem>>, vector<1x16x64xf32>
    %1 = vector.shape_cast %0 : vector<1x16x64xf32> to vector<16x64xf32>
    %2 = arith.truncf %1 : vector<16x64xf32> to vector<16x64xbf16>
    %c0_2 = arith.constant 0 : index
    %c0_3 = arith.constant 0 : index
    %3 = vector.load %arg2[%c0_2, %c0_3] : memref<64x192xbf16, #tpu.memory_space<vmem>>, vector<64x192xbf16>
    %cst = arith.constant dense<0.000000e+00> : vector<16x192xf32>
    %4 = tpu.matmul %2, %3, %cst {dimension_numbers = #tpu.dot_dimension_numbers<[1], [0], [0], [1], [0, 0, 1, 1], [], []>} : vector<16x64xbf16>, vector<64x192xbf16>, vector<16x192xf32> -> vector<16x192xf32>
    %c0_4 = arith.constant 0 : index
    %c0_5 = arith.constant 0 : index
    %5 = vector.load %arg3[%c0_4, %c0_5] : memref<1x192xf32, #tpu.memory_space<vmem>>, vector<1x192xf32>
    %6 = vector.broadcast %5 : vector<1x192xf32> to vector<16x192xf32>
    %7 = arith.addf %4, %6 : vector<16x192xf32>
    %8 = vector.extract_strided_slice %7 {offsets = [0, 0], sizes = [16, 64], strides = [1, 1]} : vector<16x192xf32> to vector<16x64xf32>
    %9 = vector.extract_strided_slice %7 {offsets = [0, 64], sizes = [16, 64], strides = [1, 1]} : vector<16x192xf32> to vector<16x64xf32>
    %10 = vector.extract_strided_slice %7 {offsets = [0, 128], sizes = [16, 64], strides = [1, 1]} : vector<16x192xf32> to vector<16x64xf32>
    %11 = arith.truncf %8 : vector<16x64xf32> to vector<16x64xbf16>
    %12 = arith.truncf %9 : vector<16x64xf32> to vector<16x64xbf16>
    %13 = arith.truncf %10 : vector<16x64xf32> to vector<16x64xbf16>
    %14 = vector.extract_strided_slice %11 {offsets = [0, 0], sizes = [16, 16], strides = [1, 1]} : vector<16x64xbf16> to vector<16x16xbf16>
    %15 = vector.extract_strided_slice %12 {offsets = [0, 0], sizes = [16, 16], strides = [1, 1]} : vector<16x64xbf16> to vector<16x16xbf16>
    %16 = vector.extract_strided_slice %13 {offsets = [0, 0], sizes = [16, 16], strides = [1, 1]} : vector<16x64xbf16> to vector<16x16xbf16>
    %cst_6 = arith.constant dense<0.000000e+00> : vector<16x16xf32>
    %17 = tpu.matmul %14, %15, %cst_6 {dimension_numbers = #tpu.dot_dimension_numbers<[1], [1], [0], [0], [0, 0, 1, 0], [], []>} : vector<16x16xbf16>, vector<16x16xbf16>, vector<16x16xf32> -> vector<16x16xf32>
    %cst_7 = arith.constant 2.500000e-01 : f32
    %18 = vector.broadcast %cst_7 : f32 to vector<16x16xf32>
    %19 = arith.mulf %17, %18 : vector<16x16xf32>
    %cst_8 = arith.constant dense<0xFF800000> : vector<16xf32>
    %20 = vector.multi_reduction <maximumf>, %19, %cst_8 [1] : vector<16x16xf32> to vector<16xf32>
    %21 = vector.shape_cast %20 : vector<16xf32> to vector<16x1xf32>
    %22 = vector.broadcast %21 : vector<16x1xf32> to vector<16x16xf32>
    %23 = arith.subf %19, %22 : vector<16x16xf32>
    %24 = math.exp %23 : vector<16x16xf32>
    %cst_9 = arith.constant dense<0.000000e+00> : vector<16xf32>
    %25 = vector.multi_reduction <add>, %24, %cst_9 [1] : vector<16x16xf32> to vector<16xf32>
    %26 = vector.shape_cast %25 : vector<16xf32> to vector<16x1xf32>
    %27 = vector.broadcast %26 : vector<16x1xf32> to vector<16x16xf32>
    %28 = arith.divf %24, %27 : vector<16x16xf32>
    %29 = arith.truncf %28 : vector<16x16xf32> to vector<16x16xbf16>
    %cst_10 = arith.constant dense<0.000000e+00> : vector<16x16xf32>
    %30 = tpu.matmul %29, %16, %cst_10 {dimension_numbers = #tpu.dot_dimension_numbers<[1], [0], [0], [1], [0, 0, 1, 1], [], []>} : vector<16x16xbf16>, vector<16x16xbf16>, vector<16x16xf32> -> vector<16x16xf32>
    %31 = vector.extract_strided_slice %11 {offsets = [0, 16], sizes = [16, 16], strides = [1, 1]} : vector<16x64xbf16> to vector<16x16xbf16>
    %32 = vector.extract_strided_slice %12 {offsets = [0, 16], sizes = [16, 16], strides = [1, 1]} : vector<16x64xbf16> to vector<16x16xbf16>
    %33 = vector.extract_strided_slice %13 {offsets = [0, 16], sizes = [16, 16], strides = [1, 1]} : vector<16x64xbf16> to vector<16x16xbf16>
    %cst_11 = arith.constant dense<0.000000e+00> : vector<16x16xf32>
    %34 = tpu.matmul %31, %32, %cst_11 {dimension_numbers = #tpu.dot_dimension_numbers<[1], [1], [0], [0], [0, 0, 1, 0], [], []>} : vector<16x16xbf16>, vector<16x16xbf16>, vector<16x16xf32> -> vector<16x16xf32>
    %cst_12 = arith.constant 2.500000e-01 : f32
    %35 = vector.broadcast %cst_12 : f32 to vector<16x16xf32>
    %36 = arith.mulf %34, %35 : vector<16x16xf32>
    %cst_13 = arith.constant dense<0xFF800000> : vector<16xf32>
    %37 = vector.multi_reduction <maximumf>, %36, %cst_13 [1] : vector<16x16xf32> to vector<16xf32>
    %38 = vector.shape_cast %37 : vector<16xf32> to vector<16x1xf32>
    %39 = vector.broadcast %38 : vector<16x1xf32> to vector<16x16xf32>
    %40 = arith.subf %36, %39 : vector<16x16xf32>
    %41 = math.exp %40 : vector<16x16xf32>
    %cst_14 = arith.constant dense<0.000000e+00> : vector<16xf32>
    %42 = vector.multi_reduction <add>, %41, %cst_14 [1] : vector<16x16xf32> to vector<16xf32>
    %43 = vector.shape_cast %42 : vector<16xf32> to vector<16x1xf32>
    %44 = vector.broadcast %43 : vector<16x1xf32> to vector<16x16xf32>
    %45 = arith.divf %41, %44 : vector<16x16xf32>
    %46 = arith.truncf %45 : vector<16x16xf32> to vector<16x16xbf16>
    %cst_15 = arith.constant dense<0.000000e+00> : vector<16x16xf32>
    %47 = tpu.matmul %46, %33, %cst_15 {dimension_numbers = #tpu.dot_dimension_numbers<[1], [0], [0], [1], [0, 0, 1, 1], [], []>} : vector<16x16xbf16>, vector<16x16xbf16>, vector<16x16xf32> -> vector<16x16xf32>
    %48 = vector.extract_strided_slice %11 {offsets = [0, 32], sizes = [16, 16], strides = [1, 1]} : vector<16x64xbf16> to vector<16x16xbf16>
    %49 = vector.extract_strided_slice %12 {offsets = [0, 32], sizes = [16, 16], strides = [1, 1]} : vector<16x64xbf16> to vector<16x16xbf16>
    %50 = vector.extract_strided_slice %13 {offsets = [0, 32], sizes = [16, 16], strides = [1, 1]} : vector<16x64xbf16> to vector<16x16xbf16>
    %cst_16 = arith.constant dense<0.000000e+00> : vector<16x16xf32>
    %51 = tpu.matmul %48, %49, %cst_16 {dimension_numbers = #tpu.dot_dimension_numbers<[1], [1], [0], [0], [0, 0, 1, 0], [], []>} : vector<16x16xbf16>, vector<16x16xbf16>, vector<16x16xf32> -> vector<16x16xf32>
    %cst_17 = arith.constant 2.500000e-01 : f32
    %52 = vector.broadcast %cst_17 : f32 to vector<16x16xf32>
    %53 = arith.mulf %51, %52 : vector<16x16xf32>
    %cst_18 = arith.constant dense<0xFF800000> : vector<16xf32>
    %54 = vector.multi_reduction <maximumf>, %53, %cst_18 [1] : vector<16x16xf32> to vector<16xf32>
    %55 = vector.shape_cast %54 : vector<16xf32> to vector<16x1xf32>
    %56 = vector.broadcast %55 : vector<16x1xf32> to vector<16x16xf32>
    %57 = arith.subf %53, %56 : vector<16x16xf32>
    %58 = math.exp %57 : vector<16x16xf32>
    %cst_19 = arith.constant dense<0.000000e+00> : vector<16xf32>
    %59 = vector.multi_reduction <add>, %58, %cst_19 [1] : vector<16x16xf32> to vector<16xf32>
    %60 = vector.shape_cast %59 : vector<16xf32> to vector<16x1xf32>
    %61 = vector.broadcast %60 : vector<16x1xf32> to vector<16x16xf32>
    %62 = arith.divf %58, %61 : vector<16x16xf32>
    %63 = arith.truncf %62 : vector<16x16xf32> to vector<16x16xbf16>
    %cst_20 = arith.constant dense<0.000000e+00> : vector<16x16xf32>
    %64 = tpu.matmul %63, %50, %cst_20 {dimension_numbers = #tpu.dot_dimension_numbers<[1], [0], [0], [1], [0, 0, 1, 1], [], []>} : vector<16x16xbf16>, vector<16x16xbf16>, vector<16x16xf32> -> vector<16x16xf32>
    %65 = vector.extract_strided_slice %11 {offsets = [0, 48], sizes = [16, 16], strides = [1, 1]} : vector<16x64xbf16> to vector<16x16xbf16>
    %66 = vector.extract_strided_slice %12 {offsets = [0, 48], sizes = [16, 16], strides = [1, 1]} : vector<16x64xbf16> to vector<16x16xbf16>
    %67 = vector.extract_strided_slice %13 {offsets = [0, 48], sizes = [16, 16], strides = [1, 1]} : vector<16x64xbf16> to vector<16x16xbf16>
    %cst_21 = arith.constant dense<0.000000e+00> : vector<16x16xf32>
    %68 = tpu.matmul %65, %66, %cst_21 {dimension_numbers = #tpu.dot_dimension_numbers<[1], [1], [0], [0], [0, 0, 1, 0], [], []>} : vector<16x16xbf16>, vector<16x16xbf16>, vector<16x16xf32> -> vector<16x16xf32>
    %cst_22 = arith.constant 2.500000e-01 : f32
    %69 = vector.broadcast %cst_22 : f32 to vector<16x16xf32>
    %70 = arith.mulf %68, %69 : vector<16x16xf32>
    %cst_23 = arith.constant dense<0xFF800000> : vector<16xf32>
    %71 = vector.multi_reduction <maximumf>, %70, %cst_23 [1] : vector<16x16xf32> to vector<16xf32>
    %72 = vector.shape_cast %71 : vector<16xf32> to vector<16x1xf32>
    %73 = vector.broadcast %72 : vector<16x1xf32> to vector<16x16xf32>
    %74 = arith.subf %70, %73 : vector<16x16xf32>
    %75 = math.exp %74 : vector<16x16xf32>
    %cst_24 = arith.constant dense<0.000000e+00> : vector<16xf32>
    %76 = vector.multi_reduction <add>, %75, %cst_24 [1] : vector<16x16xf32> to vector<16xf32>
    %77 = vector.shape_cast %76 : vector<16xf32> to vector<16x1xf32>
    %78 = vector.broadcast %77 : vector<16x1xf32> to vector<16x16xf32>
    %79 = arith.divf %75, %78 : vector<16x16xf32>
    %80 = arith.truncf %79 : vector<16x16xf32> to vector<16x16xbf16>
    %cst_25 = arith.constant dense<0.000000e+00> : vector<16x16xf32>
    %81 = tpu.matmul %80, %67, %cst_25 {dimension_numbers = #tpu.dot_dimension_numbers<[1], [0], [0], [1], [0, 0, 1, 1], [], []>} : vector<16x16xbf16>, vector<16x16xbf16>, vector<16x16xf32> -> vector<16x16xf32>
    %82 = tpu.concatenate %30, %47, %64, %81 in 1 : vector<16x16xf32>, vector<16x16xf32>, vector<16x16xf32>, vector<16x16xf32> -> vector<16x64xf32>
    %83 = arith.truncf %82 : vector<16x64xf32> to vector<16x64xbf16>
    %c0_26 = arith.constant 0 : index
    %c0_27 = arith.constant 0 : index
    %84 = vector.load %arg4[%c0_26, %c0_27] : memref<64x64xbf16, #tpu.memory_space<vmem>>, vector<64x64xbf16>
    %cst_28 = arith.constant dense<0.000000e+00> : vector<16x64xf32>
    %85 = tpu.matmul %83, %84, %cst_28 {dimension_numbers = #tpu.dot_dimension_numbers<[1], [0], [0], [1], [0, 0, 1, 1], [], []>} : vector<16x64xbf16>, vector<64x64xbf16>, vector<16x64xf32> -> vector<16x64xf32>
    %c0_29 = arith.constant 0 : index
    %c0_30 = arith.constant 0 : index
    %86 = vector.load %arg5[%c0_29, %c0_30] : memref<1x64xf32, #tpu.memory_space<vmem>>, vector<1x64xf32>
    %87 = vector.broadcast %86 : vector<1x64xf32> to vector<16x64xf32>
    %88 = arith.addf %85, %87 : vector<16x64xf32>
    %89 = arith.addf %1, %88 : vector<16x64xf32>
    %c0_31 = arith.constant 0 : index
    %c0_32 = arith.constant 0 : index
    %90 = vector.load %arg6[%c0_31, %c0_32] : memref<1x64xf32, #tpu.memory_space<vmem>>, vector<1x64xf32>
    %c0_33 = arith.constant 0 : index
    %c0_34 = arith.constant 0 : index
    %91 = vector.load %arg7[%c0_33, %c0_34] : memref<1x64xf32, #tpu.memory_space<vmem>>, vector<1x64xf32>
    %cst_35 = arith.constant dense<0.000000e+00> : vector<16xf32>
    %92 = vector.multi_reduction <add>, %89, %cst_35 [1] : vector<16x64xf32> to vector<16xf32>
    %93 = vector.shape_cast %92 : vector<16xf32> to vector<16x1xf32>
    %cst_36 = arith.constant 6.400000e+01 : f32
    %94 = vector.broadcast %cst_36 : f32 to vector<16x1xf32>
    %95 = arith.divf %93, %94 : vector<16x1xf32>
    %96 = vector.broadcast %95 : vector<16x1xf32> to vector<16x64xf32>
    %97 = arith.subf %89, %96 : vector<16x64xf32>
    %98 = arith.mulf %97, %97 : vector<16x64xf32>
    %cst_37 = arith.constant dense<0.000000e+00> : vector<16xf32>
    %99 = vector.multi_reduction <add>, %98, %cst_37 [1] : vector<16x64xf32> to vector<16xf32>
    %100 = vector.shape_cast %99 : vector<16xf32> to vector<16x1xf32>
    %cst_38 = arith.constant 6.400000e+01 : f32
    %101 = vector.broadcast %cst_38 : f32 to vector<16x1xf32>
    %102 = arith.divf %100, %101 : vector<16x1xf32>
    %103 = vector.broadcast %95 : vector<16x1xf32> to vector<16x64xf32>
    %104 = arith.subf %89, %103 : vector<16x64xf32>
    %cst_39 = arith.constant 9.99999974E-6 : f32
    %105 = vector.broadcast %cst_39 : f32 to vector<16x1xf32>
    %106 = arith.addf %102, %105 : vector<16x1xf32>
    %107 = math.rsqrt %106 : vector<16x1xf32>
    %108 = vector.broadcast %107 : vector<16x1xf32> to vector<16x64xf32>
    %109 = arith.mulf %104, %108 : vector<16x64xf32>
    %110 = vector.broadcast %90 : vector<1x64xf32> to vector<16x64xf32>
    %111 = arith.mulf %109, %110 : vector<16x64xf32>
    %112 = vector.broadcast %91 : vector<1x64xf32> to vector<16x64xf32>
    %113 = arith.addf %111, %112 : vector<16x64xf32>
    %114 = arith.truncf %113 : vector<16x64xf32> to vector<16x64xbf16>
    %c0_40 = arith.constant 0 : index
    %c0_41 = arith.constant 0 : index
    %115 = vector.load %arg8[%c0_40, %c0_41] : memref<64x64xbf16, #tpu.memory_space<vmem>>, vector<64x64xbf16>
    %cst_42 = arith.constant dense<0.000000e+00> : vector<16x64xf32>
    %116 = tpu.matmul %114, %115, %cst_42 {dimension_numbers = #tpu.dot_dimension_numbers<[1], [0], [0], [1], [0, 0, 1, 1], [], []>} : vector<16x64xbf16>, vector<64x64xbf16>, vector<16x64xf32> -> vector<16x64xf32>
    %c0_43 = arith.constant 0 : index
    %c0_44 = arith.constant 0 : index
    %117 = vector.load %arg9[%c0_43, %c0_44] : memref<1x64xf32, #tpu.memory_space<vmem>>, vector<1x64xf32>
    %118 = vector.broadcast %117 : vector<1x64xf32> to vector<16x64xf32>
    %119 = arith.addf %116, %118 : vector<16x64xf32>
    %cst_45 = arith.constant 5.000000e-01 : f32
    %120 = vector.broadcast %cst_45 : f32 to vector<16x64xf32>
    %121 = arith.mulf %120, %119 : vector<16x64xf32>
    %cst_46 = arith.constant 0.707106769 : f32
    %122 = vector.broadcast %cst_46 : f32 to vector<16x64xf32>
    %123 = arith.mulf %119, %122 : vector<16x64xf32>
    %cst_47 = arith.constant 0.000000e+00 : f32
    %124 = vector.broadcast %cst_47 : f32 to vector<16x64xf32>
    %125 = arith.cmpf oge, %123, %124 : vector<16x64xf32>
    %cst_48 = arith.constant 1.000000e+00 : f32
    %cst_49 = arith.constant -1.000000e+00 : f32
    %126 = vector.broadcast %cst_48 : f32 to vector<16x64xf32>
    %127 = vector.broadcast %cst_49 : f32 to vector<16x64xf32>
    %128 = arith.select %125, %126, %127 : vector<16x64xi1>, vector<16x64xf32>
    %129 = math.absf %123 : vector<16x64xf32>
    %cst_50 = arith.constant 0.327591091 : f32
    %130 = vector.broadcast %cst_50 : f32 to vector<16x64xf32>
    %131 = arith.mulf %130, %129 : vector<16x64xf32>
    %cst_51 = arith.constant 1.000000e+00 : f32
    %132 = vector.broadcast %cst_51 : f32 to vector<16x64xf32>
    %133 = arith.addf %132, %131 : vector<16x64xf32>
    %cst_52 = arith.constant 1.000000e+00 : f32
    %134 = vector.broadcast %cst_52 : f32 to vector<16x64xf32>
    %135 = arith.divf %134, %133 : vector<16x64xf32>
    %cst_53 = arith.constant 1.06140542 : f32
    %136 = vector.broadcast %cst_53 : f32 to vector<16x64xf32>
    %137 = arith.mulf %136, %135 : vector<16x64xf32>
    %cst_54 = arith.constant -1.45315206 : f32
    %138 = vector.broadcast %cst_54 : f32 to vector<16x64xf32>
    %139 = arith.addf %137, %138 : vector<16x64xf32>
    %140 = arith.mulf %139, %135 : vector<16x64xf32>
    %cst_55 = arith.constant 1.42141378 : f32
    %141 = vector.broadcast %cst_55 : f32 to vector<16x64xf32>
    %142 = arith.addf %140, %141 : vector<16x64xf32>
    %143 = arith.mulf %142, %135 : vector<16x64xf32>
    %cst_56 = arith.constant -0.284496725 : f32
    %144 = vector.broadcast %cst_56 : f32 to vector<16x64xf32>
    %145 = arith.addf %143, %144 : vector<16x64xf32>
    %146 = arith.mulf %145, %135 : vector<16x64xf32>
    %cst_57 = arith.constant 0.254829586 : f32
    %147 = vector.broadcast %cst_57 : f32 to vector<16x64xf32>
    %148 = arith.addf %146, %147 : vector<16x64xf32>
    %149 = arith.mulf %148, %135 : vector<16x64xf32>
    %cst_58 = arith.constant 0.000000e+00 : f32
    %150 = vector.broadcast %cst_58 : f32 to vector<16x64xf32>
    %151 = arith.subf %150, %129 : vector<16x64xf32>
    %152 = arith.mulf %151, %129 : vector<16x64xf32>
    %153 = math.exp %152 : vector<16x64xf32>
    %154 = arith.mulf %149, %153 : vector<16x64xf32>
    %cst_59 = arith.constant 1.000000e+00 : f32
    %155 = vector.broadcast %cst_59 : f32 to vector<16x64xf32>
    %156 = arith.subf %155, %154 : vector<16x64xf32>
    %157 = arith.mulf %128, %156 : vector<16x64xf32>
    %cst_60 = arith.constant 1.000000e+00 : f32
    %158 = vector.broadcast %cst_60 : f32 to vector<16x64xf32>
    %159 = arith.addf %158, %157 : vector<16x64xf32>
    %160 = arith.mulf %121, %159 : vector<16x64xf32>
    %161 = arith.truncf %160 : vector<16x64xf32> to vector<16x64xbf16>
    %c0_61 = arith.constant 0 : index
    %c0_62 = arith.constant 0 : index
    %162 = vector.load %arg10[%c0_61, %c0_62] : memref<64x64xbf16, #tpu.memory_space<vmem>>, vector<64x64xbf16>
    %cst_63 = arith.constant dense<0.000000e+00> : vector<16x64xf32>
    %163 = tpu.matmul %161, %162, %cst_63 {dimension_numbers = #tpu.dot_dimension_numbers<[1], [0], [0], [1], [0, 0, 1, 1], [], []>} : vector<16x64xbf16>, vector<64x64xbf16>, vector<16x64xf32> -> vector<16x64xf32>
    %c0_64 = arith.constant 0 : index
    %c0_65 = arith.constant 0 : index
    %164 = vector.load %arg11[%c0_64, %c0_65] : memref<1x64xf32, #tpu.memory_space<vmem>>, vector<1x64xf32>
    %165 = vector.broadcast %164 : vector<1x64xf32> to vector<16x64xf32>
    %166 = arith.addf %163, %165 : vector<16x64xf32>
    %167 = arith.addf %113, %166 : vector<16x64xf32>
    %c0_66 = arith.constant 0 : index
    %c0_67 = arith.constant 0 : index
    %168 = vector.load %arg12[%c0_66, %c0_67] : memref<1x64xf32, #tpu.memory_space<vmem>>, vector<1x64xf32>
    %c0_68 = arith.constant 0 : index
    %c0_69 = arith.constant 0 : index
    %169 = vector.load %arg13[%c0_68, %c0_69] : memref<1x64xf32, #tpu.memory_space<vmem>>, vector<1x64xf32>
    %cst_70 = arith.constant dense<0.000000e+00> : vector<16xf32>
    %170 = vector.multi_reduction <add>, %167, %cst_70 [1] : vector<16x64xf32> to vector<16xf32>
    %171 = vector.shape_cast %170 : vector<16xf32> to vector<16x1xf32>
    %cst_71 = arith.constant 6.400000e+01 : f32
    %172 = vector.broadcast %cst_71 : f32 to vector<16x1xf32>
    %173 = arith.divf %171, %172 : vector<16x1xf32>
    %174 = vector.broadcast %173 : vector<16x1xf32> to vector<16x64xf32>
    %175 = arith.subf %167, %174 : vector<16x64xf32>
    %176 = arith.mulf %175, %175 : vector<16x64xf32>
    %cst_72 = arith.constant dense<0.000000e+00> : vector<16xf32>
    %177 = vector.multi_reduction <add>, %176, %cst_72 [1] : vector<16x64xf32> to vector<16xf32>
    %178 = vector.shape_cast %177 : vector<16xf32> to vector<16x1xf32>
    %cst_73 = arith.constant 6.400000e+01 : f32
    %179 = vector.broadcast %cst_73 : f32 to vector<16x1xf32>
    %180 = arith.divf %178, %179 : vector<16x1xf32>
    %181 = vector.broadcast %173 : vector<16x1xf32> to vector<16x64xf32>
    %182 = arith.subf %167, %181 : vector<16x64xf32>
    %cst_74 = arith.constant 9.99999974E-6 : f32
    %183 = vector.broadcast %cst_74 : f32 to vector<16x1xf32>
    %184 = arith.addf %180, %183 : vector<16x1xf32>
    %185 = math.rsqrt %184 : vector<16x1xf32>
    %186 = vector.broadcast %185 : vector<16x1xf32> to vector<16x64xf32>
    %187 = arith.mulf %182, %186 : vector<16x64xf32>
    %188 = vector.broadcast %168 : vector<1x64xf32> to vector<16x64xf32>
    %189 = arith.mulf %187, %188 : vector<16x64xf32>
    %190 = vector.broadcast %169 : vector<1x64xf32> to vector<16x64xf32>
    %191 = arith.addf %189, %190 : vector<16x64xf32>
    %c0_75 = arith.constant 0 : index
    %c0_76 = arith.constant 0 : index
    %192 = vector.load %arg14[%c0_75, %c0_76] : memref<1x64xf32, #tpu.memory_space<vmem>>, vector<1x64xf32>
    %c0_77 = arith.constant 0 : index
    %c0_78 = arith.constant 0 : index
    %193 = vector.load %arg15[%c0_77, %c0_78] : memref<1x64xf32, #tpu.memory_space<vmem>>, vector<1x64xf32>
    %cst_79 = arith.constant dense<0.000000e+00> : vector<16xf32>
    %194 = vector.multi_reduction <add>, %191, %cst_79 [1] : vector<16x64xf32> to vector<16xf32>
    %195 = vector.shape_cast %194 : vector<16xf32> to vector<16x1xf32>
    %cst_80 = arith.constant 6.400000e+01 : f32
    %196 = vector.broadcast %cst_80 : f32 to vector<16x1xf32>
    %197 = arith.divf %195, %196 : vector<16x1xf32>
    %198 = vector.broadcast %197 : vector<16x1xf32> to vector<16x64xf32>
    %199 = arith.subf %191, %198 : vector<16x64xf32>
    %200 = arith.mulf %199, %199 : vector<16x64xf32>
    %cst_81 = arith.constant dense<0.000000e+00> : vector<16xf32>
    %201 = vector.multi_reduction <add>, %200, %cst_81 [1] : vector<16x64xf32> to vector<16xf32>
    %202 = vector.shape_cast %201 : vector<16xf32> to vector<16x1xf32>
    %cst_82 = arith.constant 6.400000e+01 : f32
    %203 = vector.broadcast %cst_82 : f32 to vector<16x1xf32>
    %204 = arith.divf %202, %203 : vector<16x1xf32>
    %205 = vector.broadcast %197 : vector<16x1xf32> to vector<16x64xf32>
    %206 = arith.subf %191, %205 : vector<16x64xf32>
    %cst_83 = arith.constant 9.99999974E-6 : f32
    %207 = vector.broadcast %cst_83 : f32 to vector<16x1xf32>
    %208 = arith.addf %204, %207 : vector<16x1xf32>
    %209 = math.rsqrt %208 : vector<16x1xf32>
    %210 = vector.broadcast %209 : vector<16x1xf32> to vector<16x64xf32>
    %211 = arith.mulf %206, %210 : vector<16x64xf32>
    %212 = vector.broadcast %192 : vector<1x64xf32> to vector<16x64xf32>
    %213 = arith.mulf %211, %212 : vector<16x64xf32>
    %214 = vector.broadcast %193 : vector<1x64xf32> to vector<16x64xf32>
    %215 = arith.addf %213, %214 : vector<16x64xf32>
    %c0_84 = arith.constant 0 : index
    %c0_85 = arith.constant 0 : index
    %c0_86 = arith.constant 0 : index
    %216 = vector.load %arg16[%c0_84, %c0_85, %c0_86] : memref<1x16x64xf32, #tpu.memory_space<vmem>>, vector<1x16x64xf32>
    %217 = vector.shape_cast %216 : vector<1x16x64xf32> to vector<16x64xf32>
    %218 = vector.shape_cast %215 : vector<16x64xf32> to vector<1x16x64xf32>
    tpu.vector_store %arg16[%c0_84, %c0_85, %c0_86], %218 {strides = array<i32>} : memref<1x16x64xf32, #tpu.memory_space<vmem>>, vector<1x16x64xf32>,
    return
  }
  func.func @transform_0(%arg0: i32) -> (i32, i32, i32) {
    %c0_i32 = arith.constant 0 : i32
    %c0_i32_0 = arith.constant 0 : i32
    %c0_i32_1 = arith.constant 0 : i32
    return %arg0, %c0_i32, %c0_i32_0 : i32, i32, i32
  }
  func.func @transform_1(%arg0: i32) -> (i32, i32) {
    %c0_i32 = arith.constant 0 : i32
    %c0_i32_0 = arith.constant 0 : i32
    %c0_i32_1 = arith.constant 0 : i32
    return %c0_i32, %c0_i32_0 : i32, i32
  }
  func.func @transform_2(%arg0: i32) -> (i32, i32) {
    %c0_i32 = arith.constant 0 : i32
    %c0_i32_0 = arith.constant 0 : i32
    %c0_i32_1 = arith.constant 0 : i32
    return %c0_i32, %c0_i32_0 : i32, i32
  }
  func.func @transform_3(%arg0: i32) -> (i32, i32) {
    %c0_i32 = arith.constant 0 : i32
    %c0_i32_0 = arith.constant 0 : i32
    %c0_i32_1 = arith.constant 0 : i32
    return %c0_i32, %c0_i32_0 : i32, i32
  }
  func.func @transform_4(%arg0: i32) -> (i32, i32) {
    %c0_i32 = arith.constant 0 : i32
    %c0_i32_0 = arith.constant 0 : i32
    %c0_i32_1 = arith.constant 0 : i32
    return %c0_i32, %c0_i32_0 : i32, i32
  }
  func.func @transform_5(%arg0: i32) -> (i32, i32) {
    %c0_i32 = arith.constant 0 : i32
    %c0_i32_0 = arith.constant 0 : i32
    %c0_i32_1 = arith.constant 0 : i32
    return %c0_i32, %c0_i32_0 : i32, i32
  }
  func.func @transform_6(%arg0: i32) -> (i32, i32) {
    %c0_i32 = arith.constant 0 : i32
    %c0_i32_0 = arith.constant 0 : i32
    %c0_i32_1 = arith.constant 0 : i32
    return %c0_i32, %c0_i32_0 : i32, i32
  }
  func.func @transform_7(%arg0: i32) -> (i32, i32) {
    %c0_i32 = arith.constant 0 : i32
    %c0_i32_0 = arith.constant 0 : i32
    %c0_i32_1 = arith.constant 0 : i32
    return %c0_i32, %c0_i32_0 : i32, i32
  }
  func.func @transform_8(%arg0: i32) -> (i32, i32) {
    %c0_i32 = arith.constant 0 : i32
    %c0_i32_0 = arith.constant 0 : i32
    %c0_i32_1 = arith.constant 0 : i32
    return %c0_i32, %c0_i32_0 : i32, i32
  }
  func.func @transform_9(%arg0: i32) -> (i32, i32) {
    %c0_i32 = arith.constant 0 : i32
    %c0_i32_0 = arith.constant 0 : i32
    %c0_i32_1 = arith.constant 0 : i32
    return %c0_i32, %c0_i32_0 : i32, i32
  }
  func.func @transform_10(%arg0: i32) -> (i32, i32) {
    %c0_i32 = arith.constant 0 : i32
    %c0_i32_0 = arith.constant 0 : i32
    %c0_i32_1 = arith.constant 0 : i32
    return %c0_i32, %c0_i32_0 : i32, i32
  }
  func.func @transform_11(%arg0: i32) -> (i32, i32) {
    %c0_i32 = arith.constant 0 : i32
    %c0_i32_0 = arith.constant 0 : i32
    %c0_i32_1 = arith.constant 0 : i32
    return %c0_i32, %c0_i32_0 : i32, i32
  }
  func.func @transform_12(%arg0: i32) -> (i32, i32) {
    %c0_i32 = arith.constant 0 : i32
    %c0_i32_0 = arith.constant 0 : i32
    %c0_i32_1 = arith.constant 0 : i32
    return %c0_i32, %c0_i32_0 : i32, i32
  }
  func.func @transform_13(%arg0: i32) -> (i32, i32) {
    %c0_i32 = arith.constant 0 : i32
    %c0_i32_0 = arith.constant 0 : i32
    %c0_i32_1 = arith.constant 0 : i32
    return %c0_i32, %c0_i32_0 : i32, i32
  }
  func.func @transform_14(%arg0: i32) -> (i32, i32) {
    %c0_i32 = arith.constant 0 : i32
    %c0_i32_0 = arith.constant 0 : i32
    %c0_i32_1 = arith.constant 0 : i32
    return %c0_i32, %c0_i32_0 : i32, i32
  }
  func.func @transform_15(%arg0: i32) -> (i32, i32, i32) {
    %c0_i32 = arith.constant 0 : i32
    %c0_i32_0 = arith.constant 0 : i32
    %c0_i32_1 = arith.constant 0 : i32
    return %arg0, %c0_i32, %c0_i32_0 : i32, i32, i32
  }
}

module attributes {stable_mosaic.version = 11 : i64} {
  func.func @_embed_kernel(%arg0: i32, %arg1: memref<1x24x7xf32, #tpu.memory_space<vmem>>, %arg2: memref<1x24x64xf32, #tpu.memory_space<vmem>>, %arg3: memref<21x64xbf16, #tpu.memory_space<vmem>>, %arg4: memref<1x64xf32, #tpu.memory_space<vmem>>, %arg5: memref<1x24x64xf32, #tpu.memory_space<vmem>>) attributes {dimension_semantics = [#tpu.dimension_semantics<parallel>], iteration_bounds = array<i64: 2>, scalar_prefetch = 0 : i64, scratch_operands = 0 : i64, tpu.core_type = #tpu.core_type<tc>, window_params = [{transform_indices = @transform_0, window_bounds = array<i64: 1, 24, 7>}, {transform_indices = @transform_1, window_bounds = array<i64: 1, 24, 64>}, {pipeline_mode = #tpu.pipeline_mode<synchronous>, transform_indices = @transform_2, window_bounds = array<i64: 21, 64>}, {pipeline_mode = #tpu.pipeline_mode<synchronous>, transform_indices = @transform_3, window_bounds = array<i64: 1, 64>}, {transform_indices = @transform_4, window_bounds = array<i64: 1, 24, 64>}]} {
    %c0 = arith.constant 0 : index
    %c0_0 = arith.constant 0 : index
    %c0_1 = arith.constant 0 : index
    %0 = vector.load %arg1[%c0, %c0_0, %c0_1] : memref<1x24x7xf32, #tpu.memory_space<vmem>>, vector<1x24x7xf32>
    %1 = vector.shape_cast %0 : vector<1x24x7xf32> to vector<24x7xf32>
    %2 = vector.extract_strided_slice %1 {offsets = [23, 0], sizes = [1, 7], strides = [1, 1]} : vector<24x7xf32> to vector<1x7xf32>
    %3 = vector.extract_strided_slice %1 {offsets = [0, 0], sizes = [23, 7], strides = [1, 1]} : vector<24x7xf32> to vector<23x7xf32>
    %4 = tpu.concatenate %2, %3 in 0 : vector<1x7xf32>, vector<23x7xf32> -> vector<24x7xf32>
    %5 = vector.extract_strided_slice %1 {offsets = [1, 0], sizes = [23, 7], strides = [1, 1]} : vector<24x7xf32> to vector<23x7xf32>
    %6 = vector.extract_strided_slice %1 {offsets = [0, 0], sizes = [1, 7], strides = [1, 1]} : vector<24x7xf32> to vector<1x7xf32>
    %7 = tpu.concatenate %5, %6 in 0 : vector<23x7xf32>, vector<1x7xf32> -> vector<24x7xf32>
    %8 = tpu.concatenate %4, %1, %7 in 1 : vector<24x7xf32>, vector<24x7xf32>, vector<24x7xf32> -> vector<24x21xf32>
    %9 = arith.truncf %8 : vector<24x21xf32> to vector<24x21xbf16>
    %c0_2 = arith.constant 0 : index
    %c0_3 = arith.constant 0 : index
    %10 = vector.load %arg3[%c0_2, %c0_3] : memref<21x64xbf16, #tpu.memory_space<vmem>>, vector<21x64xbf16>
    %cst = arith.constant dense<0.000000e+00> : vector<24x64xf32>
    %11 = tpu.matmul %9, %10, %cst {dimension_numbers = #tpu.dot_dimension_numbers<[1], [0], [0], [1], [0, 0, 1, 1], [], []>} : vector<24x21xbf16>, vector<21x64xbf16>, vector<24x64xf32> -> vector<24x64xf32>
    %c0_4 = arith.constant 0 : index
    %c0_5 = arith.constant 0 : index
    %12 = vector.load %arg4[%c0_4, %c0_5] : memref<1x64xf32, #tpu.memory_space<vmem>>, vector<1x64xf32>
    %13 = vector.broadcast %12 : vector<1x64xf32> to vector<24x64xf32>
    %14 = arith.addf %11, %13 : vector<24x64xf32>
    %c0_6 = arith.constant 0 : index
    %c0_7 = arith.constant 0 : index
    %c0_8 = arith.constant 0 : index
    %15 = vector.load %arg2[%c0_6, %c0_7, %c0_8] : memref<1x24x64xf32, #tpu.memory_space<vmem>>, vector<1x24x64xf32>
    %16 = vector.shape_cast %15 : vector<1x24x64xf32> to vector<24x64xf32>
    %17 = arith.addf %14, %16 : vector<24x64xf32>
    %c0_9 = arith.constant 0 : index
    %c0_10 = arith.constant 0 : index
    %c0_11 = arith.constant 0 : index
    %18 = vector.load %arg5[%c0_9, %c0_10, %c0_11] : memref<1x24x64xf32, #tpu.memory_space<vmem>>, vector<1x24x64xf32>
    %19 = vector.shape_cast %18 : vector<1x24x64xf32> to vector<24x64xf32>
    %20 = vector.shape_cast %17 : vector<24x64xf32> to vector<1x24x64xf32>
    tpu.vector_store %arg5[%c0_9, %c0_10, %c0_11], %20 {strides = array<i32>} : memref<1x24x64xf32, #tpu.memory_space<vmem>>, vector<1x24x64xf32>,
    return
  }
  func.func @transform_0(%arg0: i32) -> (i32, i32, i32) {
    %c0_i32 = arith.constant 0 : i32
    %c0_i32_0 = arith.constant 0 : i32
    %c0_i32_1 = arith.constant 0 : i32
    return %arg0, %c0_i32, %c0_i32_0 : i32, i32, i32
  }
  func.func @transform_1(%arg0: i32) -> (i32, i32, i32) {
    %c0_i32 = arith.constant 0 : i32
    %c0_i32_0 = arith.constant 0 : i32
    %c0_i32_1 = arith.constant 0 : i32
    return %arg0, %c0_i32, %c0_i32_0 : i32, i32, i32
  }
  func.func @transform_2(%arg0: i32) -> (i32, i32) {
    %c0_i32 = arith.constant 0 : i32
    %c0_i32_0 = arith.constant 0 : i32
    %c0_i32_1 = arith.constant 0 : i32
    return %c0_i32, %c0_i32_0 : i32, i32
  }
  func.func @transform_3(%arg0: i32) -> (i32, i32) {
    %c0_i32 = arith.constant 0 : i32
    %c0_i32_0 = arith.constant 0 : i32
    %c0_i32_1 = arith.constant 0 : i32
    return %c0_i32, %c0_i32_0 : i32, i32
  }
  func.func @transform_4(%arg0: i32) -> (i32, i32, i32) {
    %c0_i32 = arith.constant 0 : i32
    %c0_i32_0 = arith.constant 0 : i32
    %c0_i32_1 = arith.constant 0 : i32
    return %arg0, %c0_i32, %c0_i32_0 : i32, i32, i32
  }
}

module attributes {stable_mosaic.version = 11 : i64} {
  func.func @_norm_proj_kernel(%arg0: i32, %arg1: memref<1x8x64xf32, #tpu.memory_space<vmem>>, %arg2: memref<1x64xf32, #tpu.memory_space<vmem>>, %arg3: memref<1x64xf32, #tpu.memory_space<vmem>>, %arg4: memref<64x128xbf16, #tpu.memory_space<vmem>>, %arg5: memref<1x128xf32, #tpu.memory_space<vmem>>, %arg6: memref<1x8x128xf32, #tpu.memory_space<vmem>>) attributes {dimension_semantics = [#tpu.dimension_semantics<parallel>], iteration_bounds = array<i64: 2>, scalar_prefetch = 0 : i64, scratch_operands = 0 : i64, tpu.core_type = #tpu.core_type<tc>, window_params = [{transform_indices = @transform_0, window_bounds = array<i64: 1, 8, 64>}, {pipeline_mode = #tpu.pipeline_mode<synchronous>, transform_indices = @transform_1, window_bounds = array<i64: 1, 64>}, {pipeline_mode = #tpu.pipeline_mode<synchronous>, transform_indices = @transform_2, window_bounds = array<i64: 1, 64>}, {pipeline_mode = #tpu.pipeline_mode<synchronous>, transform_indices = @transform_3, window_bounds = array<i64: 64, 128>}, {pipeline_mode = #tpu.pipeline_mode<synchronous>, transform_indices = @transform_4, window_bounds = array<i64: 1, 128>}, {transform_indices = @transform_5, window_bounds = array<i64: 1, 8, 128>}]} {
    %c0 = arith.constant 0 : index
    %c0_0 = arith.constant 0 : index
    %c0_1 = arith.constant 0 : index
    %0 = vector.load %arg1[%c0, %c0_0, %c0_1] : memref<1x8x64xf32, #tpu.memory_space<vmem>>, vector<1x8x64xf32>
    %1 = vector.shape_cast %0 : vector<1x8x64xf32> to vector<8x64xf32>
    %c0_2 = arith.constant 0 : index
    %c0_3 = arith.constant 0 : index
    %2 = vector.load %arg2[%c0_2, %c0_3] : memref<1x64xf32, #tpu.memory_space<vmem>>, vector<1x64xf32>
    %c0_4 = arith.constant 0 : index
    %c0_5 = arith.constant 0 : index
    %3 = vector.load %arg3[%c0_4, %c0_5] : memref<1x64xf32, #tpu.memory_space<vmem>>, vector<1x64xf32>
    %cst = arith.constant dense<0.000000e+00> : vector<8xf32>
    %4 = vector.multi_reduction <add>, %1, %cst [1] : vector<8x64xf32> to vector<8xf32>
    %5 = vector.shape_cast %4 : vector<8xf32> to vector<8x1xf32>
    %cst_6 = arith.constant 6.400000e+01 : f32
    %6 = vector.broadcast %cst_6 : f32 to vector<8x1xf32>
    %7 = arith.divf %5, %6 : vector<8x1xf32>
    %8 = vector.broadcast %7 : vector<8x1xf32> to vector<8x64xf32>
    %9 = arith.subf %1, %8 : vector<8x64xf32>
    %10 = arith.mulf %9, %9 : vector<8x64xf32>
    %cst_7 = arith.constant dense<0.000000e+00> : vector<8xf32>
    %11 = vector.multi_reduction <add>, %10, %cst_7 [1] : vector<8x64xf32> to vector<8xf32>
    %12 = vector.shape_cast %11 : vector<8xf32> to vector<8x1xf32>
    %cst_8 = arith.constant 6.400000e+01 : f32
    %13 = vector.broadcast %cst_8 : f32 to vector<8x1xf32>
    %14 = arith.divf %12, %13 : vector<8x1xf32>
    %15 = vector.broadcast %7 : vector<8x1xf32> to vector<8x64xf32>
    %16 = arith.subf %1, %15 : vector<8x64xf32>
    %cst_9 = arith.constant 9.99999974E-6 : f32
    %17 = vector.broadcast %cst_9 : f32 to vector<8x1xf32>
    %18 = arith.addf %14, %17 : vector<8x1xf32>
    %19 = math.rsqrt %18 : vector<8x1xf32>
    %20 = vector.broadcast %19 : vector<8x1xf32> to vector<8x64xf32>
    %21 = arith.mulf %16, %20 : vector<8x64xf32>
    %22 = vector.broadcast %2 : vector<1x64xf32> to vector<8x64xf32>
    %23 = arith.mulf %21, %22 : vector<8x64xf32>
    %24 = vector.broadcast %3 : vector<1x64xf32> to vector<8x64xf32>
    %25 = arith.addf %23, %24 : vector<8x64xf32>
    %26 = arith.truncf %25 : vector<8x64xf32> to vector<8x64xbf16>
    %c0_10 = arith.constant 0 : index
    %c0_11 = arith.constant 0 : index
    %27 = vector.load %arg4[%c0_10, %c0_11] : memref<64x128xbf16, #tpu.memory_space<vmem>>, vector<64x128xbf16>
    %cst_12 = arith.constant dense<0.000000e+00> : vector<8x128xf32>
    %28 = tpu.matmul %26, %27, %cst_12 {dimension_numbers = #tpu.dot_dimension_numbers<[1], [0], [0], [1], [0, 0, 1, 1], [], []>} : vector<8x64xbf16>, vector<64x128xbf16>, vector<8x128xf32> -> vector<8x128xf32>
    %c0_13 = arith.constant 0 : index
    %c0_14 = arith.constant 0 : index
    %29 = vector.load %arg5[%c0_13, %c0_14] : memref<1x128xf32, #tpu.memory_space<vmem>>, vector<1x128xf32>
    %30 = vector.broadcast %29 : vector<1x128xf32> to vector<8x128xf32>
    %31 = arith.addf %28, %30 : vector<8x128xf32>
    %c0_15 = arith.constant 0 : index
    %c0_16 = arith.constant 0 : index
    %c0_17 = arith.constant 0 : index
    %32 = vector.load %arg6[%c0_15, %c0_16, %c0_17] : memref<1x8x128xf32, #tpu.memory_space<vmem>>, vector<1x8x128xf32>
    %33 = vector.shape_cast %32 : vector<1x8x128xf32> to vector<8x128xf32>
    %34 = vector.shape_cast %31 : vector<8x128xf32> to vector<1x8x128xf32>
    tpu.vector_store %arg6[%c0_15, %c0_16, %c0_17], %34 {strides = array<i32>} : memref<1x8x128xf32, #tpu.memory_space<vmem>>, vector<1x8x128xf32>,
    return
  }
  func.func @transform_0(%arg0: i32) -> (i32, i32, i32) {
    %c0_i32 = arith.constant 0 : i32
    %c0_i32_0 = arith.constant 0 : i32
    %c0_i32_1 = arith.constant 0 : i32
    return %arg0, %c0_i32, %c0_i32_0 : i32, i32, i32
  }
  func.func @transform_1(%arg0: i32) -> (i32, i32) {
    %c0_i32 = arith.constant 0 : i32
    %c0_i32_0 = arith.constant 0 : i32
    %c0_i32_1 = arith.constant 0 : i32
    return %c0_i32, %c0_i32_0 : i32, i32
  }
  func.func @transform_2(%arg0: i32) -> (i32, i32) {
    %c0_i32 = arith.constant 0 : i32
    %c0_i32_0 = arith.constant 0 : i32
    %c0_i32_1 = arith.constant 0 : i32
    return %c0_i32, %c0_i32_0 : i32, i32
  }
  func.func @transform_3(%arg0: i32) -> (i32, i32) {
    %c0_i32 = arith.constant 0 : i32
    %c0_i32_0 = arith.constant 0 : i32
    %c0_i32_1 = arith.constant 0 : i32
    return %c0_i32, %c0_i32_0 : i32, i32
  }
  func.func @transform_4(%arg0: i32) -> (i32, i32) {
    %c0_i32 = arith.constant 0 : i32
    %c0_i32_0 = arith.constant 0 : i32
    %c0_i32_1 = arith.constant 0 : i32
    return %c0_i32, %c0_i32_0 : i32, i32
  }
  func.func @transform_5(%arg0: i32) -> (i32, i32, i32) {
    %c0_i32 = arith.constant 0 : i32
    %c0_i32_0 = arith.constant 0 : i32
    %c0_i32_1 = arith.constant 0 : i32
    return %arg0, %c0_i32, %c0_i32_0 : i32, i32, i32
  }
}

module attributes {stable_mosaic.version = 11 : i64} {
  func.func @_decoder_layer_kernel(%arg0: i32, %arg1: memref<1x24x64xf32, #tpu.memory_space<vmem>>, %arg2: memref<1x32x64xf32, #tpu.memory_space<vmem>>, %arg3: memref<64x192xbf16, #tpu.memory_space<vmem>>, %arg4: memref<1x192xf32, #tpu.memory_space<vmem>>, %arg5: memref<64x64xbf16, #tpu.memory_space<vmem>>, %arg6: memref<1x64xf32, #tpu.memory_space<vmem>>, %arg7: memref<96x96xbf16, #tpu.memory_space<vmem>>, %arg8: memref<1x64xf32, #tpu.memory_space<vmem>>, %arg9: memref<1x64xf32, #tpu.memory_space<vmem>>, %arg10: memref<64x64xbf16, #tpu.memory_space<vmem>>, %arg11: memref<1x64xf32, #tpu.memory_space<vmem>>, %arg12: memref<64x128xbf16, #tpu.memory_space<vmem>>, %arg13: memref<1x128xf32, #tpu.memory_space<vmem>>, %arg14: memref<64x64xbf16, #tpu.memory_space<vmem>>, %arg15: memref<1x64xf32, #tpu.memory_space<vmem>>, %arg16: memref<1x64xf32, #tpu.memory_space<vmem>>, %arg17: memref<1x64xf32, #tpu.memory_space<vmem>>, %arg18: memref<64x64xbf16, #tpu.memory_space<vmem>>, %arg19: memref<1x64xf32, #tpu.memory_space<vmem>>, %arg20: memref<64x64xbf16, #tpu.memory_space<vmem>>, %arg21: memref<1x64xf32, #tpu.memory_space<vmem>>, %arg22: memref<1x64xf32, #tpu.memory_space<vmem>>, %arg23: memref<1x64xf32, #tpu.memory_space<vmem>>, %arg24: memref<1x24x64xf32, #tpu.memory_space<vmem>>) attributes {dimension_semantics = [#tpu.dimension_semantics<parallel>], iteration_bounds = array<i64: 2>, scalar_prefetch = 0 : i64, scratch_operands = 0 : i64, tpu.core_type = #tpu.core_type<tc>, window_params = [{transform_indices = @transform_0, window_bounds = array<i64: 1, 24, 64>}, {transform_indices = @transform_1, window_bounds = array<i64: 1, 32, 64>}, {pipeline_mode = #tpu.pipeline_mode<synchronous>, transform_indices = @transform_2, window_bounds = array<i64: 64, 192>}, {pipeline_mode = #tpu.pipeline_mode<synchronous>, transform_indices = @transform_3, window_bounds = array<i64: 1, 192>}, {pipeline_mode = #tpu.pipeline_mode<synchronous>, transform_indices = @transform_4, window_bounds = array<i64: 64, 64>}, {pipeline_mode = #tpu.pipeline_mode<synchronous>, transform_indices = @transform_5, window_bounds = array<i64: 1, 64>}, {pipeline_mode = #tpu.pipeline_mode<synchronous>, transform_indices = @transform_6, window_bounds = array<i64: 96, 96>}, {pipeline_mode = #tpu.pipeline_mode<synchronous>, transform_indices = @transform_7, window_bounds = array<i64: 1, 64>}, {pipeline_mode = #tpu.pipeline_mode<synchronous>, transform_indices = @transform_8, window_bounds = array<i64: 1, 64>}, {pipeline_mode = #tpu.pipeline_mode<synchronous>, transform_indices = @transform_9, window_bounds = array<i64: 64, 64>}, {pipeline_mode = #tpu.pipeline_mode<synchronous>, transform_indices = @transform_10, window_bounds = array<i64: 1, 64>}, {pipeline_mode = #tpu.pipeline_mode<synchronous>, transform_indices = @transform_11, window_bounds = array<i64: 64, 128>}, {pipeline_mode = #tpu.pipeline_mode<synchronous>, transform_indices = @transform_12, window_bounds = array<i64: 1, 128>}, {pipeline_mode = #tpu.pipeline_mode<synchronous>, transform_indices = @transform_13, window_bounds = array<i64: 64, 64>}, {pipeline_mode = #tpu.pipeline_mode<synchronous>, transform_indices = @transform_14, window_bounds = array<i64: 1, 64>}, {pipeline_mode = #tpu.pipeline_mode<synchronous>, transform_indices = @transform_15, window_bounds = array<i64: 1, 64>}, {pipeline_mode = #tpu.pipeline_mode<synchronous>, transform_indices = @transform_16, window_bounds = array<i64: 1, 64>}, {pipeline_mode = #tpu.pipeline_mode<synchronous>, transform_indices = @transform_17, window_bounds = array<i64: 64, 64>}, {pipeline_mode = #tpu.pipeline_mode<synchronous>, transform_indices = @transform_18, window_bounds = array<i64: 1, 64>}, {pipeline_mode = #tpu.pipeline_mode<synchronous>, transform_indices = @transform_19, window_bounds = array<i64: 64, 64>}, {pipeline_mode = #tpu.pipeline_mode<synchronous>, transform_indices = @transform_20, window_bounds = array<i64: 1, 64>}, {pipeline_mode = #tpu.pipeline_mode<synchronous>, transform_indices = @transform_21, window_bounds = array<i64: 1, 64>}, {pipeline_mode = #tpu.pipeline_mode<synchronous>, transform_indices = @transform_22, window_bounds = array<i64: 1, 64>}, {transform_indices = @transform_23, window_bounds = array<i64: 1, 24, 64>}]} {
    %c0 = arith.constant 0 : index
    %c0_0 = arith.constant 0 : index
    %c0_1 = arith.constant 0 : index
    %0 = vector.load %arg1[%c0, %c0_0, %c0_1] : memref<1x24x64xf32, #tpu.memory_space<vmem>>, vector<1x24x64xf32>
    %1 = vector.shape_cast %0 : vector<1x24x64xf32> to vector<24x64xf32>
    %c0_2 = arith.constant 0 : index
    %c0_3 = arith.constant 0 : index
    %c0_4 = arith.constant 0 : index
    %2 = vector.load %arg2[%c0_2, %c0_3, %c0_4] : memref<1x32x64xf32, #tpu.memory_space<vmem>>, vector<1x32x64xf32>
    %3 = vector.shape_cast %2 : vector<1x32x64xf32> to vector<32x64xf32>
    %4 = arith.truncf %1 : vector<24x64xf32> to vector<24x64xbf16>
    %c0_5 = arith.constant 0 : index
    %c0_6 = arith.constant 0 : index
    %5 = vector.load %arg3[%c0_5, %c0_6] : memref<64x192xbf16, #tpu.memory_space<vmem>>, vector<64x192xbf16>
    %cst = arith.constant dense<0.000000e+00> : vector<24x192xf32>
    %6 = tpu.matmul %4, %5, %cst {dimension_numbers = #tpu.dot_dimension_numbers<[1], [0], [0], [1], [0, 0, 1, 1], [], []>} : vector<24x64xbf16>, vector<64x192xbf16>, vector<24x192xf32> -> vector<24x192xf32>
    %c0_7 = arith.constant 0 : index
    %c0_8 = arith.constant 0 : index
    %7 = vector.load %arg4[%c0_7, %c0_8] : memref<1x192xf32, #tpu.memory_space<vmem>>, vector<1x192xf32>
    %8 = vector.broadcast %7 : vector<1x192xf32> to vector<24x192xf32>
    %9 = arith.addf %6, %8 : vector<24x192xf32>
    %10 = vector.extract_strided_slice %9 {offsets = [0, 0], sizes = [24, 64], strides = [1, 1]} : vector<24x192xf32> to vector<24x64xf32>
    %11 = vector.extract_strided_slice %9 {offsets = [0, 64], sizes = [24, 64], strides = [1, 1]} : vector<24x192xf32> to vector<24x64xf32>
    %12 = vector.extract_strided_slice %9 {offsets = [0, 128], sizes = [24, 64], strides = [1, 1]} : vector<24x192xf32> to vector<24x64xf32>
    %13 = arith.truncf %10 : vector<24x64xf32> to vector<24x64xbf16>
    %14 = arith.truncf %11 : vector<24x64xf32> to vector<24x64xbf16>
    %15 = arith.truncf %12 : vector<24x64xf32> to vector<24x64xbf16>
    %16 = tpu.iota {dimensions = array<i32: 0>} : vector<24x24xi32>
    %17 = tpu.iota {dimensions = array<i32: 1>} : vector<24x24xi32>
    %18 = arith.cmpi sgt, %17, %16 : vector<24x24xi32>
    %19 = vector.extract_strided_slice %13 {offsets = [0, 0], sizes = [24, 16], strides = [1, 1]} : vector<24x64xbf16> to vector<24x16xbf16>
    %20 = vector.extract_strided_slice %14 {offsets = [0, 0], sizes = [24, 16], strides = [1, 1]} : vector<24x64xbf16> to vector<24x16xbf16>
    %21 = vector.extract_strided_slice %15 {offsets = [0, 0], sizes = [24, 16], strides = [1, 1]} : vector<24x64xbf16> to vector<24x16xbf16>
    %cst_9 = arith.constant dense<0.000000e+00> : vector<24x24xf32>
    %22 = tpu.matmul %19, %20, %cst_9 {dimension_numbers = #tpu.dot_dimension_numbers<[1], [1], [0], [0], [0, 0, 1, 0], [], []>} : vector<24x16xbf16>, vector<24x16xbf16>, vector<24x24xf32> -> vector<24x24xf32>
    %cst_10 = arith.constant 2.500000e-01 : f32
    %23 = vector.broadcast %cst_10 : f32 to vector<24x24xf32>
    %24 = arith.mulf %22, %23 : vector<24x24xf32>
    %cst_11 = arith.constant -1.000000e+30 : f32
    %25 = vector.broadcast %cst_11 : f32 to vector<24x24xf32>
    %26 = arith.select %18, %25, %24 : vector<24x24xi1>, vector<24x24xf32>
    %cst_12 = arith.constant dense<0xFF800000> : vector<24xf32>
    %27 = vector.multi_reduction <maximumf>, %26, %cst_12 [1] : vector<24x24xf32> to vector<24xf32>
    %28 = vector.shape_cast %27 : vector<24xf32> to vector<24x1xf32>
    %29 = vector.broadcast %28 : vector<24x1xf32> to vector<24x24xf32>
    %30 = arith.subf %26, %29 : vector<24x24xf32>
    %31 = math.exp %30 : vector<24x24xf32>
    %cst_13 = arith.constant dense<0.000000e+00> : vector<24xf32>
    %32 = vector.multi_reduction <add>, %31, %cst_13 [1] : vector<24x24xf32> to vector<24xf32>
    %33 = vector.shape_cast %32 : vector<24xf32> to vector<24x1xf32>
    %34 = vector.broadcast %33 : vector<24x1xf32> to vector<24x24xf32>
    %35 = arith.divf %31, %34 : vector<24x24xf32>
    %36 = arith.truncf %35 : vector<24x24xf32> to vector<24x24xbf16>
    %cst_14 = arith.constant dense<0.000000e+00> : vector<24x16xf32>
    %37 = tpu.matmul %36, %21, %cst_14 {dimension_numbers = #tpu.dot_dimension_numbers<[1], [0], [0], [1], [0, 0, 1, 1], [], []>} : vector<24x24xbf16>, vector<24x16xbf16>, vector<24x16xf32> -> vector<24x16xf32>
    %38 = vector.extract_strided_slice %13 {offsets = [0, 16], sizes = [24, 16], strides = [1, 1]} : vector<24x64xbf16> to vector<24x16xbf16>
    %39 = vector.extract_strided_slice %14 {offsets = [0, 16], sizes = [24, 16], strides = [1, 1]} : vector<24x64xbf16> to vector<24x16xbf16>
    %40 = vector.extract_strided_slice %15 {offsets = [0, 16], sizes = [24, 16], strides = [1, 1]} : vector<24x64xbf16> to vector<24x16xbf16>
    %cst_15 = arith.constant dense<0.000000e+00> : vector<24x24xf32>
    %41 = tpu.matmul %38, %39, %cst_15 {dimension_numbers = #tpu.dot_dimension_numbers<[1], [1], [0], [0], [0, 0, 1, 0], [], []>} : vector<24x16xbf16>, vector<24x16xbf16>, vector<24x24xf32> -> vector<24x24xf32>
    %cst_16 = arith.constant 2.500000e-01 : f32
    %42 = vector.broadcast %cst_16 : f32 to vector<24x24xf32>
    %43 = arith.mulf %41, %42 : vector<24x24xf32>
    %cst_17 = arith.constant -1.000000e+30 : f32
    %44 = vector.broadcast %cst_17 : f32 to vector<24x24xf32>
    %45 = arith.select %18, %44, %43 : vector<24x24xi1>, vector<24x24xf32>
    %cst_18 = arith.constant dense<0xFF800000> : vector<24xf32>
    %46 = vector.multi_reduction <maximumf>, %45, %cst_18 [1] : vector<24x24xf32> to vector<24xf32>
    %47 = vector.shape_cast %46 : vector<24xf32> to vector<24x1xf32>
    %48 = vector.broadcast %47 : vector<24x1xf32> to vector<24x24xf32>
    %49 = arith.subf %45, %48 : vector<24x24xf32>
    %50 = math.exp %49 : vector<24x24xf32>
    %cst_19 = arith.constant dense<0.000000e+00> : vector<24xf32>
    %51 = vector.multi_reduction <add>, %50, %cst_19 [1] : vector<24x24xf32> to vector<24xf32>
    %52 = vector.shape_cast %51 : vector<24xf32> to vector<24x1xf32>
    %53 = vector.broadcast %52 : vector<24x1xf32> to vector<24x24xf32>
    %54 = arith.divf %50, %53 : vector<24x24xf32>
    %55 = arith.truncf %54 : vector<24x24xf32> to vector<24x24xbf16>
    %cst_20 = arith.constant dense<0.000000e+00> : vector<24x16xf32>
    %56 = tpu.matmul %55, %40, %cst_20 {dimension_numbers = #tpu.dot_dimension_numbers<[1], [0], [0], [1], [0, 0, 1, 1], [], []>} : vector<24x24xbf16>, vector<24x16xbf16>, vector<24x16xf32> -> vector<24x16xf32>
    %57 = vector.extract_strided_slice %13 {offsets = [0, 32], sizes = [24, 16], strides = [1, 1]} : vector<24x64xbf16> to vector<24x16xbf16>
    %58 = vector.extract_strided_slice %14 {offsets = [0, 32], sizes = [24, 16], strides = [1, 1]} : vector<24x64xbf16> to vector<24x16xbf16>
    %59 = vector.extract_strided_slice %15 {offsets = [0, 32], sizes = [24, 16], strides = [1, 1]} : vector<24x64xbf16> to vector<24x16xbf16>
    %cst_21 = arith.constant dense<0.000000e+00> : vector<24x24xf32>
    %60 = tpu.matmul %57, %58, %cst_21 {dimension_numbers = #tpu.dot_dimension_numbers<[1], [1], [0], [0], [0, 0, 1, 0], [], []>} : vector<24x16xbf16>, vector<24x16xbf16>, vector<24x24xf32> -> vector<24x24xf32>
    %cst_22 = arith.constant 2.500000e-01 : f32
    %61 = vector.broadcast %cst_22 : f32 to vector<24x24xf32>
    %62 = arith.mulf %60, %61 : vector<24x24xf32>
    %cst_23 = arith.constant -1.000000e+30 : f32
    %63 = vector.broadcast %cst_23 : f32 to vector<24x24xf32>
    %64 = arith.select %18, %63, %62 : vector<24x24xi1>, vector<24x24xf32>
    %cst_24 = arith.constant dense<0xFF800000> : vector<24xf32>
    %65 = vector.multi_reduction <maximumf>, %64, %cst_24 [1] : vector<24x24xf32> to vector<24xf32>
    %66 = vector.shape_cast %65 : vector<24xf32> to vector<24x1xf32>
    %67 = vector.broadcast %66 : vector<24x1xf32> to vector<24x24xf32>
    %68 = arith.subf %64, %67 : vector<24x24xf32>
    %69 = math.exp %68 : vector<24x24xf32>
    %cst_25 = arith.constant dense<0.000000e+00> : vector<24xf32>
    %70 = vector.multi_reduction <add>, %69, %cst_25 [1] : vector<24x24xf32> to vector<24xf32>
    %71 = vector.shape_cast %70 : vector<24xf32> to vector<24x1xf32>
    %72 = vector.broadcast %71 : vector<24x1xf32> to vector<24x24xf32>
    %73 = arith.divf %69, %72 : vector<24x24xf32>
    %74 = arith.truncf %73 : vector<24x24xf32> to vector<24x24xbf16>
    %cst_26 = arith.constant dense<0.000000e+00> : vector<24x16xf32>
    %75 = tpu.matmul %74, %59, %cst_26 {dimension_numbers = #tpu.dot_dimension_numbers<[1], [0], [0], [1], [0, 0, 1, 1], [], []>} : vector<24x24xbf16>, vector<24x16xbf16>, vector<24x16xf32> -> vector<24x16xf32>
    %76 = vector.extract_strided_slice %13 {offsets = [0, 48], sizes = [24, 16], strides = [1, 1]} : vector<24x64xbf16> to vector<24x16xbf16>
    %77 = vector.extract_strided_slice %14 {offsets = [0, 48], sizes = [24, 16], strides = [1, 1]} : vector<24x64xbf16> to vector<24x16xbf16>
    %78 = vector.extract_strided_slice %15 {offsets = [0, 48], sizes = [24, 16], strides = [1, 1]} : vector<24x64xbf16> to vector<24x16xbf16>
    %cst_27 = arith.constant dense<0.000000e+00> : vector<24x24xf32>
    %79 = tpu.matmul %76, %77, %cst_27 {dimension_numbers = #tpu.dot_dimension_numbers<[1], [1], [0], [0], [0, 0, 1, 0], [], []>} : vector<24x16xbf16>, vector<24x16xbf16>, vector<24x24xf32> -> vector<24x24xf32>
    %cst_28 = arith.constant 2.500000e-01 : f32
    %80 = vector.broadcast %cst_28 : f32 to vector<24x24xf32>
    %81 = arith.mulf %79, %80 : vector<24x24xf32>
    %cst_29 = arith.constant -1.000000e+30 : f32
    %82 = vector.broadcast %cst_29 : f32 to vector<24x24xf32>
    %83 = arith.select %18, %82, %81 : vector<24x24xi1>, vector<24x24xf32>
    %cst_30 = arith.constant dense<0xFF800000> : vector<24xf32>
    %84 = vector.multi_reduction <maximumf>, %83, %cst_30 [1] : vector<24x24xf32> to vector<24xf32>
    %85 = vector.shape_cast %84 : vector<24xf32> to vector<24x1xf32>
    %86 = vector.broadcast %85 : vector<24x1xf32> to vector<24x24xf32>
    %87 = arith.subf %83, %86 : vector<24x24xf32>
    %88 = math.exp %87 : vector<24x24xf32>
    %cst_31 = arith.constant dense<0.000000e+00> : vector<24xf32>
    %89 = vector.multi_reduction <add>, %88, %cst_31 [1] : vector<24x24xf32> to vector<24xf32>
    %90 = vector.shape_cast %89 : vector<24xf32> to vector<24x1xf32>
    %91 = vector.broadcast %90 : vector<24x1xf32> to vector<24x24xf32>
    %92 = arith.divf %88, %91 : vector<24x24xf32>
    %93 = arith.truncf %92 : vector<24x24xf32> to vector<24x24xbf16>
    %cst_32 = arith.constant dense<0.000000e+00> : vector<24x16xf32>
    %94 = tpu.matmul %93, %78, %cst_32 {dimension_numbers = #tpu.dot_dimension_numbers<[1], [0], [0], [1], [0, 0, 1, 1], [], []>} : vector<24x24xbf16>, vector<24x16xbf16>, vector<24x16xf32> -> vector<24x16xf32>
    %95 = tpu.concatenate %37, %56, %75, %94 in 0 : vector<24x16xf32>, vector<24x16xf32>, vector<24x16xf32>, vector<24x16xf32> -> vector<96x16xf32>
    %96 = arith.truncf %95 : vector<96x16xf32> to vector<96x16xbf16>
    %c0_33 = arith.constant 0 : index
    %c0_34 = arith.constant 0 : index
    %97 = vector.load %arg7[%c0_33, %c0_34] : memref<96x96xbf16, #tpu.memory_space<vmem>>, vector<96x96xbf16>
    %cst_35 = arith.constant dense<0.000000e+00> : vector<96x16xf32>
    %98 = tpu.matmul %97, %96, %cst_35 {dimension_numbers = #tpu.dot_dimension_numbers<[1], [0], [0], [1], [0, 0, 1, 1], [], []>} : vector<96x96xbf16>, vector<96x16xbf16>, vector<96x16xf32> -> vector<96x16xf32>
    %99 = vector.extract_strided_slice %98 {offsets = [0, 0], sizes = [24, 16], strides = [1, 1]} : vector<96x16xf32> to vector<24x16xf32>
    %100 = vector.extract_strided_slice %98 {offsets = [24, 0], sizes = [24, 16], strides = [1, 1]} : vector<96x16xf32> to vector<24x16xf32>
    %101 = vector.extract_strided_slice %98 {offsets = [48, 0], sizes = [24, 16], strides = [1, 1]} : vector<96x16xf32> to vector<24x16xf32>
    %102 = vector.extract_strided_slice %98 {offsets = [72, 0], sizes = [24, 16], strides = [1, 1]} : vector<96x16xf32> to vector<24x16xf32>
    %103 = tpu.concatenate %99, %100, %101, %102 in 1 : vector<24x16xf32>, vector<24x16xf32>, vector<24x16xf32>, vector<24x16xf32> -> vector<24x64xf32>
    %104 = arith.truncf %103 : vector<24x64xf32> to vector<24x64xbf16>
    %c0_36 = arith.constant 0 : index
    %c0_37 = arith.constant 0 : index
    %105 = vector.load %arg5[%c0_36, %c0_37] : memref<64x64xbf16, #tpu.memory_space<vmem>>, vector<64x64xbf16>
    %cst_38 = arith.constant dense<0.000000e+00> : vector<24x64xf32>
    %106 = tpu.matmul %104, %105, %cst_38 {dimension_numbers = #tpu.dot_dimension_numbers<[1], [0], [0], [1], [0, 0, 1, 1], [], []>} : vector<24x64xbf16>, vector<64x64xbf16>, vector<24x64xf32> -> vector<24x64xf32>
    %c0_39 = arith.constant 0 : index
    %c0_40 = arith.constant 0 : index
    %107 = vector.load %arg6[%c0_39, %c0_40] : memref<1x64xf32, #tpu.memory_space<vmem>>, vector<1x64xf32>
    %108 = vector.broadcast %107 : vector<1x64xf32> to vector<24x64xf32>
    %109 = arith.addf %106, %108 : vector<24x64xf32>
    %110 = arith.addf %1, %109 : vector<24x64xf32>
    %c0_41 = arith.constant 0 : index
    %c0_42 = arith.constant 0 : index
    %111 = vector.load %arg8[%c0_41, %c0_42] : memref<1x64xf32, #tpu.memory_space<vmem>>, vector<1x64xf32>
    %c0_43 = arith.constant 0 : index
    %c0_44 = arith.constant 0 : index
    %112 = vector.load %arg9[%c0_43, %c0_44] : memref<1x64xf32, #tpu.memory_space<vmem>>, vector<1x64xf32>
    %cst_45 = arith.constant dense<0.000000e+00> : vector<24xf32>
    %113 = vector.multi_reduction <add>, %110, %cst_45 [1] : vector<24x64xf32> to vector<24xf32>
    %114 = vector.shape_cast %113 : vector<24xf32> to vector<24x1xf32>
    %cst_46 = arith.constant 6.400000e+01 : f32
    %115 = vector.broadcast %cst_46 : f32 to vector<24x1xf32>
    %116 = arith.divf %114, %115 : vector<24x1xf32>
    %117 = vector.broadcast %116 : vector<24x1xf32> to vector<24x64xf32>
    %118 = arith.subf %110, %117 : vector<24x64xf32>
    %119 = arith.mulf %118, %118 : vector<24x64xf32>
    %cst_47 = arith.constant dense<0.000000e+00> : vector<24xf32>
    %120 = vector.multi_reduction <add>, %119, %cst_47 [1] : vector<24x64xf32> to vector<24xf32>
    %121 = vector.shape_cast %120 : vector<24xf32> to vector<24x1xf32>
    %cst_48 = arith.constant 6.400000e+01 : f32
    %122 = vector.broadcast %cst_48 : f32 to vector<24x1xf32>
    %123 = arith.divf %121, %122 : vector<24x1xf32>
    %124 = vector.broadcast %116 : vector<24x1xf32> to vector<24x64xf32>
    %125 = arith.subf %110, %124 : vector<24x64xf32>
    %cst_49 = arith.constant 9.99999974E-6 : f32
    %126 = vector.broadcast %cst_49 : f32 to vector<24x1xf32>
    %127 = arith.addf %123, %126 : vector<24x1xf32>
    %128 = math.rsqrt %127 : vector<24x1xf32>
    %129 = vector.broadcast %128 : vector<24x1xf32> to vector<24x64xf32>
    %130 = arith.mulf %125, %129 : vector<24x64xf32>
    %131 = vector.broadcast %111 : vector<1x64xf32> to vector<24x64xf32>
    %132 = arith.mulf %130, %131 : vector<24x64xf32>
    %133 = vector.broadcast %112 : vector<1x64xf32> to vector<24x64xf32>
    %134 = arith.addf %132, %133 : vector<24x64xf32>
    %135 = arith.truncf %134 : vector<24x64xf32> to vector<24x64xbf16>
    %c0_50 = arith.constant 0 : index
    %c0_51 = arith.constant 0 : index
    %136 = vector.load %arg10[%c0_50, %c0_51] : memref<64x64xbf16, #tpu.memory_space<vmem>>, vector<64x64xbf16>
    %cst_52 = arith.constant dense<0.000000e+00> : vector<24x64xf32>
    %137 = tpu.matmul %135, %136, %cst_52 {dimension_numbers = #tpu.dot_dimension_numbers<[1], [0], [0], [1], [0, 0, 1, 1], [], []>} : vector<24x64xbf16>, vector<64x64xbf16>, vector<24x64xf32> -> vector<24x64xf32>
    %c0_53 = arith.constant 0 : index
    %c0_54 = arith.constant 0 : index
    %138 = vector.load %arg11[%c0_53, %c0_54] : memref<1x64xf32, #tpu.memory_space<vmem>>, vector<1x64xf32>
    %139 = vector.broadcast %138 : vector<1x64xf32> to vector<24x64xf32>
    %140 = arith.addf %137, %139 : vector<24x64xf32>
    %141 = arith.truncf %3 : vector<32x64xf32> to vector<32x64xbf16>
    %c0_55 = arith.constant 0 : index
    %c0_56 = arith.constant 0 : index
    %142 = vector.load %arg12[%c0_55, %c0_56] : memref<64x128xbf16, #tpu.memory_space<vmem>>, vector<64x128xbf16>
    %cst_57 = arith.constant dense<0.000000e+00> : vector<32x128xf32>
    %143 = tpu.matmul %141, %142, %cst_57 {dimension_numbers = #tpu.dot_dimension_numbers<[1], [0], [0], [1], [0, 0, 1, 1], [], []>} : vector<32x64xbf16>, vector<64x128xbf16>, vector<32x128xf32> -> vector<32x128xf32>
    %c0_58 = arith.constant 0 : index
    %c0_59 = arith.constant 0 : index
    %144 = vector.load %arg13[%c0_58, %c0_59] : memref<1x128xf32, #tpu.memory_space<vmem>>, vector<1x128xf32>
    %145 = vector.broadcast %144 : vector<1x128xf32> to vector<32x128xf32>
    %146 = arith.addf %143, %145 : vector<32x128xf32>
    %147 = vector.extract_strided_slice %146 {offsets = [0, 0], sizes = [32, 64], strides = [1, 1]} : vector<32x128xf32> to vector<32x64xf32>
    %148 = vector.extract_strided_slice %146 {offsets = [0, 64], sizes = [32, 64], strides = [1, 1]} : vector<32x128xf32> to vector<32x64xf32>
    %149 = arith.truncf %140 : vector<24x64xf32> to vector<24x64xbf16>
    %150 = arith.truncf %147 : vector<32x64xf32> to vector<32x64xbf16>
    %151 = arith.truncf %148 : vector<32x64xf32> to vector<32x64xbf16>
    %152 = vector.extract_strided_slice %149 {offsets = [0, 0], sizes = [24, 16], strides = [1, 1]} : vector<24x64xbf16> to vector<24x16xbf16>
    %153 = vector.extract_strided_slice %150 {offsets = [0, 0], sizes = [32, 16], strides = [1, 1]} : vector<32x64xbf16> to vector<32x16xbf16>
    %154 = vector.extract_strided_slice %151 {offsets = [0, 0], sizes = [32, 16], strides = [1, 1]} : vector<32x64xbf16> to vector<32x16xbf16>
    %cst_60 = arith.constant dense<0.000000e+00> : vector<24x32xf32>
    %155 = tpu.matmul %152, %153, %cst_60 {dimension_numbers = #tpu.dot_dimension_numbers<[1], [1], [0], [0], [0, 0, 1, 0], [], []>} : vector<24x16xbf16>, vector<32x16xbf16>, vector<24x32xf32> -> vector<24x32xf32>
    %cst_61 = arith.constant 2.500000e-01 : f32
    %156 = vector.broadcast %cst_61 : f32 to vector<24x32xf32>
    %157 = arith.mulf %155, %156 : vector<24x32xf32>
    %cst_62 = arith.constant dense<0xFF800000> : vector<24xf32>
    %158 = vector.multi_reduction <maximumf>, %157, %cst_62 [1] : vector<24x32xf32> to vector<24xf32>
    %159 = vector.shape_cast %158 : vector<24xf32> to vector<24x1xf32>
    %160 = vector.broadcast %159 : vector<24x1xf32> to vector<24x32xf32>
    %161 = arith.subf %157, %160 : vector<24x32xf32>
    %162 = math.exp %161 : vector<24x32xf32>
    %cst_63 = arith.constant dense<0.000000e+00> : vector<24xf32>
    %163 = vector.multi_reduction <add>, %162, %cst_63 [1] : vector<24x32xf32> to vector<24xf32>
    %164 = vector.shape_cast %163 : vector<24xf32> to vector<24x1xf32>
    %165 = vector.broadcast %164 : vector<24x1xf32> to vector<24x32xf32>
    %166 = arith.divf %162, %165 : vector<24x32xf32>
    %167 = arith.truncf %166 : vector<24x32xf32> to vector<24x32xbf16>
    %cst_64 = arith.constant dense<0.000000e+00> : vector<24x16xf32>
    %168 = tpu.matmul %167, %154, %cst_64 {dimension_numbers = #tpu.dot_dimension_numbers<[1], [0], [0], [1], [0, 0, 1, 1], [], []>} : vector<24x32xbf16>, vector<32x16xbf16>, vector<24x16xf32> -> vector<24x16xf32>
    %169 = vector.extract_strided_slice %149 {offsets = [0, 16], sizes = [24, 16], strides = [1, 1]} : vector<24x64xbf16> to vector<24x16xbf16>
    %170 = vector.extract_strided_slice %150 {offsets = [0, 16], sizes = [32, 16], strides = [1, 1]} : vector<32x64xbf16> to vector<32x16xbf16>
    %171 = vector.extract_strided_slice %151 {offsets = [0, 16], sizes = [32, 16], strides = [1, 1]} : vector<32x64xbf16> to vector<32x16xbf16>
    %cst_65 = arith.constant dense<0.000000e+00> : vector<24x32xf32>
    %172 = tpu.matmul %169, %170, %cst_65 {dimension_numbers = #tpu.dot_dimension_numbers<[1], [1], [0], [0], [0, 0, 1, 0], [], []>} : vector<24x16xbf16>, vector<32x16xbf16>, vector<24x32xf32> -> vector<24x32xf32>
    %cst_66 = arith.constant 2.500000e-01 : f32
    %173 = vector.broadcast %cst_66 : f32 to vector<24x32xf32>
    %174 = arith.mulf %172, %173 : vector<24x32xf32>
    %cst_67 = arith.constant dense<0xFF800000> : vector<24xf32>
    %175 = vector.multi_reduction <maximumf>, %174, %cst_67 [1] : vector<24x32xf32> to vector<24xf32>
    %176 = vector.shape_cast %175 : vector<24xf32> to vector<24x1xf32>
    %177 = vector.broadcast %176 : vector<24x1xf32> to vector<24x32xf32>
    %178 = arith.subf %174, %177 : vector<24x32xf32>
    %179 = math.exp %178 : vector<24x32xf32>
    %cst_68 = arith.constant dense<0.000000e+00> : vector<24xf32>
    %180 = vector.multi_reduction <add>, %179, %cst_68 [1] : vector<24x32xf32> to vector<24xf32>
    %181 = vector.shape_cast %180 : vector<24xf32> to vector<24x1xf32>
    %182 = vector.broadcast %181 : vector<24x1xf32> to vector<24x32xf32>
    %183 = arith.divf %179, %182 : vector<24x32xf32>
    %184 = arith.truncf %183 : vector<24x32xf32> to vector<24x32xbf16>
    %cst_69 = arith.constant dense<0.000000e+00> : vector<24x16xf32>
    %185 = tpu.matmul %184, %171, %cst_69 {dimension_numbers = #tpu.dot_dimension_numbers<[1], [0], [0], [1], [0, 0, 1, 1], [], []>} : vector<24x32xbf16>, vector<32x16xbf16>, vector<24x16xf32> -> vector<24x16xf32>
    %186 = vector.extract_strided_slice %149 {offsets = [0, 32], sizes = [24, 16], strides = [1, 1]} : vector<24x64xbf16> to vector<24x16xbf16>
    %187 = vector.extract_strided_slice %150 {offsets = [0, 32], sizes = [32, 16], strides = [1, 1]} : vector<32x64xbf16> to vector<32x16xbf16>
    %188 = vector.extract_strided_slice %151 {offsets = [0, 32], sizes = [32, 16], strides = [1, 1]} : vector<32x64xbf16> to vector<32x16xbf16>
    %cst_70 = arith.constant dense<0.000000e+00> : vector<24x32xf32>
    %189 = tpu.matmul %186, %187, %cst_70 {dimension_numbers = #tpu.dot_dimension_numbers<[1], [1], [0], [0], [0, 0, 1, 0], [], []>} : vector<24x16xbf16>, vector<32x16xbf16>, vector<24x32xf32> -> vector<24x32xf32>
    %cst_71 = arith.constant 2.500000e-01 : f32
    %190 = vector.broadcast %cst_71 : f32 to vector<24x32xf32>
    %191 = arith.mulf %189, %190 : vector<24x32xf32>
    %cst_72 = arith.constant dense<0xFF800000> : vector<24xf32>
    %192 = vector.multi_reduction <maximumf>, %191, %cst_72 [1] : vector<24x32xf32> to vector<24xf32>
    %193 = vector.shape_cast %192 : vector<24xf32> to vector<24x1xf32>
    %194 = vector.broadcast %193 : vector<24x1xf32> to vector<24x32xf32>
    %195 = arith.subf %191, %194 : vector<24x32xf32>
    %196 = math.exp %195 : vector<24x32xf32>
    %cst_73 = arith.constant dense<0.000000e+00> : vector<24xf32>
    %197 = vector.multi_reduction <add>, %196, %cst_73 [1] : vector<24x32xf32> to vector<24xf32>
    %198 = vector.shape_cast %197 : vector<24xf32> to vector<24x1xf32>
    %199 = vector.broadcast %198 : vector<24x1xf32> to vector<24x32xf32>
    %200 = arith.divf %196, %199 : vector<24x32xf32>
    %201 = arith.truncf %200 : vector<24x32xf32> to vector<24x32xbf16>
    %cst_74 = arith.constant dense<0.000000e+00> : vector<24x16xf32>
    %202 = tpu.matmul %201, %188, %cst_74 {dimension_numbers = #tpu.dot_dimension_numbers<[1], [0], [0], [1], [0, 0, 1, 1], [], []>} : vector<24x32xbf16>, vector<32x16xbf16>, vector<24x16xf32> -> vector<24x16xf32>
    %203 = vector.extract_strided_slice %149 {offsets = [0, 48], sizes = [24, 16], strides = [1, 1]} : vector<24x64xbf16> to vector<24x16xbf16>
    %204 = vector.extract_strided_slice %150 {offsets = [0, 48], sizes = [32, 16], strides = [1, 1]} : vector<32x64xbf16> to vector<32x16xbf16>
    %205 = vector.extract_strided_slice %151 {offsets = [0, 48], sizes = [32, 16], strides = [1, 1]} : vector<32x64xbf16> to vector<32x16xbf16>
    %cst_75 = arith.constant dense<0.000000e+00> : vector<24x32xf32>
    %206 = tpu.matmul %203, %204, %cst_75 {dimension_numbers = #tpu.dot_dimension_numbers<[1], [1], [0], [0], [0, 0, 1, 0], [], []>} : vector<24x16xbf16>, vector<32x16xbf16>, vector<24x32xf32> -> vector<24x32xf32>
    %cst_76 = arith.constant 2.500000e-01 : f32
    %207 = vector.broadcast %cst_76 : f32 to vector<24x32xf32>
    %208 = arith.mulf %206, %207 : vector<24x32xf32>
    %cst_77 = arith.constant dense<0xFF800000> : vector<24xf32>
    %209 = vector.multi_reduction <maximumf>, %208, %cst_77 [1] : vector<24x32xf32> to vector<24xf32>
    %210 = vector.shape_cast %209 : vector<24xf32> to vector<24x1xf32>
    %211 = vector.broadcast %210 : vector<24x1xf32> to vector<24x32xf32>
    %212 = arith.subf %208, %211 : vector<24x32xf32>
    %213 = math.exp %212 : vector<24x32xf32>
    %cst_78 = arith.constant dense<0.000000e+00> : vector<24xf32>
    %214 = vector.multi_reduction <add>, %213, %cst_78 [1] : vector<24x32xf32> to vector<24xf32>
    %215 = vector.shape_cast %214 : vector<24xf32> to vector<24x1xf32>
    %216 = vector.broadcast %215 : vector<24x1xf32> to vector<24x32xf32>
    %217 = arith.divf %213, %216 : vector<24x32xf32>
    %218 = arith.truncf %217 : vector<24x32xf32> to vector<24x32xbf16>
    %cst_79 = arith.constant dense<0.000000e+00> : vector<24x16xf32>
    %219 = tpu.matmul %218, %205, %cst_79 {dimension_numbers = #tpu.dot_dimension_numbers<[1], [0], [0], [1], [0, 0, 1, 1], [], []>} : vector<24x32xbf16>, vector<32x16xbf16>, vector<24x16xf32> -> vector<24x16xf32>
    %220 = tpu.concatenate %168, %185, %202, %219 in 1 : vector<24x16xf32>, vector<24x16xf32>, vector<24x16xf32>, vector<24x16xf32> -> vector<24x64xf32>
    %221 = arith.truncf %220 : vector<24x64xf32> to vector<24x64xbf16>
    %c0_80 = arith.constant 0 : index
    %c0_81 = arith.constant 0 : index
    %222 = vector.load %arg14[%c0_80, %c0_81] : memref<64x64xbf16, #tpu.memory_space<vmem>>, vector<64x64xbf16>
    %cst_82 = arith.constant dense<0.000000e+00> : vector<24x64xf32>
    %223 = tpu.matmul %221, %222, %cst_82 {dimension_numbers = #tpu.dot_dimension_numbers<[1], [0], [0], [1], [0, 0, 1, 1], [], []>} : vector<24x64xbf16>, vector<64x64xbf16>, vector<24x64xf32> -> vector<24x64xf32>
    %c0_83 = arith.constant 0 : index
    %c0_84 = arith.constant 0 : index
    %224 = vector.load %arg15[%c0_83, %c0_84] : memref<1x64xf32, #tpu.memory_space<vmem>>, vector<1x64xf32>
    %225 = vector.broadcast %224 : vector<1x64xf32> to vector<24x64xf32>
    %226 = arith.addf %223, %225 : vector<24x64xf32>
    %227 = arith.addf %134, %226 : vector<24x64xf32>
    %c0_85 = arith.constant 0 : index
    %c0_86 = arith.constant 0 : index
    %228 = vector.load %arg16[%c0_85, %c0_86] : memref<1x64xf32, #tpu.memory_space<vmem>>, vector<1x64xf32>
    %c0_87 = arith.constant 0 : index
    %c0_88 = arith.constant 0 : index
    %229 = vector.load %arg17[%c0_87, %c0_88] : memref<1x64xf32, #tpu.memory_space<vmem>>, vector<1x64xf32>
    %cst_89 = arith.constant dense<0.000000e+00> : vector<24xf32>
    %230 = vector.multi_reduction <add>, %227, %cst_89 [1] : vector<24x64xf32> to vector<24xf32>
    %231 = vector.shape_cast %230 : vector<24xf32> to vector<24x1xf32>
    %cst_90 = arith.constant 6.400000e+01 : f32
    %232 = vector.broadcast %cst_90 : f32 to vector<24x1xf32>
    %233 = arith.divf %231, %232 : vector<24x1xf32>
    %234 = vector.broadcast %233 : vector<24x1xf32> to vector<24x64xf32>
    %235 = arith.subf %227, %234 : vector<24x64xf32>
    %236 = arith.mulf %235, %235 : vector<24x64xf32>
    %cst_91 = arith.constant dense<0.000000e+00> : vector<24xf32>
    %237 = vector.multi_reduction <add>, %236, %cst_91 [1] : vector<24x64xf32> to vector<24xf32>
    %238 = vector.shape_cast %237 : vector<24xf32> to vector<24x1xf32>
    %cst_92 = arith.constant 6.400000e+01 : f32
    %239 = vector.broadcast %cst_92 : f32 to vector<24x1xf32>
    %240 = arith.divf %238, %239 : vector<24x1xf32>
    %241 = vector.broadcast %233 : vector<24x1xf32> to vector<24x64xf32>
    %242 = arith.subf %227, %241 : vector<24x64xf32>
    %cst_93 = arith.constant 9.99999974E-6 : f32
    %243 = vector.broadcast %cst_93 : f32 to vector<24x1xf32>
    %244 = arith.addf %240, %243 : vector<24x1xf32>
    %245 = math.rsqrt %244 : vector<24x1xf32>
    %246 = vector.broadcast %245 : vector<24x1xf32> to vector<24x64xf32>
    %247 = arith.mulf %242, %246 : vector<24x64xf32>
    %248 = vector.broadcast %228 : vector<1x64xf32> to vector<24x64xf32>
    %249 = arith.mulf %247, %248 : vector<24x64xf32>
    %250 = vector.broadcast %229 : vector<1x64xf32> to vector<24x64xf32>
    %251 = arith.addf %249, %250 : vector<24x64xf32>
    %252 = arith.truncf %251 : vector<24x64xf32> to vector<24x64xbf16>
    %c0_94 = arith.constant 0 : index
    %c0_95 = arith.constant 0 : index
    %253 = vector.load %arg18[%c0_94, %c0_95] : memref<64x64xbf16, #tpu.memory_space<vmem>>, vector<64x64xbf16>
    %cst_96 = arith.constant dense<0.000000e+00> : vector<24x64xf32>
    %254 = tpu.matmul %252, %253, %cst_96 {dimension_numbers = #tpu.dot_dimension_numbers<[1], [0], [0], [1], [0, 0, 1, 1], [], []>} : vector<24x64xbf16>, vector<64x64xbf16>, vector<24x64xf32> -> vector<24x64xf32>
    %c0_97 = arith.constant 0 : index
    %c0_98 = arith.constant 0 : index
    %255 = vector.load %arg19[%c0_97, %c0_98] : memref<1x64xf32, #tpu.memory_space<vmem>>, vector<1x64xf32>
    %256 = vector.broadcast %255 : vector<1x64xf32> to vector<24x64xf32>
    %257 = arith.addf %254, %256 : vector<24x64xf32>
    %cst_99 = arith.constant 5.000000e-01 : f32
    %258 = vector.broadcast %cst_99 : f32 to vector<24x64xf32>
    %259 = arith.mulf %258, %257 : vector<24x64xf32>
    %cst_100 = arith.constant 0.707106769 : f32
    %260 = vector.broadcast %cst_100 : f32 to vector<24x64xf32>
    %261 = arith.mulf %257, %260 : vector<24x64xf32>
    %cst_101 = arith.constant 0.000000e+00 : f32
    %262 = vector.broadcast %cst_101 : f32 to vector<24x64xf32>
    %263 = arith.cmpf oge, %261, %262 : vector<24x64xf32>
    %cst_102 = arith.constant 1.000000e+00 : f32
    %cst_103 = arith.constant -1.000000e+00 : f32
    %264 = vector.broadcast %cst_102 : f32 to vector<24x64xf32>
    %265 = vector.broadcast %cst_103 : f32 to vector<24x64xf32>
    %266 = arith.select %263, %264, %265 : vector<24x64xi1>, vector<24x64xf32>
    %267 = math.absf %261 : vector<24x64xf32>
    %cst_104 = arith.constant 0.327591091 : f32
    %268 = vector.broadcast %cst_104 : f32 to vector<24x64xf32>
    %269 = arith.mulf %268, %267 : vector<24x64xf32>
    %cst_105 = arith.constant 1.000000e+00 : f32
    %270 = vector.broadcast %cst_105 : f32 to vector<24x64xf32>
    %271 = arith.addf %270, %269 : vector<24x64xf32>
    %cst_106 = arith.constant 1.000000e+00 : f32
    %272 = vector.broadcast %cst_106 : f32 to vector<24x64xf32>
    %273 = arith.divf %272, %271 : vector<24x64xf32>
    %cst_107 = arith.constant 1.06140542 : f32
    %274 = vector.broadcast %cst_107 : f32 to vector<24x64xf32>
    %275 = arith.mulf %274, %273 : vector<24x64xf32>
    %cst_108 = arith.constant -1.45315206 : f32
    %276 = vector.broadcast %cst_108 : f32 to vector<24x64xf32>
    %277 = arith.addf %275, %276 : vector<24x64xf32>
    %278 = arith.mulf %277, %273 : vector<24x64xf32>
    %cst_109 = arith.constant 1.42141378 : f32
    %279 = vector.broadcast %cst_109 : f32 to vector<24x64xf32>
    %280 = arith.addf %278, %279 : vector<24x64xf32>
    %281 = arith.mulf %280, %273 : vector<24x64xf32>
    %cst_110 = arith.constant -0.284496725 : f32
    %282 = vector.broadcast %cst_110 : f32 to vector<24x64xf32>
    %283 = arith.addf %281, %282 : vector<24x64xf32>
    %284 = arith.mulf %283, %273 : vector<24x64xf32>
    %cst_111 = arith.constant 0.254829586 : f32
    %285 = vector.broadcast %cst_111 : f32 to vector<24x64xf32>
    %286 = arith.addf %284, %285 : vector<24x64xf32>
    %287 = arith.mulf %286, %273 : vector<24x64xf32>
    %cst_112 = arith.constant 0.000000e+00 : f32
    %288 = vector.broadcast %cst_112 : f32 to vector<24x64xf32>
    %289 = arith.subf %288, %267 : vector<24x64xf32>
    %290 = arith.mulf %289, %267 : vector<24x64xf32>
    %291 = math.exp %290 : vector<24x64xf32>
    %292 = arith.mulf %287, %291 : vector<24x64xf32>
    %cst_113 = arith.constant 1.000000e+00 : f32
    %293 = vector.broadcast %cst_113 : f32 to vector<24x64xf32>
    %294 = arith.subf %293, %292 : vector<24x64xf32>
    %295 = arith.mulf %266, %294 : vector<24x64xf32>
    %cst_114 = arith.constant 1.000000e+00 : f32
    %296 = vector.broadcast %cst_114 : f32 to vector<24x64xf32>
    %297 = arith.addf %296, %295 : vector<24x64xf32>
    %298 = arith.mulf %259, %297 : vector<24x64xf32>
    %299 = arith.truncf %298 : vector<24x64xf32> to vector<24x64xbf16>
    %c0_115 = arith.constant 0 : index
    %c0_116 = arith.constant 0 : index
    %300 = vector.load %arg20[%c0_115, %c0_116] : memref<64x64xbf16, #tpu.memory_space<vmem>>, vector<64x64xbf16>
    %cst_117 = arith.constant dense<0.000000e+00> : vector<24x64xf32>
    %301 = tpu.matmul %299, %300, %cst_117 {dimension_numbers = #tpu.dot_dimension_numbers<[1], [0], [0], [1], [0, 0, 1, 1], [], []>} : vector<24x64xbf16>, vector<64x64xbf16>, vector<24x64xf32> -> vector<24x64xf32>
    %c0_118 = arith.constant 0 : index
    %c0_119 = arith.constant 0 : index
    %302 = vector.load %arg21[%c0_118, %c0_119] : memref<1x64xf32, #tpu.memory_space<vmem>>, vector<1x64xf32>
    %303 = vector.broadcast %302 : vector<1x64xf32> to vector<24x64xf32>
    %304 = arith.addf %301, %303 : vector<24x64xf32>
    %305 = arith.addf %251, %304 : vector<24x64xf32>
    %c0_120 = arith.constant 0 : index
    %c0_121 = arith.constant 0 : index
    %306 = vector.load %arg22[%c0_120, %c0_121] : memref<1x64xf32, #tpu.memory_space<vmem>>, vector<1x64xf32>
    %c0_122 = arith.constant 0 : index
    %c0_123 = arith.constant 0 : index
    %307 = vector.load %arg23[%c0_122, %c0_123] : memref<1x64xf32, #tpu.memory_space<vmem>>, vector<1x64xf32>
    %cst_124 = arith.constant dense<0.000000e+00> : vector<24xf32>
    %308 = vector.multi_reduction <add>, %305, %cst_124 [1] : vector<24x64xf32> to vector<24xf32>
    %309 = vector.shape_cast %308 : vector<24xf32> to vector<24x1xf32>
    %cst_125 = arith.constant 6.400000e+01 : f32
    %310 = vector.broadcast %cst_125 : f32 to vector<24x1xf32>
    %311 = arith.divf %309, %310 : vector<24x1xf32>
    %312 = vector.broadcast %311 : vector<24x1xf32> to vector<24x64xf32>
    %313 = arith.subf %305, %312 : vector<24x64xf32>
    %314 = arith.mulf %313, %313 : vector<24x64xf32>
    %cst_126 = arith.constant dense<0.000000e+00> : vector<24xf32>
    %315 = vector.multi_reduction <add>, %314, %cst_126 [1] : vector<24x64xf32> to vector<24xf32>
    %316 = vector.shape_cast %315 : vector<24xf32> to vector<24x1xf32>
    %cst_127 = arith.constant 6.400000e+01 : f32
    %317 = vector.broadcast %cst_127 : f32 to vector<24x1xf32>
    %318 = arith.divf %316, %317 : vector<24x1xf32>
    %319 = vector.broadcast %311 : vector<24x1xf32> to vector<24x64xf32>
    %320 = arith.subf %305, %319 : vector<24x64xf32>
    %cst_128 = arith.constant 9.99999974E-6 : f32
    %321 = vector.broadcast %cst_128 : f32 to vector<24x1xf32>
    %322 = arith.addf %318, %321 : vector<24x1xf32>
    %323 = math.rsqrt %322 : vector<24x1xf32>
    %324 = vector.broadcast %323 : vector<24x1xf32> to vector<24x64xf32>
    %325 = arith.mulf %320, %324 : vector<24x64xf32>
    %326 = vector.broadcast %306 : vector<1x64xf32> to vector<24x64xf32>
    %327 = arith.mulf %325, %326 : vector<24x64xf32>
    %328 = vector.broadcast %307 : vector<1x64xf32> to vector<24x64xf32>
    %329 = arith.addf %327, %328 : vector<24x64xf32>
    %c0_129 = arith.constant 0 : index
    %c0_130 = arith.constant 0 : index
    %c0_131 = arith.constant 0 : index
    %330 = vector.load %arg24[%c0_129, %c0_130, %c0_131] : memref<1x24x64xf32, #tpu.memory_space<vmem>>, vector<1x24x64xf32>
    %331 = vector.shape_cast %330 : vector<1x24x64xf32> to vector<24x64xf32>
    %332 = vector.shape_cast %329 : vector<24x64xf32> to vector<1x24x64xf32>
    tpu.vector_store %arg24[%c0_129, %c0_130, %c0_131], %332 {strides = array<i32>} : memref<1x24x64xf32, #tpu.memory_space<vmem>>, vector<1x24x64xf32>,
    return
  }
  func.func @transform_0(%arg0: i32) -> (i32, i32, i32) {
    %c0_i32 = arith.constant 0 : i32
    %c0_i32_0 = arith.constant 0 : i32
    %c0_i32_1 = arith.constant 0 : i32
    return %arg0, %c0_i32, %c0_i32_0 : i32, i32, i32
  }
  func.func @transform_1(%arg0: i32) -> (i32, i32, i32) {
    %c0_i32 = arith.constant 0 : i32
    %c0_i32_0 = arith.constant 0 : i32
    %c0_i32_1 = arith.constant 0 : i32
    return %arg0, %c0_i32, %c0_i32_0 : i32, i32, i32
  }
  func.func @transform_2(%arg0: i32) -> (i32, i32) {
    %c0_i32 = arith.constant 0 : i32
    %c0_i32_0 = arith.constant 0 : i32
    %c0_i32_1 = arith.constant 0 : i32
    return %c0_i32, %c0_i32_0 : i32, i32
  }
  func.func @transform_3(%arg0: i32) -> (i32, i32) {
    %c0_i32 = arith.constant 0 : i32
    %c0_i32_0 = arith.constant 0 : i32
    %c0_i32_1 = arith.constant 0 : i32
    return %c0_i32, %c0_i32_0 : i32, i32
  }
  func.func @transform_4(%arg0: i32) -> (i32, i32) {
    %c0_i32 = arith.constant 0 : i32
    %c0_i32_0 = arith.constant 0 : i32
    %c0_i32_1 = arith.constant 0 : i32
    return %c0_i32, %c0_i32_0 : i32, i32
  }
  func.func @transform_5(%arg0: i32) -> (i32, i32) {
    %c0_i32 = arith.constant 0 : i32
    %c0_i32_0 = arith.constant 0 : i32
    %c0_i32_1 = arith.constant 0 : i32
    return %c0_i32, %c0_i32_0 : i32, i32
  }
  func.func @transform_6(%arg0: i32) -> (i32, i32) {
    %c0_i32 = arith.constant 0 : i32
    %c0_i32_0 = arith.constant 0 : i32
    %c0_i32_1 = arith.constant 0 : i32
    return %c0_i32, %c0_i32_0 : i32, i32
  }
  func.func @transform_7(%arg0: i32) -> (i32, i32) {
    %c0_i32 = arith.constant 0 : i32
    %c0_i32_0 = arith.constant 0 : i32
    %c0_i32_1 = arith.constant 0 : i32
    return %c0_i32, %c0_i32_0 : i32, i32
  }
  func.func @transform_8(%arg0: i32) -> (i32, i32) {
    %c0_i32 = arith.constant 0 : i32
    %c0_i32_0 = arith.constant 0 : i32
    %c0_i32_1 = arith.constant 0 : i32
    return %c0_i32, %c0_i32_0 : i32, i32
  }
  func.func @transform_9(%arg0: i32) -> (i32, i32) {
    %c0_i32 = arith.constant 0 : i32
    %c0_i32_0 = arith.constant 0 : i32
    %c0_i32_1 = arith.constant 0 : i32
    return %c0_i32, %c0_i32_0 : i32, i32
  }
  func.func @transform_10(%arg0: i32) -> (i32, i32) {
    %c0_i32 = arith.constant 0 : i32
    %c0_i32_0 = arith.constant 0 : i32
    %c0_i32_1 = arith.constant 0 : i32
    return %c0_i32, %c0_i32_0 : i32, i32
  }
  func.func @transform_11(%arg0: i32) -> (i32, i32) {
    %c0_i32 = arith.constant 0 : i32
    %c0_i32_0 = arith.constant 0 : i32
    %c0_i32_1 = arith.constant 0 : i32
    return %c0_i32, %c0_i32_0 : i32, i32
  }
  func.func @transform_12(%arg0: i32) -> (i32, i32) {
    %c0_i32 = arith.constant 0 : i32
    %c0_i32_0 = arith.constant 0 : i32
    %c0_i32_1 = arith.constant 0 : i32
    return %c0_i32, %c0_i32_0 : i32, i32
  }
  func.func @transform_13(%arg0: i32) -> (i32, i32) {
    %c0_i32 = arith.constant 0 : i32
    %c0_i32_0 = arith.constant 0 : i32
    %c0_i32_1 = arith.constant 0 : i32
    return %c0_i32, %c0_i32_0 : i32, i32
  }
  func.func @transform_14(%arg0: i32) -> (i32, i32) {
    %c0_i32 = arith.constant 0 : i32
    %c0_i32_0 = arith.constant 0 : i32
    %c0_i32_1 = arith.constant 0 : i32
    return %c0_i32, %c0_i32_0 : i32, i32
  }
  func.func @transform_15(%arg0: i32) -> (i32, i32) {
    %c0_i32 = arith.constant 0 : i32
    %c0_i32_0 = arith.constant 0 : i32
    %c0_i32_1 = arith.constant 0 : i32
    return %c0_i32, %c0_i32_0 : i32, i32
  }
  func.func @transform_16(%arg0: i32) -> (i32, i32) {
    %c0_i32 = arith.constant 0 : i32
    %c0_i32_0 = arith.constant 0 : i32
    %c0_i32_1 = arith.constant 0 : i32
    return %c0_i32, %c0_i32_0 : i32, i32
  }
  func.func @transform_17(%arg0: i32) -> (i32, i32) {
    %c0_i32 = arith.constant 0 : i32
    %c0_i32_0 = arith.constant 0 : i32
    %c0_i32_1 = arith.constant 0 : i32
    return %c0_i32, %c0_i32_0 : i32, i32
  }
  func.func @transform_18(%arg0: i32) -> (i32, i32) {
    %c0_i32 = arith.constant 0 : i32
    %c0_i32_0 = arith.constant 0 : i32
    %c0_i32_1 = arith.constant 0 : i32
    return %c0_i32, %c0_i32_0 : i32, i32
  }
  func.func @transform_19(%arg0: i32) -> (i32, i32) {
    %c0_i32 = arith.constant 0 : i32
    %c0_i32_0 = arith.constant 0 : i32
    %c0_i32_1 = arith.constant 0 : i32
    return %c0_i32, %c0_i32_0 : i32, i32
  }
  func.func @transform_20(%arg0: i32) -> (i32, i32) {
    %c0_i32 = arith.constant 0 : i32
    %c0_i32_0 = arith.constant 0 : i32
    %c0_i32_1 = arith.constant 0 : i32
    return %c0_i32, %c0_i32_0 : i32, i32
  }
  func.func @transform_21(%arg0: i32) -> (i32, i32) {
    %c0_i32 = arith.constant 0 : i32
    %c0_i32_0 = arith.constant 0 : i32
    %c0_i32_1 = arith.constant 0 : i32
    return %c0_i32, %c0_i32_0 : i32, i32
  }
  func.func @transform_22(%arg0: i32) -> (i32, i32) {
    %c0_i32 = arith.constant 0 : i32
    %c0_i32_0 = arith.constant 0 : i32
    %c0_i32_1 = arith.constant 0 : i32
    return %c0_i32, %c0_i32_0 : i32, i32
  }
  func.func @transform_23(%arg0: i32) -> (i32, i32, i32) {
    %c0_i32 = arith.constant 0 : i32
    %c0_i32_0 = arith.constant 0 : i32
    %c0_i32_1 = arith.constant 0 : i32
    return %arg0, %c0_i32, %c0_i32_0 : i32, i32, i32
  }
}

</mosaic_0001>

<bundles_post_ra>
// kernel: informer_stack_forward.8
= control target key start
LH: loop header
LB: loop body
LE: loop exit
PB: predicated region body
PF: predicated region fallthrough
CT: control target
= control target key end

     0   :  { %s553_s15 = smov 0   ;;  %s599_s0 = inlined_call_operand.vmem [shape: f32[2,32,7], index: 0, kind: input, shape index: {}]   ;;  %s600_s1 = inlined_call_operand.vmem [shape: f32[2,32,64], index: 1, kind: input, shape index: {}]   ;;  %s601_s2 = inlined_call_operand.vmem [shape: bf16[21,64], index: 2, kind: input, shape index: {}]   ;;  %s602_s3 = inlined_call_operand.vmem [shape: f32[1,64], index: 3, kind: input, shape index: {}]   ;;  %s603_s4 = inlined_call_operand.vmem [shape: f32[2,32,64], index: 4, kind: output, shape index: {}]  }
   0x1 LB: > { %s451_s16 = sadd.s32 4294967295, %s523_s15   ;;  %p455_p0 = scmp.ge.s32.totalorder %s523_s15, 1  ;;  %s523_s15 = sphi %s553_s15, %s14_s15  }
   0x2   : > { %p172_p1 = scmp.lt.s32.totalorder %s523_s15, 3 }
   0x4   : > { %p173_p2 = pnand %p455_p0, %p172_p1 }
   0x5   : > { %p203_p3 = scmp.lt.s32.totalorder (!%p173_p2), %s451_s16, 1  ;;  %v515_v0 = vld [vmem:[%s601_s2] sm:$0xff] (!%p173_p2)   ;;  %v516_v1 = vld [vmem:[%s601_s2 + $0x8] ss:$0 sps:$4 sm:$0x77] (!%p173_p2)   ;;  %vm315_vm0 = vcmask (!%p173_p2), 1041408  }
   0x6   : > { %176 = sbr.rel (%p173_p2) target bundleno = 367 (0x16f), region = 36  ;;  %476 = vmatprep.subr.bf16.mxu0 (!%p173_p2), %v515_v0  ;;  %vm316_vm1 = vcmask (!%p173_p2), 1042432   ;;  %v525_v2 = vmov (!%p173_p2), 65535   ;;  %vm241_vm2 = vcmask (!%p173_p2), 1046528   ;;  %vm229_vm3 = vcmask (!%p173_p2), 1040384   ;;  %s526_s25 = smov (!%p173_p2), 7  }
   0x7   : > { %477 = vmatpush3.bf16.msra.mxu0 (!%p173_p2), %v515_v0  ;;  %v317_v3 = vsel (!%p173_p2), %vm315_vm0, 4294967295, %v525_v2  ;;  %s527_s26 = smov (!%p173_p2), 14   ;;  %vm277_vm4 = vcmask (!%p173_p2), 56320   ;;  %vm282_vm5 = vcmask (!%p173_p2), 113664   ;;  %vm308_vm6 = vcmask (!%p173_p2), 171008  }
   0x8   : > { %v318_v4 = vsel (!%p173_p2), %vm316_vm1, %v317_v3, 0  ;;  %v462_v52 = vld [vmem:[%s602_s3] ss:$0 sm:$0xff] (!%p173_p2)  ;;  %vm379_vm7 = vcmask (!%p173_p2), 523264  }
   0x9   : > { %v320_v8 = vand.u32 (!%p173_p2), %v516_v1, %v318_v4 }
   0xb   : > { %478 = vmatprep.subr.bf16.mxu0 (!%p173_p2), %v320_v8 }
   0xc   : > { %479 = vmatpush3.bf16.msra.mxu0 (!%p173_p2), %v320_v8 }
   0xd   : > { %s605_s16 = smov (!%p203_p3, %s451_s16), 1 }
   0xe   : > { %s567_s21 = sshll.u32 %s605_s16, 5 }
   0xf   : > { %s207_s24 = scalar_lea.vmem %s599_s0, %s567_s21  ;;  %s212_s29 = scalar_lea.vmem %s600_s1, %s567_s21 }
  0x10   : > { %v219_v5 = vld [vmem:[%s207_s24] sm:$0xff]  ;;  %v220_v6 = vld [vmem:[%s207_s24 + $0x8] sm:$0xff]  ;;  %v221_v7 = vld [vmem:[%s207_s24 + $0x10] sm:$0xff]  ;;  %s217_s8 = scalar_lea.vmem %s603_s4, %s567_s21 }
  0x11   : > { %v231_v9 = vrot.slane %v220_v6, 7  ;;  %v243_v10 = vrot.slane %v220_v6, 1  ;;  %v495_v11 = vpack.i.bf16 %v220_v6, %v219_v5  ;;  %v230_v12 = vrot.slane %v219_v5, 7  ;;  %v222_v13 = vld [vmem:[%s207_s24 + $0x18] sm:$0xff]  ;;  %v373_v54 = vld [vmem:[%s212_s29 + $0x10] sm:$0xff]  ;;  %v371_v57 = vld [vmem:[%s212_s29] sm:$0xff] }
  0x12   : > { %v242_v14 = vrot.slane %v219_v5, 1  ;;  %v233_v15 = vrot.slane %v221_v7, 7  ;;  %v245_v16 = vrot.slane %v221_v7, 1  ;;  %v224_v17 = vrot.slane %v222_v13, 7  ;;  %v374_v60 = vld [vmem:[%s212_s29 + $0x18] sm:$0xff]  ;;  %v372_v0 = vld [vmem:[%s212_s29 + $0x8] sm:$0xff] }
  0x13   : > { %496 = vrot.lane.b32.xlu0 %v495_v11, %s526_s25  ;;  %v247_v18 = vrot.slane %v222_v13, 1  ;;  %v500_v19 = vpack.i.bf16 %v222_v13, %v221_v7  ;;  %v232_v20 = vsel %vm229_vm3, %v230_v12, %v231_v9 }
  0x14   : > { %v244_v21 = vsel %vm241_vm2, %v242_v14, %v243_v10  ;;  %v246_v22 = vsel %vm241_vm2, %v243_v10, %v245_v16  ;;  %v234_v23 = vsel %vm229_vm3, %v231_v9, %v233_v15  ;;  %v235_v24 = vsel %vm229_vm3, %v233_v15, %v224_v17 }
  0x15   : > { %v505_v25 = vpack.i.bf16 %v246_v22, %v244_v21  ;;  %v248_v26 = vsel %vm241_vm2, %v245_v16, %v247_v18  ;;  %v251_v27 = vsel %vm241_vm2, %v247_v18, %v242_v14  ;;  %v240_v28 = vsel %vm229_vm3, %v224_v17, %v230_v12 }
  0x16   : > { %v510_v29 = vpack.i.bf16 %v251_v27, %v248_v26 }
  0x17   : > { %506 = vrot.lane.b32.xlu1 %v505_v25, %s527_s26  ;;  %501 = vrot.lane.b32.xlu0 %v500_v19, %s526_s25 }
  0x1b   : > { %511 = vrot.lane.b32.xlu1 %v510_v29, %s527_s26 }
  0x85   : > { %v497_v30 = vpop.permute.xlu0 %496 }
  0x86   : > { %v499_v31 = vunpack.i.h.bf16 %v497_v30  ;;  %v498_v32 = vunpack.i.l.bf16 %v497_v30 }
  0x88   : > { %v278_v35 = vsel %vm277_vm4, %v240_v28, %v498_v32  ;;  %v279_v36 = vsel %vm277_vm4, %v232_v20, %v499_v31 }
  0x89   : > { %v507_v33 = vpop.permute.xlu1 %506  ;;  %v502_v34 = vpop.permute.xlu0 %501 }
  0x8a   : > { %v509_v37 = vunpack.i.h.bf16 %v507_v33  ;;  %v508_v38 = vunpack.i.l.bf16 %v507_v33  ;;  %v504_v39 = vunpack.i.h.bf16 %v502_v34  ;;  %v503_v40 = vunpack.i.l.bf16 %v502_v34 }
  0x8c   : > { %v283_v41 = vsel %vm282_vm5, %v278_v35, %v508_v38  ;;  %v284_v42 = vsel %vm282_vm5, %v279_v36, %v509_v37  ;;  %v281_v43 = vsel %vm277_vm4, %v235_v24, %v504_v39  ;;  %v280_v44 = vsel %vm277_vm4, %v234_v23, %v503_v40 }
  0x8d   : > { %v512_v45 = vpop.permute.xlu1 %511  ;;  %v287_v46 = vpack.c.bf16 %v284_v42, %v283_v41 }
  0x8e   : > { %v514_v47 = vunpack.i.h.bf16 %v512_v45  ;;  %v513_v48 = vunpack.i.l.bf16 %v512_v45 }
  0x8f   : > { %480 = vmatprep.mubr.msk.bf16.mxu0 %vm308_vm6, %v287_v46 }
  0x90   : > { %v286_v49 = vsel %vm282_vm5, %v281_v43, %v514_v47  ;;  %v285_v50 = vsel %vm282_vm5, %v280_v44, %v513_v48 }
  0x91   : > { %v288_v51 = vpack.c.bf16 %v286_v49, %v285_v50 }
  0x93   : > { %481 = vmatmul.mubr.msk.bf16.vlgmr.msra.gmra.mrb[0].mxu0 %vm308_vm6, %v288_v51 }
 0x166   : > { %v482_v53 = vpop.f32.mrb[0].mxu0 }
 0x167   : > { %v365_v55 = vadd.f32 %v482_v53, %v462_v52  ;;  %v356_v56 = vpop.f32.mrb[1].mxu0 }
 0x168   : > { %v357_v58 = vadd.f32 %v462_v52, %v356_v56  ;;  %v483_v59 = vpop.f32.mrb[2].mxu0 }
 0x169   : > { %v377_v61 = vadd.f32 %v373_v54, %v365_v55  ;;  %v368_v62 = vadd.f32 %v483_v59, %v462_v52  ;;  %v359_v63 = vpop.f32.mrb[3].mxu0 }
 0x16a   : > { %v375_v1 = vadd.f32 %v371_v57, %v357_v58  ;;  %v360_v2 = vadd.f32 %v462_v52, %v359_v63 }
 0x16b   : > { %382 = vst.msk [vmem:[%s217_s8 + $0x10] sm:$0xff] %vm379_vm7, %v377_v61  ;;  %v378_v3 = vadd.f32 %v374_v60, %v368_v62 }
 0x16c   : > { %380 = vst.msk [vmem:[%s217_s8] sm:$0xff] %vm379_vm7, %v375_v1  ;;  %v376_v4 = vadd.f32 %v372_v0, %v360_v2 }
 0x16d   : > { %383 = vst.msk [vmem:[%s217_s8 + $0x18] sm:$0xff] %vm379_vm7, %v378_v3 }
 0x16e   : > { %381 = vst.msk [vmem:[%s217_s8 + $0x8] sm:$0xff] %vm379_vm7, %v376_v4 }
 0x16f PF: > { %s14_s15 = sadd.s32 1, %s523_s15  }
 0x170   : > { %p11_p4 = scmp.ge.s32.totalorder %s14_s15, 4  }
 0x172   :  { %13 = sbr.rel (!%p11_p4) target bundleno = 1 (0x1), region = 69 }

// kernel: informer_stack_forward.10
= control target key start
LH: loop header
LB: loop body
LE: loop exit
PB: predicated region body
PF: predicated region fallthrough
CT: control target
= control target key end

     0   :  { %v925_v3 = vmov 0   ;;  %vm73_vm0 = vcmask 1046528   ;;  %vm61_vm1 = vcmask 1040384   ;;  %s926_s15 = smov 64   ;;  %vm99_vm2 = vcmask 523264   ;;  %s1289_s0 = inlined_call_operand.vmem [shape: f32[2,32,64], index: 0, kind: input, shape index: {}]   ;;  %s1290_s1 = inlined_call_operand.vmem [shape: bf16[192,64], index: 1, kind: input, shape index: {}]   ;;  %s1291_s5 = inlined_call_operand.vmem [shape: f32[16,32], index: 5, kind: input, shape index: {}]   ;;  %s1292_s2 = inlined_call_operand.vmem [shape: f32[1,64], index: 2, kind: input, shape index: {}]   ;;  %s1293_s3 = inlined_call_operand.vmem [shape: f32[1,64], index: 3, kind: input, shape index: {}]   ;;  %s1294_s4 = inlined_call_operand.vmem [shape: f32[1,64], index: 4, kind: input, shape index: {}]   ;;  %s1295_s6 = inlined_call_operand.vmem [shape: f32[2,16,64], index: 6, kind: output, shape index: {}]  }
   0x1   :  { %v51_v0 = vld [vmem:[%s1289_s0] sm:$0xff]  ;;  %v52_v1 = vld [vmem:[%s1289_s0 + $0x8] sm:$0xff]  ;;  %192 = vmatprep.subr.bf16.mxu0 %v925_v3  ;;  %334 = vmatprep.subr.bf16.mxu1 %v925_v3  ;;  %v53_v9 = vld [vmem:[%s1289_s0 + $0x10] sm:$0xff]  ;;  %vm544_vm3 = vcmask 261120  }
   0x2   :  { %v971_v2 = vld [vmem:[%s1289_s0 + $0x20] sm:$0xff]  ;;  %v63_v4 = vrot.slane %v52_v1, 7  ;;  %v75_v5 = vrot.slane %v52_v1, 1  ;;  %v875_v6 = vpack.i.bf16 %v52_v1, %v51_v0  ;;  %v62_v7 = vrot.slane %v51_v0, 7  ;;  %v804_v8 = vld [vmem:[%s1289_s0 + $0x28] sm:$0xff]  ;;  %v54_v10 = vld [vmem:[%s1289_s0 + $0x18] sm:$0xff] }
   0x3   :  { %v74_v11 = vrot.slane %v51_v0, 1  ;;  %v285_v12 = vrot.slane %v804_v8, 7  ;;  %v880_v13 = vpack.i.bf16 %v804_v8, %v971_v2  ;;  %v284_v14 = vrot.slane %v971_v2, 7  ;;  %v805_v15 = vld [vmem:[%s1289_s0 + $0x30] sm:$0xff]  ;;  %v806_v16 = vld [vmem:[%s1289_s0 + $0x38] sm:$0xff]  ;;  %v895_v17 = vld [vmem:[%s1290_s1] sm:$0xff]  }
   0x4   :  { %876 = vrot.lane.b32.xlu0 %v875_v6, %s926_s15  ;;  %v56_v18 = vrot.slane %v54_v10, 7  ;;  %v79_v19 = vrot.slane %v54_v10, 1  ;;  %v885_v20 = vpack.i.bf16 %v54_v10, %v53_v9  ;;  %v65_v21 = vrot.slane %v53_v9, 7  ;;  %193 = vmatpush1.bf16.msra.mxu0 %v895_v17  ;;  %v896_v26 = vld [vmem:[%s1290_s1 + $0x8] sm:$0xff]   ;;  %v897_v39 = vld [vmem:[%s1290_s1 + $0x10] sm:$0xff]   ;;  %v898_v48 = vld [vmem:[%s1290_s1 + $0x18] sm:$0xff]  }
   0x5   :  { %v77_v22 = vrot.slane %v53_v9, 1  ;;  %v279_v23 = vrot.slane %v806_v16, 7  ;;  %v300_v24 = vrot.slane %v806_v16, 1  ;;  %v890_v25 = vpack.i.bf16 %v806_v16, %v805_v15  ;;  %335 = vmatpush1.bf16.msra.mxu1 %v895_v17  ;;  %194 = vmatprep.subr.bf16.mxu0 %v925_v3  ;;  %v899_v53 = vld [vmem:[%s1290_s1 + $0x20] sm:$0xff]   ;;  %v900_v54 = vld [vmem:[%s1290_s1 + $0x28] sm:$0xff]   ;;  %v901_v55 = vld [vmem:[%s1290_s1 + $0x30] sm:$0xff]  }
   0x6   :  { %886 = vrot.lane.b32.xlu1 %v885_v20, %s926_s15  ;;  %v287_v27 = vrot.slane %v805_v15, 7  ;;  %v76_v28 = vsel %vm73_vm0, %v74_v11, %v75_v5  ;;  %v1003_v29 = vsel %vm61_vm1, %v62_v7, %v63_v4  ;;  %v1006_v30 = vsel %vm61_vm1, %v56_v18, %v62_v7  ;;  %336 = vmatprep.subr.bf16.mxu1 %v925_v3  ;;  %v902_v56 = vld [vmem:[%s1290_s1 + $0x38] sm:$0xff]   ;;  %v903_v57 = vld [vmem:[%s1290_s1 + $0x40] sm:$0xff]   ;;  %v904_v58 = vld [vmem:[%s1290_s1 + $0x48] sm:$0xff]  }
   0x7   :  { %v78_v31 = vsel %vm73_vm0, %v75_v5, %v77_v22  ;;  %v1011_v32 = vsel %vm61_vm1, %v284_v14, %v285_v12  ;;  %v1014_v33 = vsel %vm61_vm1, %v279_v23, %v284_v14  ;;  %v1017_v34 = vsel %vm73_vm0, %v77_v22, %v79_v19  ;;  %v905_v59 = vld [vmem:[%s1290_s1 + $0x50] sm:$0xff]   ;;  %v906_v60 = vld [vmem:[%s1290_s1 + $0x58] sm:$0xff]   ;;  %v788_v22 = vld [vmem:[%s1292_s2] ss:$0 sm:$0xff] }
   0x8   :  { %881 = vrot.lane.b32.xlu0 %v880_v13, %s926_s15  ;;  %v105_v35 = vpack.c.bf16 %v78_v31, %v76_v28  ;;  %v1021_v36 = vsel %vm73_vm0, %v79_v19, %v74_v11  ;;  %v1024_v37 = vsel %vm61_vm1, %v63_v4, %v65_v21  ;;  %v1027_v38 = vsel %vm61_vm1, %v65_v21, %v56_v18  ;;  %v49_v21 = vld [vmem:[%s1291_s5] sm:$0xff] }
   0x9   :  { %195 = vmatpush1.bf16.msra.mxu0 %v896_v26  ;;  %337 = vmatpush1.bf16.msra.mxu1 %v896_v26  ;;  %v295_v40 = vrot.slane %v971_v2, 1  ;;  %v107_v41 = vpack.c.bf16 %v1021_v36, %v1017_v34  ;;  %v1036_v42 = vsel %vm61_vm1, %v285_v12, %v287_v27  ;;  %v1039_v43 = vsel %vm61_vm1, %v287_v27, %v279_v23 }
   0xa   :  { %891 = vrot.lane.b32.xlu1 %v890_v25, %s926_s15  ;;  %196 = vmatprep.subr.bf16.mxu0 %v925_v3  ;;  %v296_v44 = vrot.slane %v804_v8, 1  ;;  %v298_v45 = vrot.slane %v805_v15, 1 }
   0xb   :  { %338 = vmatprep.subr.bf16.mxu1 %v925_v3  ;;  %801 = vmatprep.mubr.msk.bf16.mxu0 %vm99_vm2, %v105_v35  ;;  %v1046_v46 = vsel %vm73_vm0, %v300_v24, %v295_v40 }
   0xc   :  { %v297_v47 = vsel %vm73_vm0, %v295_v40, %v296_v44  ;;  %v299_v49 = vsel %vm73_vm0, %v296_v44, %v298_v45  ;;  %v1054_v50 = vsel %vm73_vm0, %v298_v45, %v300_v24 }
   0xd   :  { %197 = vmatpush1.bf16.msra.mxu0 %v897_v39  ;;  %339 = vmatpush1.bf16.msra.mxu1 %v897_v39  ;;  %v325_v51 = vpack.c.bf16 %v299_v49, %v297_v47  ;;  %v327_v52 = vpack.c.bf16 %v1046_v46, %v1054_v50 }
   0xe   :  { %198 = vmatprep.subr.bf16.mxu0 %v925_v3  ;;  %340 = vmatprep.subr.bf16.mxu1 %v925_v3 }
   0xf   :  { %807 = vmatprep.mubr.msk.bf16.mxu1 %vm99_vm2, %v325_v51 }
  0x11   :  { %199 = vmatpush1.bf16.msra.mxu0 %v898_v48  ;;  %341 = vmatpush1.bf16.msra.mxu1 %v898_v48 }
  0x12   :  { %200 = vmatprep.subr.bf16.mxu0 %v925_v3  ;;  %342 = vmatprep.subr.bf16.mxu1 %v925_v3 }
  0x15   :  { %201 = vmatpush1.bf16.msra.mxu0 %v899_v53  ;;  %343 = vmatpush1.bf16.msra.mxu1 %v899_v53 }
  0x16   :  { %202 = vmatprep.subr.bf16.mxu0 %v925_v3  ;;  %344 = vmatprep.subr.bf16.mxu1 %v925_v3 }
  0x19   :  { %203 = vmatpush1.bf16.msra.mxu0 %v900_v54  ;;  %345 = vmatpush1.bf16.msra.mxu1 %v900_v54 }
  0x1a   :  { %204 = vmatprep.subr.bf16.mxu0 %v925_v3  ;;  %346 = vmatprep.subr.bf16.mxu1 %v925_v3 }
  0x1d   :  { %205 = vmatpush1.bf16.msra.mxu0 %v901_v55  ;;  %347 = vmatpush1.bf16.msra.mxu1 %v901_v55 }
  0x1e   :  { %206 = vmatprep.subr.bf16.mxu0 %v925_v3  ;;  %348 = vmatprep.subr.bf16.mxu1 %v925_v3 }
  0x21   :  { %207 = vmatpush1.bf16.msra.mxu0 %v902_v56  ;;  %349 = vmatpush1.bf16.msra.mxu1 %v902_v56 }
  0x22   :  { %208 = vmatprep.subr.bf16.mxu0 %v925_v3  ;;  %350 = vmatprep.subr.bf16.mxu1 %v925_v3 }
  0x25   :  { %209 = vmatpush1.bf16.msra.mxu0 %v903_v57  ;;  %351 = vmatpush1.bf16.msra.mxu1 %v903_v57 }
  0x26   :  { %210 = vmatprep.subr.bf16.mxu0 %v925_v3  ;;  %352 = vmatprep.subr.bf16.mxu1 %v925_v3 }
  0x29   :  { %211 = vmatpush1.bf16.msra.mxu0 %v904_v58  ;;  %353 = vmatpush1.bf16.msra.mxu1 %v904_v58 }
  0x2a   :  { %212 = vmatprep.subr.bf16.mxu0 %v925_v3  ;;  %354 = vmatprep.subr.bf16.mxu1 %v925_v3 }
  0x2d   :  { %213 = vmatpush1.bf16.msra.mxu0 %v905_v59  ;;  %355 = vmatpush1.bf16.msra.mxu1 %v905_v59 }
  0x2e   :  { %214 = vmatprep.subr.bf16.mxu0 %v925_v3  ;;  %356 = vmatprep.subr.bf16.mxu1 %v925_v3 }
  0x31   :  { %215 = vmatpush1.bf16.msra.mxu0 %v906_v60  ;;  %357 = vmatpush1.bf16.msra.mxu1 %v906_v60 }
  0x76   :  { %v877_v61 = vpop.permute.xlu0 %876 }
  0x77   :  { %v879_v62 = vunpack.i.h.bf16 %v877_v61  ;;  %v878_v63 = vunpack.i.l.bf16 %v877_v61 }
  0x78   :  { %v887_v0 = vpop.permute.xlu1 %886 }
  0x79   :  { %v100_v1 = vsel %vm99_vm2, %v1006_v30, %v878_v63  ;;  %v101_v2 = vsel %vm99_vm2, %v1003_v29, %v879_v62  ;;  %v889_v4 = vunpack.i.h.bf16 %v887_v0  ;;  %v888_v5 = vunpack.i.l.bf16 %v887_v0 }
  0x7a   :  { %v882_v6 = vpop.permute.xlu0 %881  ;;  %v104_v7 = vpack.c.bf16 %v101_v2, %v100_v1 }
  0x7b   :  { %v884_v8 = vunpack.i.h.bf16 %v882_v6  ;;  %v883_v9 = vunpack.i.l.bf16 %v882_v6  ;;  %v102_v3 = vsel %vm99_vm2, %v1024_v37, %v888_v5  ;;  %v103_v10 = vsel %vm99_vm2, %v1027_v38, %v889_v4 }
  0x7c   :  { %225 = vmatmul.mubr.bf16.vlgmr.msra.gmra.mrb[0].mxu0 %v104_v7  ;;  %v892_v11 = vpop.permute.xlu1 %891  ;;  %v106_v12 = vpack.c.bf16 %v103_v10, %v102_v3 }
  0x7d   :  { %v320_v13 = vsel %vm99_vm2, %v1014_v33, %v883_v9  ;;  %v321_v14 = vsel %vm99_vm2, %v1011_v32, %v884_v8  ;;  %v894_v15 = vunpack.i.h.bf16 %v892_v11  ;;  %v893_v16 = vunpack.i.l.bf16 %v892_v11  ;;  %802 = vmatprep.mubr.msk.bf16.mxu0 %vm99_vm2, %v107_v41 }
  0x7e   :  { %v324_v17 = vpack.c.bf16 %v321_v14, %v320_v13 }
  0x7f   :  { %v322_v18 = vsel %vm99_vm2, %v1036_v42, %v893_v16  ;;  %v323_v19 = vsel %vm99_vm2, %v1039_v43, %v894_v15 }
  0x80   :  { %367 = vmatmul.mubr.bf16.vlgmr.msra.gmra.mrb[0].mxu1 %v324_v17  ;;  %v326_v20 = vpack.c.bf16 %v323_v19, %v322_v18 }
  0x81   :  { %808 = vmatprep.mubr.msk.bf16.mxu1 %vm99_vm2, %v327_v52 }
  0x84   :  { %233 = vmatmul.mubr.bf16.gmra.mrb[4].mxu0 %v106_v12 }
  0x85   :  { %843 = vmatprep.mubr.msk.f32.mxu0 %vm544_vm3, %v49_v21 }
  0x88   :  { %375 = vmatmul.mubr.bf16.gmra.mrb[4].mxu1 %v326_v20 }
  0x89   :  { %854 = vmatprep.mubr.msk.f32.mxu1 %vm544_vm3, %v49_v21 }
 0x14f   :  { %v226_v23 = vpop.f32.mrb[0].mxu0 }
 0x150   :  { %v1133_v24 = vadd.f32 %v788_v22, %v226_v23  ;;  %v228_v25 = vpop.f32.mrb[1].mxu0 }
 0x151   :  { %v229_v26 = vpop.f32.mrb[2].mxu0 }
 0x152   :  { %v255_v27 = vmul.f32 %v1133_v24, %v1133_v24  ;;  %v1137_v28 = vadd.f32 %v788_v22, %v229_v26  ;;  %v231_v29 = vpop.f32.mrb[3].mxu0  ;;  %v241_v31 = vsel %vm99_vm2, %v1133_v24, 0.0 }
 0x153   :  { %v368_v30 = vpop.f32.mrb[0].mxu1 }
 0x154   :  { %v242_v32 = vsel %vm99_vm2, %v1137_v28, 0.0  ;;  %v256_v33 = vmul.f32 %v1137_v28, %v1137_v28  ;;  %v1145_v34 = vadd.f32 %v788_v22, %v368_v30  ;;  %v370_v35 = vpop.f32.mrb[1].mxu1  ;;  %v259_v38 = vsel %vm99_vm2, %v255_v27, 0.0 }
 0x155   :  { %v243_v36 = vadd.f32 %v242_v32, %v241_v31  ;;  %v371_v37 = vpop.f32.mrb[2].mxu1 }
 0x156   :  { %v260_v39 = vsel %vm99_vm2, %v256_v33, 0.0  ;;  %v397_v40 = vmul.f32 %v1145_v34, %v1145_v34  ;;  %v1151_v41 = vadd.f32 %v788_v22, %v371_v37  ;;  %v373_v42 = vpop.f32.mrb[3].mxu1  ;;  %v383_v45 = vsel %vm99_vm2, %v1145_v34, 0.0 }
 0x157   :  { %v261_v43 = vadd.f32 %v260_v39, %v259_v38  ;;  %v234_v44 = vpop.f32.mrb[4].mxu0 }
 0x158   :  { %v384_v46 = vsel %vm99_vm2, %v1151_v41, 0.0  ;;  %v398_v47 = vmul.f32 %v1151_v41, %v1151_v41  ;;  %v1159_v48 = vadd.f32 %v788_v22, %v234_v44  ;;  %v236_v49 = vpop.f32.mrb[5].mxu0  ;;  %v401_v50 = vsel %vm99_vm2, %v397_v40, 0.0 }
 0x159   :  { %v385_v51 = vadd.f32 %v384_v46, %v383_v45  ;;  %v237_v52 = vpop.f32.mrb[6].mxu0 }
 0x15a   :  { %v402_v53 = vsel %vm99_vm2, %v398_v47, 0.0  ;;  %v244_v54 = vsel %vm99_vm2, %v1159_v48, 0.0  ;;  %v257_v55 = vmul.f32 %v1159_v48, %v1159_v48  ;;  %v1167_v56 = vadd.f32 %v788_v22, %v237_v52  ;;  %v239_v57 = vpop.f32.mrb[7].mxu0 }
 0x15b   :  { %v403_v58 = vadd.f32 %v402_v53, %v401_v50  ;;  %v245_v59 = vadd.f32 %v244_v54, %v243_v36  ;;  %v376_v60 = vpop.f32.mrb[4].mxu1 }
 0x15c   :  { %v262_v61 = vsel %vm99_vm2, %v257_v55, 0.0  ;;  %v246_v62 = vsel %vm99_vm2, %v1167_v56, 0.0  ;;  %v258_v63 = vmul.f32 %v1167_v56, %v1167_v56  ;;  %v1174_v0 = vadd.f32 %v788_v22, %v376_v60  ;;  %v378_v1 = vpop.f32.mrb[5].mxu1 }
 0x15d   :  { %v263_v2 = vadd.f32 %v262_v61, %v261_v43  ;;  %v247_v4 = vadd.f32 %v246_v62, %v245_v59  ;;  %v379_v5 = vpop.f32.mrb[6].mxu1  ;;  %v427_v55 = vlaneseq  ;;  %v424_v62 = vld [vmem:[%s1294_s4] sm:$0x1] }
 0x15e   :  { %v264_v6 = vsel %vm99_vm2, %v258_v63, 0.0  ;;  %v386_v7 = vsel %vm99_vm2, %v1174_v0, 0.0  ;;  %v399_v8 = vmul.f32 %v1174_v0, %v1174_v0  ;;  %v380_v9 = vadd.f32 %v788_v22, %v379_v5  ;;  %v381_v3 = vpop.f32.mrb[7].mxu1 }
 0x15f   :  { %v248_v10 = vrot.slane %v247_v4, 4  ;;  %v265_v11 = vadd.f32 %v264_v6, %v263_v2  ;;  %v387_v12 = vadd.f32 %v386_v7, %v385_v51  ;;  %v1184_v57 = vshrl.u32 %v427_v55, 7 }
 0x160   :  { %v404_v13 = vsel %vm99_vm2, %v399_v8, 0.0  ;;  %v388_v14 = vsel %vm99_vm2, %v380_v9, 0.0  ;;  %v400_v15 = vmul.f32 %v380_v9, %v380_v9 }
 0x161   :  { %v249_v16 = vadd.f32 %v248_v10, %v247_v4  ;;  %v266_v17 = vrot.slane %v265_v11, 4  ;;  %v405_v18 = vadd.f32 %v404_v13, %v403_v58  ;;  %v389_v19 = vadd.f32 %v388_v14, %v387_v12  ;;  %v422_v58 = vld [vmem:[%s1293_s3] sm:$0x1] }
 0x162   :  { %v406_v20 = vsel %vm99_vm2, %v400_v15, 0.0  ;;  %v434_v59 = vsub.s32 0, %v1184_v57  ;;  %vm474_vm4 = vcmp.eq.s32.totalorder %v1184_v57, 0 }
 0x163   :  { %v250_v21 = vrot.slane %v249_v16, 2  ;;  %v267_v23 = vadd.f32 %v266_v17, %v265_v11  ;;  %v390_v25 = vrot.slane %v389_v19, 4  ;;  %v407_v26 = vadd.f32 %v406_v20, %v405_v18 }
 0x165   :  { %v251_v22 = vadd.f32 %v250_v21, %v249_v16  ;;  %v268_v27 = vrot.slane %v267_v23, 2  ;;  %v391_v29 = vadd.f32 %v390_v25, %v389_v19  ;;  %v408_v30 = vrot.slane %v407_v26, 4 }
 0x167   :  { %v269_v31 = vadd.f32 %v268_v27, %v267_v23  ;;  %v392_v32 = vrot.slane %v391_v29, 2  ;;  %v409_v33 = vadd.f32 %v408_v30, %v407_v26  ;;  %v252_v35 = vrot.slane %v251_v22, 1 }
 0x169   :  { %v393_v36 = vadd.f32 %v392_v32, %v391_v29  ;;  %v410_v37 = vrot.slane %v409_v33, 2  ;;  %v270_v38 = vrot.slane %v269_v31, 1  ;;  %v253_v42 = vadd.f32 %v252_v35, %v251_v22 }
 0x16a   :  { %v1214_v32 = vadd.s32 24, %v1184_v57 }
 0x16b   :  { %v394_v39 = vrot.slane %v393_v36, 1  ;;  %v411_v40 = vadd.f32 %v410_v37, %v409_v33  ;;  %v271_v45 = vadd.f32 %v270_v38, %v269_v31 }
 0x16c   :  { %vm510_vm13 = vcmp.eq.s32.totalorder %v1214_v32, 31 }
 0x16d   :  { %v395_v43 = vadd.f32 %v394_v39, %v393_v36  ;;  %v412_v44 = vrot.slane %v411_v40, 1 }
 0x16f   :  { %v396_v46 = vadd.f32 %v395_v43, %v253_v42  ;;  %v413_v47 = vadd.f32 %v412_v44, %v411_v40 }
 0x171   :  { %v414_v49 = vadd.f32 %v413_v47, %v271_v45  ;;  %v416_v50 = vmul.f32 0.015625, %v396_v46 }
 0x173   :  { %v417_v51 = vmul.f32 0.015625, %v414_v49  ;;  %v418_v52 = vmul.f32 %v416_v50, %v416_v50 }
 0x175   :  { %v419_v53 = vsub.f32 %v417_v51, %v418_v52 }
 0x177   :  { %v420_v54 = vadd.f32 1e-05, %v419_v53 }
 0x179   :  { %907 = vrsqrt.f32 %v420_v54 }
 0x183   :  { %v908_v60 = vpop.eup %907 }
 0x184   :  { %v423_v61 = vmul.f32 %v908_v60, %v422_v58 }
 0x186   :  { %v425_v63 = vmul.f32 %v423_v61, %v416_v50  ;;  %v435_v1 = vrot.slane %v423_v61, %v434_v59 }
 0x188   :  { %v426_v2 = vsub.f32 %v424_v62, %v425_v63  ;;  %v631_v4 = vmul.f32 %v435_v1, %v380_v9  ;;  %v436_v5 = vmul.f32 %v435_v1, %v1133_v24  ;;  %v437_v6 = vmul.f32 %v435_v1, %v1137_v28 }
 0x189   :  { %v438_v7 = vmul.f32 %v435_v1, %v1159_v48  ;;  %v439_v8 = vmul.f32 %v435_v1, %v1167_v56  ;;  %v628_v3 = vmul.f32 %v435_v1, %v1145_v34  ;;  %v629_v10 = vmul.f32 %v435_v1, %v1151_v41 }
 0x18a   :  { %v444_v11 = vrot.slane %v426_v2, %v434_v59  ;;  %v630_v12 = vmul.f32 %v435_v1, %v1174_v0 }
 0x18c   :  { %v635_v13 = vadd.f32 %v631_v4, %v444_v11  ;;  %v446_v14 = vadd.f32 %v444_v11, %v436_v5  ;;  %v447_v15 = vadd.f32 %v444_v11, %v437_v6  ;;  %v448_v16 = vadd.f32 %v444_v11, %v438_v7 }
 0x18d   :  { %v1200_v9 = vadd.f32 %v444_v11, %v439_v8  ;;  %v1202_v24 = vadd.f32 %v628_v3, %v444_v11  ;;  %v1204_v28 = vadd.f32 %v629_v10, %v444_v11  ;;  %v1206_v48 = vadd.f32 %v630_v12, %v444_v11 }
 0x18e   :  { %v643_v56 = vmin.f32 %v635_v13, 0.0  ;;  %v454_v17 = vmin.f32 %v446_v14, 0.0  ;;  %v455_v34 = vmin.f32 %v447_v15, 0.0  ;;  %v456_v41 = vmin.f32 %v448_v16, 0.0 }
 0x18f   :  { %v457_v19 = vmin.f32 %v1200_v9, 0.0  ;;  %v640_v25 = vmin.f32 %v1202_v24, 0.0  ;;  %v641_v26 = vmin.f32 %v1204_v28, 0.0  ;;  %v642_v22 = vmin.f32 %v1206_v48, 0.0 }
 0x190   :  { %v650_v18 = vmul.f32 1.442695, %v643_v56  ;;  %v458_v0 = vmul.f32 1.442695, %v454_v17  ;;  %v460_v20 = vmul.f32 1.442695, %v455_v34 }
 0x191   :  { %v462_v21 = vmul.f32 1.442695, %v456_v41  ;;  %v464_v23 = vmul.f32 1.442695, %v457_v19  ;;  %v644_v27 = vmul.f32 1.442695, %v640_v25 }
 0x192   :  { %909 = vpow2.f32 %v650_v18  ;;  %v646_v29 = vmul.f32 1.442695, %v641_v26  ;;  %v648_v30 = vmul.f32 1.442695, %v642_v22  ;;  %vm639_vm5 = vcmp.gt.f32.partialorder %v635_v13, 0.0 }
 0x193   :  { %911 = vpow2.f32 %v458_v0  ;;  %vm450_vm6 = vcmp.gt.f32.partialorder %v446_v14, 0.0  ;;  %vm451_vm7 = vcmp.gt.f32.partialorder %v447_v15, 0.0  ;;  %vm452_vm8 = vcmp.gt.f32.partialorder %v448_v16, 0.0 }
 0x194   :  { %913 = vpow2.f32 %v460_v20  ;;  %vm453_vm9 = vcmp.gt.f32.partialorder %v1200_v9, 0.0  ;;  %vm636_vm10 = vcmp.gt.f32.partialorder %v1202_v24, 0.0  ;;  %vm637_vm11 = vcmp.gt.f32.partialorder %v1204_v28, 0.0 }
 0x195   :  { %915 = vpow2.f32 %v462_v21  ;;  %vm638_vm12 = vcmp.gt.f32.partialorder %v1206_v48, 0.0 }
 0x196   :  { %917 = vpow2.f32 %v464_v23 }
 0x197   :  { %919 = vpow2.f32 %v644_v27 }
 0x198   :  { %921 = vpow2.f32 %v646_v29 }
 0x199   :  { %923 = vpow2.f32 %v648_v30 }
 0x19c   :  { %v910_v31 = vpop.eup %909 }
 0x19d   :  { %v912_v33 = vpop.eup %911  ;;  %v818_v35 = vadd.f32 -1.0, %v910_v31 }
 0x19e   :  { %v914_v36 = vpop.eup %913  ;;  %v809_v37 = vadd.f32 -1.0, %v912_v33 }
 0x19f   :  { %v916_v38 = vpop.eup %915  ;;  %v1218_v39 = vsel %vm639_vm5, %v635_v13, %v818_v35  ;;  %v810_v40 = vadd.f32 -1.0, %v914_v36 }
 0x1a0   :  { %v918_v42 = vpop.eup %917  ;;  %v661_v43 = vrot.slane %v1218_v39, 7  ;;  %v811_v44 = vadd.f32 -1.0, %v916_v38  ;;  %v470_v45 = vsel %vm450_vm6, %v446_v14, %v809_v37  ;;  %v686_v46 = vrot.slane %v1218_v39, 1 }
 0x1a1   :  { %v920_v47 = vpop.eup %919  ;;  %v812_v49 = vadd.f32 -1.0, %v918_v42  ;;  %v471_v50 = vsel %vm451_vm7, %v447_v15, %v810_v40  ;;  %v484_v51 = vrot.slane %v470_v45, 7  ;;  %v511_v52 = vrot.slane %v470_v45, 1 }
 0x1a2   :  { %v922_v53 = vpop.eup %921  ;;  %v472_v54 = vsel %vm452_vm8, %v448_v16, %v811_v44  ;;  %v485_v55 = vrot.slane %v471_v50, 7  ;;  %v512_v58 = vrot.slane %v471_v50, 1  ;;  %v815_v59 = vadd.f32 -1.0, %v920_v47 }
 0x1a3   :  { %v924_v60 = vpop.eup %923  ;;  %v473_v61 = vsel %vm453_vm9, %v1200_v9, %v812_v49  ;;  %v514_v62 = vrot.slane %v472_v54, 1  ;;  %v816_v63 = vadd.f32 -1.0, %v922_v53  ;;  %v487_v1 = vrot.slane %v472_v54, 7 }
 0x1a4   :  { %v479_v2 = vrot.slane %v473_v61, 7  ;;  %v486_v4 = vsel %vm61_vm1, %v484_v51, %v485_v55  ;;  %v513_v5 = vsel %vm73_vm0, %v511_v52, %v512_v58  ;;  %v817_v6 = vadd.f32 -1.0, %v924_v60 }
 0x1a5   :  { %v515_v7 = vsel %vm73_vm0, %v512_v58, %v514_v62  ;;  %v537_v8 = vmax.f32 %v486_v4, %v471_v50  ;;  %v656_v3 = vsel %vm636_vm10, %v1202_v24, %v815_v59  ;;  %v657_v10 = vsel %vm637_vm11, %v1204_v28, %v816_v63 }
 0x1a6   :  { %v494_v11 = vsel %vm61_vm1, %v479_v2, %v484_v51  ;;  %v658_v12 = vsel %vm638_vm12, %v1206_v48, %v817_v6  ;;  %v666_v13 = vrot.slane %v656_v3, 7  ;;  %v667_v14 = vrot.slane %v657_v10, 7 }
 0x1a7   :  { %v503_v15 = vsel %vm474_vm4, -1e+30, %v494_v11  ;;  %v541_v16 = vmax.f32 %v537_v8, %v515_v7  ;;  %v681_v9 = vrot.slane %v656_v3, 1  ;;  %v682_v56 = vrot.slane %v657_v10, 1 }
 0x1a8   :  { %v536_v17 = vmax.f32 %v503_v15, %v470_v45  ;;  %v668_v24 = vsel %vm61_vm1, %v666_v13, %v667_v14  ;;  %v676_v28 = vsel %vm61_vm1, %v661_v43, %v666_v13  ;;  %v684_v34 = vrot.slane %v658_v12, 1 }
 0x1a9   :  { %v677_v18 = vsel %vm474_vm4, -1e+30, %v676_v28  ;;  %v683_v48 = vsel %vm73_vm0, %v681_v9, %v682_v56  ;;  %v699_v41 = vmax.f32 %v668_v24, %v657_v10  ;;  %v488_v19 = vsel %vm61_vm1, %v485_v55, %v487_v1 }
 0x1aa   :  { %v540_v0 = vmax.f32 %v536_v17, %v513_v5  ;;  %v685_v20 = vsel %vm73_vm0, %v682_v56, %v684_v34  ;;  %v698_v21 = vmax.f32 %v677_v18, %v656_v3  ;;  %v489_v23 = vsel %vm61_vm1, %v487_v1, %v479_v2 }
 0x1ab   :  { %v703_v25 = vmax.f32 %v699_v41, %v685_v20  ;;  %v516_v26 = vrot.slane %v473_v61, 1  ;;  %v538_v22 = vmax.f32 %v488_v19, %v472_v54  ;;  %v539_v27 = vmax.f32 %v489_v23, %v473_v61  ;;  %v50_v54 = vld [vmem:[%s1291_s5 + $0x8] sm:$0xff] }
 0x1ac   :  { %v857_v29 = vpack.c.bf16 %v541_v16, %v540_v0  ;;  %v702_v30 = vmax.f32 %v698_v21, %v683_v48  ;;  %v669_v31 = vrot.slane %v658_v12, 7  ;;  %v687_v57 = vsel %vm73_vm0, %v684_v34, %v686_v46 }
 0x1ad   :  { %v517_v33 = vsel %vm73_vm0, %v514_v62, %v516_v26  ;;  %v523_v35 = vsel %vm73_vm0, %v516_v26, %v511_v52  ;;  %v693_v36 = vsel %vm73_vm0, %v686_v46, %v681_v9 }
 0x1ae   :  { %858 = vmatprep.subr.bf16.mxu0 %v857_v29  ;;  %v865_v37 = vpack.c.bf16 %v703_v25, %v702_v30  ;;  %v535_v38 = vsel %vm510_vm13, -1e+30, %v523_v35  ;;  %v542_v40 = vmax.f32 %v538_v22, %v517_v33  ;;  %v670_v42 = vsel %vm61_vm1, %v667_v14, %v669_v31 }
 0x1af   :  { %860 = vmatpush3.bf16.msra.mxu0 %v857_v29  ;;  %v543_v44 = vmax.f32 %v539_v27, %v535_v38  ;;  %v671_v45 = vsel %vm61_vm1, %v669_v31, %v661_v43  ;;  %v697_v47 = vsel %vm510_vm13, -1e+30, %v693_v36  ;;  %v700_v49 = vmax.f32 %v670_v42, %v658_v12 }
 0x1b0   :  { %866 = vmatprep.subr.bf16.mxu1 %v865_v37  ;;  %v701_v46 = vmax.f32 %v671_v45, %v1218_v39 }
 0x1b1   :  { %868 = vmatpush3.bf16.msra.mxu1 %v865_v37  ;;  %v861_v50 = vpack.c.bf16 %v543_v44, %v542_v40  ;;  %v704_v51 = vmax.f32 %v700_v49, %v687_v57 }
 0x1b2   :  { %v705_v52 = vmax.f32 %v701_v46, %v697_v47 }
 0x1b3   :  { %862 = vmatprep.subr.bf16.mxu0 %v861_v50 }
 0x1b4   :  { %v869_v53 = vpack.c.bf16 %v705_v52, %v704_v51  ;;  %864 = vmatpush3.bf16.msra.mxu0 %v861_v50 }
 0x1b6   :  { %870 = vmatprep.subr.bf16.mxu1 %v869_v53 }
 0x1b7   :  { %872 = vmatpush3.bf16.msra.mxu1 %v869_v53  ;;  %844 = vmatmul.mubr.msk.f32.vlgmr.msra.gmra.mrb[8].mxu0 %vm544_vm3, %v50_v54 }
 0x1ba   :  { %855 = vmatmul.mubr.msk.f32.vlgmr.msra.gmra.mrb[8].mxu1 %vm544_vm3, %v50_v54 }
 0x28a   :  { %v845_v32 = vpop.f32.mrb[8].mxu0 }
 0x28b   :  { %627 = vst.msk [vmem:[%s1295_s6 + $0x8] sm:$0xff] %vm99_vm2, %v845_v32  ;;  %v617_v39 = vpop.f32.mrb[9].mxu0 }
 0x28c   :  { %626 = vst.msk [vmem:[%s1295_s6] sm:$0xff] %vm99_vm2, %v617_v39 }
 0x28d   :  { %v856_v43 = vpop.f32.mrb[8].mxu1 }
 0x28e   :  { %822 = vst.msk [vmem:[%s1295_s6 + $0x18] sm:$0xff] %vm99_vm2, %v856_v43  ;;  %v772_v55 = vpop.f32.mrb[9].mxu1 }
 0x28f   :  { %821 = vst.msk [vmem:[%s1295_s6 + $0x10] sm:$0xff] %vm99_vm2, %v772_v55 }

// kernel: informer_stack_forward.11
= control target key start
LH: loop header
LB: loop body
LE: loop exit
PB: predicated region body
PF: predicated region fallthrough
CT: control target
= control target key end

     0   :  { %s2008_s18 = smov 0   ;;  %s2252_s0 = inlined_call_operand.vmem [shape: f32[2,16,64], index: 0, kind: input, shape index: {}]   ;;  %s2253_s1 = inlined_call_operand.vmem [shape: bf16[64,192], index: 1, kind: input, shape index: {}]   ;;  %s2254_s2 = inlined_call_operand.vmem [shape: f32[1,192], index: 2, kind: input, shape index: {}]   ;;  %s2255_s3 = inlined_call_operand.vmem [shape: bf16[64,64], index: 3, kind: input, shape index: {}]   ;;  %s2256_s4 = inlined_call_operand.vmem [shape: f32[1,64], index: 4, kind: input, shape index: {}]   ;;  %s2257_s5 = inlined_call_operand.vmem [shape: f32[1,64], index: 5, kind: input, shape index: {}]   ;;  %s2258_s6 = inlined_call_operand.vmem [shape: f32[1,64], index: 6, kind: input, shape index: {}]   ;;  %s2259_s7 = inlined_call_operand.vmem [shape: bf16[64,64], index: 7, kind: input, shape index: {}]   ;;  %s2260_s8 = inlined_call_operand.vmem [shape: f32[1,64], index: 8, kind: input, shape index: {}]   ;;  %s2261_s9 = inlined_call_operand.vmem [shape: bf16[64,64], index: 9, kind: input, shape index: {}]   ;;  %s2262_s10 = inlined_call_operand.vmem [shape: f32[1,64], index: 10, kind: input, shape index: {}]   ;;  %s2263_s11 = inlined_call_operand.vmem [shape: f32[1,64], index: 11, kind: input, shape index: {}]   ;;  %s2264_s12 = inlined_call_operand.vmem [shape: f32[1,64], index: 12, kind: input, shape index: {}]   ;;  %s2265_s13 = inlined_call_operand.vmem [shape: f32[1,64], index: 13, kind: input, shape index: {}]   ;;  %s2266_s14 = inlined_call_operand.vmem [shape: f32[1,64], index: 14, kind: input, shape index: {}]   ;;  %s2267_s15 = inlined_call_operand.vmem [shape: f32[2,16,64], index: 15, kind: output, shape index: {}]  }
   0x1 LB: > { %s1630_s19 = sadd.s32 4294967295, %s1915_s18   ;;  %p1634_p0 = scmp.ge.s32.totalorder %s1915_s18, 1  ;;  %s1915_s18 = sphi %s2008_s18, %s25_s18  }
   0x2   : > { %p437_p1 = scmp.lt.s32.totalorder %s1915_s18, 3 }
   0x4   : > { %p438_p2 = pnand %p1634_p0, %p437_p1 }
   0x5   : > { %v1833_v0 = vld [vmem:[%s2253_s1 + $0x4] ss:$8 sps:$4 sm:$0xff] (!%p438_p2)   ;;  %p485_p3 = scmp.lt.s32.totalorder (!%p438_p2), %s1630_s19, 1  ;;  %v1835_v1 = vld [vmem:[%s2253_s1] ss:$8 sps:$4 sm:$0xff] (!%p438_p2)   ;;  %v1917_v2 = vmov (!%p438_p2), 0   ;;  %v509_v12 = vlaneseq (!%p438_p2) }
   0x6   : > { %441 = sbr.rel (%p438_p2) target bundleno = 3446 (0xd76), region = 80  ;;  %595 = vmatprep.mubr.bf16.mxu0 (!%p438_p2), %v1917_v2  ;;  %563 = vmatprep.subr.bf16.mxu0 (!%p438_p2), %v1833_v0  ;;  %v1836_v3 = vld [vmem:[%s2253_s1 + $0x14] ss:$8 sps:$4 sm:$0xff] (!%p438_p2)   ;;  %v1838_v4 = vld [vmem:[%s2253_s1 + $0x10] ss:$8 sps:$4 sm:$0xff] (!%p438_p2)   ;;  %vm559_vm0 = vcmask (!%p438_p2), 523264  }
   0x7   : > { %564 = vmatpush1.bf16.msra.mxu0 (!%p438_p2), %v1835_v1  ;;  %v1839_v5 = vld [vmem:[%s2253_s1 + $0x24] ss:$8 sps:$4 sm:$0xff] (!%p438_p2)   ;;  %v1841_v6 = vld [vmem:[%s2253_s1 + $0x20] ss:$8 sps:$4 sm:$0xff] (!%p438_p2)   ;;  %v1842_v7 = vld [vmem:[%s2253_s1 + $0x34] ss:$8 sps:$4 sm:$0xff] (!%p438_p2)  }
   0x8   : > { %565 = vmatprep.subr.bf16.mxu0 (!%p438_p2), %v1836_v3  ;;  %v1844_v8 = vld [vmem:[%s2253_s1 + $0x30] ss:$8 sps:$4 sm:$0xff] (!%p438_p2)   ;;  %v510_v13 = vshrl.u32 (!%p438_p2), %v509_v12, 7  ;;  %v1918_v14 = vmov (!%p438_p2), 0.0   ;;  %v507_v16 = vld [vmem:[%s2254_s2] sm:$0x3] (!%p438_p2) }
   0x9   : > { %1715 = vmatprep.subr.bf16.mxu1 (!%p438_p2), %v1918_v14  ;;  %vm1919_vm1 = vmmov (!%p438_p2), 0   ;;  %s1920_s29 = smov (!%p438_p2), 64   ;;  %vm611_vm2 = vcmask (!%p438_p2), 130048   ;;  %s1921_s16 = smov (!%p438_p2), 48   ;;  %vm1124_vm3 = vcmask (!%p438_p2), 261120   ;;  %vm1127_vm4 = vcmask (!%p438_p2), 392192  }
   0xa   : > { %v511_v15 = vsub.s32 (!%p438_p2), 0, %v510_v13  ;;  %v515_v17 = vsub.s32 (!%p438_p2), 1, %v510_v13  ;;  %1717 = vmatprep.mubr.msk.bf16.mxu1 (!%p438_p2), %vm1919_vm1, %v1918_v14  ;;  %s1922_s17 = smov (!%p438_p2), 96   ;;  %s1923_s20 = smov (!%p438_p2), 112  }
   0xb   : > { %566 = vmatpush1.bf16.msra.mxu0 (!%p438_p2), %v1838_v4  ;;  %s1924_s21 = smov (!%p438_p2), 32   ;;  %s1925_s22 = smov (!%p438_p2), 16  }
   0xc   : > { %567 = vmatprep.subr.bf16.mxu0 (!%p438_p2), %v1839_v5  ;;  %v512_v18 = vrot.slane (!%p438_p2), %v507_v16, %v511_v15  ;;  %v516_v20 = vrot.slane (!%p438_p2), %v507_v16, %v515_v17  ;;  %s1926_s23 = smov (!%p438_p2), 80  }
   0xd   : > { %s2269_s19 = smov (!%p485_p3, %s1630_s19), 1 }
   0xe   : > { %s1682_s30 = sshll.u32 %s2269_s19, 4 }
   0xf   : > { %s489_s24 = scalar_lea.vmem %s2252_s0, %s1682_s30  ;;  %568 = vmatpush1.bf16.msra.mxu0 %v1841_v6 }
  0x10   : > { %v2048_v9 = vld [vmem:[%s489_s24] sm:$0xff]  ;;  %v2050_v10 = vld [vmem:[%s489_s24 + $0x8] sm:$0xff]  ;;  %569 = vmatprep.subr.bf16.mxu0 %v1842_v7 }
  0x11   : > { %v498_v11 = vpack.c.bf16 %v2050_v10, %v2048_v9 }
  0x13   : > { %570 = vmatpush1.bf16.msra.mxu0 %v1844_v8 }
  0x14   : > { %1739 = vmatprep.subr.bf16.mxu0 %v1918_v14 }
  0x16   : > { %1647 = vmatmul.mubr.msk.bf16.vlgmr.msra.gmra.mrb[0].mxu0 %vm559_vm0, %v498_v11 }
  0x17   : > { %1741 = vmatprep.mubr.msk.bf16.mxu0 %vm1919_vm1, %v1918_v14 }
  0xe9   : > { %v597_v19 = vpop.f32.mrb[0].mxu0 }
  0xea   : > { %v599_v21 = vpop.f32.mrb[1].mxu0  ;;  %v598_v23 = vadd.f32 %v597_v19, %v512_v18 }
  0xeb   : > { %v601_v22 = vpop.f32.mrb[2].mxu0  ;;  %v600_v26 = vadd.f32 %v599_v21, %v516_v20 }
  0xec   : > { %v602_v24 = vadd.f32 %v601_v22, %v512_v18  ;;  %v603_v25 = vpop.f32.mrb[3].mxu0 }
  0xed   : > { %v604_v27 = vadd.f32 %v603_v25, %v516_v20 }
  0xee   : > { %v606_v28 = vpack.c.bf16 %v602_v24, %v598_v23 }
  0xef   : > { %v2064_v29 = vpack.c.bf16 %v604_v27, %v600_v26 }
  0xf0   : > { %609 = vrot.lane.b32.xlu0 %v606_v28, %s1920_s29 }
 0x162   : > { %v610_v30 = vpop.permute.xlu0 %609 }
 0x163   : > { %v616_v31 = vsel %vm611_vm2, %v610_v30, 0 }
 0x164   : > { %1716 = vmatpush3.bf16.xpose.msra.mxu1 %v616_v31 }
 0x165   : > { %1721 = vmatprep.subr.bf16.mxu1 %v1918_v14 }
 0x16b   : > { %1718 = vmatmul.mubr.msk.bf16.vlgmr.msra.gmra.mrb[0].mxu1 %vm611_vm2, %v606_v28 }
 0x16c   : > { %1722 = vmatpush3.bf16.msra.mxu1 %v2064_v29  ;;  %1723 = vmatprep.mubr.msk.bf16.mxu1 %vm1919_vm1, %v1918_v14 }
 0x16d   : > { %1727 = vmatprep.subr.bf16.mxu1 %v1918_v14 }
 0x23e   : > { %v652_v32 = vpop.f32.mrb[0].mxu1 }
 0x23f   : > { %v659_v33 = vmul.f32 0.25, %v652_v32  ;;  %v1719_v34 = vpop.f32.mrb[1].mxu1 }
 0x240   : > { %v655_v35 = vpop.f32.mrb[2].mxu1 }
 0x241   : > { %v660_v36 = vmul.f32 0.25, %v655_v35  ;;  %v1720_v37 = vpop.f32.mrb[3].mxu1  ;;  %v661_v38 = vsel %vm611_vm2, %v659_v33, -inf }
 0x242   : > { %662 = vmax.xlane.f32.xlu0 %v661_v38 }
 0x243   : > { %v664_v39 = vsel %vm611_vm2, %v660_v36, -inf }
 0x244   : > { %665 = vmax.xlane.f32.xlu1 %v664_v39 }
 0x255   : > { %730 = vrot.lane.b32.xlu1 %v606_v28, %s1921_s16 }
 0x258   : > { %852 = vrot.lane.b32.xlu0 %v606_v28, %s1922_s17 }
 0x2cf   : > { %v663_v40 = vpop.xlane.xlu0 %662 }
 0x2d0   : > { %v667_v41 = vsub.f32 %v659_v33, %v663_v40 }
 0x2d1   : > { %v666_v42 = vpop.xlane.xlu1 %665 }
 0x2d2   : > { %v669_v43 = vmul.f32 1.442695, %v667_v41  ;;  %v668_v44 = vsub.f32 %v660_v36, %v666_v42 }
 0x2d3   : > { %v853_v62 = vpop.permute.xlu0 %852 }
 0x2d4   : > { %1857 = vpow2.f32 %v669_v43  ;;  %v671_v45 = vmul.f32 1.442695, %v668_v44 }
 0x2d5   : > { %v731_v50 = vpop.permute.xlu1 %730 }
 0x2d6   : > { %1859 = vpow2.f32 %v671_v45  ;;  %v736_v63 = vsel %vm611_vm2, %v731_v50, 0 }
 0x2de   : > { %v1858_v46 = vpop.eup %1857 }
 0x2df   : > { %v673_v47 = vsel %vm611_vm2, %v1858_v46, 0.0 }
 0x2e0   : > { %v1860_v48 = vpop.eup %1859  ;;  %674 = vadd.xlane.f32.xlu1 %v673_v47 }
 0x2e1   : > { %v676_v49 = vsel %vm611_vm2, %v1860_v48, 0.0 }
 0x2e4   : > { %677 = vadd.xlane.f32.xlu1 %v676_v49 }
 0x2f5   : > { %728 = vrot.lane.b32.xlu1 %v606_v28, %s1923_s20 }
 0x2f9   : > { %854 = vrot.lane.b32.xlu1 %v606_v28, %s1924_s21 }
 0x2fd   : > { %977 = vrot.lane.b32.xlu1 %v606_v28, %s1925_s22 }
 0x301   : > { %975 = vrot.lane.b32.xlu1 %v606_v28, %s1926_s23 }
 0x36d   : > { %v675_v51 = vpop.xlane.xlu1 %674 }
 0x36e   : > { %1861 = vrcp.f32 %v675_v51 }
 0x371   : > { %v678_v52 = vpop.xlane.xlu1 %677 }
 0x372   : > { %1863 = vrcp.f32 %v678_v52 }
 0x375   : > { %v729_v53 = vpop.permute.xlu1 %728 }
 0x378   : > { %v1862_v55 = vpop.eup %1861 }
 0x379   : > { %v855_v54 = vpop.permute.xlu1 %854  ;;  %v680_v58 = vmul.f32 %v1862_v55, %v1858_v46 }
 0x37a   : > { %v860_v56 = vsel %vm611_vm2, %v855_v54, 0 }
 0x37b   : > { %1740 = vmatpush3.bf16.xpose.msra.mxu0 %v860_v56 }
 0x37c   : > { %v1864_v57 = vpop.eup %1863  ;;  %1751 = vmatprep.subr.bf16.mxu0 %v1918_v14 }
 0x37d   : > { %v682_v59 = vmul.f32 %v1864_v57, %v1860_v48  ;;  %v978_v60 = vpop.permute.xlu1 %977 }
 0x37e   : > { %v983_v0 = vsel %vm611_vm2, %v978_v60, 0 }
 0x37f   : > { %v683_v61 = vpack.c.bf16 %v682_v59, %v680_v58 }
 0x381   : > { %1724 = vmatmul.mubr.msk.bf16.vlgmr.msra.gmra.mrb[4].mxu1 %vm611_vm2, %v683_v61  ;;  %v976_v1 = vpop.permute.xlu1 %975 }
 0x382   : > { %1728 = vmatpush3.bf16.xpose.msra.mxu1 %v736_v63  ;;  %1742 = vmatmul.mubr.msk.bf16.vlgmr.msra.gmra.mrb[4].mxu0 %vm611_vm2, %v853_v62 }
 0x383   : > { %1752 = vmatpush3.bf16.xpose.msra.mxu0 %v983_v0  ;;  %1729 = vmatprep.mubr.msk.bf16.mxu1 %vm1919_vm1, %v1918_v14 }
 0x384   : > { %1753 = vmatprep.mubr.msk.bf16.mxu0 %vm1919_vm1, %v1918_v14  ;;  %1733 = vmatprep.subr.bf16.mxu1 %v1918_v14 }
 0x385   : > { %1763 = vmatprep.subr.bf16.mxu0 %v1918_v14 }
 0x389   : > { %1730 = vmatmul.mubr.msk.bf16.vlgmr.msra.gmra.mrb[8].mxu1 %vm611_vm2, %v729_v53 }
 0x38a   : > { %1754 = vmatmul.mubr.msk.bf16.vlgmr.msra.gmra.mrb[8].mxu0 %vm611_vm2, %v976_v1  ;;  %1735 = vmatprep.mubr.msk.bf16.mxu1 %vm1919_vm1, %v1918_v14 }
 0x38b   : > { %1771 = vmatprep.mubr.msk.bf16.mxu0 %vm1919_vm1, %v1918_v14 }
 0x454   : > { %v2101_v2 = vpop.f32.mrb[4].mxu1 }
 0x455   : > { %v1725_v3 = vpop.f32.mrb[5].mxu1  ;;  %v896_v4 = vpop.f32.mrb[4].mxu0 }
 0x456   : > { %v2103_v5 = vpop.f32.mrb[6].mxu1  ;;  %v1743_v6 = vpop.f32.mrb[5].mxu0  ;;  %v903_v19 = vmul.f32 0.25, %v896_v4 }
 0x457   : > { %v1726_v7 = vpop.f32.mrb[7].mxu1  ;;  %v899_v8 = vpop.f32.mrb[6].mxu0 }
 0x458   : > { %v1744_v11 = vpop.f32.mrb[7].mxu0  ;;  %v904_v27 = vmul.f32 0.25, %v899_v8  ;;  %v905_v28 = vsel %vm611_vm2, %v903_v19, -inf }
 0x45a   : > { %v908_v32 = vsel %vm611_vm2, %v904_v27, -inf }
 0x45c   : > { %v772_v12 = vpop.f32.mrb[8].mxu1 }
 0x45d   : > { %v779_v13 = vmul.f32 0.25, %v772_v12  ;;  %v1731_v15 = vpop.f32.mrb[9].mxu1  ;;  %v1019_v16 = vpop.f32.mrb[8].mxu0 }
 0x45e   : > { %v775_v17 = vpop.f32.mrb[10].mxu1  ;;  %v1755_v18 = vpop.f32.mrb[9].mxu0  ;;  %v1026_v25 = vmul.f32 0.25, %v1019_v16 }
 0x45f   : > { %v780_v20 = vmul.f32 0.25, %v775_v17  ;;  %v1732_v21 = vpop.f32.mrb[11].mxu1  ;;  %v1022_v22 = vpop.f32.mrb[10].mxu0  ;;  %v781_v23 = vsel %vm611_vm2, %v779_v13, -inf }
 0x460   : > { %v1756_v24 = vpop.f32.mrb[11].mxu0  ;;  %782 = vmax.xlane.f32.xlu1 %v781_v23  ;;  %v1028_v30 = vsel %vm611_vm2, %v1026_v25, -inf  ;;  %v1027_v31 = vmul.f32 0.25, %v1022_v22 }
 0x461   : > { %v784_v26 = vsel %vm611_vm2, %v780_v20, -inf }
 0x462   : > { %785 = vmax.xlane.f32.xlu0 %v784_v26  ;;  %v1031_v33 = vsel %vm611_vm2, %v1027_v31, -inf }
 0x464   : > { %906 = vmax.xlane.f32.xlu1 %v905_v28  ;;  %v1845_v28 = vld [vmem:[%s2255_s3] sm:$0xff]  }
 0x465   : > { %1764 = vmatpush3.bf16.msra.mxu0 %v1845_v28 }
 0x466   : > { %1029 = vmax.xlane.f32.xlu0 %v1028_v30  ;;  %1765 = vmatprep.subr.bf16.mxu0 %v1918_v14 }
 0x468   : > { %909 = vmax.xlane.f32.xlu1 %v908_v32  ;;  %v1846_v32 = vld [vmem:[%s2255_s3 + $0x8] sm:$0xff]  }
 0x469   : > { %1766 = vmatpush3.bf16.msra.mxu0 %v1846_v32 }
 0x46a   : > { %1767 = vmatprep.subr.bf16.mxu0 %v1918_v14 }
 0x46c   : > { %1032 = vmax.xlane.f32.xlu1 %v1031_v33 }
 0x4ed   : > { %v783_v34 = vpop.xlane.xlu1 %782 }
 0x4ee   : > { %v787_v39 = vsub.f32 %v779_v13, %v783_v34 }
 0x4ef   : > { %v786_v35 = vpop.xlane.xlu0 %785 }
 0x4f0   : > { %v789_v45 = vmul.f32 1.442695, %v787_v39  ;;  %v788_v46 = vsub.f32 %v780_v20, %v786_v35  ;;  %v1848_v39 = vld [vmem:[%s2255_s3 + $0x18] sm:$0xff]  }
 0x4f1   : > { %v907_v36 = vpop.xlane.xlu1 %906 }
 0x4f2   : > { %v911_v37 = vsub.f32 %v903_v19, %v907_v36  ;;  %v791_v50 = vmul.f32 1.442695, %v788_v46  ;;  %v1847_v36 = vld [vmem:[%s2255_s3 + $0x10] sm:$0xff]  }
 0x4f3   : > { %v1030_v38 = vpop.xlane.xlu0 %1029  ;;  %1768 = vmatpush3.bf16.msra.mxu0 %v1847_v36 }
 0x4f4   : > { %v913_v40 = vmul.f32 1.442695, %v911_v37  ;;  %v1034_v41 = vsub.f32 %v1026_v25, %v1030_v38  ;;  %1769 = vmatprep.subr.bf16.mxu0 %v1918_v14 }
 0x4f5   : > { %v910_v42 = vpop.xlane.xlu1 %909 }
 0x4f6   : > { %1865 = vpow2.f32 %v913_v40  ;;  %v1036_v43 = vmul.f32 1.442695, %v1034_v41  ;;  %v912_v44 = vsub.f32 %v904_v27, %v910_v42 }
 0x4f7   : > { %1770 = vmatpush3.bf16.msra.mxu0 %v1848_v39 }
 0x4f8   : > { %1867 = vpow2.f32 %v1036_v43  ;;  %v915_v47 = vmul.f32 1.442695, %v912_v44  ;;  %1787 = vmatprep.subr.bf16.mxu0 %v1918_v14 }
 0x4f9   : > { %v1033_v48 = vpop.xlane.xlu1 %1032 }
 0x4fa   : > { %1869 = vpow2.f32 %v915_v47  ;;  %v1035_v49 = vsub.f32 %v1027_v31, %v1033_v48 }
 0x4fb   : > { %1871 = vpow2.f32 %v789_v45 }
 0x4fc   : > { %v1038_v51 = vmul.f32 1.442695, %v1035_v49 }
 0x4fe   : > { %1873 = vpow2.f32 %v1038_v51 }
 0x4ff   : > { %1875 = vpow2.f32 %v791_v50 }
 0x500   : > { %v1866_v52 = vpop.eup %1865 }
 0x501   : > { %v917_v53 = vsel %vm611_vm2, %v1866_v52, 0.0 }
 0x502   : > { %v1868_v54 = vpop.eup %1867  ;;  %918 = vadd.xlane.f32.xlu0 %v917_v53 }
 0x503   : > { %v1040_v57 = vsel %vm611_vm2, %v1868_v54, 0.0 }
 0x504   : > { %v1870_v55 = vpop.eup %1869 }
 0x505   : > { %v920_v56 = vsel %vm611_vm2, %v1870_v55, 0.0  ;;  %v1872_v58 = vpop.eup %1871 }
 0x506   : > { %921 = vadd.xlane.f32.xlu1 %v920_v56  ;;  %1041 = vadd.xlane.f32.xlu0 %v1040_v57  ;;  %v793_v61 = vsel %vm611_vm2, %v1872_v58, 0.0 }
 0x508   : > { %v1874_v59 = vpop.eup %1873 }
 0x509   : > { %v1043_v60 = vsel %vm611_vm2, %v1874_v59, 0.0  ;;  %v1876_v62 = vpop.eup %1875 }
 0x50a   : > { %1044 = vadd.xlane.f32.xlu1 %v1043_v60  ;;  %794 = vadd.xlane.f32.xlu0 %v793_v61  ;;  %v796_v63 = vsel %vm611_vm2, %v1876_v62, 0.0 }
 0x50e   : > { %797 = vadd.xlane.f32.xlu1 %v796_v63 }
 0x51f   : > { %928 = vrot.lane.b32.xlu1 %v2064_v29, %s1922_s17 }
 0x520   : > { %805 = vrot.lane.b32.xlu0 %v2064_v29, %s1923_s20 }
 0x523   : > { %1051 = vrot.lane.b32.xlu1 %v2064_v29, %s1926_s23 }
 0x58f   : > { %v919_v0 = vpop.xlane.xlu0 %918 }
 0x593   : > { %v922_v1 = vpop.xlane.xlu1 %921  ;;  %v1042_v3 = vpop.xlane.xlu0 %1041 }
 0x597   : > { %v1045_v4 = vpop.xlane.xlu1 %1044  ;;  %v795_v6 = vpop.xlane.xlu0 %794 }
 0x598   : > { %1877 = vrcp.f32 %v795_v6 }
 0x59b   : > { %v798_v7 = vpop.xlane.xlu1 %797  ;;  %v806_v8 = vpop.permute.xlu0 %805 }
 0x59c   : > { %1879 = vrcp.f32 %v798_v7  ;;  %1734 = vmatpush3.bf16.msra.mxu1 %v806_v8 }
 0x59d   : > { %1745 = vmatprep.subr.bf16.mxu1 %v1918_v14  ;;  %1881 = vrcp.f32 %v922_v1 }
 0x59e   : > { %1883 = vrcp.f32 %v919_v0  ;;  %v1656_v0 = vld [vmem:[%s2256_s4] ss:$0 sm:$0xff] }
 0x59f   : > { %1885 = vrcp.f32 %v1045_v4  ;;  %v929_v17 = vpop.permute.xlu1 %928 }
 0x5a0   : > { %1887 = vrcp.f32 %v1042_v3 }
 0x5a2   : > { %v1878_v11 = vpop.eup %1877 }
 0x5a3   : > { %v800_v13 = vmul.f32 %v1878_v11, %v1872_v58  ;;  %v1052_v23 = vpop.permute.xlu1 %1051 }
 0x5a6   : > { %v1880_v12 = vpop.eup %1879 }
 0x5a7   : > { %v802_v15 = vmul.f32 %v1880_v12, %v1876_v62  ;;  %v1882_v16 = vpop.eup %1881 }
 0x5a8   : > { %v1884_v18 = vpop.eup %1883  ;;  %v926_v19 = vmul.f32 %v1882_v16, %v1870_v55 }
 0x5a9   : > { %v803_v29 = vpack.c.bf16 %v802_v15, %v800_v13  ;;  %v924_v20 = vmul.f32 %v1884_v18, %v1866_v52  ;;  %v1886_v22 = vpop.eup %1885 }
 0x5aa   : > { %v1888_v24 = vpop.eup %1887  ;;  %v1049_v25 = vmul.f32 %v1886_v22, %v1874_v59  ;;  %v1850_v22 = vld [vmem:[%s2259_s7 + $0x8] sm:$0xff]  }
 0x5ab   : > { %1736 = vmatmul.mubr.msk.bf16.vlgmr.msra.gmra.mrb[12].mxu1 %vm611_vm2, %v803_v29  ;;  %v927_v21 = vpack.c.bf16 %v926_v19, %v924_v20  ;;  %v1047_v26 = vmul.f32 %v1888_v24, %v1868_v54  ;;  %v1852_v24 = vld [vmem:[%s2259_s7 + $0x18] sm:$0xff]  }
 0x5ac   : > { %1746 = vmatpush3.bf16.msra.mxu1 %v929_v17  ;;  %1747 = vmatprep.mubr.msk.bf16.mxu1 %vm1919_vm1, %v1918_v14 }
 0x5ad   : > { %1757 = vmatprep.subr.bf16.mxu1 %v1918_v14  ;;  %v1050_v27 = vpack.c.bf16 %v1049_v25, %v1047_v26 }
 0x5b3   : > { %1748 = vmatmul.mubr.msk.bf16.vlgmr.msra.gmra.mrb[16].mxu1 %vm611_vm2, %v927_v21 }
 0x5b4   : > { %1758 = vmatpush3.bf16.msra.mxu1 %v1052_v23  ;;  %1759 = vmatprep.mubr.msk.bf16.mxu1 %vm1919_vm1, %v1918_v14  ;;  %v1851_v23 = vld [vmem:[%s2259_s7 + $0x10] sm:$0xff]  }
 0x5b5   : > { %1775 = vmatprep.subr.bf16.mxu1 %v1918_v14 }
 0x5bb   : > { %1760 = vmatmul.mubr.msk.bf16.vlgmr.msra.gmra.mrb[20].mxu1 %vm611_vm2, %v1050_v27 }
 0x5bc   : > { %1783 = vmatprep.mubr.msk.bf16.mxu1 %vm1919_vm1, %v1918_v14 }
 0x67e   : > { %v845_v30 = vpop.f32.mrb[12].mxu1 }
 0x67f   : > { %v1737_v31 = vpop.f32.mrb[13].mxu1 }
 0x680   : > { %v848_v33 = vpop.f32.mrb[14].mxu1 }
 0x681   : > { %v1818_v34 = vpack.i.bf16 %v848_v33, %v845_v30  ;;  %v1738_v35 = vpop.f32.mrb[15].mxu1  ;;  %v1662_v33 = vld [vmem:[%s2257_s5] ss:$0 sm:$0xff] }
 0x683   : > { %1819 = vrot.lane.b32.xlu0 %v1818_v34, %s1925_s22 }
 0x686   : > { %v968_v37 = vpop.f32.mrb[16].mxu1 }
 0x687   : > { %v1749_v38 = vpop.f32.mrb[17].mxu1 }
 0x688   : > { %v971_v40 = vpop.f32.mrb[18].mxu1  ;;  %v1663_v38 = vld [vmem:[%s2258_s6] ss:$0 sm:$0xff] }
 0x689   : > { %v1823_v41 = vpack.i.bf16 %v971_v40, %v968_v37  ;;  %v1750_v42 = vpop.f32.mrb[19].mxu1 }
 0x68b   : > { %1824 = vrot.lane.b32.xlu1 %v1823_v41, %s1924_s21 }
 0x68e   : > { %v1091_v43 = vpop.f32.mrb[20].mxu1 }
 0x68f   : > { %v1761_v44 = vpop.f32.mrb[21].mxu1 }
 0x690   : > { %v1094_v45 = vpop.f32.mrb[22].mxu1  ;;  %v1854_v44 = vld [vmem:[%s2261_s9 + $0x8] sm:$0xff]  }
 0x691   : > { %v1828_v46 = vpack.i.bf16 %v1094_v45, %v1091_v43  ;;  %v1762_v47 = vpop.f32.mrb[23].mxu1  ;;  %v1853_v43 = vld [vmem:[%s2261_s9] sm:$0xff]   ;;  %v1855_v45 = vld [vmem:[%s2261_s9 + $0x10] sm:$0xff]  }
 0x692   : > { %v1664_v47 = vld [vmem:[%s2260_s8] ss:$0 sm:$0xff] }
 0x693   : > { %1829 = vrot.lane.b32.xlu0 %v1828_v46, %s1921_s16  ;;  %v1856_v46 = vld [vmem:[%s2261_s9 + $0x18] sm:$0xff]   ;;  %s494_s16 = scalar_lea.vmem %s2267_s15, %s1682_s30 }
 0x6f5   : > { %v1820_v48 = vpop.permute.xlu0 %1819 }
 0x6f6   : > { %v1822_v50 = vunpack.i.h.bf16 %v1820_v48  ;;  %v1821_v51 = vunpack.i.l.bf16 %v1820_v48 }
 0x6f8   : > { %v1123_v55 = vsel %vm611_vm2, %v2103_v5, %v1822_v50  ;;  %v1122_v56 = vsel %vm611_vm2, %v2101_v2, %v1821_v51 }
 0x6fd   : > { %v1825_v49 = vpop.permute.xlu1 %1824 }
 0x6fe   : > { %v1827_v52 = vunpack.i.h.bf16 %v1825_v49  ;;  %v1826_v53 = vunpack.i.l.bf16 %v1825_v49 }
 0x700   : > { %v1126_v59 = vsel %vm1124_vm3, %v1123_v55, %v1827_v52  ;;  %v1125_v60 = vsel %vm1124_vm3, %v1122_v56, %v1826_v53 }
 0x705   : > { %v1830_v54 = vpop.permute.xlu0 %1829 }
 0x706   : > { %v1832_v57 = vunpack.i.h.bf16 %v1830_v54  ;;  %v1831_v58 = vunpack.i.l.bf16 %v1830_v54 }
 0x708   : > { %v1129_v61 = vsel %vm1127_vm4, %v1126_v59, %v1832_v57  ;;  %v1128_v62 = vsel %vm1127_vm4, %v1125_v60, %v1831_v58 }
 0x709   : > { %v1130_v63 = vpack.c.bf16 %v1129_v61, %v1128_v62 }
 0x70b   : > { %1772 = vmatmul.mubr.msk.bf16.vlgmr.msra.gmra.mrb[12].mxu0 %vm559_vm0, %v1130_v63 }
 0x70c   : > { %1795 = vmatprep.mubr.msk.bf16.mxu0 %vm1919_vm1, %v1918_v14  ;;  %1788 = vmatpush3.bf16.msra.mxu0 %v1853_v43 }
 0x70d   : > { %1789 = vmatprep.subr.bf16.mxu0 %v1918_v14 }
 0x710   : > { %1790 = vmatpush3.bf16.msra.mxu0 %v1854_v44  ;;  %v1670_v44 = vld [vmem:[%s2262_s10] ss:$0 sm:$0xff] }
 0x711   : > { %1791 = vmatprep.subr.bf16.mxu0 %v1918_v14 }
 0x714   : > { %1792 = vmatpush3.bf16.msra.mxu0 %v1855_v45 }
 0x715   : > { %1793 = vmatprep.subr.bf16.mxu0 %v1918_v14 }
 0x718   : > { %1794 = vmatpush3.bf16.msra.mxu0 %v1856_v46 }
 0x7de   : > { %v1207_v5 = vpop.f32.mrb[12].mxu0 }
 0x7df   : > { %v1208_v1 = vadd.f32 %v1656_v0, %v1207_v5  ;;  %v1773_v3 = vpop.f32.mrb[13].mxu0 }
 0x7e0   : > { %v1210_v2 = vpop.f32.mrb[14].mxu0 }
 0x7e1   : > { %v1211_v4 = vadd.f32 %v1656_v0, %v1210_v2  ;;  %v1774_v6 = vpop.f32.mrb[15].mxu0  ;;  %v1214_v7 = vadd.f32 %v1208_v1, %v2048_v9 }
 0x7e3   : > { %v1218_v8 = vsel %vm559_vm0, %v1214_v7, 0.0  ;;  %v1215_v11 = vadd.f32 %v1211_v4, %v2050_v10  ;;  %v1849_v10 = vld [vmem:[%s2259_s7] sm:$0xff]  }
 0x7e4   : > { %1219 = vadd.xlane.f32.xlu1 %v1218_v8  ;;  %1776 = vmatpush3.bf16.msra.mxu1 %v1849_v10 }
 0x7e5   : > { %v1221_v12 = vsel %vm559_vm0, %v1215_v11, 0.0  ;;  %1777 = vmatprep.subr.bf16.mxu1 %v1918_v14 }
 0x7e6   : > { %1222 = vadd.xlane.f32.xlu0 %v1221_v12 }
 0x7e8   : > { %1778 = vmatpush3.bf16.msra.mxu1 %v1850_v22 }
 0x7e9   : > { %1779 = vmatprep.subr.bf16.mxu1 %v1918_v14 }
 0x7ec   : > { %1780 = vmatpush3.bf16.msra.mxu1 %v1851_v23 }
 0x7ed   : > { %1781 = vmatprep.subr.bf16.mxu1 %v1918_v14 }
 0x7f0   : > { %1782 = vmatpush3.bf16.msra.mxu1 %v1852_v24 }
 0x871   : > { %v1220_v13 = vpop.xlane.xlu1 %1219 }
 0x872   : > { %v1225_v15 = vmul.f32 0.015625, %v1220_v13 }
 0x873   : > { %v1223_v29 = vpop.xlane.xlu0 %1222 }
 0x874   : > { %v1227_v16 = vsub.f32 %v1214_v7, %v1225_v15  ;;  %v1226_v17 = vmul.f32 0.015625, %v1223_v29 }
 0x876   : > { %v1228_v18 = vsub.f32 %v1215_v11, %v1226_v17  ;;  %v1229_v19 = vmul.f32 %v1227_v16, %v1227_v16 }
 0x878   : > { %v1231_v20 = vsel %vm559_vm0, %v1229_v19, 0.0  ;;  %v1230_v21 = vmul.f32 %v1228_v18, %v1228_v18 }
 0x879   : > { %1232 = vadd.xlane.f32.xlu0 %v1231_v20 }
 0x87a   : > { %v1234_v9 = vsel %vm559_vm0, %v1230_v21, 0.0 }
 0x87b   : > { %1235 = vadd.xlane.f32.xlu1 %v1234_v9 }
 0x906   : > { %v1233_v25 = vpop.xlane.xlu0 %1232 }
 0x907   : > { %v1237_v26 = vmul.f32 0.015625, %v1233_v25 }
 0x908   : > { %v1236_v27 = vpop.xlane.xlu1 %1235 }
 0x909   : > { %v1239_v28 = vadd.f32 1e-05, %v1237_v26  ;;  %v1238_v30 = vmul.f32 0.015625, %v1236_v27  ;;  %v1927_v27 = vmov -1.0  }
 0x90b   : > { %1889 = vrsqrt.f32 %v1239_v28  ;;  %v1240_v31 = vadd.f32 1e-05, %v1238_v30 }
 0x90d   : > { %1891 = vrsqrt.f32 %v1240_v31 }
 0x915   : > { %v1890_v32 = vpop.eup %1889 }
 0x916   : > { %v1243_v34 = vmul.f32 %v1890_v32, %v1227_v16 }
 0x917   : > { %v1892_v35 = vpop.eup %1891 }
 0x918   : > { %v1251_v36 = vmul.f32 %v1662_v33, %v1243_v34  ;;  %v1244_v37 = vmul.f32 %v1892_v35, %v1228_v18 }
 0x91a   : > { %v1252_v39 = vmul.f32 %v1662_v33, %v1244_v37  ;;  %v2191_v40 = vadd.f32 %v1663_v38, %v1251_v36 }
 0x91c   : > { %v2193_v41 = vadd.f32 %v1663_v38, %v1252_v39 }
 0x91e   : > { %v1261_v42 = vpack.c.bf16 %v2193_v41, %v2191_v40 }
 0x920   : > { %1784 = vmatmul.mubr.msk.bf16.vlgmr.msra.gmra.mrb[24].mxu1 %vm559_vm0, %v1261_v42 }
 0x9f3   : > { %v1338_v48 = vpop.f32.mrb[24].mxu1 }
 0x9f4   : > { %v1339_v49 = vadd.f32 %v1664_v47, %v1338_v48  ;;  %v1785_v50 = vpop.f32.mrb[25].mxu1 }
 0x9f5   : > { %v1341_v51 = vpop.f32.mrb[26].mxu1 }
 0x9f6   : > { %v1347_v52 = vmul.f32 0.70710677, %v1339_v49  ;;  %v1342_v53 = vadd.f32 %v1664_v47, %v1341_v51  ;;  %v1786_v54 = vpop.f32.mrb[27].mxu1  ;;  %v1345_v36 = vmul.f32 0.5, %v1339_v49 }
 0x9f8   : > { %v1353_v55 = vand.u32 2147483647, %v1347_v52  ;;  %v1348_v56 = vmul.f32 0.70710677, %v1342_v53  ;;  %vm1349_vm5 = vcmp.ge.f32.partialorder %v1347_v52, 0.0  ;;  %v1346_v37 = vmul.f32 0.5, %v1342_v53 }
 0x9f9   : > { %v1351_v28 = vsel %vm1349_vm5, 1.0, %v1927_v27 }
 0x9fa   : > { %v1355_v57 = vmul.f32 0.3275911, %v1353_v55  ;;  %v1354_v14 = vand.u32 2147483647, %v1348_v56  ;;  %v1381_v61 = vsub.f32 0.0, %v1353_v55  ;;  %vm1350_vm6 = vcmp.ge.f32.partialorder %v1348_v56, 0.0 }
 0x9fb   : > { %v1352_v33 = vsel %vm1350_vm6, 1.0, %v1927_v27 }
 0x9fc   : > { %v1357_v58 = vadd.f32 1.0, %v1355_v57  ;;  %v1356_v59 = vmul.f32 0.3275911, %v1354_v14  ;;  %v1382_v62 = vsub.f32 0.0, %v1354_v14  ;;  %v1383_v0 = vmul.f32 %v1381_v61, %v1353_v55 }
 0x9fe   : > { %1893 = vrcp.f32 %v1357_v58  ;;  %v1358_v60 = vadd.f32 1.0, %v1356_v59  ;;  %v1384_v2 = vmul.f32 %v1382_v62, %v1354_v14  ;;  %v1385_v4 = vmul.f32 1.442695, %v1383_v0 }
 0xa00   : > { %1895 = vrcp.f32 %v1358_v60  ;;  %v1387_v12 = vmul.f32 1.442695, %v1384_v2 }
 0xa01   : > { %1897 = vpow2.f32 %v1385_v4  ;;  %v1676_v4 = vld [vmem:[%s2263_s11] ss:$0 sm:$0xff] }
 0xa02   : > { %1899 = vpow2.f32 %v1387_v12 }
 0xa08   : > { %v1894_v63 = vpop.eup %1893 }
 0xa09   : > { %v1363_v5 = vmul.f32 1.0614054, %v1894_v63 }
 0xa0a   : > { %v1896_v1 = vpop.eup %1895 }
 0xa0b   : > { %v1365_v3 = vadd.f32 -1.4531521, %v1363_v5  ;;  %v1364_v6 = vmul.f32 1.0614054, %v1896_v1  ;;  %v1898_v10 = vpop.eup %1897 }
 0xa0c   : > { %v1900_v25 = vpop.eup %1899 }
 0xa0d   : > { %v1367_v7 = vmul.f32 %v1894_v63, %v1365_v3  ;;  %v1366_v8 = vadd.f32 -1.4531521, %v1364_v6 }
 0xa0f   : > { %v1369_v11 = vadd.f32 1.4214138, %v1367_v7  ;;  %v1368_v13 = vmul.f32 %v1896_v1, %v1366_v8  ;;  %v1677_v8 = vld [vmem:[%s2264_s12] ss:$0 sm:$0xff] }
 0xa11   : > { %v1371_v15 = vmul.f32 %v1894_v63, %v1369_v11  ;;  %v1370_v29 = vadd.f32 1.4214138, %v1368_v13 }
 0xa13   : > { %v1373_v16 = vadd.f32 -0.28449672, %v1371_v15  ;;  %v1372_v17 = vmul.f32 %v1896_v1, %v1370_v29 }
 0xa15   : > { %v1375_v18 = vmul.f32 %v1894_v63, %v1373_v16  ;;  %v1374_v19 = vadd.f32 -0.28449672, %v1372_v17 }
 0xa17   : > { %v1377_v20 = vadd.f32 0.2548296, %v1375_v18  ;;  %v1376_v21 = vmul.f32 %v1896_v1, %v1374_v19 }
 0xa19   : > { %v1379_v9 = vmul.f32 %v1894_v63, %v1377_v20  ;;  %v1378_v22 = vadd.f32 0.2548296, %v1376_v21 }
 0xa1b   : > { %v1389_v23 = vmul.f32 %v1898_v10, %v1379_v9  ;;  %v1380_v24 = vmul.f32 %v1896_v1, %v1378_v22 }
 0xa1d   : > { %v1391_v26 = vsub.f32 1.0, %v1389_v23  ;;  %v1390_v30 = vmul.f32 %v1900_v25, %v1380_v24 }
 0xa1f   : > { %v1393_v31 = vmul.f32 %v1391_v26, %v1351_v28  ;;  %v1392_v32 = vsub.f32 1.0, %v1390_v30 }
 0xa21   : > { %v1395_v34 = vadd.f32 1.0, %v1393_v31  ;;  %v1394_v35 = vmul.f32 %v1392_v32, %v1352_v33 }
 0xa23   : > { %v1396_v38 = vadd.f32 1.0, %v1394_v35  ;;  %v1397_v39 = vmul.f32 %v1395_v34, %v1345_v36  ;;  %v1678_v34 = vld [vmem:[%s2265_s13] ss:$0 sm:$0xff] }
 0xa25   : > { %v1398_v42 = vmul.f32 %v1396_v38, %v1346_v37  ;;  %v1679_v37 = vld [vmem:[%s2266_s14] ss:$0 sm:$0xff] }
 0xa27   : > { %v1399_v43 = vpack.c.bf16 %v1398_v42, %v1397_v39 }
 0xa29   : > { %1796 = vmatmul.mubr.msk.bf16.vlgmr.msra.gmra.mrb[16].mxu0 %vm559_vm0, %v1399_v43 }
 0xafc   : > { %v1476_v45 = vpop.f32.mrb[16].mxu0 }
 0xafd   : > { %v1477_v46 = vadd.f32 %v1670_v44, %v1476_v45  ;;  %v1797_v47 = vpop.f32.mrb[17].mxu0 }
 0xafe   : > { %v1479_v48 = vpop.f32.mrb[18].mxu0 }
 0xaff   : > { %v1480_v50 = vadd.f32 %v1670_v44, %v1479_v48  ;;  %v1798_v51 = vpop.f32.mrb[19].mxu0  ;;  %v1483_v52 = vadd.f32 %v1477_v46, %v2191_v40 }
 0xb01   : > { %v1487_v49 = vsel %vm559_vm0, %v1483_v52, 0.0  ;;  %v1484_v53 = vadd.f32 %v1480_v50, %v2193_v41 }
 0xb02   : > { %1488 = vadd.xlane.f32.xlu0 %v1487_v49 }
 0xb03   : > { %v1490_v54 = vsel %vm559_vm0, %v1484_v53, 0.0 }
 0xb04   : > { %1491 = vadd.xlane.f32.xlu1 %v1490_v54 }
 0xb8f   : > { %v1489_v55 = vpop.xlane.xlu0 %1488 }
 0xb90   : > { %v1493_v56 = vmul.f32 0.015625, %v1489_v55 }
 0xb91   : > { %v1492_v57 = vpop.xlane.xlu1 %1491 }
 0xb92   : > { %v1495_v14 = vsub.f32 %v1483_v52, %v1493_v56  ;;  %v1494_v58 = vmul.f32 0.015625, %v1492_v57 }
 0xb94   : > { %v1496_v59 = vsub.f32 %v1484_v53, %v1494_v58  ;;  %v1497_v60 = vmul.f32 %v1495_v14, %v1495_v14 }
 0xb96   : > { %v1499_v61 = vsel %vm559_vm0, %v1497_v60, 0.0  ;;  %v1498_v62 = vmul.f32 %v1496_v59, %v1496_v59 }
 0xb97   : > { %1500 = vadd.xlane.f32.xlu0 %v1499_v61 }
 0xb98   : > { %v1502_v40 = vsel %vm559_vm0, %v1498_v62, 0.0 }
 0xb99   : > { %1503 = vadd.xlane.f32.xlu1 %v1502_v40 }
 0xc24   : > { %v1501_v63 = vpop.xlane.xlu0 %1500 }
 0xc25   : > { %v1505_v41 = vmul.f32 0.015625, %v1501_v63 }
 0xc26   : > { %v1504_v0 = vpop.xlane.xlu1 %1503 }
 0xc27   : > { %v1507_v5 = vadd.f32 1e-05, %v1505_v41  ;;  %v1506_v1 = vmul.f32 0.015625, %v1504_v0 }
 0xc29   : > { %1901 = vrsqrt.f32 %v1507_v5  ;;  %v1508_v3 = vadd.f32 1e-05, %v1506_v1 }
 0xc2b   : > { %1903 = vrsqrt.f32 %v1508_v3 }
 0xc33   : > { %v1902_v2 = vpop.eup %1901 }
 0xc34   : > { %v1511_v6 = vmul.f32 %v1902_v2, %v1495_v14 }
 0xc35   : > { %v1904_v7 = vpop.eup %1903 }
 0xc36   : > { %v1519_v11 = vmul.f32 %v1676_v4, %v1511_v6  ;;  %v1512_v12 = vmul.f32 %v1904_v7, %v1496_v59 }
 0xc38   : > { %v1527_v13 = vadd.f32 %v1677_v8, %v1519_v11  ;;  %v1520_v15 = vmul.f32 %v1676_v4, %v1512_v12 }
 0xc3a   : > { %v1531_v29 = vsel %vm559_vm0, %v1527_v13, 0.0  ;;  %v1528_v16 = vadd.f32 %v1677_v8, %v1520_v15 }
 0xc3b   : > { %1532 = vadd.xlane.f32.xlu0 %v1531_v29 }
 0xc3c   : > { %v1534_v17 = vsel %vm559_vm0, %v1528_v16, 0.0 }
 0xc3d   : > { %1535 = vadd.xlane.f32.xlu1 %v1534_v17 }
 0xcc8   : > { %v1533_v18 = vpop.xlane.xlu0 %1532 }
 0xcc9   : > { %v1537_v19 = vmul.f32 0.015625, %v1533_v18 }
 0xcca   : > { %v1536_v20 = vpop.xlane.xlu1 %1535 }
 0xccb   : > { %v1539_v21 = vsub.f32 %v1527_v13, %v1537_v19  ;;  %v1538_v9 = vmul.f32 0.015625, %v1536_v20 }
 0xccd   : > { %v1540_v10 = vsub.f32 %v1528_v16, %v1538_v9  ;;  %v1541_v22 = vmul.f32 %v1539_v21, %v1539_v21 }
 0xccf   : > { %v1543_v23 = vsel %vm559_vm0, %v1541_v22, 0.0  ;;  %v1542_v24 = vmul.f32 %v1540_v10, %v1540_v10 }
 0xcd0   : > { %1544 = vadd.xlane.f32.xlu0 %v1543_v23 }
 0xcd1   : > { %v1546_v25 = vsel %vm559_vm0, %v1542_v24, 0.0 }
 0xcd2   : > { %1547 = vadd.xlane.f32.xlu1 %v1546_v25 }
 0xd5d   : > { %v1545_v26 = vpop.xlane.xlu0 %1544 }
 0xd5e   : > { %v1549_v27 = vmul.f32 0.015625, %v1545_v26 }
 0xd5f   : > { %v1548_v28 = vpop.xlane.xlu1 %1547 }
 0xd60   : > { %v1551_v30 = vadd.f32 1e-05, %v1549_v27  ;;  %v1550_v31 = vmul.f32 0.015625, %v1548_v28 }
 0xd62   : > { %1905 = vrsqrt.f32 %v1551_v30  ;;  %v1552_v32 = vadd.f32 1e-05, %v1550_v31 }
 0xd64   : > { %1907 = vrsqrt.f32 %v1552_v32 }
 0xd6c   : > { %v1906_v33 = vpop.eup %1905 }
 0xd6d   : > { %v1555_v35 = vmul.f32 %v1906_v33, %v1539_v21 }
 0xd6e   : > { %v1908_v36 = vpop.eup %1907 }
 0xd6f   : > { %v1563_v38 = vmul.f32 %v1678_v34, %v1555_v35  ;;  %v1556_v39 = vmul.f32 %v1908_v36, %v1540_v10 }
 0xd71   : > { %v1571_v42 = vadd.f32 %v1679_v37, %v1563_v38  ;;  %v1564_v43 = vmul.f32 %v1678_v34, %v1556_v39 }
 0xd73   : > { %1573 = vst.msk [vmem:[%s494_s16] sm:$0xff] %vm559_vm0, %v1571_v42  ;;  %v1572_v44 = vadd.f32 %v1679_v37, %v1564_v43 }
 0xd75   : > { %1574 = vst.msk [vmem:[%s494_s16 + $0x8] sm:$0xff] %vm559_vm0, %v1572_v44 }
 0xd76 PF: > { %s25_s18 = sadd.s32 1, %s1915_s18  }
 0xd77   : > { %p22_p4 = scmp.ge.s32.totalorder %s25_s18, 4  }
 0xd79   :  { %24 = sbr.rel (!%p22_p4) target bundleno = 1 (0x1), region = 110 }

// kernel: informer_stack_forward.9
= control target key start
LH: loop header
LB: loop body
LE: loop exit
PB: predicated region body
PF: predicated region fallthrough
CT: control target
= control target key end

     0   :  { %s2501_s18 = smov 0   ;;  %s2919_s0 = inlined_call_operand.vmem [shape: f32[2,32,64], index: 0, kind: input, shape index: {}]   ;;  %s2920_s1 = inlined_call_operand.vmem [shape: bf16[64,192], index: 1, kind: input, shape index: {}]   ;;  %s2921_s2 = inlined_call_operand.vmem [shape: f32[1,192], index: 2, kind: input, shape index: {}]   ;;  %s2922_s3 = inlined_call_operand.vmem [shape: bf16[64,64], index: 3, kind: input, shape index: {}]   ;;  %s2923_s4 = inlined_call_operand.vmem [shape: f32[1,64], index: 4, kind: input, shape index: {}]   ;;  %s2924_s5 = inlined_call_operand.vmem [shape: f32[1,64], index: 5, kind: input, shape index: {}]   ;;  %s2925_s6 = inlined_call_operand.vmem [shape: f32[1,64], index: 6, kind: input, shape index: {}]   ;;  %s2926_s7 = inlined_call_operand.vmem [shape: bf16[64,64], index: 7, kind: input, shape index: {}]   ;;  %s2927_s8 = inlined_call_operand.vmem [shape: f32[1,64], index: 8, kind: input, shape index: {}]   ;;  %s2928_s9 = inlined_call_operand.vmem [shape: bf16[64,64], index: 9, kind: input, shape index: {}]   ;;  %s2929_s10 = inlined_call_operand.vmem [shape: f32[1,64], index: 10, kind: input, shape index: {}]   ;;  %s2930_s11 = inlined_call_operand.vmem [shape: f32[1,64], index: 11, kind: input, shape index: {}, may-alias: {11,13}]   ;;  %s2931_s12 = inlined_call_operand.vmem [shape: f32[1,64], index: 12, kind: input, shape index: {}, may-alias: {12,14}]   ;;  %s2932_s13 = inlined_call_operand.vmem [shape: f32[1,64], index: 13, kind: input, shape index: {}, may-alias: {11,13}]   ;;  %s2933_s14 = inlined_call_operand.vmem [shape: f32[1,64], index: 14, kind: input, shape index: {}, may-alias: {12,14}]   ;;  %s2934_s15 = inlined_call_operand.vmem [shape: f32[2,32,64], index: 15, kind: output, shape index: {}]  }
   0x1 LB: > { %s2015_s19 = sadd.s32 4294967295, %s2410_s18   ;;  %p2019_p0 = scmp.ge.s32.totalorder %s2410_s18, 1  ;;  %s2410_s18 = sphi %s2501_s18, %s25_s18  }
   0x2   : > { %p437_p1 = scmp.lt.s32.totalorder %s2410_s18, 3 }
   0x4   : > { %p438_p2 = pnand %p2019_p0, %p437_p1 }
   0x5   : > { %v2284_v0 = vld [vmem:[%s2920_s1 + $0x4] ss:$8 sps:$4 sm:$0xff] (!%p438_p2)   ;;  %p485_p3 = scmp.lt.s32.totalorder (!%p438_p2), %s2015_s19, 1  ;;  %v2286_v1 = vld [vmem:[%s2920_s1] ss:$8 sps:$4 sm:$0xff] (!%p438_p2)   ;;  %v2412_v2 = vmov (!%p438_p2), 0   ;;  %v512_v15 = vlaneseq (!%p438_p2) }
   0x6   : > { %441 = sbr.rel (%p438_p2) target bundleno = 3225 (0xc99), region = 80  ;;  %601 = vmatprep.mubr.bf16.mxu0 (!%p438_p2), %v2412_v2  ;;  %569 = vmatprep.subr.bf16.mxu0 (!%p438_p2), %v2284_v0  ;;  %v2287_v3 = vld [vmem:[%s2920_s1 + $0x14] ss:$8 sps:$4 sm:$0xff] (!%p438_p2)   ;;  %v2289_v4 = vld [vmem:[%s2920_s1 + $0x10] ss:$8 sps:$4 sm:$0xff] (!%p438_p2)   ;;  %vm562_vm0 = vcmask (!%p438_p2), 523264  }
   0x7   : > { %570 = vmatpush1.bf16.msra.mxu0 (!%p438_p2), %v2286_v1  ;;  %v2290_v5 = vld [vmem:[%s2920_s1 + $0x24] ss:$8 sps:$4 sm:$0xff] (!%p438_p2)   ;;  %v2292_v6 = vld [vmem:[%s2920_s1 + $0x20] ss:$8 sps:$4 sm:$0xff] (!%p438_p2)   ;;  %v2293_v7 = vld [vmem:[%s2920_s1 + $0x34] ss:$8 sps:$4 sm:$0xff] (!%p438_p2)  }
   0x8   : > { %571 = vmatprep.subr.bf16.mxu0 (!%p438_p2), %v2287_v3  ;;  %v2295_v8 = vld [vmem:[%s2920_s1 + $0x30] ss:$8 sps:$4 sm:$0xff] (!%p438_p2)   ;;  %v513_v16 = vshrl.u32 (!%p438_p2), %v512_v15, 7  ;;  %v510_v18 = vld [vmem:[%s2921_s2] sm:$0x3] (!%p438_p2)  ;;  %vm632_vm1 = vcmask (!%p438_p2), 130048  }
   0x9   : > { %s2413_s25 = smov (!%p438_p2), 64   ;;  %s2414_s26 = smov (!%p438_p2), 48   ;;  %vm698_vm2 = vcmask (!%p438_p2), 261120   ;;  %vm1398_vm3 = vcmask (!%p438_p2), 392192  }
   0xa   : > { %v514_v17 = vsub.s32 (!%p438_p2), 0, %v513_v16  ;;  %v518_v19 = vsub.s32 (!%p438_p2), 1, %v513_v16  ;;  %s2415_s27 = smov (!%p438_p2), 112   ;;  %s2416_s29 = smov (!%p438_p2), 32  }
   0xb   : > { %572 = vmatpush1.bf16.msra.mxu0 (!%p438_p2), %v2289_v4  ;;  %s2417_s30 = smov (!%p438_p2), 96   ;;  %s2418_s16 = smov (!%p438_p2), 16  }
   0xc   : > { %573 = vmatprep.subr.bf16.mxu0 (!%p438_p2), %v2290_v5  ;;  %v515_v20 = vrot.slane (!%p438_p2), %v510_v18, %v514_v17  ;;  %v519_v22 = vrot.slane (!%p438_p2), %v510_v18, %v518_v19  ;;  %s2419_s17 = smov (!%p438_p2), 80  }
   0xd   : > { %s2936_s19 = smov (!%p485_p3, %s2015_s19), 1 }
   0xe   : > { %s2077_s28 = sshll.u32 %s2936_s19, 5 }
   0xf   : > { %s489_s13 = scalar_lea.vmem %s2919_s0, %s2077_s28  ;;  %574 = vmatpush1.bf16.msra.mxu0 %v2292_v6 }
  0x10   : > { %v2541_v9 = vld [vmem:[%s489_s13] sm:$0xff]  ;;  %v2543_v10 = vld [vmem:[%s489_s13 + $0x8] sm:$0xff]  ;;  %575 = vmatprep.subr.bf16.mxu0 %v2293_v7  ;;  %v2548_v12 = vld [vmem:[%s489_s13 + $0x10] sm:$0xff] }
  0x11   : > { %v500_v11 = vpack.c.bf16 %v2543_v10, %v2541_v9  ;;  %v2550_v13 = vld [vmem:[%s489_s13 + $0x18] sm:$0xff] }
  0x12   : > { %v501_v14 = vpack.c.bf16 %v2550_v13, %v2548_v12 }
  0x13   : > { %576 = vmatpush1.bf16.msra.mxu0 %v2295_v8 }
  0x16   : > { %2032 = vmatmul.mubr.msk.bf16.vlgmr.msra.gmra.mrb[0].mxu0 %vm562_vm0, %v500_v11 }
  0x17   : > { %611 = vmatprep.mubr.bf16.mxu0 %v2412_v2 }
  0x1e   : > { %2033 = vmatmul.mubr.msk.bf16.gmra.mrb[4].mxu0 %vm562_vm0, %v501_v14 }
  0xe9   : > { %v603_v21 = vpop.f32.mrb[0].mxu0 }
  0xea   : > { %v605_v23 = vpop.f32.mrb[1].mxu0  ;;  %v604_v25 = vadd.f32 %v603_v21, %v515_v20 }
  0xeb   : > { %v607_v24 = vpop.f32.mrb[2].mxu0  ;;  %v606_v28 = vadd.f32 %v605_v23, %v519_v22 }
  0xec   : > { %v608_v26 = vadd.f32 %v607_v24, %v515_v20  ;;  %v609_v27 = vpop.f32.mrb[3].mxu0 }
  0xed   : > { %v610_v29 = vadd.f32 %v609_v27, %v519_v22 }
  0xee   : > { %v2558_v30 = vpack.c.bf16 %v608_v26, %v604_v25 }
  0xef   : > { %v2560_v31 = vpack.c.bf16 %v610_v29, %v606_v28 }
  0xf0   : > { %628 = vrot.lane.b32.xlu0 %v2558_v30, %s2413_s25  ;;  %2133 = vmatprep.mubr.msk.bf16.mxu1 %vm632_vm1, %v2558_v30 }
  0xf1   : > { %v613_v32 = vpop.f32.mrb[4].mxu0 }
  0xf2   : > { %v615_v33 = vpop.f32.mrb[5].mxu0  ;;  %v614_v35 = vadd.f32 %v613_v32, %v515_v20 }
  0xf3   : > { %v617_v34 = vpop.f32.mrb[6].mxu0  ;;  %v616_v38 = vadd.f32 %v615_v33, %v519_v22 }
  0xf4   : > { %v618_v36 = vadd.f32 %v617_v34, %v515_v20  ;;  %v619_v37 = vpop.f32.mrb[7].mxu0  ;;  %804 = vrot.lane.b32.xlu0 %v2558_v30, %s2414_s26 }
  0xf5   : > { %v620_v39 = vadd.f32 %v619_v37, %v519_v22 }
  0xf6   : > { %v2567_v40 = vpack.c.bf16 %v618_v36, %v614_v35 }
  0xf7   : > { %v2569_v41 = vpack.c.bf16 %v620_v39, %v616_v38 }
  0xf8   : > { %630 = vrot.lane.b32.xlu1 %v2567_v40, %s2413_s25  ;;  %800 = vrot.lane.b32.xlu0 %v2558_v30, %s2415_s27 }
  0xfc   : > { %806 = vrot.lane.b32.xlu1 %v2567_v40, %s2414_s26  ;;  %802 = vrot.lane.b32.xlu0 %v2567_v40, %s2415_s27 }
 0x100   : > { %986 = vrot.lane.b32.xlu1 %v2558_v30, %s2416_s29  ;;  %982 = vrot.lane.b32.xlu0 %v2558_v30, %s2417_s30 }
 0x104   : > { %988 = vrot.lane.b32.xlu1 %v2567_v40, %s2416_s29 }
 0x108   : > { %984 = vrot.lane.b32.xlu1 %v2567_v40, %s2417_s30 }
 0x162   : > { %v629_v42 = vpop.permute.xlu0 %628 }
 0x163   : > { %2229 = vmatprep.subr.msk.bf16.mxu1 %vm632_vm1, %v629_v42  ;;  %v640_v43 = vsel %vm632_vm1, %v629_v42, 0 }
 0x164   : > { %2130 = vmatpush3.bf16.xpose.msra.mxu1 %v640_v43 }
 0x166   : > { %v805_v44 = vpop.permute.xlu0 %804 }
 0x167   : > { %v815_v45 = vsel %vm632_vm1, %v805_v44, 0  ;;  %2231 = vmatprep.subr.msk.bf16.mxu0 %vm632_vm1, %v805_v44 }
 0x168   : > { %2146 = vmatpush3.bf16.xpose.msra.mxu0 %v815_v45 }
 0x16a   : > { %v631_v46 = vpop.permute.xlu1 %630  ;;  %v801_v47 = vpop.permute.xlu0 %800 }
 0x16b   : > { %2230 = vmatprep.subr.msk.bf16.mxu1 %vm632_vm1, %v631_v46  ;;  %2149 = vmatprep.mubr.msk.bf16.mxu0 %vm632_vm1, %v801_v47  ;;  %v643_v48 = vsel %vm632_vm1, %v631_v46, 0 }
 0x16c   : > { %2132 = vmatpush3.bf16.xpose.msra.mxu1 %v643_v48 }
 0x16d   : > { %2137 = vmatprep.subr.bf16.mxu1 %v2560_v31 }
 0x16e   : > { %v807_v49 = vpop.permute.xlu1 %806  ;;  %v803_v51 = vpop.permute.xlu0 %802 }
 0x16f   : > { %v818_v50 = vsel %vm632_vm1, %v807_v49, 0  ;;  %2232 = vmatprep.subr.msk.bf16.mxu0 %vm632_vm1, %v807_v49 }
 0x170   : > { %2148 = vmatpush3.bf16.xpose.msra.mxu0 %v818_v50 }
 0x172   : > { %v987_v52 = vpop.permute.xlu1 %986  ;;  %v983_v54 = vpop.permute.xlu0 %982 }
 0x173   : > { %2134 = vmatmul.mubr.msk.bf16.vlgmr.msra.gmra.mrb[0].mxu1 %vm632_vm1, %v2567_v40  ;;  %2233 = vmatprep.subr.msk.bf16.mxu0 %vm632_vm1, %v987_v52  ;;  %v997_v53 = vsel %vm632_vm1, %v987_v52, 0 }
 0x174   : > { %2138 = vmatpush3.bf16.msra.mxu1 %v2560_v31 }
 0x175   : > { %2139 = vmatprep.subr.bf16.mxu1 %v2569_v41 }
 0x176   : > { %v989_v55 = vpop.permute.xlu1 %988 }
 0x177   : > { %2150 = vmatmul.mubr.msk.bf16.vlgmr.msra.gmra.mrb[8].mxu0 %vm632_vm1, %v803_v51  ;;  %v1000_v56 = vsel %vm632_vm1, %v989_v55, 0 }
 0x178   : > { %2140 = vmatpush3.bf16.msra.mxu1 %v2569_v41  ;;  %2162 = vmatpush3.bf16.xpose.msra.mxu0 %v997_v53 }
 0x179   : > { %2165 = vmatprep.mubr.msk.bf16.mxu0 %vm632_vm1, %v983_v54  ;;  %2234 = vmatprep.subr.msk.bf16.mxu0 %vm632_vm1, %v989_v55 }
 0x17a   : > { %v985_v57 = vpop.permute.xlu1 %984 }
 0x180   : > { %2164 = vmatpush3.bf16.xpose.msra.mxu0 %v1000_v56 }
 0x187   : > { %2166 = vmatmul.mubr.msk.bf16.vlgmr.msra.gmra.mrb[12].mxu0 %vm632_vm1, %v985_v57 }
 0x246   : > { %v2135_v58 = vpop.f32.mrb[0].mxu1 }
 0x247   : > { %v696_v59 = vmul.f32 0.25, %v2135_v58  ;;  %v679_v60 = vpop.f32.mrb[1].mxu1 }
 0x248   : > { %v2136_v61 = vpop.f32.mrb[2].mxu1  ;;  %v694_v62 = vmul.f32 0.25, %v679_v60 }
 0x249   : > { %v682_v63 = vpop.f32.mrb[3].mxu1  ;;  %v705_v0 = vsel %vm698_vm2, %v696_v59, -inf  ;;  %v697_v5 = vmul.f32 0.25, %v2136_v61 }
 0x24a   : > { %v2151_v1 = vpop.f32.mrb[8].mxu0  ;;  %706 = vmax.xlane.f32.xlu0 %v705_v0  ;;  %v699_v11 = vsel %vm698_vm2, %v694_v62, -inf  ;;  %v695_v14 = vmul.f32 0.25, %v682_v63 }
 0x24b   : > { %v871_v2 = vmul.f32 0.25, %v2151_v1  ;;  %v854_v3 = vpop.f32.mrb[9].mxu0  ;;  %v708_v17 = vsel %vm698_vm2, %v697_v5, -inf }
 0x24c   : > { %v2152_v4 = vpop.f32.mrb[10].mxu0  ;;  %v869_v6 = vmul.f32 0.25, %v854_v3  ;;  %v702_v20 = vsel %vm698_vm2, %v695_v14, -inf }
 0x24d   : > { %v857_v7 = vpop.f32.mrb[11].mxu0  ;;  %v879_v8 = vsel %vm698_vm2, %v871_v2, -inf  ;;  %v872_v18 = vmul.f32 0.25, %v2152_v4 }
 0x24e   : > { %880 = vmax.xlane.f32.xlu1 %v879_v8  ;;  %700 = vmax.xlane.f32.xlu0 %v699_v11  ;;  %v2611_v15 = vmul.f32 0.25, %v857_v7  ;;  %v873_v16 = vsel %vm698_vm2, %v869_v6, -inf }
 0x24f   : > { %v882_v21 = vsel %vm698_vm2, %v872_v18, -inf }
 0x250   : > { %v876_v19 = vsel %vm698_vm2, %v2611_v15, -inf }
 0x252   : > { %874 = vmax.xlane.f32.xlu1 %v873_v16  ;;  %709 = vmax.xlane.f32.xlu0 %v708_v17 }
 0x256   : > { %877 = vmax.xlane.f32.xlu0 %v876_v19  ;;  %703 = vmax.xlane.f32.xlu1 %v702_v20 }
 0x25a   : > { %v2167_v22 = vpop.f32.mrb[12].mxu0  ;;  %883 = vmax.xlane.f32.xlu0 %v882_v21 }
 0x25b   : > { %v2619_v23 = vmul.f32 0.25, %v2167_v22  ;;  %v1036_v24 = vpop.f32.mrb[13].mxu0 }
 0x25c   : > { %v2168_v25 = vpop.f32.mrb[14].mxu0  ;;  %v2621_v26 = vmul.f32 0.25, %v1036_v24 }
 0x25d   : > { %v1039_v27 = vpop.f32.mrb[15].mxu0  ;;  %v1061_v28 = vsel %vm698_vm2, %v2619_v23, -inf  ;;  %v2627_v32 = vmul.f32 0.25, %v2168_v25 }
 0x25e   : > { %v2625_v29 = vmul.f32 0.25, %v1039_v27  ;;  %1062 = vmax.xlane.f32.xlu1 %v1061_v28  ;;  %v1055_v34 = vsel %vm698_vm2, %v2621_v26, -inf }
 0x25f   : > { %v1064_v35 = vsel %vm698_vm2, %v2627_v32, -inf }
 0x260   : > { %v1058_v33 = vsel %vm698_vm2, %v2625_v29, -inf }
 0x261   : > { %1059 = vmax.xlane.f32.xlu0 %v1058_v33 }
 0x262   : > { %1056 = vmax.xlane.f32.xlu1 %v1055_v34 }
 0x265   : > { %1065 = vmax.xlane.f32.xlu0 %v1064_v35 }
 0x273   : > { %921 = vrot.lane.b32.xlu1 %v2560_v31, %s2415_s27 }
 0x2d7   : > { %v707_v36 = vpop.xlane.xlu0 %706 }
 0x2d8   : > { %v713_v37 = vsub.f32 %v696_v59, %v707_v36 }
 0x2da   : > { %v719_v38 = vmul.f32 1.442695, %v713_v37 }
 0x2db   : > { %v881_v39 = vpop.xlane.xlu1 %880  ;;  %v701_v42 = vpop.xlane.xlu0 %700 }
 0x2dc   : > { %2308 = vpow2.f32 %v719_v38  ;;  %v887_v43 = vsub.f32 %v871_v2, %v881_v39  ;;  %v711_v44 = vsub.f32 %v694_v62, %v701_v42 }
 0x2de   : > { %v893_v45 = vmul.f32 1.442695, %v887_v43  ;;  %v715_v46 = vmul.f32 1.442695, %v711_v44 }
 0x2df   : > { %v875_v47 = vpop.xlane.xlu1 %874  ;;  %v710_v48 = vpop.xlane.xlu0 %709 }
 0x2e0   : > { %2310 = vpow2.f32 %v893_v45  ;;  %v885_v49 = vsub.f32 %v869_v6, %v875_v47  ;;  %v714_v50 = vsub.f32 %v697_v5, %v710_v48 }
 0x2e1   : > { %2312 = vpow2.f32 %v715_v46 }
 0x2e2   : > { %v889_v51 = vmul.f32 1.442695, %v885_v49  ;;  %v721_v52 = vmul.f32 1.442695, %v714_v50 }
 0x2e3   : > { %v878_v53 = vpop.xlane.xlu0 %877  ;;  %v704_v54 = vpop.xlane.xlu1 %703 }
 0x2e4   : > { %2314 = vpow2.f32 %v721_v52  ;;  %v712_v56 = vsub.f32 %v695_v14, %v704_v54  ;;  %v886_v61 = vsub.f32 %v2611_v15, %v878_v53 }
 0x2e5   : > { %2316 = vpow2.f32 %v889_v51 }
 0x2e6   : > { %v2637_v55 = vpop.eup %2308  ;;  %v717_v62 = vmul.f32 1.442695, %v712_v56  ;;  %v891_v3 = vmul.f32 1.442695, %v886_v61 }
 0x2e7   : > { %v884_v57 = vpop.xlane.xlu0 %883  ;;  %v729_v58 = vsel %vm698_vm2, %v2637_v55, 0.0 }
 0x2e8   : > { %v888_v59 = vsub.f32 %v872_v18, %v884_v57  ;;  %730 = vadd.xlane.f32.xlu1 %v729_v58 }
 0x2ea   : > { %v2641_v60 = vpop.eup %2310  ;;  %v895_v63 = vmul.f32 1.442695, %v888_v59 }
 0x2eb   : > { %v1063_v0 = vpop.xlane.xlu1 %1062  ;;  %v903_v1 = vsel %vm698_vm2, %v2641_v60, 0.0  ;;  %v2646_v2 = vpop.eup %2312 }
 0x2ec   : > { %2318 = vpow2.f32 %v895_v63  ;;  %904 = vadd.xlane.f32.xlu1 %v903_v1  ;;  %v723_v6 = vsel %vm698_vm2, %v2646_v2, 0.0  ;;  %v1069_v21 = vsub.f32 %v2619_v23, %v1063_v0 }
 0x2ed   : > { %2320 = vpow2.f32 %v717_v62 }
 0x2ee   : > { %v2648_v4 = vpop.eup %2314  ;;  %2322 = vpow2.f32 %v891_v3  ;;  %v1060_v22 = vpop.xlane.xlu0 %1059  ;;  %v1075_v24 = vmul.f32 1.442695, %v1069_v21 }
 0x2ef   : > { %v1057_v5 = vpop.xlane.xlu1 %1056  ;;  %v2652_v7 = vpop.eup %2316  ;;  %v732_v8 = vsel %vm698_vm2, %v2648_v4, 0.0  ;;  %v1068_v34 = vsub.f32 %v2625_v29, %v1060_v22 }
 0x2f0   : > { %724 = vadd.xlane.f32.xlu1 %v723_v6  ;;  %733 = vadd.xlane.f32.xlu0 %v732_v8  ;;  %v897_v14 = vsel %vm698_vm2, %v2652_v7, 0.0  ;;  %v1067_v25 = vsub.f32 %v2621_v26, %v1057_v5  ;;  %2324 = vpow2.f32 %v1075_v24 }
 0x2f1   : > { %v1073_v37 = vmul.f32 1.442695, %v1068_v34 }
 0x2f2   : > { %v1071_v27 = vmul.f32 1.442695, %v1067_v25  ;;  %v1066_v28 = vpop.xlane.xlu0 %1065 }
 0x2f3   : > { %v2656_v11 = vpop.permute.xlu1 %921  ;;  %v1070_v33 = vsub.f32 %v2627_v32, %v1066_v28 }
 0x2f4   : > { %898 = vadd.xlane.f32.xlu1 %v897_v14  ;;  %2153 = vmatprep.subr.bf16.mxu1 %v2656_v11  ;;  %2326 = vpow2.f32 %v1071_v27 }
 0x2f5   : > { %v1077_v35 = vmul.f32 1.442695, %v1070_v33 }
 0x2f6   : > { %v2661_v15 = vpop.eup %2318 }
 0x2f7   : > { %v906_v16 = vsel %vm698_vm2, %v2661_v15, 0.0  ;;  %v2665_v17 = vpop.eup %2320  ;;  %2328 = vpow2.f32 %v1077_v35 }
 0x2f8   : > { %907 = vadd.xlane.f32.xlu0 %v906_v16  ;;  %v726_v18 = vsel %vm698_vm2, %v2665_v17, 0.0  ;;  %v2669_v19 = vpop.eup %2322  ;;  %2330 = vpow2.f32 %v1073_v37 }
 0x2f9   : > { %v900_v20 = vsel %vm698_vm2, %v2669_v19, 0.0 }
 0x2fa   : > { %v2681_v36 = vpop.eup %2324 }
 0x2fb   : > { %v1085_v23 = vsel %vm698_vm2, %v2681_v36, 0.0 }
 0x2fc   : > { %727 = vadd.xlane.f32.xlu0 %v726_v18 }
 0x2fe   : > { %v2685_v38 = vpop.eup %2326 }
 0x2ff   : > { %v1079_v26 = vsel %vm698_vm2, %v2685_v38, 0.0 }
 0x300   : > { %901 = vadd.xlane.f32.xlu0 %v900_v20 }
 0x301   : > { %v2689_v39 = vpop.eup %2328 }
 0x302   : > { %v1088_v29 = vsel %vm698_vm2, %v2689_v39, 0.0  ;;  %v2693_v32 = vpop.eup %2330 }
 0x303   : > { %v1082_v42 = vsel %vm698_vm2, %v2693_v32, 0.0 }
 0x305   : > { %1101 = vrot.lane.b32.xlu1 %v2560_v31, %s2417_s30 }
 0x316   : > { %923 = vrot.lane.b32.xlu0 %v2569_v41, %s2415_s27 }
 0x329   : > { %1086 = vadd.xlane.f32.xlu1 %v1085_v23 }
 0x32d   : > { %1080 = vadd.xlane.f32.xlu1 %v1079_v26 }
 0x335   : > { %1089 = vadd.xlane.f32.xlu0 %v1088_v29 }
 0x339   : > { %1083 = vadd.xlane.f32.xlu0 %v1082_v42 }
 0x33e   : > { %1103 = vrot.lane.b32.xlu1 %v2569_v41, %s2417_s30 }
 0x342   : > { %1168 = vrot.lane.b32.xlu1 %v2567_v40, %s2418_s16 }
 0x346   : > { %1164 = vrot.lane.b32.xlu1 %v2567_v40, %s2419_s17 }
 0x34f   : > { %1166 = vrot.lane.b32.xlu0 %v2558_v30, %s2418_s16 }
 0x353   : > { %1162 = vrot.lane.b32.xlu0 %v2558_v30, %s2419_s17 }
 0x375   : > { %v731_v43 = vpop.xlane.xlu1 %730 }
 0x379   : > { %v905_v44 = vpop.xlane.xlu1 %904 }
 0x37d   : > { %v734_v45 = vpop.xlane.xlu0 %733  ;;  %v725_v46 = vpop.xlane.xlu1 %724 }
 0x37e   : > { %2332 = vrcp.f32 %v734_v45 }
 0x37f   : > { %2334 = vrcp.f32 %v725_v46 }
 0x380   : > { %2336 = vrcp.f32 %v731_v43 }
 0x381   : > { %v899_v48 = vpop.xlane.xlu1 %898 }
 0x385   : > { %v908_v47 = vpop.xlane.xlu0 %907  ;;  %v1102_v6 = vpop.permute.xlu1 %1101 }
 0x388   : > { %v2333_v40 = vpop.eup %2332 }
 0x389   : > { %v728_v49 = vpop.xlane.xlu0 %727  ;;  %v2335_v51 = vpop.eup %2334  ;;  %v742_v53 = vmul.f32 %v2333_v40, %v2648_v4 }
 0x38a   : > { %2338 = vrcp.f32 %v728_v49  ;;  %v2337_v52 = vpop.eup %2336  ;;  %v736_v54 = vmul.f32 %v2335_v51, %v2646_v2 }
 0x38b   : > { %2340 = vrcp.f32 %v899_v48  ;;  %v740_v58 = vmul.f32 %v2337_v52, %v2637_v55 }
 0x38d   : > { %v902_v50 = vpop.xlane.xlu0 %901  ;;  %v744_v62 = vpack.c.bf16 %v742_v53, %v740_v58 }
 0x38e   : > { %2342 = vrcp.f32 %v902_v50 }
 0x38f   : > { %2344 = vrcp.f32 %v908_v47 }
 0x390   : > { %2346 = vrcp.f32 %v905_v44 }
 0x391   : > { %v924_v4 = vpop.permute.xlu0 %923 }
 0x394   : > { %v2339_v30 = vpop.eup %2338 }
 0x395   : > { %v738_v56 = vmul.f32 %v2339_v30, %v2665_v17  ;;  %v2341_v57 = vpop.eup %2340 }
 0x396   : > { %v910_v0 = vmul.f32 %v2341_v57, %v2652_v7 }
 0x397   : > { %v743_v59 = vpack.c.bf16 %v738_v56, %v736_v54 }
 0x398   : > { %v2343_v61 = vpop.eup %2342 }
 0x399   : > { %v2345_v63 = vpop.eup %2344  ;;  %2141 = vmatprep.mubr.msk.bf16.mxu1 %vm698_vm2, %v743_v59  ;;  %v912_v1 = vmul.f32 %v2343_v61, %v2669_v19 }
 0x39a   : > { %2142 = vmatmul.mubr.msk.bf16.vlgmr.msra.gmra.mrb[4].mxu1 %vm698_vm2, %v744_v62  ;;  %v2347_v3 = vpop.eup %2346  ;;  %v916_v5 = vmul.f32 %v2345_v63, %v2661_v15 }
 0x39b   : > { %2154 = vmatpush3.bf16.msra.mxu1 %v2656_v11  ;;  %v917_v2 = vpack.c.bf16 %v912_v1, %v910_v0  ;;  %v914_v55 = vmul.f32 %v2347_v3, %v2641_v60 }
 0x39c   : > { %2155 = vmatprep.subr.bf16.mxu1 %v924_v4 }
 0x39d   : > { %2157 = vmatprep.mubr.msk.bf16.mxu1 %vm698_vm2, %v917_v2  ;;  %v918_v7 = vpack.c.bf16 %v916_v5, %v914_v55 }
 0x39f   : > { %2156 = vmatpush3.bf16.msra.mxu1 %v924_v4 }
 0x3a0   : > { %2169 = vmatprep.subr.bf16.mxu1 %v1102_v6 }
 0x3a2   : > { %2158 = vmatmul.mubr.msk.bf16.vlgmr.msra.gmra.mrb[8].mxu1 %vm698_vm2, %v918_v7 }
 0x3a3   : > { %2170 = vmatpush3.bf16.msra.mxu1 %v1102_v6 }
 0x3b6   : > { %v1087_v8 = vpop.xlane.xlu1 %1086 }
 0x3ba   : > { %v1081_v14 = vpop.xlane.xlu1 %1080 }
 0x3be   : > { %v1104_v16 = vpop.permute.xlu1 %1103 }
 0x3bf   : > { %2171 = vmatprep.subr.bf16.mxu1 %v1104_v16 }
 0x3c0   : > { %2172 = vmatpush3.bf16.msra.mxu1 %v1104_v16 }
 0x3c2   : > { %v1090_v11 = vpop.xlane.xlu0 %1089  ;;  %v1169_v35 = vpop.permute.xlu1 %1168 }
 0x3c3   : > { %2348 = vrcp.f32 %v1090_v11  ;;  %v1180_v37 = vsel %vm632_vm1, %v1169_v35, 0 }
 0x3c4   : > { %2350 = vrcp.f32 %v1081_v14 }
 0x3c5   : > { %2352 = vrcp.f32 %v1087_v8 }
 0x3c6   : > { %v1084_v15 = vpop.xlane.xlu0 %1083  ;;  %v1165_v23 = vpop.permute.xlu1 %1164 }
 0x3c7   : > { %2354 = vrcp.f32 %v1084_v15 }
 0x3ca   : > { %v1167_v17 = vpop.permute.xlu0 %1166 }
 0x3cb   : > { %2235 = vmatprep.subr.msk.bf16.mxu1 %vm632_vm1, %v1167_v17  ;;  %v1177_v33 = vsel %vm632_vm1, %v1167_v17, 0 }
 0x3cd   : > { %v2349_v60 = vpop.eup %2348 }
 0x3ce   : > { %v2351_v18 = vpop.eup %2350  ;;  %v1098_v21 = vmul.f32 %v2349_v60, %v2689_v39  ;;  %v1163_v34 = vpop.permute.xlu0 %1162 }
 0x3cf   : > { %v2353_v19 = vpop.eup %2352  ;;  %v1092_v22 = vmul.f32 %v2351_v18, %v2685_v38 }
 0x3d0   : > { %v1096_v25 = vmul.f32 %v2353_v19, %v2681_v36 }
 0x3d1   : > { %v2355_v20 = vpop.eup %2354 }
 0x3d2   : > { %v1094_v24 = vmul.f32 %v2355_v20, %v2693_v32  ;;  %v1100_v28 = vpack.c.bf16 %v1098_v21, %v1096_v25 }
 0x3d4   : > { %v1099_v27 = vpack.c.bf16 %v1094_v24, %v1092_v22 }
 0x3d6   : > { %2173 = vmatprep.mubr.msk.bf16.mxu1 %vm698_vm2, %v1099_v27 }
 0x3d7   : > { %2174 = vmatmul.mubr.msk.bf16.vlgmr.msra.gmra.mrb[12].mxu1 %vm698_vm2, %v1100_v28 }
 0x3d8   : > { %2178 = vmatpush3.bf16.xpose.msra.mxu1 %v1177_v33  ;;  %2181 = vmatprep.mubr.msk.bf16.mxu1 %vm632_vm1, %v1163_v34 }
 0x3d9   : > { %2236 = vmatprep.subr.msk.bf16.mxu1 %vm632_vm1, %v1169_v35 }
 0x3e0   : > { %2180 = vmatpush3.bf16.xpose.msra.mxu1 %v1180_v37 }
 0x3e7   : > { %2182 = vmatmul.mubr.msk.bf16.vlgmr.msra.gmra.mrb[16].mxu1 %vm632_vm1, %v1165_v23 }
 0x46d   : > { %v2732_v36 = vpop.f32.mrb[4].mxu1 }
 0x46e   : > { %v2734_v38 = vpop.f32.mrb[5].mxu1 }
 0x46f   : > { %v2736_v26 = vpop.f32.mrb[6].mxu1 }
 0x470   : > { %v2738_v39 = vpop.f32.mrb[7].mxu1 }
 0x475   : > { %v2159_v29 = vpop.f32.mrb[8].mxu1 }
 0x476   : > { %v967_v32 = vpop.f32.mrb[9].mxu1 }
 0x477   : > { %v2160_v42 = vpop.f32.mrb[10].mxu1 }
 0x478   : > { %v2259_v43 = vpack.i.bf16 %v2160_v42, %v2159_v29  ;;  %v970_v44 = vpop.f32.mrb[11].mxu1 }
 0x479   : > { %v2254_v45 = vpack.i.bf16 %v970_v44, %v967_v32  ;;  %v2296_v44 = vld [vmem:[%s2922_s3] sm:$0xff]  }
 0x47a   : > { %2193 = vmatprep.subr.bf16.mxu0 %v2296_v44 }
 0x47b   : > { %2194 = vmatpush3.bf16.msra.mxu0 %v2296_v44 }
 0x4aa   : > { %v2175_v46 = vpop.f32.mrb[12].mxu1 }
 0x4ab   : > { %v1147_v47 = vpop.f32.mrb[13].mxu1 }
 0x4ac   : > { %v2176_v48 = vpop.f32.mrb[14].mxu1 }
 0x4ad   : > { %v2269_v49 = vpack.i.bf16 %v2176_v48, %v2175_v46  ;;  %v1150_v50 = vpop.f32.mrb[15].mxu1  ;;  %v2298_v46 = vld [vmem:[%s2922_s3 + $0x10] sm:$0xff]  }
 0x4ae   : > { %v2264_v40 = vpack.i.bf16 %v1150_v50, %v1147_v47  ;;  %v2299_v47 = vld [vmem:[%s2922_s3 + $0x18] sm:$0xff]  }
 0x4ba   : > { %v2183_v51 = vpop.f32.mrb[16].mxu1 }
 0x4bb   : > { %v1216_v52 = vpop.f32.mrb[17].mxu1  ;;  %v1233_v56 = vmul.f32 0.25, %v2183_v51 }
 0x4bc   : > { %v1231_v30 = vmul.f32 0.25, %v1216_v52  ;;  %v2184_v53 = vpop.f32.mrb[18].mxu1 }
 0x4bd   : > { %v1219_v54 = vpop.f32.mrb[19].mxu1  ;;  %v1234_v61 = vmul.f32 0.25, %v2184_v53  ;;  %v1241_v62 = vsel %vm698_vm2, %v1233_v56, -inf }
 0x4be   : > { %v1232_v57 = vmul.f32 0.25, %v1219_v54  ;;  %v1235_v58 = vsel %vm698_vm2, %v1231_v30, -inf }
 0x4bf   : > { %1236 = vmax.xlane.f32.xlu0 %v1235_v58  ;;  %v1244_v63 = vsel %vm698_vm2, %v1234_v61, -inf }
 0x4c0   : > { %v1238_v59 = vsel %vm698_vm2, %v1232_v57, -inf }
 0x4c1   : > { %1239 = vmax.xlane.f32.xlu1 %v1238_v59 }
 0x4c3   : > { %1242 = vmax.xlane.f32.xlu0 %v1241_v62 }
 0x4c7   : > { %1245 = vmax.xlane.f32.xlu0 %v1244_v63 }
 0x54c   : > { %v1237_v0 = vpop.xlane.xlu0 %1236 }
 0x54d   : > { %v1247_v1 = vsub.f32 %v1231_v30, %v1237_v0 }
 0x54e   : > { %v1240_v3 = vpop.xlane.xlu1 %1239 }
 0x54f   : > { %v1251_v5 = vmul.f32 1.442695, %v1247_v1  ;;  %v1248_v55 = vsub.f32 %v1232_v57, %v1240_v3 }
 0x550   : > { %v1243_v4 = vpop.xlane.xlu0 %1242 }
 0x551   : > { %v1249_v2 = vsub.f32 %v1233_v56, %v1243_v4  ;;  %v1253_v14 = vmul.f32 1.442695, %v1248_v55 }
 0x553   : > { %v1255_v6 = vmul.f32 1.442695, %v1249_v2 }
 0x554   : > { %v1246_v7 = vpop.xlane.xlu0 %1245 }
 0x555   : > { %2356 = vpow2.f32 %v1255_v6  ;;  %v1250_v8 = vsub.f32 %v1234_v61, %v1246_v7 }
 0x556   : > { %2358 = vpow2.f32 %v1251_v5 }
 0x557   : > { %v1257_v16 = vmul.f32 1.442695, %v1250_v8 }
 0x559   : > { %2360 = vpow2.f32 %v1257_v16 }
 0x55a   : > { %2362 = vpow2.f32 %v1253_v14 }
 0x55f   : > { %v2357_v11 = vpop.eup %2356 }
 0x560   : > { %v1265_v15 = vsel %vm698_vm2, %v2357_v11, 0.0  ;;  %v2359_v17 = vpop.eup %2358 }
 0x561   : > { %1266 = vadd.xlane.f32.xlu1 %v1265_v15  ;;  %v1259_v19 = vsel %vm698_vm2, %v2359_v17, 0.0 }
 0x563   : > { %v2361_v60 = vpop.eup %2360 }
 0x564   : > { %v1268_v18 = vsel %vm698_vm2, %v2361_v60, 0.0  ;;  %v2363_v20 = vpop.eup %2362 }
 0x565   : > { %1269 = vadd.xlane.f32.xlu0 %v1268_v18  ;;  %1260 = vadd.xlane.f32.xlu1 %v1259_v19  ;;  %v1262_v21 = vsel %vm698_vm2, %v2363_v20, 0.0 }
 0x569   : > { %1263 = vadd.xlane.f32.xlu0 %v1262_v21 }
 0x576   : > { %1281 = vrot.lane.b32.xlu1 %v2560_v31, %s2419_s17 }
 0x57a   : > { %2255 = vrot.lane.b32.xlu1 %v2254_v45, %s2418_s16  ;;  %v2297_v45 = vld [vmem:[%s2922_s3 + $0x8] sm:$0xff]  }
 0x57b   : > { %2195 = vmatprep.subr.bf16.mxu0 %v2297_v45 }
 0x57c   : > { %2196 = vmatpush3.bf16.msra.mxu0 %v2297_v45 }
 0x57d   : > { %2197 = vmatprep.subr.bf16.mxu0 %v2298_v46 }
 0x57e   : > { %2260 = vrot.lane.b32.xlu1 %v2259_v43, %s2418_s16  ;;  %s494_s16 = scalar_lea.vmem %s2934_s15, %s2077_s28 }
 0x57f   : > { %1283 = vrot.lane.b32.xlu0 %v2569_v41, %s2419_s17 }
 0x580   : > { %2198 = vmatpush3.bf16.msra.mxu0 %v2298_v46 }
 0x581   : > { %2199 = vmatprep.subr.bf16.mxu0 %v2299_v47 }
 0x582   : > { %2270 = vrot.lane.b32.xlu1 %v2269_v49, %s2416_s29 }
 0x583   : > { %2265 = vrot.lane.b32.xlu0 %v2264_v40, %s2416_s29 }
 0x584   : > { %2200 = vmatpush3.bf16.msra.mxu0 %v2299_v47 }
 0x5ee   : > { %v1267_v22 = vpop.xlane.xlu1 %1266 }
 0x5f2   : > { %v1270_v24 = vpop.xlane.xlu0 %1269  ;;  %v1261_v25 = vpop.xlane.xlu1 %1260 }
 0x5f3   : > { %2364 = vrcp.f32 %v1270_v24 }
 0x5f4   : > { %2366 = vrcp.f32 %v1261_v25 }
 0x5f5   : > { %2368 = vrcp.f32 %v1267_v22 }
 0x5f6   : > { %v1264_v27 = vpop.xlane.xlu0 %1263  ;;  %v1282_v28 = vpop.permute.xlu1 %1281 }
 0x5f7   : > { %2370 = vrcp.f32 %v1264_v27  ;;  %2185 = vmatprep.subr.bf16.mxu1 %v1282_v28 }
 0x5f8   : > { %2186 = vmatpush3.bf16.msra.mxu1 %v1282_v28 }
 0x5fa   : > { %v1284_v31 = vpop.permute.xlu0 %1283  ;;  %v2256_v30 = vpop.permute.xlu1 %2255 }
 0x5fb   : > { %2187 = vmatprep.subr.bf16.mxu1 %v1284_v31  ;;  %v2258_v56 = vunpack.i.h.bf16 %v2256_v30  ;;  %v2257_v57 = vunpack.i.l.bf16 %v2256_v30 }
 0x5fc   : > { %2188 = vmatpush3.bf16.msra.mxu1 %v1284_v31 }
 0x5fd   : > { %v2365_v33 = vpop.eup %2364  ;;  %v1391_v3 = vsel %vm632_vm1, %v2738_v39, %v2258_v56  ;;  %v1390_v4 = vsel %vm632_vm1, %v2734_v38, %v2257_v57 }
 0x5fe   : > { %v2367_v41 = vpop.eup %2366  ;;  %v1278_v37 = vmul.f32 %v2365_v33, %v2361_v60  ;;  %v2261_v53 = vpop.permute.xlu1 %2260 }
 0x5ff   : > { %v2369_v34 = vpop.eup %2368  ;;  %v1272_v23 = vmul.f32 %v2367_v41, %v2359_v17  ;;  %v2266_v58 = vpop.permute.xlu0 %2265  ;;  %v2263_v59 = vunpack.i.h.bf16 %v2261_v53  ;;  %v2262_v61 = vunpack.i.l.bf16 %v2261_v53 }
 0x600   : > { %v1276_v32 = vmul.f32 %v2369_v34, %v2357_v11  ;;  %v2268_v0 = vunpack.i.h.bf16 %v2266_v58  ;;  %v2267_v1 = vunpack.i.l.bf16 %v2266_v58  ;;  %v2300_v58 = vld [vmem:[%s2926_s7] sm:$0xff]  }
 0x601   : > { %v2371_v35 = vpop.eup %2370  ;;  %v1393_v5 = vsel %vm632_vm1, %v2736_v26, %v2263_v59  ;;  %v1392_v55 = vsel %vm632_vm1, %v2732_v36, %v2262_v61  ;;  %2205 = vmatprep.subr.bf16.mxu1 %v2300_v58  ;;  %v2301_v59 = vld [vmem:[%s2926_s7 + $0x8] sm:$0xff]   ;;  %v2302_v61 = vld [vmem:[%s2926_s7 + $0x10] sm:$0xff]  }
 0x602   : > { %v1274_v29 = vmul.f32 %v2371_v35, %v2363_v20  ;;  %v1280_v43 = vpack.c.bf16 %v1278_v37, %v1276_v32  ;;  %v2271_v54 = vpop.permute.xlu1 %2270  ;;  %v1394_v15 = vsel %vm698_vm2, %v1390_v4, %v2267_v1  ;;  %v1395_v38 = vsel %vm698_vm2, %v1391_v3, %v2268_v0  ;;  %v2050_v20 = vld [vmem:[%s2923_s4] ss:$0 sm:$0xff] }
 0x603   : > { %v2273_v62 = vunpack.i.h.bf16 %v2271_v54  ;;  %v2272_v63 = vunpack.i.l.bf16 %v2271_v54 }
 0x604   : > { %v1279_v42 = vpack.c.bf16 %v1274_v29, %v1272_v23 }
 0x605   : > { %v1396_v14 = vsel %vm698_vm2, %v1392_v55, %v2272_v63  ;;  %v1397_v16 = vsel %vm698_vm2, %v1393_v5, %v2273_v62  ;;  %v2303_v62 = vld [vmem:[%s2926_s7 + $0x18] sm:$0xff]  }
 0x606   : > { %2189 = vmatprep.mubr.msk.bf16.mxu1 %vm698_vm2, %v1279_v42 }
 0x607   : > { %2190 = vmatmul.mubr.msk.bf16.vlgmr.msra.gmra.mrb[20].mxu1 %vm698_vm2, %v1280_v43 }
 0x608   : > { %2206 = vmatpush3.bf16.msra.mxu1 %v2300_v58 }
 0x609   : > { %2207 = vmatprep.subr.bf16.mxu1 %v2301_v59 }
 0x60c   : > { %2208 = vmatpush3.bf16.msra.mxu1 %v2301_v59 }
 0x60d   : > { %2209 = vmatprep.subr.bf16.mxu1 %v2302_v61 }
 0x610   : > { %2210 = vmatpush3.bf16.msra.mxu1 %v2302_v61 }
 0x611   : > { %2211 = vmatprep.subr.bf16.mxu1 %v2303_v62 }
 0x614   : > { %2212 = vmatpush3.bf16.msra.mxu1 %v2303_v62 }
 0x6da   : > { %v2191_v48 = vpop.f32.mrb[20].mxu1 }
 0x6db   : > { %v1327_v49 = vpop.f32.mrb[21].mxu1 }
 0x6dc   : > { %v2192_v50 = vpop.f32.mrb[22].mxu1 }
 0x6dd   : > { %v2279_v40 = vpack.i.bf16 %v2192_v50, %v2191_v48  ;;  %v1330_v51 = vpop.f32.mrb[23].mxu1 }
 0x6de   : > { %v2274_v52 = vpack.i.bf16 %v1330_v51, %v1327_v49 }
 0x6df   : > { %2280 = vrot.lane.b32.xlu1 %v2279_v40, %s2414_s26 }
 0x6e0   : > { %2275 = vrot.lane.b32.xlu0 %v2274_v52, %s2414_s26 }
 0x751   : > { %v2281_v2 = vpop.permute.xlu1 %2280 }
 0x752   : > { %v2283_v6 = vunpack.i.h.bf16 %v2281_v2  ;;  %v2282_v7 = vunpack.i.l.bf16 %v2281_v2  ;;  %v2276_v8 = vpop.permute.xlu0 %2275 }
 0x753   : > { %v2278_v11 = vunpack.i.h.bf16 %v2276_v8  ;;  %v2277_v39 = vunpack.i.l.bf16 %v2276_v8 }
 0x754   : > { %v1401_v17 = vsel %vm1398_vm3, %v1396_v14, %v2282_v7  ;;  %v1402_v26 = vsel %vm1398_vm3, %v1397_v16, %v2283_v6 }
 0x755   : > { %v1404_v60 = vpack.c.bf16 %v1402_v26, %v1401_v17  ;;  %v1399_v36 = vsel %vm1398_vm3, %v1394_v15, %v2277_v39  ;;  %v1400_v18 = vsel %vm1398_vm3, %v1395_v38, %v2278_v11  ;;  %v2057_v11 = vld [vmem:[%s2924_s5] ss:$0 sm:$0xff] }
 0x756   : > { %v1403_v19 = vpack.c.bf16 %v1400_v18, %v1399_v36 }
 0x758   : > { %2201 = vmatprep.mubr.msk.bf16.mxu0 %vm562_vm0, %v1403_v19 }
 0x759   : > { %2202 = vmatmul.mubr.msk.bf16.vlgmr.msra.gmra.mrb[16].mxu0 %vm562_vm0, %v1404_v60  ;;  %v2058_v60 = vld [vmem:[%s2925_s6] ss:$0 sm:$0xff] }
 0x82c   : > { %v2203_v21 = vpop.f32.mrb[16].mxu0 }
 0x82d   : > { %v1484_v22 = vpop.f32.mrb[17].mxu0  ;;  %v1493_v24 = vadd.f32 %v2203_v21, %v2050_v20 }
 0x82e   : > { %v1485_v25 = vadd.f32 %v2050_v20, %v1484_v22  ;;  %v2204_v27 = vpop.f32.mrb[18].mxu0 }
 0x82f   : > { %v1487_v28 = vpop.f32.mrb[19].mxu0  ;;  %v1496_v41 = vadd.f32 %v2204_v27, %v2050_v20  ;;  %v1501_v37 = vadd.f32 %v1493_v24, %v2548_v12 }
 0x830   : > { %v1488_v31 = vadd.f32 %v2050_v20, %v1487_v28  ;;  %v1499_v33 = vadd.f32 %v1485_v25, %v2541_v9 }
 0x831   : > { %v1511_v29 = vsel %vm562_vm0, %v1501_v37, 0.0  ;;  %v1502_v32 = vadd.f32 %v1496_v41, %v2550_v13  ;;  %v2304_v41 = vld [vmem:[%s2928_s9] sm:$0xff]  }
 0x832   : > { %v1505_v34 = vsel %vm562_vm0, %v1499_v33, 0.0  ;;  %v1500_v35 = vadd.f32 %v1488_v31, %v2543_v10  ;;  %2217 = vmatprep.subr.bf16.mxu0 %v2304_v41 }
 0x833   : > { %1506 = vadd.xlane.f32.xlu0 %v1505_v34  ;;  %v1514_v42 = vsel %vm562_vm0, %v1502_v32, 0.0  ;;  %2218 = vmatpush3.bf16.msra.mxu0 %v2304_v41  ;;  %v2305_v34 = vld [vmem:[%s2928_s9 + $0x8] sm:$0xff]  }
 0x834   : > { %v1508_v23 = vsel %vm562_vm0, %v1500_v35, 0.0  ;;  %2219 = vmatprep.subr.bf16.mxu0 %v2305_v34 }
 0x835   : > { %1509 = vadd.xlane.f32.xlu1 %v1508_v23  ;;  %v2059_v23 = vld [vmem:[%s2927_s8] ss:$0 sm:$0xff] }
 0x837   : > { %1512 = vadd.xlane.f32.xlu0 %v1511_v29  ;;  %2220 = vmatpush3.bf16.msra.mxu0 %v2305_v34 }
 0x83b   : > { %1515 = vadd.xlane.f32.xlu0 %v1514_v42 }
 0x8c0   : > { %v1507_v9 = vpop.xlane.xlu0 %1506 }
 0x8c1   : > { %v1518_v43 = vmul.f32 0.015625, %v1507_v9 }
 0x8c2   : > { %v1510_v44 = vpop.xlane.xlu1 %1509 }
 0x8c3   : > { %v1522_v45 = vsub.f32 %v1499_v33, %v1518_v43  ;;  %v1519_v46 = vmul.f32 0.015625, %v1510_v44 }
 0x8c4   : > { %v1513_v10 = vpop.xlane.xlu0 %1512 }
 0x8c5   : > { %v1523_v47 = vsub.f32 %v1500_v35, %v1519_v46  ;;  %v1520_v12 = vmul.f32 0.015625, %v1513_v10  ;;  %v1526_v48 = vmul.f32 %v1522_v45, %v1522_v45  ;;  %v2306_v35 = vld [vmem:[%s2928_s9 + $0x10] sm:$0xff]  }
 0x8c6   : > { %2221 = vmatprep.subr.bf16.mxu0 %v2306_v35 }
 0x8c7   : > { %v1524_v49 = vsub.f32 %v1501_v37, %v1520_v12  ;;  %v1530_v50 = vsel %vm562_vm0, %v1526_v48, 0.0  ;;  %v1527_v40 = vmul.f32 %v1523_v47, %v1523_v47  ;;  %2222 = vmatpush3.bf16.msra.mxu0 %v2306_v35  ;;  %v2307_v37 = vld [vmem:[%s2928_s9 + $0x18] sm:$0xff]  }
 0x8c8   : > { %1531 = vadd.xlane.f32.xlu1 %v1530_v50  ;;  %v1516_v51 = vpop.xlane.xlu0 %1515  ;;  %2223 = vmatprep.subr.bf16.mxu0 %v2307_v37 }
 0x8c9   : > { %v1521_v13 = vmul.f32 0.015625, %v1516_v51  ;;  %v1533_v52 = vsel %vm562_vm0, %v1527_v40, 0.0  ;;  %v1528_v30 = vmul.f32 %v1524_v49, %v1524_v49 }
 0x8ca   : > { %1534 = vadd.xlane.f32.xlu0 %v1533_v52 }
 0x8cb   : > { %v1525_v53 = vsub.f32 %v1502_v32, %v1521_v13  ;;  %v1536_v54 = vsel %vm562_vm0, %v1528_v30, 0.0  ;;  %2224 = vmatpush3.bf16.msra.mxu0 %v2307_v37 }
 0x8cc   : > { %1537 = vadd.xlane.f32.xlu1 %v1536_v54 }
 0x8cd   : > { %v1529_v56 = vmul.f32 %v1525_v53, %v1525_v53 }
 0x8cf   : > { %v1539_v57 = vsel %vm562_vm0, %v1529_v56, 0.0 }
 0x8d0   : > { %1540 = vadd.xlane.f32.xlu0 %v1539_v57 }
 0x955   : > { %v1532_v63 = vpop.xlane.xlu1 %1531 }
 0x956   : > { %v1542_v0 = vmul.f32 0.015625, %v1532_v63 }
 0x957   : > { %v1535_v1 = vpop.xlane.xlu0 %1534 }
 0x958   : > { %v1546_v3 = vadd.f32 1e-05, %v1542_v0  ;;  %v1543_v4 = vmul.f32 0.015625, %v1535_v1 }
 0x959   : > { %v1538_v2 = vpop.xlane.xlu1 %1537 }
 0x95a   : > { %2372 = vrsqrt.f32 %v1546_v3  ;;  %v1547_v5 = vadd.f32 1e-05, %v1543_v4  ;;  %v1544_v55 = vmul.f32 0.015625, %v1538_v2 }
 0x95c   : > { %2374 = vrsqrt.f32 %v1547_v5  ;;  %v1548_v6 = vadd.f32 1e-05, %v1544_v55 }
 0x95d   : > { %v1541_v7 = vpop.xlane.xlu0 %1540 }
 0x95e   : > { %2376 = vrsqrt.f32 %v1548_v6  ;;  %v1545_v8 = vmul.f32 0.015625, %v1541_v7 }
 0x960   : > { %v1549_v14 = vadd.f32 1e-05, %v1545_v8 }
 0x962   : > { %2378 = vrsqrt.f32 %v1549_v14 }
 0x964   : > { %v2373_v16 = vpop.eup %2372 }
 0x965   : > { %v1554_v39 = vmul.f32 %v2373_v16, %v1522_v45 }
 0x966   : > { %v2375_v15 = vpop.eup %2374 }
 0x967   : > { %v1555_v38 = vmul.f32 %v2375_v15, %v1523_v47  ;;  %v1564_v17 = vmul.f32 %v2057_v11, %v1554_v39 }
 0x968   : > { %v2377_v26 = vpop.eup %2376 }
 0x969   : > { %v1556_v36 = vmul.f32 %v2377_v26, %v1524_v49  ;;  %v1565_v18 = vmul.f32 %v2057_v11, %v1555_v38  ;;  %v2823_v19 = vadd.f32 %v2058_v60, %v1564_v17 }
 0x96b   : > { %v2825_v20 = vadd.f32 %v2058_v60, %v1565_v18  ;;  %v1566_v22 = vmul.f32 %v2057_v11, %v1556_v36 }
 0x96c   : > { %v2379_v21 = vpop.eup %2378 }
 0x96d   : > { %v1557_v24 = vmul.f32 %v2379_v21, %v1525_v53  ;;  %v1578_v25 = vpack.c.bf16 %v2825_v20, %v2823_v19  ;;  %v2830_v28 = vadd.f32 %v2058_v60, %v1566_v22 }
 0x96f   : > { %v1567_v27 = vmul.f32 %v2057_v11, %v1557_v24  ;;  %2213 = vmatprep.mubr.msk.bf16.mxu1 %vm562_vm0, %v1578_v25 }
 0x971   : > { %v2832_v31 = vadd.f32 %v2058_v60, %v1567_v27 }
 0x973   : > { %v1579_v33 = vpack.c.bf16 %v2832_v31, %v2830_v28 }
 0x975   : > { %2214 = vmatmul.mubr.msk.bf16.vlgmr.msra.gmra.mrb[24].mxu1 %vm562_vm0, %v1579_v33 }
 0xa48   : > { %v2215_v29 = vpop.f32.mrb[24].mxu1 }
 0xa49   : > { %v2852_v32 = vadd.f32 %v2215_v29, %v2059_v23  ;;  %v1659_v42 = vpop.f32.mrb[25].mxu1 }
 0xa4a   : > { %v2854_v9 = vadd.f32 %v2059_v23, %v1659_v42  ;;  %v2216_v43 = vpop.f32.mrb[26].mxu1 }
 0xa4b   : > { %v2857_v44 = vmul.f32 0.70710677, %v2852_v32  ;;  %v2859_v45 = vadd.f32 %v2216_v43, %v2059_v23  ;;  %v1662_v46 = vpop.f32.mrb[27].mxu1 }
 0xa4c   : > { %v2862_v10 = vmul.f32 0.70710677, %v2854_v9  ;;  %v2868_v48 = vadd.f32 %v2059_v23, %v1662_v46 }
 0xa4d   : > { %v1692_v47 = vand.u32 2147483647, %v2857_v44  ;;  %v2866_v12 = vmul.f32 0.70710677, %v2859_v45  ;;  %vm1684_vm4 = vcmp.ge.f32.partialorder %v2857_v44, 0.0 }
 0xa4e   : > { %v1690_v49 = vand.u32 2147483647, %v2862_v10  ;;  %v2873_v52 = vmul.f32 0.70710677, %v2868_v48  ;;  %vm1682_vm5 = vcmp.ge.f32.partialorder %v2862_v10, 0.0 }
 0xa4f   : > { %v1696_v50 = vmul.f32 0.3275911, %v1692_v47  ;;  %v1693_v51 = vand.u32 2147483647, %v2866_v12  ;;  %v1748_v59 = vsub.f32 0.0, %v1692_v47  ;;  %vm1685_vm6 = vcmp.ge.f32.partialorder %v2866_v12, 0.0 }
 0xa50   : > { %v1694_v40 = vmul.f32 0.3275911, %v1690_v49  ;;  %v1691_v54 = vand.u32 2147483647, %v2873_v52  ;;  %v1746_v61 = vsub.f32 0.0, %v1690_v49  ;;  %vm1683_vm7 = vcmp.ge.f32.partialorder %v2873_v52, 0.0 }
 0xa51   : > { %v1700_v13 = vadd.f32 1.0, %v1696_v50  ;;  %v1697_v53 = vmul.f32 0.3275911, %v1693_v51  ;;  %v1752_v63 = vmul.f32 %v1748_v59, %v1692_v47  ;;  %v1749_v0 = vsub.f32 0.0, %v1693_v51 }
 0xa52   : > { %v1698_v30 = vadd.f32 1.0, %v1694_v40  ;;  %v1695_v57 = vmul.f32 0.3275911, %v1691_v54  ;;  %v1750_v4 = vmul.f32 %v1746_v61, %v1690_v49  ;;  %v1747_v5 = vsub.f32 0.0, %v1691_v54 }
 0xa53   : > { %2380 = vrcp.f32 %v1700_v13  ;;  %v1701_v56 = vadd.f32 1.0, %v1697_v53  ;;  %v1758_v7 = vmul.f32 1.442695, %v1752_v63  ;;  %v1753_v14 = vmul.f32 %v1749_v0, %v1693_v51 }
 0xa54   : > { %2382 = vrcp.f32 %v1698_v30  ;;  %v1699_v58 = vadd.f32 1.0, %v1695_v57  ;;  %v1754_v11 = vmul.f32 1.442695, %v1750_v4  ;;  %v1751_v17 = vmul.f32 %v1747_v5, %v1691_v54 }
 0xa55   : > { %2384 = vrcp.f32 %v1701_v56  ;;  %v1760_v21 = vmul.f32 1.442695, %v1753_v14  ;;  %v2420_v4 = vmov -1.0  }
 0xa56   : > { %2386 = vrcp.f32 %v1699_v58  ;;  %v1756_v33 = vmul.f32 1.442695, %v1751_v17  ;;  %v1686_v44 = vsel %vm1682_vm5, 1.0, %v2420_v4  ;;  %v1687_v17 = vsel %vm1683_vm7, 1.0, %v2420_v4 }
 0xa57   : > { %2388 = vpow2.f32 %v1758_v7 }
 0xa58   : > { %2390 = vpow2.f32 %v1754_v11  ;;  %v1689_v11 = vsel %vm1685_vm6, 1.0, %v2420_v4 }
 0xa59   : > { %2392 = vpow2.f32 %v1760_v21 }
 0xa5a   : > { %2394 = vpow2.f32 %v1756_v33 }
 0xa5d   : > { %v2381_v62 = vpop.eup %2380 }
 0xa5e   : > { %v2383_v1 = vpop.eup %2382  ;;  %v1712_v3 = vmul.f32 1.0614054, %v2381_v62 }
 0xa5f   : > { %v1710_v2 = vmul.f32 1.0614054, %v2383_v1  ;;  %v2385_v6 = vpop.eup %2384 }
 0xa60   : > { %v1716_v55 = vadd.f32 -1.4531521, %v1712_v3  ;;  %v1713_v39 = vmul.f32 1.0614054, %v2385_v6  ;;  %v2387_v15 = vpop.eup %2386 }
 0xa61   : > { %v1714_v8 = vadd.f32 -1.4531521, %v1710_v2  ;;  %v1711_v36 = vmul.f32 1.0614054, %v2387_v15  ;;  %v2389_v30 = vpop.eup %2388  ;;  %v1688_v2 = vsel %vm1684_vm4, 1.0, %v2420_v4 }
 0xa62   : > { %v1720_v16 = vmul.f32 %v2381_v62, %v1716_v55  ;;  %v1717_v60 = vadd.f32 -1.4531521, %v1713_v39  ;;  %v2391_v54 = vpop.eup %2390 }
 0xa63   : > { %v1718_v38 = vmul.f32 %v2383_v1, %v1714_v8  ;;  %v1715_v25 = vadd.f32 -1.4531521, %v1711_v36  ;;  %v2393_v3 = vpop.eup %2392 }
 0xa64   : > { %v1724_v26 = vadd.f32 1.4214138, %v1720_v16  ;;  %v1721_v24 = vmul.f32 %v2385_v6, %v1717_v60  ;;  %v2395_v7 = vpop.eup %2394  ;;  %v1677_v60 = vmul.f32 0.5, %v2859_v45 }
 0xa65   : > { %v1722_v18 = vadd.f32 1.4214138, %v1718_v38  ;;  %v1719_v35 = vmul.f32 %v2387_v15, %v1715_v25  ;;  %v1676_v38 = vmul.f32 0.5, %v2852_v32  ;;  %v2066_v32 = vld [vmem:[%s2929_s10] ss:$0 sm:$0xff] }
 0xa66   : > { %v1728_v22 = vmul.f32 %v2381_v62, %v1724_v26  ;;  %v1725_v34 = vadd.f32 1.4214138, %v1721_v24 }
 0xa67   : > { %v1726_v27 = vmul.f32 %v2383_v1, %v1722_v18  ;;  %v1723_v42 = vadd.f32 1.4214138, %v1719_v35 }
 0xa68   : > { %v1732_v41 = vadd.f32 -0.28449672, %v1728_v22  ;;  %v1729_v29 = vmul.f32 %v2385_v6, %v1725_v34  ;;  %v1675_v22 = vmul.f32 0.5, %v2868_v48 }
 0xa69   : > { %v1730_v37 = vadd.f32 -0.28449672, %v1726_v27  ;;  %v1727_v49 = vmul.f32 %v2387_v15, %v1723_v42 }
 0xa6a   : > { %v1736_v23 = vmul.f32 %v2381_v62, %v1732_v41  ;;  %v1733_v47 = vadd.f32 -0.28449672, %v1729_v29 }
 0xa6b   : > { %v1734_v43 = vmul.f32 %v2383_v1, %v1730_v37  ;;  %v1731_v13 = vadd.f32 -0.28449672, %v1727_v49 }
 0xa6c   : > { %v1740_v46 = vadd.f32 0.2548296, %v1736_v23  ;;  %v1737_v51 = vmul.f32 %v2385_v6, %v1733_v47 }
 0xa6d   : > { %v1738_v50 = vadd.f32 0.2548296, %v1734_v43  ;;  %v1735_v58 = vmul.f32 %v2387_v15, %v1731_v13 }
 0xa6e   : > { %v1744_v40 = vmul.f32 %v2381_v62, %v1740_v46  ;;  %v1741_v57 = vadd.f32 0.2548296, %v1737_v51 }
 0xa6f   : > { %v1742_v53 = vmul.f32 %v2383_v1, %v1738_v50  ;;  %v1739_v0 = vadd.f32 0.2548296, %v1735_v58 }
 0xa70   : > { %v1764_v56 = vmul.f32 %v2389_v30, %v1744_v40  ;;  %v1745_v63 = vmul.f32 %v2385_v6, %v1741_v57 }
 0xa71   : > { %v1762_v59 = vmul.f32 %v2391_v54, %v1742_v53  ;;  %v1743_v55 = vmul.f32 %v2387_v15, %v1739_v0  ;;  %v1674_v15 = vmul.f32 0.5, %v2854_v9 }
 0xa72   : > { %v1768_v61 = vsub.f32 1.0, %v1764_v56  ;;  %v1765_v1 = vmul.f32 %v2393_v3, %v1745_v63 }
 0xa73   : > { %v1766_v62 = vsub.f32 1.0, %v1762_v59  ;;  %v1763_v16 = vmul.f32 %v2395_v7, %v1743_v55 }
 0xa74   : > { %v1772_v5 = vmul.f32 %v1768_v61, %v1688_v2  ;;  %v1769_v14 = vsub.f32 1.0, %v1765_v1 }
 0xa75   : > { %v1770_v8 = vmul.f32 %v1766_v62, %v1686_v44  ;;  %v1767_v39 = vsub.f32 1.0, %v1763_v16 }
 0xa76   : > { %v1776_v10 = vadd.f32 1.0, %v1772_v5  ;;  %v1773_v6 = vmul.f32 %v1769_v14, %v1689_v11 }
 0xa77   : > { %v1774_v26 = vadd.f32 1.0, %v1770_v8  ;;  %v1771_v36 = vmul.f32 %v1767_v39, %v1687_v17  ;;  %v2073_v17 = vld [vmem:[%s2930_s11] ss:$0 sm:$0xff] }
 0xa78   : > { %v1777_v12 = vadd.f32 1.0, %v1773_v6  ;;  %v1780_v18 = vmul.f32 %v1776_v10, %v1676_v38 }
 0xa79   : > { %v1775_v52 = vadd.f32 1.0, %v1771_v36  ;;  %v1778_v24 = vmul.f32 %v1774_v26, %v1674_v15 }
 0xa7a   : > { %v1781_v21 = vmul.f32 %v1777_v12, %v1677_v60  ;;  %v2074_v12 = vld [vmem:[%s2931_s12] ss:$0 sm:$0xff] }
 0xa7b   : > { %v1779_v27 = vmul.f32 %v1775_v52, %v1675_v22 }
 0xa7c   : > { %v1783_v25 = vpack.c.bf16 %v1781_v21, %v1780_v18 }
 0xa7d   : > { %v1782_v33 = vpack.c.bf16 %v1779_v27, %v1778_v24 }
 0xa7f   : > { %2225 = vmatprep.mubr.msk.bf16.mxu0 %vm562_vm0, %v1782_v33 }
 0xa80   : > { %2226 = vmatmul.mubr.msk.bf16.vlgmr.msra.gmra.mrb[20].mxu0 %vm562_vm0, %v1783_v25 }
 0xb53   : > { %v2227_v45 = vpop.f32.mrb[20].mxu0 }
 0xb54   : > { %v1863_v41 = vpop.f32.mrb[21].mxu0  ;;  %v1872_v9 = vadd.f32 %v2227_v45, %v2066_v32 }
 0xb55   : > { %v1864_v34 = vadd.f32 %v2066_v32, %v1863_v41  ;;  %v2228_v35 = vpop.f32.mrb[22].mxu0 }
 0xb56   : > { %v1866_v37 = vpop.f32.mrb[23].mxu0  ;;  %v1875_v48 = vadd.f32 %v2228_v35, %v2066_v32  ;;  %v1880_v46 = vadd.f32 %v1872_v9, %v2830_v28 }
 0xb57   : > { %v1867_v23 = vadd.f32 %v2066_v32, %v1866_v37  ;;  %v1878_v29 = vadd.f32 %v1864_v34, %v2823_v19 }
 0xb58   : > { %v1881_v49 = vadd.f32 %v1875_v48, %v2832_v31  ;;  %v1890_v50 = vsel %vm562_vm0, %v1880_v46, 0.0 }
 0xb59   : > { %v1884_v42 = vsel %vm562_vm0, %v1878_v29, 0.0  ;;  %v1879_v43 = vadd.f32 %v1867_v23, %v2825_v20 }
 0xb5a   : > { %1885 = vadd.xlane.f32.xlu1 %v1884_v42  ;;  %v1893_v40 = vsel %vm562_vm0, %v1881_v49, 0.0 }
 0xb5b   : > { %v1887_v47 = vsel %vm562_vm0, %v1879_v43, 0.0 }
 0xb5c   : > { %1888 = vadd.xlane.f32.xlu0 %v1887_v47 }
 0xb5e   : > { %1891 = vadd.xlane.f32.xlu1 %v1890_v50 }
 0xb60   : > { %1894 = vadd.xlane.f32.xlu0 %v1893_v40 }
 0xbe7   : > { %v1886_v51 = vpop.xlane.xlu1 %1885 }
 0xbe8   : > { %v1896_v19 = vmul.f32 0.015625, %v1886_v51 }
 0xbe9   : > { %v1889_v13 = vpop.xlane.xlu0 %1888 }
 0xbea   : > { %v1900_v30 = vsub.f32 %v1878_v29, %v1896_v19  ;;  %v1897_v53 = vmul.f32 0.015625, %v1889_v13 }
 0xbeb   : > { %v1892_v20 = vpop.xlane.xlu1 %1891 }
 0xbec   : > { %v1901_v54 = vsub.f32 %v1879_v43, %v1897_v53  ;;  %v1898_v28 = vmul.f32 0.015625, %v1892_v20  ;;  %v1904_v56 = vmul.f32 %v1900_v30, %v1900_v30 }
 0xbed   : > { %v1895_v57 = vpop.xlane.xlu0 %1894 }
 0xbee   : > { %v1902_v58 = vsub.f32 %v1880_v46, %v1898_v28  ;;  %v1899_v59 = vmul.f32 0.015625, %v1895_v57  ;;  %v1908_v31 = vsel %vm562_vm0, %v1904_v56, 0.0  ;;  %v1905_v61 = vmul.f32 %v1901_v54, %v1901_v54 }
 0xbef   : > { %1909 = vadd.xlane.f32.xlu1 %v1908_v31 }
 0xbf0   : > { %v1903_v63 = vsub.f32 %v1881_v49, %v1899_v59  ;;  %v1911_v0 = vsel %vm562_vm0, %v1905_v61, 0.0  ;;  %v1906_v3 = vmul.f32 %v1902_v58, %v1902_v58 }
 0xbf1   : > { %1912 = vadd.xlane.f32.xlu0 %v1911_v0 }
 0xbf2   : > { %v1914_v4 = vsel %vm562_vm0, %v1906_v3, 0.0  ;;  %v1907_v2 = vmul.f32 %v1903_v63, %v1903_v63 }
 0xbf3   : > { %1915 = vadd.xlane.f32.xlu1 %v1914_v4 }
 0xbf4   : > { %v1917_v62 = vsel %vm562_vm0, %v1907_v2, 0.0 }
 0xbf5   : > { %1918 = vadd.xlane.f32.xlu0 %v1917_v62 }
 0xc7c   : > { %v1910_v5 = vpop.xlane.xlu1 %1909 }
 0xc7d   : > { %v1920_v1 = vmul.f32 0.015625, %v1910_v5 }
 0xc7e   : > { %v1913_v55 = vpop.xlane.xlu0 %1912 }
 0xc7f   : > { %v1924_v7 = vadd.f32 1e-05, %v1920_v1  ;;  %v1921_v44 = vmul.f32 0.015625, %v1913_v55 }
 0xc80   : > { %v1916_v8 = vpop.xlane.xlu1 %1915 }
 0xc81   : > { %2396 = vrsqrt.f32 %v1924_v7  ;;  %v1925_v14 = vadd.f32 1e-05, %v1921_v44  ;;  %v1922_v16 = vmul.f32 0.015625, %v1916_v8 }
 0xc82   : > { %v1919_v11 = vpop.xlane.xlu0 %1918 }
 0xc83   : > { %2398 = vrsqrt.f32 %v1925_v14  ;;  %v1926_v10 = vadd.f32 1e-05, %v1922_v16  ;;  %v1923_v6 = vmul.f32 0.015625, %v1919_v11 }
 0xc85   : > { %2400 = vrsqrt.f32 %v1926_v10  ;;  %v1927_v39 = vadd.f32 1e-05, %v1923_v6 }
 0xc87   : > { %2402 = vrsqrt.f32 %v1927_v39 }
 0xc8b   : > { %v2397_v38 = vpop.eup %2396 }
 0xc8c   : > { %v1932_v26 = vmul.f32 %v2397_v38, %v1900_v30 }
 0xc8d   : > { %v2399_v60 = vpop.eup %2398 }
 0xc8e   : > { %v1942_v36 = vmul.f32 %v2073_v17, %v1932_v26  ;;  %v1933_v15 = vmul.f32 %v2399_v60, %v1901_v54 }
 0xc8f   : > { %v2401_v18 = vpop.eup %2400 }
 0xc90   : > { %v1952_v21 = vadd.f32 %v2074_v12, %v1942_v36  ;;  %v1943_v22 = vmul.f32 %v2073_v17, %v1933_v15  ;;  %v1934_v52 = vmul.f32 %v2401_v18, %v1902_v58 }
 0xc91   : > { %v2403_v24 = vpop.eup %2402 }
 0xc92   : > { %1956 = vst.msk [vmem:[%s494_s16] sm:$0xff] %vm562_vm0, %v1952_v21  ;;  %v1953_v25 = vadd.f32 %v2074_v12, %v1943_v22  ;;  %v1944_v27 = vmul.f32 %v2073_v17, %v1934_v52  ;;  %v1935_v33 = vmul.f32 %v2403_v24, %v1903_v63 }
 0xc94   : > { %1957 = vst.msk [vmem:[%s494_s16 + $0x8] sm:$0xff] %vm562_vm0, %v1953_v25  ;;  %v1954_v32 = vadd.f32 %v2074_v12, %v1944_v27  ;;  %v1945_v45 = vmul.f32 %v2073_v17, %v1935_v33 }
 0xc96   : > { %1958 = vst.msk [vmem:[%s494_s16 + $0x10] sm:$0xff] %vm562_vm0, %v1954_v32  ;;  %v1955_v41 = vadd.f32 %v2074_v12, %v1945_v45 }
 0xc98   : > { %1959 = vst.msk [vmem:[%s494_s16 + $0x18] sm:$0xff] %vm562_vm0, %v1955_v41 }
 0xc99 PF: > { %s25_s18 = sadd.s32 1, %s2410_s18  }
 0xc9a   : > { %p22_p4 = scmp.ge.s32.totalorder %s25_s18, 4  }
 0xc9c   :  { %24 = sbr.rel (!%p22_p4) target bundleno = 1 (0x1), region = 110 }

// kernel: informer_stack_forward.13
= control target key start
LH: loop header
LB: loop body
LE: loop exit
PB: predicated region body
PF: predicated region fallthrough
CT: control target
= control target key end

     0   :  { %s519_s15 = smov 0   ;;  %s559_s0 = inlined_call_operand.vmem [shape: f32[2,24,7], index: 0, kind: input, shape index: {}]   ;;  %s560_s1 = inlined_call_operand.vmem [shape: f32[2,24,64], index: 1, kind: input, shape index: {}]   ;;  %s561_s2 = inlined_call_operand.vmem [shape: bf16[21,64], index: 2, kind: input, shape index: {}]   ;;  %s562_s3 = inlined_call_operand.vmem [shape: f32[1,64], index: 3, kind: input, shape index: {}]   ;;  %s563_s4 = inlined_call_operand.vmem [shape: f32[2,24,64], index: 4, kind: output, shape index: {}]  }
   0x1 LB: > { %s432_s16 = sadd.s32 4294967295, %s489_s15   ;;  %p436_p0 = scmp.ge.s32.totalorder %s489_s15, 1  ;;  %s489_s15 = sphi %s519_s15, %s14_s15  }
   0x2   : > { %p172_p1 = scmp.lt.s32.totalorder %s489_s15, 3 }
   0x4   : > { %p173_p2 = pnand %p436_p0, %p172_p1 }
   0x5   : > { %p203_p3 = scmp.lt.s32.totalorder (!%p173_p2), %s432_s16, 1  ;;  %v481_v0 = vld [vmem:[%s561_s2] sm:$0xff] (!%p173_p2)   ;;  %vm300_vm0 = vcmask (!%p173_p2), 1041408   ;;  %v482_v1 = vld [vmem:[%s561_s2 + $0x8] ss:$0 sps:$4 sm:$0x77] (!%p173_p2)  }
   0x6   : > { %176 = sbr.rel (%p173_p2) target bundleno = 366 (0x16e), region = 36  ;;  %451 = vmatprep.subr.bf16.mxu0 (!%p173_p2), %v481_v0  ;;  %vm301_vm1 = vcmask (!%p173_p2), 1042432   ;;  %v491_v2 = vmov (!%p173_p2), 65535   ;;  %vm236_vm2 = vcmask (!%p173_p2), 1046528   ;;  %vm227_vm3 = vcmask (!%p173_p2), 1040384   ;;  %s492_s25 = smov (!%p173_p2), 7  }
   0x7   : > { %452 = vmatpush3.bf16.msra.mxu0 (!%p173_p2), %v481_v0  ;;  %v302_v3 = vsel (!%p173_p2), %vm300_vm0, 4294967295, %v491_v2  ;;  %s493_s26 = smov (!%p173_p2), 14   ;;  %vm264_vm4 = vcmask (!%p173_p2), 56320   ;;  %vm268_vm5 = vcmask (!%p173_p2), 113664   ;;  %vm293_vm6 = vcmask (!%p173_p2), 171008  }
   0x8   : > { %v303_v4 = vsel (!%p173_p2), %vm301_vm1, %v302_v3, 0  ;;  %v440_v39 = vld [vmem:[%s562_s3] ss:$0 sm:$0xff] (!%p173_p2)  ;;  %vm361_vm7 = vcmask (!%p173_p2), 523264  }
   0x9   : > { %v305_v5 = vand.u32 (!%p173_p2), %v482_v1, %v303_v4 }
   0xb   : > { %453 = vmatprep.subr.bf16.mxu0 (!%p173_p2), %v305_v5 }
   0xc   : > { %454 = vmatpush3.bf16.msra.mxu0 (!%p173_p2), %v305_v5 }
   0xd   : > { %s565_s16 = smov (!%p203_p3, %s432_s16), 1 }
   0xe   : > { %s533_s21 = smul.u32 24, %s565_s16 }
  0x10   : > { %s207_s24 = scalar_lea.vmem %s559_s0, %s533_s21  ;;  %s212_s29 = scalar_lea.vmem %s560_s1, %s533_s21 }
  0x11   : > { %v219_v6 = vld [vmem:[%s207_s24] sm:$0xff]  ;;  %v220_v7 = vld [vmem:[%s207_s24 + $0x8] sm:$0xff]  ;;  %v221_v8 = vld [vmem:[%s207_s24 + $0x10] sm:$0xff]  ;;  %s217_s8 = scalar_lea.vmem %s563_s4, %s533_s21 }
  0x12   : > { %v229_v9 = vrot.slane %v220_v7, 7  ;;  %v238_v10 = vrot.slane %v220_v7, 1  ;;  %v471_v11 = vpack.i.bf16 %v220_v7, %v219_v6  ;;  %v228_v12 = vrot.slane %v219_v6, 7  ;;  %v357_v41 = vld [vmem:[%s212_s29 + $0x10] sm:$0xff]  ;;  %v355_v44 = vld [vmem:[%s212_s29] sm:$0xff]  ;;  %v356_v49 = vld [vmem:[%s212_s29 + $0x8] sm:$0xff] }
  0x13   : > { %v237_v13 = vrot.slane %v219_v6, 1  ;;  %v240_v14 = vrot.slane %v221_v8, 1  ;;  %v223_v15 = vrot.slane %v221_v8, 7 }
  0x14   : > { %472 = vrot.lane.b32.xlu0 %v471_v11, %s492_s25  ;;  %v230_v16 = vsel %vm227_vm3, %v228_v12, %v229_v9 }
  0x15   : > { %v239_v17 = vsel %vm236_vm2, %v237_v13, %v238_v10  ;;  %v241_v18 = vsel %vm236_vm2, %v238_v10, %v240_v14  ;;  %v231_v19 = vsel %vm227_vm3, %v229_v9, %v223_v15  ;;  %v235_v21 = vsel %vm227_vm3, %v223_v15, %v228_v12 }
  0x16   : > { %v476_v20 = vpack.i.bf16 %v241_v18, %v239_v17  ;;  %v244_v22 = vsel %vm236_vm2, %v240_v14, %v237_v13 }
  0x18   : > { %477 = vrot.lane.b32.xlu1 %v476_v20, %s493_s26  ;;  %249 = vrot.lane.b32.xlu0 %v221_v8, %s492_s25 }
  0x1c   : > { %259 = vrot.lane.b32.xlu1 %v244_v22, %s493_s26 }
  0x86   : > { %v473_v23 = vpop.permute.xlu0 %472 }
  0x87   : > { %v475_v24 = vunpack.i.h.bf16 %v473_v23  ;;  %v474_v25 = vunpack.i.l.bf16 %v473_v23 }
  0x89   : > { %v265_v28 = vsel %vm264_vm4, %v235_v21, %v474_v25  ;;  %v266_v29 = vsel %vm264_vm4, %v230_v16, %v475_v24 }
  0x8a   : > { %v478_v26 = vpop.permute.xlu1 %477  ;;  %v250_v27 = vpop.permute.xlu0 %249 }
  0x8b   : > { %v480_v30 = vunpack.i.h.bf16 %v478_v26  ;;  %v479_v31 = vunpack.i.l.bf16 %v478_v26  ;;  %v267_v32 = vsel %vm264_vm4, %v231_v19, %v250_v27 }
  0x8d   : > { %v269_v33 = vsel %vm268_vm5, %v265_v28, %v479_v31  ;;  %v270_v34 = vsel %vm268_vm5, %v266_v29, %v480_v30 }
  0x8e   : > { %v260_v35 = vpop.permute.xlu1 %259  ;;  %v272_v36 = vpack.c.bf16 %v270_v34, %v269_v33 }
  0x8f   : > { %v271_v37 = vsel %vm268_vm5, %v267_v32, %v260_v35 }
  0x90   : > { %v273_v38 = vpack.c.bf16 %v271_v37, %v271_v37  ;;  %455 = vmatprep.mubr.msk.bf16.mxu0 %vm293_vm6, %v272_v36 }
  0x92   : > { %456 = vmatmul.mubr.msk.bf16.vlgmr.msra.gmra.mrb[0].mxu0 %vm293_vm6, %v273_v38 }
 0x165   : > { %v457_v40 = vpop.f32.mrb[0].mxu0 }
 0x166   : > { %v350_v42 = vadd.f32 %v457_v40, %v440_v39  ;;  %v341_v43 = vpop.f32.mrb[1].mxu0 }
 0x167   : > { %v342_v45 = vadd.f32 %v440_v39, %v341_v43  ;;  %v458_v46 = vpop.f32.mrb[2].mxu0 }
 0x168   : > { %v360_v47 = vadd.f32 %v357_v41, %v350_v42  ;;  %v344_v48 = vpop.f32.mrb[3].mxu0 }
 0x169   : > { %v358_v50 = vadd.f32 %v355_v44, %v342_v45  ;;  %v345_v51 = vadd.f32 %v440_v39, %v344_v48 }
 0x16a   : > { %364 = vst.msk [vmem:[%s217_s8 + $0x10] sm:$0xff] %vm361_vm7, %v360_v47 }
 0x16b   : > { %362 = vst.msk [vmem:[%s217_s8] sm:$0xff] %vm361_vm7, %v358_v50  ;;  %v359_v52 = vadd.f32 %v356_v49, %v345_v51 }
 0x16d   : > { %363 = vst.msk [vmem:[%s217_s8 + $0x8] sm:$0xff] %vm361_vm7, %v359_v52 }
 0x16e PF: > { %s14_s15 = sadd.s32 1, %s489_s15  }
 0x16f   : > { %p11_p4 = scmp.ge.s32.totalorder %s14_s15, 4  }
 0x171   :  { %13 = sbr.rel (!%p11_p4) target bundleno = 1 (0x1), region = 69 }

// kernel: informer_stack_forward.15
= control target key start
LH: loop header
LB: loop body
LE: loop exit
PB: predicated region body
PF: predicated region fallthrough
CT: control target
= control target key end

     0   :  { %s480_s18 = smov 0   ;;  %s528_s0 = inlined_call_operand.vmem [shape: f32[2,8,64], index: 0, kind: input, shape index: {}]   ;;  %s529_s1 = inlined_call_operand.vmem [shape: f32[1,64], index: 1, kind: input, shape index: {}]   ;;  %s530_s2 = inlined_call_operand.vmem [shape: f32[1,64], index: 2, kind: input, shape index: {}]   ;;  %s531_s3 = inlined_call_operand.vmem [shape: bf16[64,128], index: 3, kind: input, shape index: {}]   ;;  %s532_s4 = inlined_call_operand.vmem [shape: f32[1,128], index: 4, kind: input, shape index: {}]   ;;  %s533_s5 = inlined_call_operand.vmem [shape: f32[2,8,128], index: 5, kind: output, shape index: {}]  }
   0x1 LB: > { %s390_s19 = sadd.s32 4294967295, %s446_s18   ;;  %p394_p0 = scmp.ge.s32.totalorder %s446_s18, 1  ;;  %s446_s18 = sphi %s480_s18, %s15_s18  }
   0x2   : > { %p186_p1 = scmp.lt.s32.totalorder %s446_s18, 3 }
   0x4   : > { %p187_p2 = pnand %p394_p0, %p186_p1 }
   0x5   : > { %p212_p3 = scmp.lt.s32.totalorder (!%p187_p2), %s390_s19, 1  ;;  %vm224_vm0 = vcmask (!%p187_p2), 523264   ;;  %v434_v7 = vld [vmem:[%s531_s3] sm:$0xff] (!%p187_p2)   ;;  %v448_v8 = vmov (!%p187_p2), 0.0   ;;  %v435_v9 = vld [vmem:[%s531_s3 + $0x8] sm:$0xff] (!%p187_p2)   ;;  %v436_v10 = vld [vmem:[%s531_s3 + $0x10] sm:$0xff] (!%p187_p2)  }
   0x6   : > { %190 = sbr.rel (%p187_p2) target bundleno = 547 (0x223), region = 40  ;;  %412 = vmatprep.subr.bf16.mxu0 (!%p187_p2), %v448_v8  ;;  %v437_v11 = vld [vmem:[%s531_s3 + $0x18] sm:$0xff] (!%p187_p2)   ;;  %vm449_vm1 = vmmov (!%p187_p2), 0   ;;  %v397_v16 = vld [vmem:[%s529_s1] ss:$0 sm:$0xff] (!%p187_p2) }
   0x7   : > { %413 = vmatpush3.bf16.msra.mxu0 (!%p187_p2), %v434_v7  ;;  %420 = vmatprep.mubr.msk.bf16.mxu0 (!%p187_p2), %vm449_vm1, %v448_v8  ;;  %v398_v18 = vld [vmem:[%s530_s2] ss:$0 sm:$0xff] (!%p187_p2) }
   0x8   : > { %414 = vmatprep.subr.bf16.mxu0 (!%p187_p2), %v448_v8  ;;  %v399_v22 = vld [vmem:[%s532_s4] ss:$0 sm:$0xff] (!%p187_p2) }
   0xb   : > { %415 = vmatpush3.bf16.msra.mxu0 (!%p187_p2), %v435_v9 }
   0xc   : > { %416 = vmatprep.subr.bf16.mxu0 (!%p187_p2), %v448_v8 }
   0xd   : > { %s535_s19 = smov (!%p212_p3, %s390_s19), 1 }
   0xe   : > { %s395_s20 = sshll.u32 %s535_s19, 3 }
   0xf   : > { %s215_s23 = scalar_lea.vmem %s528_s0, %s395_s20  ;;  %417 = vmatpush3.bf16.msra.mxu0 %v436_v10  ;;  %s219_s15 = scalar_lea.vmem %s533_s5, %s395_s20 }
  0x10   : > { %v221_v0 = vld [vmem:[%s215_s23] sm:$0xff]  ;;  %418 = vmatprep.subr.bf16.mxu0 %v448_v8 }
  0x11   : > { %v225_v1 = vsel %vm224_vm0, %v221_v0, 0.0 }
  0x12   : > { %226 = vadd.xlane.f32.xlu0 %v225_v1 }
  0x13   : > { %419 = vmatpush3.bf16.msra.mxu0 %v437_v11 }
  0x9f   : > { %v227_v2 = vpop.xlane.xlu0 %226 }
  0xa0   : > { %v229_v3 = vmul.f32 0.015625, %v227_v2 }
  0xa2   : > { %v230_v4 = vsub.f32 %v221_v0, %v229_v3 }
  0xa4   : > { %v231_v5 = vmul.f32 %v230_v4, %v230_v4 }
  0xa6   : > { %v232_v6 = vsel %vm224_vm0, %v231_v5, 0.0 }
  0xa7   : > { %233 = vadd.xlane.f32.xlu0 %v232_v6 }
 0x134   : > { %v234_v12 = vpop.xlane.xlu0 %233 }
 0x135   : > { %v235_v13 = vmul.f32 0.015625, %v234_v12 }
 0x137   : > { %v236_v14 = vadd.f32 1e-05, %v235_v13 }
 0x139   : > { %438 = vrsqrt.f32 %v236_v14 }
 0x143   : > { %v439_v15 = vpop.eup %438 }
 0x144   : > { %v238_v17 = vmul.f32 %v439_v15, %v230_v4 }
 0x146   : > { %v245_v19 = vmul.f32 %v397_v16, %v238_v17 }
 0x148   : > { %v252_v20 = vadd.f32 %v398_v18, %v245_v19 }
 0x14a   : > { %v253_v21 = vpack.c.bf16 %v252_v20, %v252_v20 }
 0x14c   : > { %421 = vmatmul.mubr.msk.bf16.vlgmr.msra.gmra.mrb[0].mxu0 %vm224_vm0, %v253_v21 }
 0x21f   : > { %v330_v23 = vpop.f32.mrb[0].mxu0 }
 0x220   : > { %v331_v24 = vadd.f32 %v399_v22, %v330_v23  ;;  %v422_v25 = vpop.f32.mrb[1].mxu0 }
 0x221   : > { %v333_v26 = vpop.f32.mrb[2].mxu0 }
 0x222   : > { %336 = vst [vmem:[%s219_s15] sm:$0xff] %v331_v24  ;;  %v423_v27 = vpop.f32.mrb[3].mxu0 }
 0x223 PF: > { %s15_s18 = sadd.s32 1, %s446_s18  }
 0x224   : > { %p12_p4 = scmp.ge.s32.totalorder %s15_s18, 4  }
 0x226   :  { %14 = sbr.rel (!%p12_p4) target bundleno = 1 (0x1), region = 70 }

// kernel: informer_stack_forward.14
= control target key start
LH: loop header
LB: loop body
LE: loop exit
PB: predicated region body
PF: predicated region fallthrough
CT: control target
= control target key end

     0   :  { %s4850_s0 = inlined_call_operand.vmem [shape: f32[2,24,64], index: 0, kind: input, shape index: {}]   ;;  %s4851_s1 = inlined_call_operand.vmem [shape: f32[2,32,64], index: 1, kind: input, shape index: {}]   ;;  %s4852_s2 = inlined_call_operand.vmem [shape: bf16[64,192], index: 2, kind: input, shape index: {}]   ;;  %s4853_s3 = inlined_call_operand.vmem [shape: f32[1,192], index: 3, kind: input, shape index: {}]   ;;  %s4854_s4 = inlined_call_operand.vmem [shape: bf16[64,64], index: 4, kind: input, shape index: {}]   ;;  %s4855_s5 = inlined_call_operand.vmem [shape: f32[1,64], index: 5, kind: input, shape index: {}]   ;;  %s4856_s6 = inlined_call_operand.vmem [shape: bf16[96,96], index: 6, kind: input, shape index: {}]   ;;  %s4857_s7 = inlined_call_operand.vmem [shape: f32[1,64], index: 7, kind: input, shape index: {}]   ;;  %s4858_s8 = inlined_call_operand.vmem [shape: f32[1,64], index: 8, kind: input, shape index: {}]   ;;  %s4859_s9 = inlined_call_operand.vmem [shape: bf16[64,64], index: 9, kind: input, shape index: {}]   ;;  %s4860_s10 = inlined_call_operand.vmem [shape: f32[1,64], index: 10, kind: input, shape index: {}]   ;;  %s4861_s11 = inlined_call_operand.vmem [shape: bf16[64,128], index: 11, kind: input, shape index: {}]   ;;  %s4862_s12 = inlined_call_operand.vmem [shape: f32[1,128], index: 12, kind: input, shape index: {}]   ;;  %s4863_s13 = inlined_call_operand.vmem [shape: bf16[64,64], index: 13, kind: input, shape index: {}]   ;;  %s4864_s14 = inlined_call_operand.vmem [shape: f32[1,64], index: 14, kind: input, shape index: {}]   ;;  %s4865_s15 = inlined_call_operand.vmem [shape: f32[1,64], index: 15, kind: input, shape index: {}]   ;;  %s4866_s16 = inlined_call_operand.vmem [shape: f32[1,64], index: 16, kind: input, shape index: {}]   ;;  %s4867_s17 = inlined_call_operand.vmem [shape: bf16[64,64], index: 17, kind: input, shape index: {}]   ;;  %s4868_s18 = inlined_call_operand.vmem [shape: f32[1,64], index: 18, kind: input, shape index: {}]   ;;  %s4869_s19 = inlined_call_operand.vmem [shape: bf16[64,64], index: 19, kind: input, shape index: {}]   ;;  %s4870_s20 = inlined_call_operand.vmem [shape: f32[1,64], index: 20, kind: input, shape index: {}]   ;;  %s4871_s21 = inlined_call_operand.vmem [shape: f32[1,64], index: 21, kind: input, shape index: {}]   ;;  %s4872_s22 = inlined_call_operand.vmem [shape: f32[1,64], index: 22, kind: input, shape index: {}]   ;;  %s4873_s23 = inlined_call_operand.vmem [shape: f32[2,24,64], index: 23, kind: output, shape index: {}]  }
   0x1   :  { %4892 = sst [smem:[#allocation2_spill]] %s4850_s0 }
   0x2   :  { %4893 = sst [smem:[#allocation3_spill]] %s4851_s1 }
   0x3   :  { %4894 = sst [smem:[#allocation4_spill]] %s4852_s2 }
   0x4   :  { %4895 = sst [smem:[#allocation5_spill]] %s4853_s3 }
   0x5   :  { %4896 = sst [smem:[#allocation6_spill]] %s4854_s4  ;;  %s4192_s4 = smov 0  }
   0x6   :  { %4897 = sst [smem:[#allocation7_spill]] %s4855_s5 }
   0x7   :  { %4898 = sst [smem:[#allocation8_spill]] %s4856_s6 }
   0x8   :  { %4899 = sst [smem:[#allocation9_spill]] %s4857_s7 }
   0x9 LB: > { %s3367_s30 = sadd.s32 4294967295, %s4061_s4   ;;  %p3371_p0 = scmp.ge.s32.totalorder %s4061_s4, 1  ;;  %s4061_s4 = sphi %s4192_s4, %s33_s4  }
   0xa   : > { %p647_p1 = scmp.lt.s32.totalorder %s4061_s4, 3 }
   0xc   : > { %p648_p2 = pnand %p3371_p0, %p647_p1 }
   0xd   : > { %s4900_s5 = sld [smem:[#allocation4_spill]] (!%p648_p2)  ;;  %p716_p3 = scmp.lt.s32.totalorder (!%p648_p2), %s3367_s30, 1  ;;  %v4063_v2 = vmov (!%p648_p2), 0   ;;  %vm801_vm0 = vcmask (!%p648_p2), 523264   ;;  %v751_v14 = vlaneseq (!%p648_p2)  ;;  %vm878_vm1 = vcmask (!%p648_p2), 130048  }
   0xe   : > { %651 = sbr.rel (%p648_p2) target bundleno = 6327 (0x18b7), region = 112  ;;  %840 = vmatprep.mubr.bf16.mxu0 (!%p648_p2), %v4063_v2  ;;  %s4901_s25 = sld [smem:[#allocation2_spill]] (!%p648_p2)  ;;  %vm987_vm2 = vcmask (!%p648_p2), 1043456   ;;  %vm945_vm4 = vcmask (!%p648_p2), 195584   ;;  %vm1602_vm7 = vcmask (!%p648_p2), 785408   ;;  %vm1741_vm8 = vcmask (!%p648_p2), 261120  }
   0xf   : > { %v4244_v15 = vshrl.u32 (!%p648_p2), %v751_v14, 7  ;;  %s4902_s24 = sld [smem:[#allocation5_spill]] (!%p648_p2)  ;;  %s4886_s26 = smov (!%p648_p2), 48   ;;  %v4306_v56 = vand.u32 (!%p648_p2), 127, %v751_v14  ;;  %vm1745_vm9 = vcmask (!%p648_p2), 392192  }
  0x10   : > { %s4884_s2 = smov (!%p648_p2), 112   ;;  %s4888_s6 = smov (!%p648_p2), 32  }
  0x11   : > { %v753_v16 = vsub.s32 (!%p648_p2), 0, %v4244_v15  ;;  %v757_v18 = vsub.s32 (!%p648_p2), 1, %v4244_v15  ;;  %s4880_s27 = smov (!%p648_p2), 96   ;;  %v4309_v57 = vadd.s32 (!%p648_p2), 8, %v4244_v15  ;;  %v4312_v58 = vadd.s32 (!%p648_p2), 16, %v4244_v15  ;;  %s4890_s7 = smov (!%p648_p2), 16  }
  0x12   : > { %vm869_vm3 = vcmp.gt.s32.totalorder (!%p648_p2), %v4306_v56, %v4244_v15  ;;  %s4878_s28 = smov (!%p648_p2), 80   ;;  %s4905_s29 = smov (!%p648_p2), 32  }
  0x13   : > { %v3885_v0 = vld [vmem:[%s4900_s5 + $0x4] ss:$8 sps:$4 sm:$0xff] (!%p648_p2)   ;;  %v3887_v1 = vld [vmem:[%s4900_s5] ss:$8 sps:$4 sm:$0xff] (!%p648_p2)   ;;  %v3888_v3 = vld [vmem:[%s4900_s5 + $0x14] ss:$8 sps:$4 sm:$0xff] (!%p648_p2)   ;;  %vm870_vm5 = vcmp.gt.s32.totalorder (!%p648_p2), %v4306_v56, %v4309_v57  ;;  %vm871_vm6 = vcmp.gt.s32.totalorder (!%p648_p2), %v4306_v56, %v4312_v58 }
  0x14   : > { %808 = vmatprep.subr.bf16.mxu0 (!%p648_p2), %v3885_v0  ;;  %v3890_v4 = vld [vmem:[%s4900_s5 + $0x10] ss:$8 sps:$4 sm:$0xff] (!%p648_p2)   ;;  %v3891_v5 = vld [vmem:[%s4900_s5 + $0x24] ss:$8 sps:$4 sm:$0xff] (!%p648_p2)   ;;  %v3893_v6 = vld [vmem:[%s4900_s5 + $0x20] ss:$8 sps:$4 sm:$0xff] (!%p648_p2)  }
  0x15   : > { %s4917_s30 = smov (!%p716_p3, %s3367_s30), 1  ;;  %809 = vmatpush1.bf16.msra.mxu0 %v3887_v1  ;;  %v3894_v7 = vld [vmem:[%s4900_s5 + $0x34] ss:$8 sps:$4 sm:$0xff]   ;;  %v3896_v8 = vld [vmem:[%s4900_s5 + $0x30] ss:$8 sps:$4 sm:$0xff]   ;;  %s4906_s0 = smov 48  }
  0x16   : > { %810 = vmatprep.subr.bf16.mxu0 %v3888_v3  ;;  %s4877_s3 = smul.u32 24, %s4917_s30  ;;  %v749_v17 = vld [vmem:[%s4902_s24] sm:$0x3]  ;;  %s4903_s24 = sld [smem:[#allocation8_spill]] }
  0x17   : > { %v754_v19 = vrot.slane %v749_v17, %v753_v16  ;;  %v758_v21 = vrot.slane %v749_v17, %v757_v18 }
  0x18   : > { %s4223_s1 = scalar_lea.vmem %s4901_s25, %s4877_s3  ;;  %s4882_s25 = smov 64  }
  0x19   : > { %811 = vmatpush1.bf16.msra.mxu0 %v3890_v4  ;;  %v732_v9 = vld [vmem:[%s4223_s1] sm:$0xff]  ;;  %v733_v10 = vld [vmem:[%s4223_s1 + $0x8] sm:$0xff]  ;;  %v4237_v12 = vld [vmem:[%s4223_s1 + $0x10] sm:$0xff]  ;;  %s3480_s3 = sshll.u32 %s4917_s30, 5 }
  0x1a   : > { %812 = vmatprep.subr.bf16.mxu0 %v3891_v5  ;;  %v739_v11 = vpack.c.bf16 %v733_v10, %v732_v9  ;;  %v740_v13 = vpack.c.bf16 %v4237_v12, %v4237_v12 }
  0x1d   : > { %813 = vmatpush1.bf16.msra.mxu0 %v3893_v6 }
  0x1e   : > { %814 = vmatprep.subr.bf16.mxu0 %v3894_v7 }
  0x21   : > { %815 = vmatpush1.bf16.msra.mxu0 %v3896_v8 }
  0x24   : > { %3384 = vmatmul.mubr.msk.bf16.vlgmr.msra.gmra.mrb[0].mxu0 %vm801_vm0, %v739_v11 }
  0x25   : > { %850 = vmatprep.mubr.bf16.mxu0 %v4063_v2 }
  0x2c   : > { %3385 = vmatmul.mubr.msk.bf16.gmra.mrb[4].mxu0 %vm801_vm0, %v740_v13 }
  0xf7   : > { %v842_v20 = vpop.f32.mrb[0].mxu0 }
  0xf8   : > { %v844_v22 = vpop.f32.mrb[1].mxu0  ;;  %v843_v24 = vadd.f32 %v842_v20, %v754_v19 }
  0xf9   : > { %v846_v23 = vpop.f32.mrb[2].mxu0  ;;  %v845_v27 = vadd.f32 %v844_v22, %v758_v21 }
  0xfa   : > { %v847_v25 = vadd.f32 %v846_v23, %v754_v19  ;;  %v848_v26 = vpop.f32.mrb[3].mxu0 }
  0xfb   : > { %v849_v28 = vadd.f32 %v848_v26, %v758_v21 }
  0xfc   : > { %v4251_v29 = vpack.c.bf16 %v847_v25, %v843_v24 }
  0xfd   : > { %v4253_v30 = vpack.c.bf16 %v849_v28, %v845_v27 }
  0xfe   : > { %874 = vrot.lane.b32.xlu0 %v4251_v29, %s4882_s25  ;;  %3597 = vmatprep.mubr.msk.bf16.mxu1 %vm878_vm1, %v4251_v29 }
  0xff   : > { %v852_v31 = vpop.f32.mrb[4].mxu0 }
 0x100   : > { %v853_v32 = vadd.f32 %v852_v31, %v754_v19  ;;  %v854_v33 = vpop.f32.mrb[5].mxu0 }
 0x101   : > { %v856_v34 = vpop.f32.mrb[6].mxu0  ;;  %v855_v45 = vadd.f32 %v854_v33, %v758_v21 }
 0x102   : > { %v4259_v35 = vpack.c.bf16 %v853_v32, %v853_v32  ;;  %v857_v36 = vpop.f32.mrb[7].mxu0  ;;  %1043 = vrot.lane.b32.xlu0 %v4251_v29, %s4886_s26 }
 0x103   : > { %v4290_v49 = vpack.c.bf16 %v855_v45, %v855_v45 }
 0x104   : > { %876 = vrot.lane.b32.xlu1 %v4259_v35, %s4882_s25  ;;  %s4914_s25 = smov 16  }
 0x105   : > { %v989_v50 = vsel %vm987_vm2, %v4290_v49, 0 }
 0x106   : > { %1039 = vrot.lane.b32.xlu0 %v4251_v29, %s4884_s2 }
 0x108   : > { %1045 = vrot.lane.b32.xlu1 %v4259_v35, %s4886_s26 }
 0x10a   : > { %1041 = vrot.lane.b32.xlu0 %v4259_v35, %s4884_s2 }
 0x10c   : > { %1216 = vrot.lane.b32.xlu1 %v4251_v29, %s4888_s6 }
 0x10e   : > { %1212 = vrot.lane.b32.xlu0 %v4251_v29, %s4880_s27 }
 0x110   : > { %1218 = vrot.lane.b32.xlu1 %v4259_v35, %s4888_s6  ;;  %s4904_s6 = sld [smem:[#allocation6_spill]] }
 0x114   : > { %1214 = vrot.lane.b32.xlu1 %v4259_v35, %s4880_s27 }
 0x170   : > { %v875_v37 = vpop.permute.xlu0 %874 }
 0x171   : > { %3817 = vmatprep.subr.msk.bf16.mxu1 %vm878_vm1, %v875_v37  ;;  %v886_v38 = vsel %vm878_vm1, %v875_v37, 0 }
 0x172   : > { %3594 = vmatpush3.bf16.xpose.msra.mxu1 %v886_v38 }
 0x174   : > { %v1044_v39 = vpop.permute.xlu0 %1043 }
 0x175   : > { %3820 = vmatprep.subr.msk.bf16.mxu0 %vm878_vm1, %v1044_v39  ;;  %v1054_v40 = vsel %vm878_vm1, %v1044_v39, 0 }
 0x176   : > { %v877_v41 = vpop.permute.xlu1 %876  ;;  %3610 = vmatpush3.bf16.xpose.msra.mxu0 %v1054_v40 }
 0x177   : > { %3818 = vmatprep.subr.msk.bf16.mxu1 %vm878_vm1, %v877_v41  ;;  %v889_v42 = vsel %vm878_vm1, %v877_v41, 0 }
 0x178   : > { %v1040_v43 = vpop.permute.xlu0 %1039 }
 0x179   : > { %3613 = vmatprep.mubr.msk.bf16.mxu0 %vm878_vm1, %v1040_v43 }
 0x17a   : > { %v1046_v44 = vpop.permute.xlu1 %1045  ;;  %3596 = vmatpush3.bf16.xpose.msra.mxu1 %v889_v42 }
 0x17b   : > { %3601 = vmatprep.subr.bf16.mxu1 %v4253_v30  ;;  %3821 = vmatprep.subr.msk.bf16.mxu0 %vm878_vm1, %v1046_v44  ;;  %v1057_v46 = vsel %vm878_vm1, %v1046_v44, 0 }
 0x17c   : > { %v1042_v48 = vpop.permute.xlu0 %1041 }
 0x17e   : > { %v1217_v47 = vpop.permute.xlu1 %1216  ;;  %3612 = vmatpush3.bf16.xpose.msra.mxu0 %v1057_v46 }
 0x17f   : > { %3823 = vmatprep.subr.msk.bf16.mxu0 %vm878_vm1, %v1217_v47  ;;  %v1227_v51 = vsel %vm878_vm1, %v1217_v47, 0 }
 0x180   : > { %v1213_v52 = vpop.permute.xlu0 %1212 }
 0x181   : > { %3598 = vmatmul.mubr.msk.bf16.vlgmr.msra.gmra.mrb[0].mxu1 %vm878_vm1, %v4259_v35 }
 0x182   : > { %3602 = vmatpush3.bf16.msra.mxu1 %v4253_v30  ;;  %v1219_v53 = vpop.permute.xlu1 %1218 }
 0x183   : > { %3819 = vmatprep.subr.msk.bf16.mxu1 %vm987_vm2, %v4290_v49  ;;  %v1230_v54 = vsel %vm878_vm1, %v1219_v53, 0 }
 0x185   : > { %3614 = vmatmul.mubr.msk.bf16.vlgmr.msra.gmra.mrb[8].mxu0 %vm878_vm1, %v1042_v48 }
 0x186   : > { %3604 = vmatpush3.bf16.msra.mxu1 %v989_v50  ;;  %3626 = vmatpush3.bf16.xpose.msra.mxu0 %v1227_v51  ;;  %v1215_v55 = vpop.permute.xlu1 %1214 }
 0x187   : > { %3629 = vmatprep.mubr.msk.bf16.mxu0 %vm878_vm1, %v1213_v52  ;;  %3824 = vmatprep.subr.msk.bf16.mxu0 %vm878_vm1, %v1219_v53 }
 0x18e   : > { %3628 = vmatpush3.bf16.xpose.msra.mxu0 %v1230_v54 }
 0x195   : > { %3630 = vmatmul.mubr.msk.bf16.vlgmr.msra.gmra.mrb[12].mxu0 %vm878_vm1, %v1215_v55 }
 0x254   : > { %v3599_v59 = vpop.f32.mrb[0].mxu1 }
 0x255   : > { %v925_v60 = vpop.f32.mrb[1].mxu1  ;;  %v941_v61 = vmul.f32 0.25, %v3599_v59 }
 0x256   : > { %v939_v62 = vmul.f32 0.25, %v925_v60  ;;  %v3600_v63 = vpop.f32.mrb[2].mxu1 }
 0x257   : > { %v928_v0 = vpop.f32.mrb[3].mxu1  ;;  %v944_v9 = vsel %vm871_vm6, -1e+30, %v941_v61 }
 0x258   : > { %v940_v1 = vmul.f32 0.25, %v928_v0  ;;  %v3615_v2 = vpop.f32.mrb[8].mxu0  ;;  %v942_v3 = vsel %vm869_vm3, -1e+30, %v939_v62  ;;  %v952_v14 = vsel %vm945_vm4, %v944_v9, -inf }
 0x259   : > { %v1093_v4 = vpop.f32.mrb[9].mxu0  ;;  %v946_v5 = vsel %vm945_vm4, %v942_v3, -inf  ;;  %v1109_v16 = vmul.f32 0.25, %v3615_v2 }
 0x25a   : > { %v1107_v6 = vmul.f32 0.25, %v1093_v4  ;;  %v3616_v7 = vpop.f32.mrb[10].mxu0  ;;  %947 = vmax.xlane.f32.xlu0 %v946_v5  ;;  %v943_v8 = vsel %vm870_vm5, -1e+30, %v940_v1 }
 0x25b   : > { %v1096_v10 = vpop.f32.mrb[11].mxu0  ;;  %v949_v11 = vsel %vm945_vm4, %v943_v8, -inf  ;;  %v1112_v21 = vsel %vm871_vm6, -1e+30, %v1109_v16 }
 0x25c   : > { %v1108_v13 = vmul.f32 0.25, %v1096_v10  ;;  %950 = vmax.xlane.f32.xlu1 %v949_v11  ;;  %v1110_v18 = vsel %vm869_vm3, -1e+30, %v1107_v6  ;;  %v1119_v22 = vsel %vm945_vm4, %v1112_v21, -inf }
 0x25d   : > { %v1113_v20 = vsel %vm945_vm4, %v1110_v18, -inf }
 0x25e   : > { %953 = vmax.xlane.f32.xlu0 %v952_v14  ;;  %v1111_v17 = vsel %vm870_vm5, -1e+30, %v1108_v13 }
 0x25f   : > { %v1116_v19 = vsel %vm945_vm4, %v1111_v17, -inf }
 0x260   : > { %1117 = vmax.xlane.f32.xlu1 %v1116_v19 }
 0x262   : > { %1114 = vmax.xlane.f32.xlu0 %v1113_v20 }
 0x266   : > { %1120 = vmax.xlane.f32.xlu0 %v1119_v22 }
 0x268   : > { %v3631_v23 = vpop.f32.mrb[12].mxu0 }
 0x269   : > { %v1266_v24 = vpop.f32.mrb[13].mxu0  ;;  %v1282_v25 = vmul.f32 0.25, %v3631_v23 }
 0x26a   : > { %v1280_v26 = vmul.f32 0.25, %v1266_v24  ;;  %v3632_v27 = vpop.f32.mrb[14].mxu0 }
 0x26b   : > { %v1269_v28 = vpop.f32.mrb[15].mxu0  ;;  %v1285_v36 = vsel %vm871_vm6, -1e+30, %v1282_v25 }
 0x26c   : > { %v1281_v31 = vmul.f32 0.25, %v1269_v28  ;;  %v1283_v32 = vsel %vm869_vm3, -1e+30, %v1280_v26  ;;  %v1292_v38 = vsel %vm945_vm4, %v1285_v36, -inf }
 0x26d   : > { %v1286_v33 = vsel %vm945_vm4, %v1283_v32, -inf }
 0x26e   : > { %1287 = vmax.xlane.f32.xlu1 %v1286_v33  ;;  %v4351_v34 = vsel %vm870_vm5, -1e+30, %v1281_v31 }
 0x26f   : > { %v1289_v37 = vsel %vm945_vm4, %v4351_v34, -inf }
 0x270   : > { %1290 = vmax.xlane.f32.xlu0 %v1289_v37 }
 0x272   : > { %1293 = vmax.xlane.f32.xlu1 %v1292_v38 }
 0x283   : > { %1150 = vrot.lane.b32.xlu1 %v4253_v30, %s4884_s2 }
 0x2e7   : > { %v948_v39 = vpop.xlane.xlu0 %947 }
 0x2e8   : > { %v955_v41 = vsub.f32 %v942_v3, %v948_v39 }
 0x2e9   : > { %v951_v40 = vpop.xlane.xlu1 %950 }
 0x2ea   : > { %v958_v45 = vmul.f32 1.442695, %v955_v41  ;;  %v956_v54 = vsub.f32 %v943_v8, %v951_v40 }
 0x2eb   : > { %v954_v42 = vpop.xlane.xlu0 %953 }
 0x2ec   : > { %v957_v43 = vsub.f32 %v944_v9, %v954_v42  ;;  %v960_v61 = vmul.f32 1.442695, %v956_v54 }
 0x2ed   : > { %v1118_v44 = vpop.xlane.xlu1 %1117 }
 0x2ee   : > { %v962_v46 = vmul.f32 1.442695, %v957_v43  ;;  %v1123_v47 = vsub.f32 %v1111_v17, %v1118_v44 }
 0x2ef   : > { %v1115_v48 = vpop.xlane.xlu0 %1114 }
 0x2f0   : > { %3927 = vpow2.f32 %v962_v46  ;;  %v1127_v50 = vmul.f32 1.442695, %v1123_v47  ;;  %v1122_v51 = vsub.f32 %v1110_v18, %v1115_v48 }
 0x2f1   : > { %3929 = vpow2.f32 %v958_v45 }
 0x2f2   : > { %3931 = vpow2.f32 %v1127_v50  ;;  %v1125_v55 = vmul.f32 1.442695, %v1122_v51 }
 0x2f3   : > { %v1121_v52 = vpop.xlane.xlu0 %1120 }
 0x2f4   : > { %v1124_v53 = vsub.f32 %v1112_v21, %v1121_v52 }
 0x2f6   : > { %v1129_v59 = vmul.f32 1.442695, %v1124_v53 }
 0x2f8   : > { %3933 = vpow2.f32 %v1129_v59 }
 0x2f9   : > { %3935 = vpow2.f32 %v1125_v55 }
 0x2fa   : > { %v4361_v60 = vpop.eup %3927  ;;  %3937 = vpow2.f32 %v960_v61 }
 0x2fb   : > { %v1288_v62 = vpop.xlane.xlu1 %1287  ;;  %v970_v63 = vsel %vm945_vm4, %v4361_v60, 0.0  ;;  %v4365_v0 = vpop.eup %3929 }
 0x2fc   : > { %971 = vadd.xlane.f32.xlu0 %v970_v63  ;;  %v964_v2 = vsel %vm945_vm4, %v4365_v0, 0.0  ;;  %v4369_v3 = vpop.eup %3931  ;;  %v1295_v14 = vsub.f32 %v1283_v32, %v1288_v62 }
 0x2fd   : > { %v1134_v7 = vsel %vm945_vm4, %v4369_v3, 0.0  ;;  %v1291_v17 = vpop.xlane.xlu0 %1290 }
 0x2fe   : > { %v1298_v18 = vmul.f32 1.442695, %v1295_v14  ;;  %v1296_v19 = vsub.f32 %v4351_v34, %v1291_v17 }
 0x2ff   : > { %v1294_v1 = vpop.xlane.xlu1 %1293 }
 0x300   : > { %965 = vadd.xlane.f32.xlu0 %v964_v2  ;;  %v1297_v13 = vsub.f32 %v1285_v36, %v1294_v1  ;;  %v1300_v20 = vmul.f32 1.442695, %v1296_v19 }
 0x302   : > { %v4371_v4 = vpop.eup %3933  ;;  %v1302_v16 = vmul.f32 1.442695, %v1297_v13 }
 0x303   : > { %v4373_v5 = vpop.permute.xlu1 %1150  ;;  %v1137_v6 = vsel %vm945_vm4, %v4371_v4, 0.0  ;;  %v3936_v8 = vpop.eup %3935 }
 0x304   : > { %1138 = vadd.xlane.f32.xlu1 %v1137_v6  ;;  %1135 = vadd.xlane.f32.xlu0 %v1134_v7  ;;  %v1131_v9 = vsel %vm945_vm4, %v3936_v8, 0.0  ;;  %v3938_v10 = vpop.eup %3937  ;;  %3939 = vpow2.f32 %v1302_v16 }
 0x305   : > { %3617 = vmatprep.subr.bf16.mxu1 %v4373_v5  ;;  %v967_v11 = vsel %vm945_vm4, %v3938_v10, 0.0  ;;  %3941 = vpow2.f32 %v1298_v18 }
 0x306   : > { %3943 = vpow2.f32 %v1300_v20 }
 0x308   : > { %1132 = vadd.xlane.f32.xlu1 %v1131_v9 }
 0x30c   : > { %968 = vadd.xlane.f32.xlu1 %v967_v11 }
 0x30e   : > { %v4387_v21 = vpop.eup %3939 }
 0x30f   : > { %v1310_v22 = vsel %vm945_vm4, %v4387_v21, 0.0  ;;  %v4391_v23 = vpop.eup %3941 }
 0x310   : > { %v1304_v24 = vsel %vm945_vm4, %v4391_v23, 0.0  ;;  %v4395_v25 = vpop.eup %3943 }
 0x311   : > { %v1307_v26 = vsel %vm945_vm4, %v4395_v25, 0.0 }
 0x31a   : > { %1152 = vrot.lane.b32.xlu0 %v4290_v49, %s4884_s2  ;;  %s4907_s2 = sld [smem:[#allocation7_spill]] }
 0x31d   : > { %1321 = vrot.lane.b32.xlu1 %v4253_v30, %s4880_s27 }
 0x339   : > { %1311 = vadd.xlane.f32.xlu0 %v1310_v22 }
 0x33d   : > { %1305 = vadd.xlane.f32.xlu0 %v1304_v24 }
 0x341   : > { %1308 = vadd.xlane.f32.xlu1 %v1307_v26 }
 0x352   : > { %1323 = vrot.lane.b32.xlu1 %v4290_v49, %s4880_s27  ;;  %s4909_s27 = sld [smem:[#allocation9_spill]] }
 0x353   : > { %1387 = vrot.lane.b32.xlu0 %v4251_v29, %s4890_s7 }
 0x356   : > { %1389 = vrot.lane.b32.xlu1 %v4259_v35, %s4890_s7 }
 0x357   : > { %1383 = vrot.lane.b32.xlu0 %v4251_v29, %s4878_s28 }
 0x35a   : > { %1385 = vrot.lane.b32.xlu1 %v4259_v35, %s4878_s28 }
 0x389   : > { %v972_v27 = vpop.xlane.xlu0 %971 }
 0x38a   : > { %3945 = vrcp.f32 %v972_v27 }
 0x38d   : > { %v966_v28 = vpop.xlane.xlu0 %965 }
 0x38e   : > { %3947 = vrcp.f32 %v966_v28 }
 0x391   : > { %v1139_v31 = vpop.xlane.xlu1 %1138  ;;  %v1136_v33 = vpop.xlane.xlu0 %1135 }
 0x394   : > { %v3946_v36 = vpop.eup %3945 }
 0x395   : > { %v1133_v32 = vpop.xlane.xlu1 %1132  ;;  %v978_v40 = vmul.f32 %v3946_v36, %v4361_v60  ;;  %v1153_v48 = vpop.permute.xlu0 %1152 }
 0x396   : > { %3949 = vrcp.f32 %v1133_v32  ;;  %v1162_v51 = vsel %vm987_vm2, %v1153_v48, 0 }
 0x397   : > { %3951 = vrcp.f32 %v1136_v33  ;;  %v980_v45 = vpack.c.bf16 %v978_v40, %v978_v40 }
 0x398   : > { %v3948_v37 = vpop.eup %3947 }
 0x399   : > { %v969_v34 = vpop.xlane.xlu1 %968  ;;  %v974_v35 = vmul.f32 %v3948_v37, %v4365_v0 }
 0x39a   : > { %3953 = vrcp.f32 %v969_v34 }
 0x39b   : > { %3955 = vrcp.f32 %v1139_v31 }
 0x39d   : > { %v1322_v52 = vpop.permute.xlu1 %1321 }
 0x3a0   : > { %v3950_v38 = vpop.eup %3949 }
 0x3a1   : > { %v3952_v39 = vpop.eup %3951  ;;  %v1141_v42 = vmul.f32 %v3950_v38, %v3936_v8 }
 0x3a2   : > { %v1143_v44 = vmul.f32 %v3952_v39, %v4369_v3 }
 0x3a4   : > { %v3954_v29 = vpop.eup %3953  ;;  %v1146_v47 = vpack.c.bf16 %v1143_v44, %v1141_v42 }
 0x3a5   : > { %v976_v41 = vmul.f32 %v3954_v29, %v3938_v10  ;;  %v3956_v46 = vpop.eup %3955 }
 0x3a6   : > { %v1145_v50 = vmul.f32 %v3956_v46, %v4371_v4 }
 0x3a7   : > { %v979_v43 = vpack.c.bf16 %v976_v41, %v974_v35 }
 0x3a8   : > { %v1147_v53 = vpack.c.bf16 %v1145_v50, %v1145_v50 }
 0x3a9   : > { %3605 = vmatprep.mubr.msk.bf16.mxu1 %vm945_vm4, %v979_v43 }
 0x3aa   : > { %3606 = vmatmul.mubr.msk.bf16.vlgmr.msra.gmra.mrb[4].mxu1 %vm945_vm4, %v980_v45 }
 0x3ab   : > { %3618 = vmatpush3.bf16.msra.mxu1 %v4373_v5  ;;  %3621 = vmatprep.mubr.msk.bf16.mxu1 %vm945_vm4, %v1146_v47 }
 0x3ac   : > { %3822 = vmatprep.subr.msk.bf16.mxu1 %vm987_vm2, %v1153_v48 }
 0x3af   : > { %3620 = vmatpush3.bf16.msra.mxu1 %v1162_v51 }
 0x3b0   : > { %3633 = vmatprep.subr.bf16.mxu1 %v1322_v52 }
 0x3b2   : > { %3622 = vmatmul.mubr.msk.bf16.vlgmr.msra.gmra.mrb[8].mxu1 %vm945_vm4, %v1147_v53 }
 0x3b3   : > { %3634 = vmatpush3.bf16.msra.mxu1 %v1322_v52 }
 0x3c6   : > { %v1312_v54 = vpop.xlane.xlu0 %1311 }
 0x3c7   : > { %3957 = vrcp.f32 %v1312_v54 }
 0x3ca   : > { %v1306_v55 = vpop.xlane.xlu0 %1305 }
 0x3cb   : > { %3959 = vrcp.f32 %v1306_v55 }
 0x3ce   : > { %v1309_v59 = vpop.xlane.xlu1 %1308  ;;  %v1388_v62 = vpop.permute.xlu0 %1387 }
 0x3cf   : > { %3961 = vrcp.f32 %v1309_v59  ;;  %v1398_v7 = vsel %vm878_vm1, %v1388_v62, 0 }
 0x3d1   : > { %v3958_v63 = vpop.eup %3957 }
 0x3d2   : > { %v1324_v60 = vpop.permute.xlu1 %1323  ;;  %v1318_v2 = vmul.f32 %v3958_v63, %v4387_v21  ;;  %v1384_v8 = vpop.permute.xlu0 %1383 }
 0x3d3   : > { %v1333_v61 = vsel %vm987_vm2, %v1324_v60, 0  ;;  %3825 = vmatprep.subr.msk.bf16.mxu1 %vm987_vm2, %v1324_v60 }
 0x3d4   : > { %3636 = vmatpush3.bf16.msra.mxu1 %v1333_v61  ;;  %v1320_v6 = vpack.c.bf16 %v1318_v2, %v1318_v2 }
 0x3d5   : > { %3826 = vmatprep.subr.msk.bf16.mxu1 %vm878_vm1, %v1388_v62  ;;  %v3960_v0 = vpop.eup %3959 }
 0x3d6   : > { %v1314_v3 = vmul.f32 %v3960_v0, %v4391_v23  ;;  %v1390_v9 = vpop.permute.xlu1 %1389 }
 0x3d7   : > { %v1401_v10 = vsel %vm878_vm1, %v1390_v9, 0 }
 0x3d9   : > { %v3962_v1 = vpop.eup %3961 }
 0x3da   : > { %v1316_v4 = vmul.f32 %v3962_v1, %v4395_v25  ;;  %v1386_v11 = vpop.permute.xlu1 %1385 }
 0x3dc   : > { %v1319_v5 = vpack.c.bf16 %v1316_v4, %v1314_v3 }
 0x3de   : > { %3637 = vmatprep.mubr.msk.bf16.mxu1 %vm945_vm4, %v1319_v5 }
 0x3df   : > { %3638 = vmatmul.mubr.msk.bf16.vlgmr.msra.gmra.mrb[12].mxu1 %vm945_vm4, %v1320_v6 }
 0x3e0   : > { %3642 = vmatpush3.bf16.xpose.msra.mxu1 %v1398_v7  ;;  %3645 = vmatprep.mubr.msk.bf16.mxu1 %vm878_vm1, %v1384_v8  ;;  %v3897_v7 = vld [vmem:[%s4903_s24] sm:$0xff]  }
 0x3e1   : > { %3827 = vmatprep.subr.msk.bf16.mxu1 %vm878_vm1, %v1390_v9  ;;  %3669 = vmatprep.mubr.msk.bf16.mxu0 %vm1602_vm7, %v3897_v7 }
 0x3e8   : > { %3644 = vmatpush3.bf16.xpose.msra.mxu1 %v1401_v10 }
 0x3ef   : > { %3646 = vmatmul.mubr.msk.bf16.vlgmr.msra.gmra.mrb[16].mxu1 %vm878_vm1, %v1386_v11 }
 0x47d   : > { %v3607_v13 = vpop.f32.mrb[4].mxu1 }
 0x47e   : > { %v1025_v14 = vpop.f32.mrb[5].mxu1 }
 0x47f   : > { %v3608_v16 = vpop.f32.mrb[6].mxu1 }
 0x480   : > { %v1028_v17 = vpop.f32.mrb[7].mxu1  ;;  %v3898_v16 = vld [vmem:[%s4903_s24 + $0x8] sm:$0xff]  }
 0x481   : > { %v1554_v18 = vpack.c.bf16 %v1028_v17, %v1025_v14  ;;  %v3899_v17 = vld [vmem:[%s4903_s24 + $0x10] sm:$0xff]  }
 0x483   : > { %3657 = vmatprep.subr.bf16.mxu0 %v1554_v18 }
 0x484   : > { %3658 = vmatpush3.bf16.msra.mxu0 %v1554_v18  ;;  %v3900_v18 = vld [vmem:[%s4903_s24 + $0x18] sm:$0xff]  }
 0x485   : > { %v3623_v19 = vpop.f32.mrb[8].mxu1 }
 0x486   : > { %v1198_v20 = vpop.f32.mrb[9].mxu1 }
 0x487   : > { %v1555_v21 = vpack.c.bf16 %v1198_v20, %v3607_v13  ;;  %v3624_v22 = vpop.f32.mrb[10].mxu1  ;;  %v3902_v20 = vld [vmem:[%s4903_s24 + $0x28] sm:$0xff]  }
 0x488   : > { %v1201_v23 = vpop.f32.mrb[11].mxu1 }
 0x489   : > { %v1556_v24 = vpack.c.bf16 %v3623_v19, %v1201_v23  ;;  %3659 = vmatprep.subr.bf16.mxu0 %v1555_v21  ;;  %v3901_v19 = vld [vmem:[%s4903_s24 + $0x20] sm:$0xff]  }
 0x48a   : > { %3660 = vmatpush3.bf16.msra.mxu0 %v1555_v21  ;;  %v3903_v21 = vld [vmem:[%s4904_s6] sm:$0xff]  }
 0x48b   : > { %3661 = vmatprep.subr.bf16.mxu0 %v1556_v24 }
 0x48e   : > { %3662 = vmatpush3.bf16.msra.mxu0 %v1556_v24  ;;  %v3904_v24 = vld [vmem:[%s4904_s6 + $0x8] sm:$0xff]  }
 0x4b2   : > { %v4433_v25 = vpop.f32.mrb[12].mxu1 }
 0x4b3   : > { %v1369_v26 = vpop.f32.mrb[13].mxu1 }
 0x4b4   : > { %v3640_v27 = vpop.f32.mrb[14].mxu1 }
 0x4b5   : > { %v1372_v28 = vpop.f32.mrb[15].mxu1  ;;  %v3905_v27 = vld [vmem:[%s4904_s6 + $0x10] sm:$0xff]  }
 0x4b6   : > { %v1557_v31 = vpack.c.bf16 %v1372_v28, %v1369_v26 }
 0x4b8   : > { %3663 = vmatprep.subr.bf16.mxu0 %v1557_v31 }
 0x4b9   : > { %3664 = vmatpush3.bf16.msra.mxu0 %v1557_v31 }
 0x4c2   : > { %v3647_v32 = vpop.f32.mrb[16].mxu1 }
 0x4c3   : > { %v1437_v33 = vpop.f32.mrb[17].mxu1  ;;  %v1453_v34 = vmul.f32 0.25, %v3647_v32  ;;  %v3906_v32 = vld [vmem:[%s4904_s6 + $0x18] sm:$0xff]  }
 0x4c4   : > { %v1451_v36 = vmul.f32 0.25, %v1437_v33  ;;  %v3648_v37 = vpop.f32.mrb[18].mxu1 }
 0x4c5   : > { %v1440_v38 = vpop.f32.mrb[19].mxu1  ;;  %v1456_v41 = vsel %vm871_vm6, -1e+30, %v1453_v34 }
 0x4c6   : > { %v1452_v39 = vmul.f32 0.25, %v1440_v38  ;;  %v1454_v29 = vsel %vm869_vm3, -1e+30, %v1451_v36  ;;  %v1463_v43 = vsel %vm945_vm4, %v1456_v41, -inf }
 0x4c7   : > { %v1457_v40 = vsel %vm945_vm4, %v1454_v29, -inf }
 0x4c8   : > { %1458 = vmax.xlane.f32.xlu0 %v1457_v40  ;;  %v1455_v35 = vsel %vm870_vm5, -1e+30, %v1452_v39 }
 0x4c9   : > { %v1460_v42 = vsel %vm945_vm4, %v1455_v35, -inf }
 0x4ca   : > { %1461 = vmax.xlane.f32.xlu1 %v1460_v42 }
 0x4cc   : > { %1464 = vmax.xlane.f32.xlu0 %v1463_v43 }
 0x555   : > { %v1459_v44 = vpop.xlane.xlu0 %1458 }
 0x556   : > { %v1466_v45 = vsub.f32 %v1454_v29, %v1459_v44 }
 0x557   : > { %v1462_v15 = vpop.xlane.xlu1 %1461 }
 0x558   : > { %v1467_v46 = vsub.f32 %v1455_v35, %v1462_v15  ;;  %v1469_v51 = vmul.f32 1.442695, %v1466_v45 }
 0x559   : > { %v1465_v47 = vpop.xlane.xlu0 %1464 }
 0x55a   : > { %v1471_v48 = vmul.f32 1.442695, %v1467_v46  ;;  %v1468_v50 = vsub.f32 %v1456_v41, %v1465_v47 }
 0x55c   : > { %3963 = vpow2.f32 %v1471_v48  ;;  %v1473_v57 = vmul.f32 1.442695, %v1468_v50 }
 0x55e   : > { %3965 = vpow2.f32 %v1473_v57 }
 0x55f   : > { %3967 = vpow2.f32 %v1469_v51 }
 0x566   : > { %v3964_v56 = vpop.eup %3963 }
 0x567   : > { %v1478_v58 = vsel %vm945_vm4, %v3964_v56, 0.0 }
 0x568   : > { %v3966_v52 = vpop.eup %3965  ;;  %1479 = vadd.xlane.f32.xlu1 %v1478_v58 }
 0x569   : > { %v1481_v53 = vsel %vm945_vm4, %v3966_v52, 0.0  ;;  %v3968_v54 = vpop.eup %3967 }
 0x56a   : > { %1482 = vadd.xlane.f32.xlu0 %v1481_v53  ;;  %v1475_v55 = vsel %vm945_vm4, %v3968_v54, 0.0 }
 0x56e   : > { %1476 = vadd.xlane.f32.xlu0 %v1475_v55 }
 0x579   : > { %1492 = vrot.lane.b32.xlu1 %v4253_v30, %s4878_s28 }
 0x584   : > { %1494 = vrot.lane.b32.xlu0 %v4290_v49, %s4878_s28  ;;  %s4913_s28 = smov 80  }
 0x5f5   : > { %v1480_v59 = vpop.xlane.xlu1 %1479 }
 0x5f7   : > { %v1483_v60 = vpop.xlane.xlu0 %1482 }
 0x5f8   : > { %3969 = vrcp.f32 %v1483_v60 }
 0x5f9   : > { %v1493_v61 = vpop.permute.xlu1 %1492  ;;  %3971 = vrcp.f32 %v1480_v59 }
 0x5fa   : > { %3649 = vmatprep.subr.bf16.mxu1 %v1493_v61 }
 0x5fb   : > { %v1477_v62 = vpop.xlane.xlu0 %1476  ;;  %3650 = vmatpush3.bf16.msra.mxu1 %v1493_v61 }
 0x5fc   : > { %3973 = vrcp.f32 %v1477_v62 }
 0x5ff   : > { %v1495_v63 = vpop.permute.xlu0 %1494 }
 0x600   : > { %v1504_v0 = vsel %vm987_vm2, %v1495_v63, 0  ;;  %3828 = vmatprep.subr.msk.bf16.mxu1 %vm987_vm2, %v1495_v63 }
 0x601   : > { %3652 = vmatpush3.bf16.msra.mxu1 %v1504_v0  ;;  %v3414_v0 = vld [vmem:[%s4907_s2] ss:$0 sm:$0xff] }
 0x602   : > { %v3970_v1 = vpop.eup %3969  ;;  %3681 = vmatprep.subr.bf16.mxu1 %v3903_v21 }
 0x603   : > { %v3972_v30 = vpop.eup %3971  ;;  %v1489_v3 = vmul.f32 %v3970_v1, %v3966_v52 }
 0x604   : > { %v1487_v4 = vmul.f32 %v3972_v30, %v3964_v56 }
 0x605   : > { %v1491_v6 = vpack.c.bf16 %v1489_v3, %v1489_v3 }
 0x606   : > { %v3974_v2 = vpop.eup %3973 }
 0x607   : > { %v1485_v49 = vmul.f32 %v3974_v2, %v3968_v54 }
 0x609   : > { %v1490_v5 = vpack.c.bf16 %v1487_v4, %v1485_v49 }
 0x60b   : > { %3653 = vmatprep.mubr.msk.bf16.mxu1 %vm945_vm4, %v1490_v5 }
 0x60c   : > { %3654 = vmatmul.mubr.msk.bf16.vlgmr.msra.gmra.mrb[20].mxu1 %vm945_vm4, %v1491_v6  ;;  %v4053_v6 = vld [vmem:[%s4223_s1] sm:$0xff] }
 0x60d   : > { %3682 = vmatpush3.bf16.msra.mxu1 %v3903_v21 }
 0x60e   : > { %3683 = vmatprep.subr.bf16.mxu1 %v3904_v24 }
 0x611   : > { %3684 = vmatpush3.bf16.msra.mxu1 %v3904_v24 }
 0x612   : > { %3685 = vmatprep.subr.bf16.mxu1 %v3905_v27 }
 0x615   : > { %3686 = vmatpush3.bf16.msra.mxu1 %v3905_v27 }
 0x616   : > { %3687 = vmatprep.subr.bf16.mxu1 %v3906_v32 }
 0x619   : > { %3688 = vmatpush3.bf16.msra.mxu1 %v3906_v32 }
 0x6df   : > { %v3655_v8 = vpop.f32.mrb[20].mxu1 }
 0x6e0   : > { %v1540_v9 = vpop.f32.mrb[21].mxu1 }
 0x6e1   : > { %v1558_v10 = vpack.c.bf16 %v1540_v9, %v4433_v25  ;;  %v3656_v11 = vpop.f32.mrb[22].mxu1  ;;  %v4054_v9 = vld [vmem:[%s4223_s1 + $0x8] sm:$0xff]  ;;  %s4908_s1 = sld [smem:[#allocation3_spill]] }
 0x6e2   : > { %v1543_v13 = vpop.f32.mrb[23].mxu1 }
 0x6e3   : > { %v1559_v14 = vpack.c.bf16 %v3655_v8, %v1543_v13  ;;  %3665 = vmatprep.subr.bf16.mxu0 %v1558_v10 }
 0x6e4   : > { %3666 = vmatpush3.bf16.msra.mxu0 %v1558_v10 }
 0x6e5   : > { %3667 = vmatprep.subr.bf16.mxu0 %v1559_v14 }
 0x6e7   : > { %s725_s26 = scalar_lea.vmem %s4908_s1, %s3480_s3  ;;  %s4912_s3 = smov 96  }
 0x6e8   : > { %3668 = vmatpush3.bf16.msra.mxu0 %v1559_v14 }
 0x6eb   : > { %3670 = vmatmul.mubr.msk.bf16.vlgmr.msra.gmra.mrb[16].mxu0 %vm1602_vm7, %v3898_v16  ;;  %v3907_v16 = vld [vmem:[%s4861_s11] sm:$0xff]  }
 0x6ec   : > { %3673 = vmatprep.mubr.msk.bf16.mxu0 %vm1602_vm7, %v3899_v17  ;;  %v3908_v17 = vld [vmem:[%s4861_s11 + $0x8] sm:$0xff]   ;;  %3705 = vmatprep.subr.bf16.mxu0 %v3907_v16 }
 0x6ed   : > { %3706 = vmatpush3.bf16.msra.mxu0 %v3907_v16 }
 0x6ee   : > { %3707 = vmatprep.subr.bf16.mxu0 %v3908_v17 }
 0x6f1   : > { %3708 = vmatpush3.bf16.msra.mxu0 %v3908_v17 }
 0x6f3   : > { %3674 = vmatmul.mubr.msk.bf16.gmra.mrb[20].mxu0 %vm1602_vm7, %v3900_v18 }
 0x6f4   : > { %3677 = vmatprep.mubr.msk.bf16.mxu0 %vm1602_vm7, %v3901_v19 }
 0x6fb   : > { %3678 = vmatmul.mubr.msk.bf16.gmra.mrb[24].mxu0 %vm1602_vm7, %v3902_v20 }
 0x7be   : > { %v3671_v22 = vpop.f32.mrb[16].mxu0 }
 0x7bf   : > { %v1655_v23 = vpop.f32.mrb[17].mxu0 }
 0x7c0   : > { %v3672_v25 = vpop.f32.mrb[18].mxu0 }
 0x7c1   : > { %v1658_v26 = vpop.f32.mrb[19].mxu0 }
 0x7c6   : > { %v3675_v28 = vpop.f32.mrb[20].mxu0 }
 0x7c7   : > { %v1671_v31 = vpop.f32.mrb[21].mxu0 }
 0x7c8   : > { %v3855_v33 = vpack.i.bf16 %v1671_v31, %v3672_v25  ;;  %v3676_v34 = vpop.f32.mrb[22].mxu0 }
 0x7c9   : > { %v3860_v36 = vpack.i.bf16 %v3676_v34, %v3675_v28  ;;  %v1674_v37 = vpop.f32.mrb[23].mxu0 }
 0x7ca   : > { %3856 = vrot.lane.b32.xlu1 %v3855_v33, %s4890_s7 }
 0x7cb   : > { %3861 = vrot.lane.b32.xlu0 %v3860_v36, %s4905_s29  ;;  %v3910_v36 = vld [vmem:[%s4861_s11 + $0x18] sm:$0xff]  }
 0x7ce   : > { %1709 = vrot.lane.b32.xlu1 %v1674_v37, %s4890_s7  ;;  %v3679_v38 = vpop.f32.mrb[24].mxu0  ;;  %v735_v37 = vld [vmem:[%s725_s26] sm:$0xff] }
 0x7cf   : > { %v1687_v39 = vpop.f32.mrb[25].mxu0 }
 0x7d0   : > { %v3680_v29 = vpop.f32.mrb[26].mxu0 }
 0x7d1   : > { %v1690_v40 = vpop.f32.mrb[27].mxu0 }
 0x7d2   : > { %v3865_v35 = vpack.i.bf16 %v3679_v38, %v1690_v40  ;;  %1721 = vrot.lane.b32.xlu1 %v1687_v39, %s4905_s29  ;;  %v736_v38 = vld [vmem:[%s725_s26 + $0x8] sm:$0xff]  ;;  %v737_v39 = vld [vmem:[%s725_s26 + $0x10] sm:$0xff] }
 0x7d3   : > { %v2002_v40 = vpack.c.bf16 %v736_v38, %v735_v37 }
 0x7d4   : > { %3866 = vrot.lane.b32.xlu0 %v3865_v35, %s4906_s0 }
 0x7d5   : > { %3713 = vmatprep.mubr.msk.bf16.mxu0 %vm801_vm0, %v2002_v40 }
 0x7d6   : > { %1733 = vrot.lane.b32.xlu1 %v3680_v29, %s4906_s0  ;;  %v738_v29 = vld [vmem:[%s725_s26 + $0x18] sm:$0xff]  ;;  %s4910_s26 = smov 112  }
 0x7d7   : > { %v2003_v35 = vpack.c.bf16 %v738_v29, %v737_v39 }
 0x83c   : > { %v3857_v41 = vpop.permute.xlu1 %3856 }
 0x83d   : > { %v3859_v43 = vunpack.i.h.bf16 %v3857_v41  ;;  %v3858_v44 = vunpack.i.l.bf16 %v3857_v41  ;;  %v3862_v15 = vpop.permute.xlu0 %3861  ;;  %v3911_v41 = vld [vmem:[%s4859_s9] sm:$0xff]  }
 0x83e   : > { %v3864_v45 = vunpack.i.h.bf16 %v3862_v15  ;;  %v3863_v46 = vunpack.i.l.bf16 %v3862_v15  ;;  %3693 = vmatprep.subr.bf16.mxu1 %v3911_v41 }
 0x83f   : > { %v1739_v48 = vsel %vm878_vm1, %v1658_v26, %v3859_v43  ;;  %v1738_v50 = vsel %vm878_vm1, %v1655_v23, %v3858_v44  ;;  %v3913_v43 = vld [vmem:[%s4859_s9 + $0x10] sm:$0xff]   ;;  %v3914_v44 = vld [vmem:[%s4859_s9 + $0x18] sm:$0xff]  }
 0x840   : > { %v1710_v42 = vpop.permute.xlu1 %1709  ;;  %v1743_v52 = vsel %vm1741_vm8, %v1739_v48, %v3864_v45  ;;  %v1742_v53 = vsel %vm1741_vm8, %v1738_v50, %v3863_v46 }
 0x841   : > { %v1740_v57 = vsel %vm878_vm1, %v3671_v22, %v1710_v42  ;;  %v3912_v42 = vld [vmem:[%s4859_s9 + $0x8] sm:$0xff]  }
 0x844   : > { %v1722_v47 = vpop.permute.xlu1 %1721 }
 0x845   : > { %v1744_v54 = vsel %vm1741_vm8, %v1740_v57, %v1722_v47 }
 0x846   : > { %v3867_v51 = vpop.permute.xlu0 %3866 }
 0x847   : > { %v3869_v56 = vunpack.i.h.bf16 %v3867_v51  ;;  %v3868_v58 = vunpack.i.l.bf16 %v3867_v51 }
 0x848   : > { %v1734_v55 = vpop.permute.xlu1 %1733 }
 0x849   : > { %v1747_v59 = vsel %vm1745_vm9, %v1743_v52, %v3869_v56  ;;  %v1746_v60 = vsel %vm1745_vm9, %v1742_v53, %v3868_v58  ;;  %v1748_v61 = vsel %vm1745_vm9, %v1744_v54, %v1734_v55  ;;  %v3421_v52 = vld [vmem:[%s4909_s27] ss:$0 sm:$0xff]  ;;  %s4911_s27 = smov 64  }
 0x84a   : > { %v1749_v62 = vpack.c.bf16 %v1747_v59, %v1746_v60  ;;  %v1750_v63 = vpack.c.bf16 %v1748_v61, %v1748_v61  ;;  %v3422_v61 = vld [vmem:[%s4858_s8] ss:$0 sm:$0xff] }
 0x84c   : > { %3689 = vmatprep.mubr.msk.bf16.mxu1 %vm801_vm0, %v1749_v62 }
 0x84d   : > { %3690 = vmatmul.mubr.msk.bf16.vlgmr.msra.gmra.mrb[24].mxu1 %vm801_vm0, %v1750_v63 }
 0x84e   : > { %3694 = vmatpush3.bf16.msra.mxu1 %v3911_v41 }
 0x84f   : > { %3695 = vmatprep.subr.bf16.mxu1 %v3912_v42 }
 0x852   : > { %3696 = vmatpush3.bf16.msra.mxu1 %v3912_v42 }
 0x853   : > { %3697 = vmatprep.subr.bf16.mxu1 %v3913_v43 }
 0x856   : > { %3698 = vmatpush3.bf16.msra.mxu1 %v3913_v43 }
 0x857   : > { %3699 = vmatprep.subr.bf16.mxu1 %v3914_v44 }
 0x85a   : > { %3700 = vmatpush3.bf16.msra.mxu1 %v3914_v44 }
 0x920   : > { %v3691_v1 = vpop.f32.mrb[24].mxu1 }
 0x921   : > { %v1830_v30 = vpop.f32.mrb[25].mxu1  ;;  %v1839_v2 = vadd.f32 %v3691_v1, %v3414_v0 }
 0x922   : > { %v1831_v3 = vadd.f32 %v3414_v0, %v1830_v30  ;;  %v3692_v49 = vpop.f32.mrb[26].mxu1 }
 0x923   : > { %v1833_v4 = vpop.f32.mrb[27].mxu1  ;;  %v1846_v11 = vadd.f32 %v1839_v2, %v4237_v12  ;;  %v3909_v12 = vld [vmem:[%s4861_s11 + $0x10] sm:$0xff]  }
 0x924   : > { %v1834_v5 = vadd.f32 %v3414_v0, %v1833_v4  ;;  %v1844_v7 = vadd.f32 %v4053_v6, %v1831_v3  ;;  %3709 = vmatprep.subr.bf16.mxu0 %v3909_v12  ;;  %v3430_v4 = vld [vmem:[%s4862_s12] ss:$0 sm:$0xff] }
 0x925   : > { %v1855_v14 = vsel %vm801_vm0, %v1846_v11, 0.0  ;;  %3710 = vmatpush3.bf16.msra.mxu0 %v3909_v12 }
 0x926   : > { %v1849_v8 = vsel %vm801_vm0, %v1844_v7, 0.0  ;;  %v1845_v10 = vadd.f32 %v4054_v9, %v1834_v5  ;;  %3711 = vmatprep.subr.bf16.mxu0 %v3910_v36 }
 0x927   : > { %1850 = vadd.xlane.f32.xlu0 %v1849_v8 }
 0x928   : > { %v1852_v13 = vsel %vm801_vm0, %v1845_v10, 0.0 }
 0x929   : > { %1853 = vadd.xlane.f32.xlu1 %v1852_v13  ;;  %3712 = vmatpush3.bf16.msra.mxu0 %v3910_v36 }
 0x92b   : > { %1856 = vadd.xlane.f32.xlu0 %v1855_v14 }
 0x92c   : > { %3714 = vmatmul.mubr.msk.bf16.vlgmr.msra.gmra.mrb[28].mxu0 %vm801_vm0, %v2003_v35 }
 0x9b4   : > { %v1851_v18 = vpop.xlane.xlu0 %1850 }
 0x9b5   : > { %v1859_v19 = vmul.f32 0.015625, %v1851_v18 }
 0x9b6   : > { %v1854_v20 = vpop.xlane.xlu1 %1853 }
 0x9b7   : > { %v1862_v21 = vsub.f32 %v1844_v7, %v1859_v19  ;;  %v1860_v22 = vmul.f32 0.015625, %v1854_v20  ;;  %v3423_v20 = vld [vmem:[%s4860_s10] ss:$0 sm:$0xff] }
 0x9b8   : > { %v1857_v23 = vpop.xlane.xlu0 %1856 }
 0x9b9   : > { %v1863_v24 = vsub.f32 %v1845_v10, %v1860_v22  ;;  %v1861_v25 = vmul.f32 0.015625, %v1857_v23  ;;  %v1865_v26 = vmul.f32 %v1862_v21, %v1862_v21 }
 0x9bb   : > { %v1864_v27 = vsub.f32 %v1846_v11, %v1861_v25  ;;  %v1868_v28 = vsel %vm801_vm0, %v1865_v26, 0.0  ;;  %v1866_v31 = vmul.f32 %v1863_v24, %v1863_v24 }
 0x9bc   : > { %1869 = vadd.xlane.f32.xlu0 %v1868_v28 }
 0x9bd   : > { %v1871_v32 = vsel %vm801_vm0, %v1866_v31, 0.0  ;;  %v1867_v33 = vmul.f32 %v1864_v27, %v1864_v27 }
 0x9be   : > { %1872 = vadd.xlane.f32.xlu1 %v1871_v32 }
 0x9bf   : > { %v1874_v34 = vsel %vm801_vm0, %v1867_v33, 0.0 }
 0x9c0   : > { %1875 = vadd.xlane.f32.xlu0 %v1874_v34 }
 0x9ff   : > { %v3715_v5 = vpop.f32.mrb[28].mxu0 }
 0xa00   : > { %v2092_v6 = vadd.f32 %v3715_v5, %v3430_v4  ;;  %v2083_v7 = vpop.f32.mrb[29].mxu0 }
 0xa01   : > { %v2084_v8 = vadd.f32 %v3430_v4, %v2083_v7  ;;  %v3716_v9 = vpop.f32.mrb[30].mxu0 }
 0xa02   : > { %v2095_v10 = vadd.f32 %v3716_v9, %v3430_v4  ;;  %v2086_v11 = vpop.f32.mrb[31].mxu0 }
 0xa03   : > { %v2087_v13 = vadd.f32 %v3430_v4, %v2086_v11 }
 0xa04   : > { %v4575_v14 = vpack.c.bf16 %v2095_v10, %v2092_v6 }
 0xa05   : > { %v4577_v16 = vpack.c.bf16 %v2087_v13, %v2084_v8 }
 0xa06   : > { %2270 = vrot.lane.b32.xlu0 %v4575_v14, %s4910_s26  ;;  %v2112_v12 = vsel %vm878_vm1, %v4575_v14, 0 }
 0xa07   : > { %2268 = vrot.lane.b32.xlu1 %v4577_v16, %s4910_s26  ;;  %3829 = vmatprep.subr.msk.bf16.mxu1 %vm878_vm1, %v4577_v16  ;;  %v2109_v17 = vsel %vm878_vm1, %v4577_v16, 0 }
 0xa49   : > { %v1870_v15 = vpop.xlane.xlu0 %1869 }
 0xa4a   : > { %v1877_v45 = vmul.f32 0.015625, %v1870_v15 }
 0xa4b   : > { %v1873_v46 = vpop.xlane.xlu1 %1872 }
 0xa4c   : > { %v1880_v47 = vadd.f32 1e-05, %v1877_v45  ;;  %v1878_v48 = vmul.f32 0.015625, %v1873_v46 }
 0xa4d   : > { %v1876_v50 = vpop.xlane.xlu0 %1875 }
 0xa4e   : > { %3975 = vrsqrt.f32 %v1880_v47  ;;  %v1881_v51 = vadd.f32 1e-05, %v1878_v48  ;;  %v1879_v57 = vmul.f32 0.015625, %v1876_v50 }
 0xa50   : > { %3977 = vrsqrt.f32 %v1881_v51  ;;  %v1882_v56 = vadd.f32 1e-05, %v1879_v57 }
 0xa52   : > { %3979 = vrsqrt.f32 %v1882_v56 }
 0xa58   : > { %v3976_v58 = vpop.eup %3975 }
 0xa59   : > { %v1886_v53 = vmul.f32 %v3976_v58, %v1862_v21 }
 0xa5a   : > { %v3978_v54 = vpop.eup %3977 }
 0xa5b   : > { %v1887_v55 = vmul.f32 %v3978_v54, %v1863_v24  ;;  %v1895_v59 = vmul.f32 %v3421_v52, %v1886_v53 }
 0xa5c   : > { %v3980_v60 = vpop.eup %3979 }
 0xa5d   : > { %v1888_v62 = vmul.f32 %v3980_v60, %v1864_v27  ;;  %v1896_v63 = vmul.f32 %v3421_v52, %v1887_v55  ;;  %v4560_v0 = vadd.f32 %v3422_v61, %v1895_v59 }
 0xa5f   : > { %v4562_v1 = vadd.f32 %v3422_v61, %v1896_v63  ;;  %v1897_v30 = vmul.f32 %v3421_v52, %v1888_v62 }
 0xa61   : > { %v1907_v2 = vpack.c.bf16 %v4562_v1, %v4560_v0  ;;  %v4566_v3 = vadd.f32 %v3422_v61, %v1897_v30 }
 0xa63   : > { %3701 = vmatprep.mubr.msk.bf16.mxu1 %vm801_vm0, %v1907_v2  ;;  %v1908_v49 = vpack.c.bf16 %v4566_v3, %v4566_v3 }
 0xa65   : > { %3702 = vmatmul.mubr.msk.bf16.vlgmr.msra.gmra.mrb[28].mxu1 %vm801_vm0, %v1908_v49 }
 0xa66   : > { %3718 = vmatpush3.bf16.xpose.msra.mxu1 %v2109_v17 }
 0xa67   : > { %3830 = vmatprep.subr.msk.bf16.mxu1 %vm878_vm1, %v4575_v14 }
 0xa6e   : > { %3720 = vmatpush3.bf16.xpose.msra.mxu1 %v2112_v12 }
 0xa78   : > { %v2271_v32 = vpop.permute.xlu0 %2270 }
 0xa79   : > { %v2269_v18 = vpop.permute.xlu1 %2268  ;;  %v2282_v33 = vsel %vm878_vm1, %v2271_v32, 0 }
 0xa7a   : > { %3831 = vmatprep.subr.msk.bf16.mxu1 %vm878_vm1, %v2269_v18  ;;  %v2279_v31 = vsel %vm878_vm1, %v2269_v18, 0 }
 0xb38   : > { %v3703_v19 = vpop.f32.mrb[28].mxu1 }
 0xb39   : > { %v1988_v21 = vpop.f32.mrb[29].mxu1  ;;  %v1997_v23 = vadd.f32 %v3703_v19, %v3423_v20 }
 0xb3a   : > { %v3704_v22 = vpop.f32.mrb[30].mxu1  ;;  %v1989_v25 = vadd.f32 %v3423_v20, %v1988_v21 }
 0xb3b   : > { %v1991_v24 = vpop.f32.mrb[31].mxu1  ;;  %v4597_v28 = vpack.c.bf16 %v1997_v23, %v1997_v23 }
 0xb3c   : > { %v1992_v26 = vadd.f32 %v3423_v20, %v1991_v24 }
 0xb3e   : > { %v4595_v27 = vpack.c.bf16 %v1992_v26, %v1989_v25 }
 0xb40   : > { %3721 = vmatprep.mubr.msk.bf16.mxu1 %vm878_vm1, %v4595_v27  ;;  %2264 = vrot.lane.b32.xlu1 %v4595_v27, %s4910_s26 }
 0xb41   : > { %3722 = vmatmul.mubr.msk.bf16.vlgmr.msra.gmra.mrb[32].mxu1 %vm878_vm1, %v4597_v28 }
 0xb42   : > { %3734 = vmatpush3.bf16.xpose.msra.mxu1 %v2279_v31 }
 0xb43   : > { %3832 = vmatprep.subr.msk.bf16.mxu1 %vm878_vm1, %v2271_v32 }
 0xb44   : > { %2266 = vrot.lane.b32.xlu1 %v4597_v28, %s4910_s26 }
 0xb4a   : > { %3736 = vmatpush3.bf16.xpose.msra.mxu1 %v2282_v33 }
 0xbb2   : > { %v2265_v34 = vpop.permute.xlu1 %2264 }
 0xbb3   : > { %3737 = vmatprep.mubr.msk.bf16.mxu1 %vm878_vm1, %v2265_v34 }
 0xbb6   : > { %v2267_v36 = vpop.permute.xlu1 %2266 }
 0xbb7   : > { %3738 = vmatmul.mubr.msk.bf16.vlgmr.msra.gmra.mrb[36].mxu1 %vm878_vm1, %v2267_v36 }
 0xc14   : > { %v3723_v37 = vpop.f32.mrb[32].mxu1 }
 0xc15   : > { %v2148_v38 = vpop.f32.mrb[33].mxu1  ;;  %v2164_v35 = vmul.f32 0.25, %v3723_v37 }
 0xc16   : > { %v2162_v39 = vmul.f32 0.25, %v2148_v38  ;;  %v3724_v29 = vpop.f32.mrb[34].mxu1 }
 0xc17   : > { %v2151_v40 = vpop.f32.mrb[35].mxu1  ;;  %v2171_v44 = vsel %vm1741_vm8, %v2164_v35, -inf }
 0xc18   : > { %v2163_v41 = vmul.f32 0.25, %v2151_v40  ;;  %v2165_v42 = vsel %vm1741_vm8, %v2162_v39, -inf }
 0xc19   : > { %2166 = vmax.xlane.f32.xlu0 %v2165_v42 }
 0xc1a   : > { %v2168_v43 = vsel %vm1741_vm8, %v2163_v41, -inf }
 0xc1b   : > { %2169 = vmax.xlane.f32.xlu1 %v2168_v43 }
 0xc1d   : > { %2172 = vmax.xlane.f32.xlu0 %v2171_v44 }
 0xc8a   : > { %v3739_v15 = vpop.f32.mrb[36].mxu1 }
 0xc8b   : > { %v2318_v45 = vpop.f32.mrb[37].mxu1  ;;  %v2334_v50 = vmul.f32 0.25, %v3739_v15 }
 0xc8c   : > { %v2332_v46 = vmul.f32 0.25, %v2318_v45  ;;  %v3740_v47 = vpop.f32.mrb[38].mxu1 }
 0xc8d   : > { %v2321_v48 = vpop.f32.mrb[39].mxu1  ;;  %v2341_v58 = vsel %vm1741_vm8, %v2334_v50, -inf }
 0xc8e   : > { %v2333_v51 = vmul.f32 0.25, %v2321_v48  ;;  %v2335_v57 = vsel %vm1741_vm8, %v2332_v46, -inf }
 0xc8f   : > { %2336 = vmax.xlane.f32.xlu0 %v2335_v57 }
 0xc90   : > { %v2338_v56 = vsel %vm1741_vm8, %v2333_v51, -inf }
 0xc91   : > { %2339 = vmax.xlane.f32.xlu1 %v2338_v56 }
 0xc93   : > { %2342 = vmax.xlane.f32.xlu0 %v2341_v58 }
 0xca2   : > { %2202 = vrot.lane.b32.xlu1 %v4577_v16, %s4911_s27 }
 0xca6   : > { %v2167_v52 = vpop.xlane.xlu0 %2166 }
 0xca7   : > { %v2174_v61 = vsub.f32 %v2162_v39, %v2167_v52 }
 0xca8   : > { %v2170_v53 = vpop.xlane.xlu1 %2169 }
 0xca9   : > { %v2175_v54 = vsub.f32 %v2163_v41, %v2170_v53  ;;  %v2177_v30 = vmul.f32 1.442695, %v2174_v61 }
 0xcaa   : > { %v2173_v59 = vpop.xlane.xlu0 %2172 }
 0xcab   : > { %v2179_v55 = vmul.f32 1.442695, %v2175_v54  ;;  %v2176_v60 = vsub.f32 %v2164_v35, %v2173_v59 }
 0xcad   : > { %3981 = vpow2.f32 %v2179_v55  ;;  %v2181_v62 = vmul.f32 1.442695, %v2176_v60 }
 0xcaf   : > { %3983 = vpow2.f32 %v2181_v62 }
 0xcb0   : > { %3985 = vpow2.f32 %v2177_v30 }
 0xcb7   : > { %v3982_v63 = vpop.eup %3981 }
 0xcb8   : > { %v2186_v2 = vsel %vm1741_vm8, %v3982_v63, 0.0 }
 0xcb9   : > { %2187 = vadd.xlane.f32.xlu0 %v2186_v2  ;;  %v3984_v49 = vpop.eup %3983 }
 0xcba   : > { %v2189_v4 = vsel %vm1741_vm8, %v3984_v49, 0.0  ;;  %v3986_v5 = vpop.eup %3985 }
 0xcbb   : > { %v2183_v6 = vsel %vm1741_vm8, %v3986_v5, 0.0 }
 0xcc6   : > { %2190 = vadd.xlane.f32.xlu1 %v2189_v4 }
 0xcca   : > { %2184 = vadd.xlane.f32.xlu1 %v2183_v6 }
 0xccf   : > { %2204 = vrot.lane.b32.xlu0 %v4575_v14, %s4911_s27 }
 0xcdb   : > { %2370 = vrot.lane.b32.xlu1 %v4577_v16, %s4906_s0 }
 0xd1c   : > { %v2337_v7 = vpop.xlane.xlu0 %2336 }
 0xd1d   : > { %v2344_v9 = vsub.f32 %v2332_v46, %v2337_v7 }
 0xd1e   : > { %v2340_v8 = vpop.xlane.xlu1 %2339 }
 0xd1f   : > { %v2345_v10 = vsub.f32 %v2333_v51, %v2340_v8  ;;  %v2347_v18 = vmul.f32 1.442695, %v2344_v9 }
 0xd20   : > { %v2343_v11 = vpop.xlane.xlu0 %2342 }
 0xd21   : > { %v2349_v13 = vmul.f32 1.442695, %v2345_v10  ;;  %v2346_v17 = vsub.f32 %v2334_v50, %v2343_v11 }
 0xd22   : > { %v2203_v12 = vpop.permute.xlu1 %2202 }
 0xd23   : > { %3987 = vpow2.f32 %v2349_v13  ;;  %v2351_v19 = vmul.f32 1.442695, %v2346_v17  ;;  %3725 = vmatprep.subr.bf16.mxu0 %v2203_v12 }
 0xd24   : > { %3726 = vmatpush3.bf16.msra.mxu0 %v2203_v12 }
 0xd25   : > { %3989 = vpow2.f32 %v2351_v19 }
 0xd26   : > { %3991 = vpow2.f32 %v2347_v18 }
 0xd2d   : > { %v3988_v20 = vpop.eup %3987 }
 0xd2e   : > { %v2356_v21 = vsel %vm1741_vm8, %v3988_v20, 0.0 }
 0xd2f   : > { %v3990_v22 = vpop.eup %3989  ;;  %2357 = vadd.xlane.f32.xlu1 %v2356_v21 }
 0xd30   : > { %v2359_v23 = vsel %vm1741_vm8, %v3990_v22, 0.0  ;;  %v3992_v24 = vpop.eup %3991 }
 0xd31   : > { %2360 = vadd.xlane.f32.xlu0 %v2359_v23  ;;  %v2353_v25 = vsel %vm1741_vm8, %v3992_v24, 0.0 }
 0xd35   : > { %2354 = vadd.xlane.f32.xlu0 %v2353_v25 }
 0xd40   : > { %2372 = vrot.lane.b32.xlu1 %v4575_v14, %s4906_s0 }
 0xd44   : > { %2436 = vrot.lane.b32.xlu1 %v4575_v14, %s4912_s3 }
 0xd46   : > { %v2188_v26 = vpop.xlane.xlu0 %2187 }
 0xd48   : > { %2432 = vrot.lane.b32.xlu1 %v4597_v28, %s4912_s3 }
 0xd4a   : > { %v2205_v31 = vpop.permute.xlu0 %2204 }
 0xd4b   : > { %2434 = vrot.lane.b32.xlu0 %v4577_v16, %s4912_s3  ;;  %3727 = vmatprep.subr.bf16.mxu0 %v2205_v31 }
 0xd4c   : > { %3728 = vmatpush3.bf16.msra.mxu0 %v2205_v31 }
 0xd4f   : > { %2430 = vrot.lane.b32.xlu0 %v4595_v27, %s4912_s3 }
 0xd53   : > { %v2191_v32 = vpop.xlane.xlu1 %2190 }
 0xd54   : > { %3993 = vrcp.f32 %v2191_v32 }
 0xd55   : > { %3995 = vrcp.f32 %v2188_v26 }
 0xd57   : > { %v2185_v33 = vpop.xlane.xlu1 %2184 }
 0xd58   : > { %3997 = vrcp.f32 %v2185_v33 }
 0xd5b   : > { %v2371_v34 = vpop.permute.xlu1 %2370 }
 0xd5c   : > { %3741 = vmatprep.subr.bf16.mxu0 %v2371_v34 }
 0xd5e   : > { %v3994_v36 = vpop.eup %3993 }
 0xd5f   : > { %v3996_v37 = vpop.eup %3995  ;;  %v2197_v39 = vmul.f32 %v3994_v36, %v3984_v49 }
 0xd60   : > { %v2195_v40 = vmul.f32 %v3996_v37, %v3982_v63 }
 0xd61   : > { %v2199_v41 = vpack.c.bf16 %v2197_v39, %v2197_v39 }
 0xd62   : > { %v3998_v38 = vpop.eup %3997 }
 0xd63   : > { %v2193_v29 = vmul.f32 %v3998_v38, %v3986_v5 }
 0xd65   : > { %v2198_v35 = vpack.c.bf16 %v2195_v40, %v2193_v29 }
 0xd67   : > { %3729 = vmatprep.mubr.msk.bf16.mxu0 %vm1741_vm8, %v2198_v35 }
 0xd68   : > { %3730 = vmatmul.mubr.msk.bf16.vlgmr.msra.gmra.mrb[32].mxu0 %vm1741_vm8, %v2199_v41 }
 0xd69   : > { %3742 = vmatpush3.bf16.msra.mxu0 %v2371_v34 }
 0xdbc   : > { %v2358_v42 = vpop.xlane.xlu1 %2357 }
 0xdbe   : > { %v2361_v43 = vpop.xlane.xlu0 %2360 }
 0xdbf   : > { %3999 = vrcp.f32 %v2361_v43 }
 0xdc0   : > { %v2373_v44 = vpop.permute.xlu1 %2372  ;;  %4001 = vrcp.f32 %v2358_v42 }
 0xdc1   : > { %3743 = vmatprep.subr.bf16.mxu0 %v2373_v44 }
 0xdc2   : > { %v2355_v15 = vpop.xlane.xlu0 %2354  ;;  %3744 = vmatpush3.bf16.msra.mxu0 %v2373_v44 }
 0xdc3   : > { %4003 = vrcp.f32 %v2355_v15 }
 0xdc4   : > { %v2437_v54 = vpop.permute.xlu1 %2436 }
 0xdc5   : > { %v2448_v55 = vsel %vm878_vm1, %v2437_v54, 0 }
 0xdc6   : > { %v2435_v45 = vpop.permute.xlu0 %2434 }
 0xdc7   : > { %3833 = vmatprep.subr.msk.bf16.mxu0 %vm878_vm1, %v2435_v45  ;;  %v2445_v52 = vsel %vm878_vm1, %v2435_v45, 0 }
 0xdc8   : > { %v2433_v59 = vpop.permute.xlu1 %2432 }
 0xdc9   : > { %v4000_v46 = vpop.eup %3999 }
 0xdca   : > { %v4002_v47 = vpop.eup %4001  ;;  %v2367_v50 = vmul.f32 %v4000_v46, %v3990_v22  ;;  %v2431_v53 = vpop.permute.xlu0 %2430 }
 0xdcb   : > { %v2365_v57 = vmul.f32 %v4002_v47, %v3988_v20 }
 0xdcc   : > { %v2369_v58 = vpack.c.bf16 %v2367_v50, %v2367_v50 }
 0xdcd   : > { %v4004_v48 = vpop.eup %4003 }
 0xdce   : > { %v2363_v51 = vmul.f32 %v4004_v48, %v3992_v24 }
 0xdd0   : > { %v2368_v56 = vpack.c.bf16 %v2365_v57, %v2363_v51 }
 0xdd2   : > { %3745 = vmatprep.mubr.msk.bf16.mxu0 %vm1741_vm8, %v2368_v56 }
 0xdd3   : > { %3746 = vmatmul.mubr.msk.bf16.vlgmr.msra.gmra.mrb[36].mxu0 %vm1741_vm8, %v2369_v58 }
 0xdd4   : > { %3750 = vmatpush3.bf16.xpose.msra.mxu0 %v2445_v52  ;;  %3753 = vmatprep.mubr.msk.bf16.mxu0 %vm878_vm1, %v2431_v53 }
 0xdd5   : > { %3834 = vmatprep.subr.msk.bf16.mxu0 %vm878_vm1, %v2437_v54 }
 0xddc   : > { %3752 = vmatpush3.bf16.xpose.msra.mxu0 %v2448_v55 }
 0xde3   : > { %3754 = vmatmul.mubr.msk.bf16.vlgmr.msra.gmra.mrb[40].mxu0 %vm878_vm1, %v2433_v59 }
 0xe3b   : > { %v4650_v60 = vpop.f32.mrb[32].mxu0 }
 0xe3c   : > { %v4652_v61 = vpop.f32.mrb[33].mxu0 }
 0xe3d   : > { %v3732_v62 = vpop.f32.mrb[34].mxu0 }
 0xe3e   : > { %v4654_v63 = vpop.f32.mrb[35].mxu0 }
 0xea6   : > { %v4656_v30 = vpop.f32.mrb[36].mxu0 }
 0xea7   : > { %v4658_v2 = vpop.f32.mrb[37].mxu0 }
 0xea8   : > { %v3748_v49 = vpop.f32.mrb[38].mxu0 }
 0xea9   : > { %v4660_v4 = vpop.f32.mrb[39].mxu0 }
 0xeaa   : > { %v3870_v5 = vpack.i.bf16 %v4660_v4, %v4658_v2 }
 0xeb6   : > { %v3755_v6 = vpop.f32.mrb[40].mxu0 }
 0xeb7   : > { %v2484_v7 = vpop.f32.mrb[41].mxu0  ;;  %v2500_v11 = vmul.f32 0.25, %v3755_v6 }
 0xeb8   : > { %v2498_v8 = vmul.f32 0.25, %v2484_v7  ;;  %v3756_v9 = vpop.f32.mrb[42].mxu0 }
 0xeb9   : > { %v2487_v10 = vpop.f32.mrb[43].mxu0  ;;  %v2507_v18 = vsel %vm1741_vm8, %v2500_v11, -inf }
 0xeba   : > { %v2499_v13 = vmul.f32 0.25, %v2487_v10  ;;  %v2501_v17 = vsel %vm1741_vm8, %v2498_v8, -inf }
 0xebb   : > { %2502 = vmax.xlane.f32.xlu0 %v2501_v17 }
 0xebc   : > { %v2504_v12 = vsel %vm1741_vm8, %v2499_v13, -inf }
 0xebd   : > { %2505 = vmax.xlane.f32.xlu1 %v2504_v12 }
 0xebf   : > { %2508 = vmax.xlane.f32.xlu0 %v2507_v18 }
 0xece   : > { %2536 = vrot.lane.b32.xlu1 %v4577_v16, %s4905_s29 }
 0xf48   : > { %v2503_v19 = vpop.xlane.xlu0 %2502 }
 0xf49   : > { %v2510_v21 = vsub.f32 %v2498_v8, %v2503_v19 }
 0xf4a   : > { %v2506_v20 = vpop.xlane.xlu1 %2505 }
 0xf4b   : > { %v2511_v22 = vsub.f32 %v2499_v13, %v2506_v20  ;;  %v2513_v31 = vmul.f32 1.442695, %v2510_v21 }
 0xf4c   : > { %v2509_v23 = vpop.xlane.xlu0 %2508 }
 0xf4d   : > { %v2515_v24 = vmul.f32 1.442695, %v2511_v22  ;;  %v2512_v25 = vsub.f32 %v2500_v11, %v2509_v23 }
 0xf4e   : > { %v2537_v26 = vpop.permute.xlu1 %2536 }
 0xf4f   : > { %4005 = vpow2.f32 %v2515_v24  ;;  %v2517_v32 = vmul.f32 1.442695, %v2512_v25  ;;  %3757 = vmatprep.subr.bf16.mxu1 %v2537_v26 }
 0xf50   : > { %3758 = vmatpush3.bf16.msra.mxu1 %v2537_v26 }
 0xf51   : > { %4007 = vpow2.f32 %v2517_v32 }
 0xf52   : > { %4009 = vpow2.f32 %v2513_v31 }
 0xf59   : > { %v4006_v33 = vpop.eup %4005 }
 0xf5a   : > { %v2522_v34 = vsel %vm1741_vm8, %v4006_v33, 0.0 }
 0xf5b   : > { %v4008_v36 = vpop.eup %4007  ;;  %2523 = vadd.xlane.f32.xlu1 %v2522_v34 }
 0xf5c   : > { %v2525_v37 = vsel %vm1741_vm8, %v4008_v36, 0.0  ;;  %v4010_v38 = vpop.eup %4009 }
 0xf5d   : > { %2526 = vadd.xlane.f32.xlu0 %v2525_v37  ;;  %v2519_v39 = vsel %vm1741_vm8, %v4010_v38, 0.0 }
 0xf61   : > { %2520 = vadd.xlane.f32.xlu0 %v2519_v39 }
 0xf6c   : > { %2600 = vrot.lane.b32.xlu1 %v4577_v16, %s4913_s28 }
 0xf70   : > { %2602 = vrot.lane.b32.xlu1 %v4575_v14, %s4913_s28 }
 0xf74   : > { %2598 = vrot.lane.b32.xlu1 %v4597_v28, %s4913_s28 }
 0xf77   : > { %2538 = vrot.lane.b32.xlu0 %v4575_v14, %s4905_s29 }
 0xf7b   : > { %2596 = vrot.lane.b32.xlu0 %v4595_v27, %s4913_s28 }
 0xfe8   : > { %v2524_v29 = vpop.xlane.xlu1 %2523 }
 0xfea   : > { %v2527_v40 = vpop.xlane.xlu0 %2526 }
 0xfeb   : > { %4011 = vrcp.f32 %v2527_v40 }
 0xfec   : > { %4013 = vrcp.f32 %v2524_v29  ;;  %v2601_v42 = vpop.permute.xlu1 %2600 }
 0xfed   : > { %v2611_v48 = vsel %vm878_vm1, %v2601_v42, 0 }
 0xfee   : > { %v2521_v35 = vpop.xlane.xlu0 %2520 }
 0xfef   : > { %4015 = vrcp.f32 %v2521_v35 }
 0xff0   : > { %v2603_v51 = vpop.permute.xlu1 %2602 }
 0xff1   : > { %v2614_v57 = vsel %vm878_vm1, %v2603_v51, 0 }
 0xff2   : > { %v2539_v41 = vpop.permute.xlu0 %2538 }
 0xff3   : > { %3759 = vmatprep.subr.bf16.mxu1 %v2539_v41 }
 0xff4   : > { %3760 = vmatpush3.bf16.msra.mxu1 %v2539_v41  ;;  %v2599_v56 = vpop.permute.xlu1 %2598  ;;  %v3915_v41 = vld [vmem:[%s4863_s13] sm:$0xff]  }
 0xff5   : > { %3835 = vmatprep.subr.msk.bf16.mxu1 %vm878_vm1, %v2601_v42  ;;  %v4012_v43 = vpop.eup %4011  ;;  %v3916_v42 = vld [vmem:[%s4863_s13 + $0x8] sm:$0xff]  }
 0xff6   : > { %v4014_v28 = vpop.eup %4013  ;;  %v2533_v15 = vmul.f32 %v4012_v43, %v4008_v36  ;;  %v2597_v50 = vpop.permute.xlu0 %2596  ;;  %v3917_v43 = vld [vmem:[%s4863_s13 + $0x10] sm:$0xff]  }
 0xff7   : > { %v2531_v46 = vmul.f32 %v4014_v28, %v4006_v33  ;;  %v3918_v28 = vld [vmem:[%s4863_s13 + $0x18] sm:$0xff]  }
 0xff8   : > { %v2535_v27 = vpack.c.bf16 %v2533_v15, %v2533_v15 }
 0xff9   : > { %v4016_v44 = vpop.eup %4015 }
 0xffa   : > { %v2529_v45 = vmul.f32 %v4016_v44, %v4010_v38 }
 0xffc   : > { %v2534_v47 = vpack.c.bf16 %v2531_v46, %v2529_v45 }
 0xffe   : > { %3761 = vmatprep.mubr.msk.bf16.mxu1 %vm1741_vm8, %v2534_v47 }
 0xfff   : > { %3762 = vmatmul.mubr.msk.bf16.vlgmr.msra.gmra.mrb[40].mxu1 %vm1741_vm8, %v2535_v27 }
0x1000   : > { %3766 = vmatpush3.bf16.xpose.msra.mxu1 %v2611_v48  ;;  %3769 = vmatprep.mubr.msk.bf16.mxu1 %vm878_vm1, %v2597_v50 }
0x1001   : > { %3836 = vmatprep.subr.msk.bf16.mxu1 %vm878_vm1, %v2603_v51 }
0x1008   : > { %3768 = vmatpush3.bf16.xpose.msra.mxu1 %v2614_v57 }
0x100f   : > { %3770 = vmatmul.mubr.msk.bf16.vlgmr.msra.gmra.mrb[44].mxu1 %vm878_vm1, %v2599_v56 }
0x10d2   : > { %v3763_v58 = vpop.f32.mrb[40].mxu1 }
0x10d3   : > { %v2582_v52 = vpop.f32.mrb[41].mxu1 }
0x10d4   : > { %v3764_v53 = vpop.f32.mrb[42].mxu1 }
0x10d5   : > { %v2585_v54 = vpop.f32.mrb[43].mxu1 }
0x10d6   : > { %v3875_v55 = vpack.i.bf16 %v2585_v54, %v2582_v52 }
0x10e2   : > { %v3771_v59 = vpop.f32.mrb[44].mxu1 }
0x10e3   : > { %v2650_v62 = vpop.f32.mrb[45].mxu1  ;;  %v2666_v8 = vmul.f32 0.25, %v3771_v59 }
0x10e4   : > { %v2664_v49 = vmul.f32 0.25, %v2650_v62  ;;  %v3772_v6 = vpop.f32.mrb[46].mxu1 }
0x10e5   : > { %v2653_v7 = vpop.f32.mrb[47].mxu1  ;;  %v2673_v13 = vsel %vm1741_vm8, %v2666_v8, -inf }
0x10e6   : > { %v2665_v9 = vmul.f32 0.25, %v2653_v7  ;;  %v2667_v10 = vsel %vm1741_vm8, %v2664_v49, -inf }
0x10e7   : > { %2668 = vmax.xlane.f32.xlu0 %v2667_v10 }
0x10e8   : > { %v2670_v11 = vsel %vm1741_vm8, %v2665_v9, -inf }
0x10e9   : > { %2671 = vmax.xlane.f32.xlu1 %v2670_v11 }
0x10eb   : > { %2674 = vmax.xlane.f32.xlu0 %v2673_v13 }
0x1174   : > { %v2669_v17 = vpop.xlane.xlu0 %2668 }
0x1175   : > { %v2676_v18 = vsub.f32 %v2664_v49, %v2669_v17 }
0x1176   : > { %v2672_v12 = vpop.xlane.xlu1 %2671 }
0x1177   : > { %v2677_v19 = vsub.f32 %v2665_v9, %v2672_v12  ;;  %v2679_v23 = vmul.f32 1.442695, %v2676_v18 }
0x1178   : > { %v2675_v20 = vpop.xlane.xlu0 %2674 }
0x1179   : > { %v2681_v21 = vmul.f32 1.442695, %v2677_v19  ;;  %v2678_v22 = vsub.f32 %v2666_v8, %v2675_v20 }
0x117b   : > { %4017 = vpow2.f32 %v2681_v21  ;;  %v2683_v24 = vmul.f32 1.442695, %v2678_v22 }
0x117d   : > { %4019 = vpow2.f32 %v2683_v24 }
0x117e   : > { %4021 = vpow2.f32 %v2679_v23 }
0x1185   : > { %v4018_v25 = vpop.eup %4017 }
0x1186   : > { %v2688_v26 = vsel %vm1741_vm8, %v4018_v25, 0.0 }
0x1187   : > { %v4020_v31 = vpop.eup %4019  ;;  %2689 = vadd.xlane.f32.xlu1 %v2688_v26 }
0x1188   : > { %v2691_v32 = vsel %vm1741_vm8, %v4020_v31, 0.0  ;;  %v4022_v33 = vpop.eup %4021 }
0x1189   : > { %2692 = vadd.xlane.f32.xlu0 %v2691_v32  ;;  %v2685_v34 = vsel %vm1741_vm8, %v4022_v33, 0.0 }
0x118d   : > { %2686 = vadd.xlane.f32.xlu0 %v2685_v34 }
0x1198   : > { %2702 = vrot.lane.b32.xlu1 %v4577_v16, %s4914_s25 }
0x119c   : > { %3871 = vrot.lane.b32.xlu1 %v3870_v5, %s4914_s25 }
0x11a0   : > { %2769 = vrot.lane.b32.xlu1 %v4656_v30, %s4914_s25 }
0x11a3   : > { %2704 = vrot.lane.b32.xlu0 %v4575_v14, %s4914_s25 }
0x11a4   : > { %2781 = vrot.lane.b32.xlu1 %v3763_v58, %s4905_s29 }
0x11a7   : > { %3876 = vrot.lane.b32.xlu0 %v3875_v55, %s4905_s29 }
0x1214   : > { %v2690_v36 = vpop.xlane.xlu1 %2689 }
0x1216   : > { %v2693_v37 = vpop.xlane.xlu0 %2692 }
0x1217   : > { %4023 = vrcp.f32 %v2693_v37 }
0x1218   : > { %v2703_v38 = vpop.permute.xlu1 %2702  ;;  %4025 = vrcp.f32 %v2690_v36 }
0x1219   : > { %3773 = vmatprep.subr.bf16.mxu0 %v2703_v38 }
0x121a   : > { %v2687_v16 = vpop.xlane.xlu0 %2686  ;;  %3774 = vmatpush3.bf16.msra.mxu0 %v2703_v38 }
0x121b   : > { %4027 = vrcp.f32 %v2687_v16 }
0x121c   : > { %v3872_v27 = vpop.permute.xlu1 %3871 }
0x121d   : > { %v3874_v57 = vunpack.i.h.bf16 %v3872_v27  ;;  %v3873_v56 = vunpack.i.l.bf16 %v3872_v27 }
0x121e   : > { %v2705_v2 = vpop.permute.xlu0 %2704 }
0x121f   : > { %3775 = vmatprep.subr.bf16.mxu0 %v2705_v2  ;;  %v2799_v54 = vsel %vm878_vm1, %v4654_v63, %v3874_v57  ;;  %v2798_v62 = vsel %vm878_vm1, %v4652_v61, %v3873_v56  ;;  %v3453_v61 = vld [vmem:[%s4864_s14] ss:$0 sm:$0xff] }
0x1220   : > { %3776 = vmatpush3.bf16.msra.mxu0 %v2705_v2  ;;  %v2770_v48 = vpop.permute.xlu1 %2769 }
0x1221   : > { %v4024_v30 = vpop.eup %4023  ;;  %3781 = vmatprep.subr.bf16.mxu0 %v3915_v41  ;;  %v2800_v55 = vsel %vm878_vm1, %v4650_v60, %v2770_v48 }
0x1222   : > { %v4026_v4 = vpop.eup %4025  ;;  %v2699_v14 = vmul.f32 %v4024_v30, %v4020_v31  ;;  %v3877_v50 = vpop.permute.xlu0 %3876 }
0x1223   : > { %v2697_v29 = vmul.f32 %v4026_v4, %v4018_v25  ;;  %v3879_v58 = vunpack.i.h.bf16 %v3877_v50  ;;  %v3878_v52 = vunpack.i.l.bf16 %v3877_v50  ;;  %v3460_v50 = vld [vmem:[%s4865_s15] ss:$0 sm:$0xff] }
0x1224   : > { %v2701_v35 = vpack.c.bf16 %v2699_v14, %v2699_v14  ;;  %v2782_v51 = vpop.permute.xlu1 %2781 }
0x1225   : > { %v4028_v5 = vpop.eup %4027  ;;  %v2803_v49 = vsel %vm1741_vm8, %v2800_v55, %v2782_v51  ;;  %v2801_v8 = vsel %vm1741_vm8, %v2798_v62, %v3878_v52  ;;  %v2802_v9 = vsel %vm1741_vm8, %v2799_v54, %v3879_v58 }
0x1226   : > { %v2695_v39 = vmul.f32 %v4028_v5, %v4022_v33 }
0x1228   : > { %v2700_v40 = vpack.c.bf16 %v2697_v29, %v2695_v39  ;;  %v3919_v29 = vld [vmem:[%s4867_s17] sm:$0xff]  }
0x1229   : > { %3793 = vmatprep.subr.bf16.mxu1 %v3919_v29 }
0x122a   : > { %3777 = vmatprep.mubr.msk.bf16.mxu0 %vm1741_vm8, %v2700_v40  ;;  %3794 = vmatpush3.bf16.msra.mxu1 %v3919_v29  ;;  %v3920_v40 = vld [vmem:[%s4867_s17 + $0x8] sm:$0xff]  }
0x122b   : > { %3778 = vmatmul.mubr.msk.bf16.vlgmr.msra.gmra.mrb[44].mxu0 %vm1741_vm8, %v2701_v35  ;;  %3795 = vmatprep.subr.bf16.mxu1 %v3920_v40  ;;  %v3921_v35 = vld [vmem:[%s4867_s17 + $0x10] sm:$0xff]  }
0x122c   : > { %3782 = vmatpush3.bf16.msra.mxu0 %v3915_v41  ;;  %v3922_v41 = vld [vmem:[%s4867_s17 + $0x18] sm:$0xff]  }
0x122d   : > { %3783 = vmatprep.subr.bf16.mxu0 %v3916_v42 }
0x122e   : > { %3796 = vmatpush3.bf16.msra.mxu1 %v3920_v40 }
0x122f   : > { %3797 = vmatprep.subr.bf16.mxu1 %v3921_v35 }
0x1230   : > { %3784 = vmatpush3.bf16.msra.mxu0 %v3916_v42 }
0x1231   : > { %3785 = vmatprep.subr.bf16.mxu0 %v3917_v43 }
0x1232   : > { %3798 = vmatpush3.bf16.msra.mxu1 %v3921_v35 }
0x1233   : > { %3799 = vmatprep.subr.bf16.mxu1 %v3922_v41 }
0x1234   : > { %3786 = vmatpush3.bf16.msra.mxu0 %v3917_v43 }
0x1235   : > { %3787 = vmatprep.subr.bf16.mxu0 %v3918_v28 }
0x1236   : > { %3800 = vmatpush3.bf16.msra.mxu1 %v3922_v41 }
0x1238   : > { %3788 = vmatpush3.bf16.msra.mxu0 %v3918_v28 }
0x12fe   : > { %v3779_v44 = vpop.f32.mrb[44].mxu0 }
0x12ff   : > { %2793 = vrot.lane.b32.xlu1 %v3779_v44, %s4906_s0  ;;  %v2748_v15 = vpop.f32.mrb[45].mxu0 }
0x1300   : > { %v3780_v45 = vpop.f32.mrb[46].mxu0 }
0x1301   : > { %v2751_v46 = vpop.f32.mrb[47].mxu0 }
0x1302   : > { %v3880_v47 = vpack.i.bf16 %v2751_v46, %v2748_v15 }
0x1304   : > { %3881 = vrot.lane.b32.xlu0 %v3880_v47, %s4906_s0  ;;  %s4915_s0 = smul.u32 24, %s4917_s30 }
0x1306   : > { %s730_s1 = scalar_lea.vmem %s4873_s23, %s4915_s0 }
0x1371   : > { %v2794_v53 = vpop.permute.xlu1 %2793 }
0x1372   : > { %v2806_v10 = vsel %vm1745_vm9, %v2803_v49, %v2794_v53  ;;  %v3461_v53 = vld [vmem:[%s4866_s16] ss:$0 sm:$0xff] }
0x1373   : > { %v2808_v60 = vpack.c.bf16 %v2806_v10, %v2806_v10  ;;  %v3924_v10 = vld [vmem:[%s4869_s19 + $0x8] sm:$0xff]  }
0x1376   : > { %v3882_v59 = vpop.permute.xlu0 %3881 }
0x1377   : > { %v3884_v6 = vunpack.i.h.bf16 %v3882_v59  ;;  %v3883_v7 = vunpack.i.l.bf16 %v3882_v59 }
0x1379   : > { %v2804_v11 = vsel %vm1745_vm9, %v2801_v8, %v3883_v7  ;;  %v2805_v63 = vsel %vm1745_vm9, %v2802_v9, %v3884_v6  ;;  %v3923_v9 = vld [vmem:[%s4869_s19] sm:$0xff]  }
0x137a   : > { %v2807_v13 = vpack.c.bf16 %v2805_v63, %v2804_v11  ;;  %3805 = vmatprep.subr.bf16.mxu0 %v3923_v9  ;;  %v3925_v11 = vld [vmem:[%s4869_s19 + $0x10] sm:$0xff]   ;;  %v3926_v63 = vld [vmem:[%s4869_s19 + $0x18] sm:$0xff]  }
0x137c   : > { %3789 = vmatprep.mubr.msk.bf16.mxu0 %vm801_vm0, %v2807_v13  ;;  %v3462_v13 = vld [vmem:[%s4868_s18] ss:$0 sm:$0xff] }
0x137d   : > { %3790 = vmatmul.mubr.msk.bf16.vlgmr.msra.gmra.mrb[48].mxu0 %vm801_vm0, %v2808_v60 }
0x137e   : > { %3806 = vmatpush3.bf16.msra.mxu0 %v3923_v9 }
0x137f   : > { %3807 = vmatprep.subr.bf16.mxu0 %v3924_v10 }
0x1382   : > { %3808 = vmatpush3.bf16.msra.mxu0 %v3924_v10 }
0x1383   : > { %3809 = vmatprep.subr.bf16.mxu0 %v3925_v11 }
0x1386   : > { %3810 = vmatpush3.bf16.msra.mxu0 %v3925_v11 }
0x1387   : > { %3811 = vmatprep.subr.bf16.mxu0 %v3926_v63 }
0x138a   : > { %3812 = vmatpush3.bf16.msra.mxu0 %v3926_v63 }
0x1450   : > { %v3791_v17 = vpop.f32.mrb[48].mxu0 }
0x1451   : > { %v2888_v12 = vpop.f32.mrb[49].mxu0  ;;  %v2897_v18 = vadd.f32 %v3791_v17, %v3453_v61 }
0x1452   : > { %v2889_v19 = vadd.f32 %v3453_v61, %v2888_v12  ;;  %v3792_v20 = vpop.f32.mrb[50].mxu0 }
0x1453   : > { %v2891_v21 = vpop.f32.mrb[51].mxu0  ;;  %v2904_v24 = vadd.f32 %v2897_v18, %v4566_v3 }
0x1454   : > { %v2902_v22 = vadd.f32 %v2889_v19, %v4560_v0  ;;  %v2892_v23 = vadd.f32 %v3453_v61, %v2891_v21 }
0x1455   : > { %v2913_v32 = vsel %vm801_vm0, %v2904_v24, 0.0 }
0x1456   : > { %v2903_v25 = vadd.f32 %v2892_v23, %v4562_v1  ;;  %v2907_v26 = vsel %vm801_vm0, %v2902_v22, 0.0 }
0x1457   : > { %2908 = vadd.xlane.f32.xlu0 %v2907_v26 }
0x1458   : > { %v2910_v31 = vsel %vm801_vm0, %v2903_v25, 0.0 }
0x1459   : > { %2911 = vadd.xlane.f32.xlu1 %v2910_v31 }
0x145b   : > { %2914 = vadd.xlane.f32.xlu0 %v2913_v32 }
0x14e4   : > { %v2909_v33 = vpop.xlane.xlu0 %2908 }
0x14e5   : > { %v2916_v34 = vmul.f32 0.015625, %v2909_v33 }
0x14e6   : > { %v2912_v36 = vpop.xlane.xlu1 %2911 }
0x14e7   : > { %v2919_v37 = vsub.f32 %v2902_v22, %v2916_v34  ;;  %v2917_v38 = vmul.f32 0.015625, %v2912_v36 }
0x14e8   : > { %v2915_v0 = vpop.xlane.xlu0 %2914 }
0x14e9   : > { %v2920_v16 = vsub.f32 %v2903_v25, %v2917_v38  ;;  %v2918_v2 = vmul.f32 0.015625, %v2915_v0  ;;  %v2922_v3 = vmul.f32 %v2919_v37, %v2919_v37 }
0x14eb   : > { %v2921_v30 = vsub.f32 %v2904_v24, %v2918_v2  ;;  %v2925_v1 = vsel %vm801_vm0, %v2922_v3, 0.0  ;;  %v2923_v4 = vmul.f32 %v2920_v16, %v2920_v16 }
0x14ec   : > { %2926 = vadd.xlane.f32.xlu0 %v2925_v1 }
0x14ed   : > { %v2928_v5 = vsel %vm801_vm0, %v2923_v4, 0.0  ;;  %v2924_v14 = vmul.f32 %v2921_v30, %v2921_v30 }
0x14ee   : > { %2929 = vadd.xlane.f32.xlu1 %v2928_v5 }
0x14ef   : > { %v2931_v39 = vsel %vm801_vm0, %v2924_v14, 0.0 }
0x14f0   : > { %2932 = vadd.xlane.f32.xlu0 %v2931_v39 }
0x1579   : > { %v2927_v42 = vpop.xlane.xlu0 %2926 }
0x157a   : > { %v2934_v43 = vmul.f32 0.015625, %v2927_v42 }
0x157b   : > { %v2930_v28 = vpop.xlane.xlu1 %2929 }
0x157c   : > { %v2937_v44 = vadd.f32 1e-05, %v2934_v43  ;;  %v2935_v15 = vmul.f32 0.015625, %v2930_v28 }
0x157d   : > { %v2933_v45 = vpop.xlane.xlu0 %2932 }
0x157e   : > { %4029 = vrsqrt.f32 %v2937_v44  ;;  %v2938_v46 = vadd.f32 1e-05, %v2935_v15  ;;  %v2936_v47 = vmul.f32 0.015625, %v2933_v45 }
0x1580   : > { %4031 = vrsqrt.f32 %v2938_v46  ;;  %v2939_v27 = vadd.f32 1e-05, %v2936_v47 }
0x1582   : > { %4033 = vrsqrt.f32 %v2939_v27 }
0x1588   : > { %v4030_v48 = vpop.eup %4029 }
0x1589   : > { %v2943_v51 = vmul.f32 %v4030_v48, %v2919_v37 }
0x158a   : > { %v4032_v57 = vpop.eup %4031 }
0x158b   : > { %v2944_v56 = vmul.f32 %v4032_v57, %v2920_v16  ;;  %v2952_v58 = vmul.f32 %v3460_v50, %v2943_v51 }
0x158c   : > { %v4034_v52 = vpop.eup %4033 }
0x158d   : > { %v2945_v54 = vmul.f32 %v4034_v52, %v2921_v30  ;;  %v2953_v55 = vmul.f32 %v3460_v50, %v2944_v56  ;;  %v4768_v59 = vadd.f32 %v3461_v53, %v2952_v58 }
0x158f   : > { %v4770_v62 = vadd.f32 %v3461_v53, %v2953_v55  ;;  %v2954_v49 = vmul.f32 %v3460_v50, %v2945_v54 }
0x1591   : > { %v2964_v6 = vpack.c.bf16 %v4770_v62, %v4768_v59  ;;  %v4774_v7 = vadd.f32 %v3461_v53, %v2954_v49 }
0x1593   : > { %3801 = vmatprep.mubr.msk.bf16.mxu1 %vm801_vm0, %v2964_v6  ;;  %v2965_v8 = vpack.c.bf16 %v4774_v7, %v4774_v7 }
0x1595   : > { %3802 = vmatmul.mubr.msk.bf16.vlgmr.msra.gmra.mrb[48].mxu1 %vm801_vm0, %v2965_v8 }
0x1668   : > { %v3803_v60 = vpop.f32.mrb[48].mxu1 }
0x1669   : > { %v4795_v61 = vadd.f32 %v3803_v60, %v3462_v13  ;;  %v3045_v17 = vpop.f32.mrb[49].mxu1 }
0x166a   : > { %v4797_v12 = vadd.f32 %v3462_v13, %v3045_v17  ;;  %v3804_v18 = vpop.f32.mrb[50].mxu1 }
0x166b   : > { %v4800_v19 = vmul.f32 0.70710677, %v4795_v61  ;;  %v3048_v20 = vpop.f32.mrb[51].mxu1 }
0x166c   : > { %v4803_v21 = vmul.f32 0.70710677, %v4797_v12  ;;  %v4805_v22 = vadd.f32 %v3462_v13, %v3048_v20  ;;  %v4071_v20 = vmov -1.0  }
0x166d   : > { %v3073_v23 = vand.u32 2147483647, %v4800_v19  ;;  %vm3067_vm10 = vcmp.ge.f32.partialorder %v4800_v19, 0.0 }
0x166e   : > { %v3071_v24 = vand.u32 2147483647, %v4803_v21  ;;  %v4810_v26 = vmul.f32 0.70710677, %v4805_v22  ;;  %vm3065_vm11 = vcmp.ge.f32.partialorder %v4803_v21, 0.0  ;;  %v3061_v21 = vmul.f32 0.5, %v4795_v61 }
0x166f   : > { %v3076_v25 = vmul.f32 0.3275911, %v3073_v23  ;;  %v3115_v38 = vsub.f32 0.0, %v3073_v23 }
0x1670   : > { %v3074_v31 = vmul.f32 0.3275911, %v3071_v24  ;;  %v3072_v33 = vand.u32 2147483647, %v4810_v26  ;;  %v3113_v0 = vsub.f32 0.0, %v3071_v24  ;;  %vm3066_vm12 = vcmp.ge.f32.partialorder %v4810_v26, 0.0 }
0x1671   : > { %v3079_v32 = vadd.f32 1.0, %v3076_v25  ;;  %v3118_v2 = vmul.f32 %v3115_v38, %v3073_v23  ;;  %v3070_v23 = vsel %vm3067_vm10, 1.0, %v4071_v20  ;;  %v3069_v19 = vsel %vm3066_vm12, 1.0, %v4071_v20  ;;  %v3469_v26 = vld [vmem:[%s4870_s20] ss:$0 sm:$0xff] }
0x1672   : > { %v3077_v34 = vadd.f32 1.0, %v3074_v31  ;;  %v3075_v36 = vmul.f32 0.3275911, %v3072_v33  ;;  %v3114_v3 = vsub.f32 0.0, %v3072_v33  ;;  %v3116_v4 = vmul.f32 %v3113_v0, %v3071_v24 }
0x1673   : > { %4035 = vrcp.f32 %v3079_v32  ;;  %v3123_v29 = vmul.f32 1.442695, %v3118_v2  ;;  %v3068_v31 = vsel %vm3065_vm11, 1.0, %v4071_v20  ;;  %v3059_v0 = vmul.f32 0.5, %v4797_v12 }
0x1674   : > { %4037 = vrcp.f32 %v3077_v34  ;;  %v3078_v37 = vadd.f32 1.0, %v3075_v36  ;;  %v3117_v35 = vmul.f32 %v3114_v3, %v3072_v33  ;;  %v3119_v42 = vmul.f32 1.442695, %v3116_v4 }
0x1676   : > { %4039 = vrcp.f32 %v3078_v37  ;;  %v3121_v46 = vmul.f32 1.442695, %v3117_v35 }
0x1677   : > { %4041 = vpow2.f32 %v3123_v29 }
0x1678   : > { %4043 = vpow2.f32 %v3119_v42 }
0x1679   : > { %4045 = vpow2.f32 %v3121_v46 }
0x167d   : > { %v4036_v16 = vpop.eup %4035 }
0x167e   : > { %v4038_v30 = vpop.eup %4037  ;;  %v3088_v1 = vmul.f32 1.0614054, %v4036_v16 }
0x167f   : > { %v3086_v5 = vmul.f32 1.0614054, %v4038_v30 }
0x1680   : > { %v3091_v14 = vadd.f32 -1.4531521, %v3088_v1  ;;  %v4040_v39 = vpop.eup %4039 }
0x1681   : > { %v3089_v40 = vadd.f32 -1.4531521, %v3086_v5  ;;  %v3087_v43 = vmul.f32 1.0614054, %v4040_v39  ;;  %v4042_v8 = vpop.eup %4041 }
0x1682   : > { %v3094_v41 = vmul.f32 %v4036_v16, %v3091_v14  ;;  %v4044_v10 = vpop.eup %4043 }
0x1683   : > { %v3092_v28 = vmul.f32 %v4038_v30, %v3089_v40  ;;  %v3090_v15 = vadd.f32 -1.4531521, %v3087_v43  ;;  %v4046_v18 = vpop.eup %4045 }
0x1684   : > { %v3097_v44 = vadd.f32 1.4214138, %v3094_v41 }
0x1685   : > { %v3095_v45 = vadd.f32 1.4214138, %v3092_v28  ;;  %v3093_v27 = vmul.f32 %v4040_v39, %v3090_v15 }
0x1686   : > { %v3100_v47 = vmul.f32 %v4036_v16, %v3097_v44 }
0x1687   : > { %v3098_v48 = vmul.f32 %v4038_v30, %v3095_v45  ;;  %v3096_v51 = vadd.f32 1.4214138, %v3093_v27 }
0x1688   : > { %v3103_v50 = vadd.f32 -0.28449672, %v3100_v47 }
0x1689   : > { %v3101_v57 = vadd.f32 -0.28449672, %v3098_v48  ;;  %v3099_v58 = vmul.f32 %v4040_v39, %v3096_v51 }
0x168a   : > { %v3106_v56 = vmul.f32 %v4036_v16, %v3103_v50 }
0x168b   : > { %v3104_v52 = vmul.f32 %v4038_v30, %v3101_v57  ;;  %v3102_v54 = vadd.f32 -0.28449672, %v3099_v58 }
0x168c   : > { %v3109_v53 = vadd.f32 0.2548296, %v3106_v56 }
0x168d   : > { %v3107_v55 = vadd.f32 0.2548296, %v3104_v52  ;;  %v3105_v6 = vmul.f32 %v4040_v39, %v3102_v54 }
0x168e   : > { %v3112_v49 = vmul.f32 %v4036_v16, %v3109_v53  ;;  %v3060_v16 = vmul.f32 0.5, %v4805_v22 }
0x168f   : > { %v3110_v9 = vmul.f32 %v4038_v30, %v3107_v55  ;;  %v3108_v63 = vadd.f32 0.2548296, %v3105_v6 }
0x1690   : > { %v3127_v11 = vmul.f32 %v4042_v8, %v3112_v49 }
0x1691   : > { %v3125_v13 = vmul.f32 %v4044_v10, %v3110_v9  ;;  %v3111_v17 = vmul.f32 %v4040_v39, %v3108_v63 }
0x1692   : > { %v3130_v60 = vsub.f32 1.0, %v3127_v11 }
0x1693   : > { %v3128_v24 = vsub.f32 1.0, %v3125_v13  ;;  %v3126_v32 = vmul.f32 %v4046_v18, %v3111_v17  ;;  %v3476_v13 = vld [vmem:[%s4871_s21] ss:$0 sm:$0xff] }
0x1694   : > { %v3133_v25 = vmul.f32 %v3130_v60, %v3070_v23  ;;  %v3477_v18 = vld [vmem:[%s4872_s22] ss:$0 sm:$0xff] }
0x1695   : > { %v3131_v33 = vmul.f32 %v3128_v24, %v3068_v31  ;;  %v3129_v34 = vsub.f32 1.0, %v3126_v32 }
0x1696   : > { %v3136_v36 = vadd.f32 1.0, %v3133_v25 }
0x1697   : > { %v3134_v37 = vadd.f32 1.0, %v3131_v33  ;;  %v3132_v38 = vmul.f32 %v3129_v34, %v3069_v19 }
0x1698   : > { %v3139_v3 = vmul.f32 %v3136_v36, %v3061_v21 }
0x1699   : > { %v3135_v2 = vadd.f32 1.0, %v3132_v38  ;;  %v3137_v30 = vmul.f32 %v3134_v37, %v3059_v0 }
0x169a   : > { %v3141_v5 = vpack.c.bf16 %v3139_v3, %v3139_v3 }
0x169b   : > { %v3138_v1 = vmul.f32 %v3135_v2, %v3060_v16 }
0x169d   : > { %v3140_v4 = vpack.c.bf16 %v3138_v1, %v3137_v30 }
0x169f   : > { %3813 = vmatprep.mubr.msk.bf16.mxu0 %vm801_vm0, %v3140_v4 }
0x16a0   : > { %3814 = vmatmul.mubr.msk.bf16.vlgmr.msra.gmra.mrb[52].mxu0 %vm801_vm0, %v3141_v5 }
0x1773   : > { %v3815_v14 = vpop.f32.mrb[52].mxu0 }
0x1774   : > { %v3221_v61 = vpop.f32.mrb[53].mxu0  ;;  %v3230_v39 = vadd.f32 %v3815_v14, %v3469_v26 }
0x1775   : > { %v3222_v12 = vadd.f32 %v3469_v26, %v3221_v61  ;;  %v3816_v29 = vpop.f32.mrb[54].mxu0 }
0x1776   : > { %v3224_v22 = vpop.f32.mrb[55].mxu0  ;;  %v3237_v41 = vadd.f32 %v3230_v39, %v4774_v7 }
0x1777   : > { %v3235_v40 = vadd.f32 %v3222_v12, %v4768_v59  ;;  %v3225_v35 = vadd.f32 %v3469_v26, %v3224_v22 }
0x1778   : > { %v3246_v44 = vsel %vm801_vm0, %v3237_v41, 0.0 }
0x1779   : > { %v3236_v42 = vadd.f32 %v3225_v35, %v4770_v62  ;;  %v3240_v43 = vsel %vm801_vm0, %v3235_v40, 0.0 }
0x177a   : > { %3241 = vadd.xlane.f32.xlu1 %v3240_v43 }
0x177b   : > { %v3243_v28 = vsel %vm801_vm0, %v3236_v42, 0.0 }
0x177c   : > { %3244 = vadd.xlane.f32.xlu0 %v3243_v28 }
0x177e   : > { %3247 = vadd.xlane.f32.xlu1 %v3246_v44 }
0x1807   : > { %v3242_v15 = vpop.xlane.xlu1 %3241 }
0x1808   : > { %v3249_v45 = vmul.f32 0.015625, %v3242_v15 }
0x1809   : > { %v3245_v46 = vpop.xlane.xlu0 %3244 }
0x180a   : > { %v3252_v47 = vsub.f32 %v3235_v40, %v3249_v45  ;;  %v3250_v27 = vmul.f32 0.015625, %v3245_v46 }
0x180b   : > { %v3248_v59 = vpop.xlane.xlu1 %3247 }
0x180c   : > { %v3253_v48 = vsub.f32 %v3236_v42, %v3250_v27  ;;  %v3251_v50 = vmul.f32 0.015625, %v3248_v59  ;;  %v3255_v7 = vmul.f32 %v3252_v47, %v3252_v47 }
0x180e   : > { %v3254_v51 = vsub.f32 %v3237_v41, %v3251_v50  ;;  %v3258_v62 = vsel %vm801_vm0, %v3255_v7, 0.0  ;;  %v3256_v57 = vmul.f32 %v3253_v48, %v3253_v48 }
0x180f   : > { %3259 = vadd.xlane.f32.xlu0 %v3258_v62 }
0x1810   : > { %v3261_v56 = vsel %vm801_vm0, %v3256_v57, 0.0  ;;  %v3257_v58 = vmul.f32 %v3254_v51, %v3254_v51 }
0x1811   : > { %3262 = vadd.xlane.f32.xlu1 %v3261_v56 }
0x1812   : > { %v3264_v52 = vsel %vm801_vm0, %v3257_v58, 0.0 }
0x1813   : > { %3265 = vadd.xlane.f32.xlu0 %v3264_v52 }
0x189c   : > { %v3260_v53 = vpop.xlane.xlu0 %3259 }
0x189d   : > { %v3267_v54 = vmul.f32 0.015625, %v3260_v53 }
0x189e   : > { %v3263_v55 = vpop.xlane.xlu1 %3262 }
0x189f   : > { %v3270_v49 = vadd.f32 1e-05, %v3267_v54  ;;  %v3268_v6 = vmul.f32 0.015625, %v3263_v55 }
0x18a0   : > { %v3266_v8 = vpop.xlane.xlu0 %3265 }
0x18a1   : > { %4047 = vrsqrt.f32 %v3270_v49  ;;  %v3271_v9 = vadd.f32 1e-05, %v3268_v6  ;;  %v3269_v10 = vmul.f32 0.015625, %v3266_v8 }
0x18a3   : > { %4049 = vrsqrt.f32 %v3271_v9  ;;  %v3272_v11 = vadd.f32 1e-05, %v3269_v10 }
0x18a5   : > { %4051 = vrsqrt.f32 %v3272_v11 }
0x18ab   : > { %v4048_v63 = vpop.eup %4047 }
0x18ac   : > { %v3276_v60 = vmul.f32 %v4048_v63, %v3252_v47 }
0x18ad   : > { %v4050_v17 = vpop.eup %4049 }
0x18ae   : > { %v3285_v20 = vmul.f32 %v3476_v13, %v3276_v60  ;;  %v3277_v23 = vmul.f32 %v4050_v17, %v3253_v48 }
0x18af   : > { %v4052_v24 = vpop.eup %4051 }
0x18b0   : > { %v3294_v25 = vadd.f32 %v3477_v18, %v3285_v20  ;;  %v3286_v31 = vmul.f32 %v3476_v13, %v3277_v23  ;;  %v3278_v32 = vmul.f32 %v4052_v24, %v3254_v51 }
0x18b2   : > { %3297 = vst.msk [vmem:[%s730_s1] sm:$0xff] %vm801_vm0, %v3294_v25  ;;  %v3295_v33 = vadd.f32 %v3477_v18, %v3286_v31  ;;  %v3287_v34 = vmul.f32 %v3476_v13, %v3278_v32 }
0x18b4   : > { %3298 = vst.msk [vmem:[%s730_s1 + $0x8] sm:$0xff] %vm801_vm0, %v3295_v33  ;;  %v3296_v36 = vadd.f32 %v3477_v18, %v3287_v34 }
0x18b6   : > { %3299 = vst.msk [vmem:[%s730_s1 + $0x10] sm:$0xff] %vm801_vm0, %v3296_v36 }
0x18b7 PF: > { %s33_s4 = sadd.s32 1, %s4061_s4  }
0x18b8   : > { %p30_p4 = scmp.ge.s32.totalorder %s33_s4, 4  }
0x18ba   :  { %32 = sbr.rel (!%p30_p4) target bundleno = 9 (0x9), region = 145 }

</bundles_post_ra>
